<compile_context>
chip_gen: v7x
topology: tpu7x:2x2x1
jax: 0.10.0
libtpu: 0.0.40
codegen_flags: <defaults>
</compile_context>

<pallas_src>
import functools

import numpy as np
import jax
import jax.numpy as jnp
from jax.experimental import pallas as pl
from jax.experimental.pallas import tpu as pltpu

# ------------------------- fixed module geometry -----------------------------
LAT_C, LAT_H, LAT_W = 16, 8, 8                      # x.view(-1, 16, 8, 8)
DEC_COUT, DEC_K, DEC_STRIDE, DEC_PAD = 4, 4, 2, 1   # ConvTranspose2d(16, 4, 4, 2, 1)
DEC_HO = (LAT_H - 1) * DEC_STRIDE - 2 * DEC_PAD + DEC_K   # 16
DEC_WO = (LAT_W - 1) * DEC_STRIDE - 2 * DEC_PAD + DEC_K   # 16


# ----------------------------- exact GELU ------------------------------------
def _erf(x):
    # Abramowitz & Stegun 7.1.26 polynomial (|err| < 1.5e-7 ≈ f32 roundoff).
    # Reproduces PyTorch's exact (erf-based) GELU at f32 precision.
    a1, a2, a3 = 0.254829592, -0.284496736, 1.421413741
    a4, a5, p = -1.453152027, 1.061405429, 0.3275911
    s = jnp.where(x < 0.0, -1.0, 1.0)
    z = jnp.abs(x)
    t = pl.reciprocal(1.0 + p * z, approx=True)      # EUP slot — free filler
    poly = ((((a5 * t + a4) * t + a3) * t + a2) * t + a1) * t
    return s * (1.0 - poly * jnp.exp(-z * z))


def _gelu_exact(x):
    # PyTorch nn.functional.gelu default (approximate='none').
    return 0.5 * x * (1.0 + _erf(x * 0.7071067811865476))


# ------------------------- Linear (+ GELU) kernel -----------------------------
def _linear_kernel(x_ref, w_ref, b_ref, o_ref, *, apply_gelu):
    # x: (Bp, K) bf16, w: (K, tn) bf16, b: (1, tn) f32 -> o: (Bp, tn)
    y = jnp.dot(x_ref[...], w_ref[...], preferred_element_type=jnp.float32)
    y = y + b_ref[...]
    if apply_gelu:
        y = _gelu_exact(y)
    o_ref[...] = y.astype(o_ref.dtype)


def linear_pallas(x, w, b, *, tn=512, apply_gelu=True, out_dtype=jnp.bfloat16):
    """Computes [gelu](x @ w + b), tiled over the N (lane) axis."""
    x = x.astype(jnp.bfloat16)
    w = w.astype(jnp.bfloat16)
    B, K = x.shape
    K2, N = w.shape
    assert K == K2 and N % tn == 0, (K, K2, N, tn)
    b2 = b.reshape(1, N).astype(jnp.float32)

    cost = pl.CostEstimate(
        flops=2 * B * K * N,
        transcendentals=(B * N) if apply_gelu else 0,
        bytes_accessed=(x.size * 2 + w.size * 2 + b2.size * 4
                        + B * N * np.dtype(out_dtype).itemsize))

    return pl.pallas_call(
        functools.partial(_linear_kernel, apply_gelu=apply_gelu),
        out_shape=jax.ShapeDtypeStruct((B, N), out_dtype),
        grid_spec=pltpu.PrefetchScalarGridSpec(
            num_scalar_prefetch=0,
            grid=(N // tn,),
            in_specs=[
                pl.BlockSpec((B, K), lambda j: (0, 0)),     # activations resident
                pl.BlockSpec((K, tn), lambda j: (0, j)),    # stream weight columns
                pl.BlockSpec((1, tn), lambda j: (0, j)),
            ],
            out_specs=pl.BlockSpec((B, tn), lambda j: (0, j)),
        ),
        compiler_params=pltpu.CompilerParams(
            dimension_semantics=("parallel",),
            vmem_limit_bytes=32 * 1024 * 1024),
        cost_estimate=cost,
    )(x, w, b2)


# --------------------- deconv -> dense matrix (one-time) ----------------------
def _deconv_as_matrix(wd, bd):
    """ConvTranspose2d(16,4,4,2,1) on a (LAT_C,8,8) NCHW latent as a dense
    (1024, 1024) map on the flattened latent. Built once with numpy."""
    wd = np.asarray(wd, np.float32)            # (Cin, Cout, K, K) — PyTorch layout
    bd = np.asarray(bd, np.float32)
    Cin, Cout, K, _ = wd.shape
    M = np.zeros((Cin * LAT_H * LAT_W, Cout * DEC_HO * DEC_WO), np.float32)
    for kh in range(K):
        for kw in range(K):
            for hi in range(LAT_H):
                ho = hi * DEC_STRIDE - DEC_PAD + kh
                if ho < 0 or ho >= DEC_HO:
                    continue
                for wi in range(LAT_W):
                    wo = wi * DEC_STRIDE - DEC_PAD + kw
                    if wo < 0 or wo >= DEC_WO:
                        continue
                    rows = np.arange(Cin) * (LAT_H * LAT_W) + hi * LAT_W + wi
                    cols = np.arange(Cout) * (DEC_HO * DEC_WO) + ho * DEC_WO + wo
                    M[np.ix_(rows, cols)] += wd[:, :, kh, kw]
    bM = np.repeat(bd, DEC_HO * DEC_WO)        # per-output-column bias
    return M, bM


def prepare_params(raw):
    """One-time weight preprocessing: bf16 MLP weights + dense deconv matrix."""
    M, bM = _deconv_as_matrix(raw["wd"], raw["bd"])
    return dict(
        w1=jnp.asarray(raw["w1"], jnp.bfloat16), b1=jnp.asarray(raw["b1"], jnp.float32),
        w2=jnp.asarray(raw["w2"], jnp.bfloat16), b2=jnp.asarray(raw["b2"], jnp.float32),
        w3=jnp.asarray(raw["w3"], jnp.bfloat16), b3=jnp.asarray(raw["b3"], jnp.float32),
        wM=jnp.asarray(M, jnp.bfloat16), bM=jnp.asarray(bM, jnp.float32),
    )


# ------------------------------ model forward ---------------------------------
def _pad_rows(x, mult=8):
    B = x.shape[0]
    Bp = ((B + mult - 1) // mult) * mult
    if Bp != B:
        x = jnp.pad(x, ((0, Bp - B), (0, 0)))
    return x, B


def fmri_encoder(params, fmri):
    x, B = _pad_rows(fmri.astype(jnp.bfloat16))            # (Bp, Din)
    h = linear_pallas(x, params["w1"], params["b1"], apply_gelu=True)
    h = linear_pallas(h, params["w2"], params["b2"], apply_gelu=True)
    h = linear_pallas(h, params["w3"], params["b3"], apply_gelu=True)
    # ConvTranspose2d folded into a dense lane-dense matmul on the flat latent.
    out = linear_pallas(h, params["wM"], params["bM"],
                        apply_gelu=False, out_dtype=jnp.float32)
    return out[:B].reshape(B, DEC_COUT, DEC_HO, DEC_WO)     # NCHW


def fmri2image(params, fmri):
    latents = fmri_encoder(params, fmri)                    # (B, 4, 16, 16)
    # TODO(synk): self.vae.decode (frozen pretrained diffusers AutoencoderKL) needs
    # external checkpoint weights; the decode stage is not reproduced here and the
    # encoder latents are returned instead.
    return latents.astype(jnp.float32)


# ------------------------------ parameter init --------------------------------
def init_params(key, din):
    ks = jax.random.split(key, 8)

    def dense(kw, kb, fi, fo):
        w = jax.random.normal(kw, (fi, fo), jnp.float32) / jnp.sqrt(float(fi))
        b = 0.01 * jax.random.normal(kb, (fo,), jnp.float32)
        return w, b

    w1, b1 = dense(ks[0], ks[1], din, 2048)
    w2, b2 = dense(ks[2], ks[3], 2048, 2048)
    w3, b3 = dense(ks[4], ks[5], 2048, 1024)
    wd = 0.05 * jax.random.normal(ks[6], (LAT_C, DEC_COUT, DEC_K, DEC_K), jnp.float32)
    bd = 0.01 * jax.random.normal(ks[7], (DEC_COUT,), jnp.float32)
    return dict(w1=w1, b1=b1, w2=w2, b2=b2, w3=w3, b3=b3, wd=wd, bd=bd)


# ------------------------------ pure-JAX reference -----------------------------
def reference_forward(raw, fmri):
    h = jax.nn.gelu(fmri @ raw["w1"] + raw["b1"], approximate=False)
    h = jax.nn.gelu(h @ raw["w2"] + raw["b2"], approximate=False)
    h = jax.nn.gelu(h @ raw["w3"] + raw["b3"], approximate=False)
    lat = h.reshape(-1, LAT_C, LAT_H, LAT_W)
    rhs = jnp.transpose(raw["wd"], (1, 0, 2, 3))[:, :, ::-1, ::-1]   # (oc, ic, kh, kw)
    pad = DEC_K - 1 - DEC_PAD
    out = jax.lax.conv_general_dilated(
        lat, rhs, window_strides=(1, 1), padding=((pad, pad), (pad, pad)),
        lhs_dilation=(DEC_STRIDE, DEC_STRIDE), rhs_dilation=(1, 1),
        dimension_numbers=("NCHW", "OIHW", "NCHW"))
    return out + raw["bd"][None, :, None, None]


if __name__ == "__main__":
    B, Din = 2, 512
    key = jax.random.PRNGKey(0)
    k_par, k_in = jax.random.split(key)
    raw = init_params(k_par, Din)
    fmri = jax.random.normal(k_in, (B, Din), jnp.float32)

    params = prepare_params(raw)                 # one-time: bf16 weights + deconv matrix
    fwd = jax.jit(fmri2image)
    out = jax.block_until_ready(fwd(params, fmri))
    assert out.shape == (B, DEC_COUT, DEC_HO, DEC_WO) and out.dtype == jnp.float32

    ref = reference_forward(raw, fmri)           # f32 ground truth
    err = float(jnp.max(jnp.abs(out - ref)))
    assert err < 5e-2, f"max abs err vs reference: {err}"
    print("KERNEL_OK")
</pallas_src>

<mosaic_0001>
module attributes {stable_mosaic.version = 11 : i64} {
  func.func @_linear_kernel(%arg0: i32, %arg1: memref<8x512xbf16, #tpu.memory_space<vmem>>, %arg2: memref<512x512xbf16, #tpu.memory_space<vmem>>, %arg3: memref<1x512xf32, #tpu.memory_space<vmem>>, %arg4: memref<8x512xbf16, #tpu.memory_space<vmem>>) attributes {dimension_semantics = [#tpu.dimension_semantics<parallel>], iteration_bounds = array<i64: 4>, scalar_prefetch = 0 : i64, scratch_operands = 0 : i64, tpu.core_type = #tpu.core_type<tc>, window_params = [{pipeline_mode = #tpu.pipeline_mode<synchronous>, transform_indices = @transform_0, window_bounds = array<i64: 8, 512>}, {transform_indices = @transform_1, window_bounds = array<i64: 512, 512>}, {transform_indices = @transform_2, window_bounds = array<i64: 1, 512>}, {transform_indices = @transform_3, window_bounds = array<i64: 8, 512>}]} {
    %c0 = arith.constant 0 : index
    %c0_0 = arith.constant 0 : index
    %0 = vector.load %arg1[%c0, %c0_0] : memref<8x512xbf16, #tpu.memory_space<vmem>>, vector<8x512xbf16>
    %c0_1 = arith.constant 0 : index
    %c0_2 = arith.constant 0 : index
    %1 = vector.load %arg2[%c0_1, %c0_2] : memref<512x512xbf16, #tpu.memory_space<vmem>>, vector<512x512xbf16>
    %cst = arith.constant dense<0.000000e+00> : vector<8x512xf32>
    %2 = tpu.matmul %0, %1, %cst {dimension_numbers = #tpu.dot_dimension_numbers<[1], [0], [0], [1], [0, 0, 1, 1], [], []>} : vector<8x512xbf16>, vector<512x512xbf16>, vector<8x512xf32> -> vector<8x512xf32>
    %c0_3 = arith.constant 0 : index
    %c0_4 = arith.constant 0 : index
    %3 = vector.load %arg3[%c0_3, %c0_4] : memref<1x512xf32, #tpu.memory_space<vmem>>, vector<1x512xf32>
    %4 = vector.broadcast %3 : vector<1x512xf32> to vector<8x512xf32>
    %5 = arith.addf %2, %4 : vector<8x512xf32>
    %cst_5 = arith.constant 5.000000e-01 : f32
    %6 = vector.broadcast %cst_5 : f32 to vector<8x512xf32>
    %7 = arith.mulf %6, %5 : vector<8x512xf32>
    %cst_6 = arith.constant 0.707106769 : f32
    %8 = vector.broadcast %cst_6 : f32 to vector<8x512xf32>
    %9 = arith.mulf %5, %8 : vector<8x512xf32>
    %cst_7 = arith.constant 0.000000e+00 : f32
    %10 = vector.broadcast %cst_7 : f32 to vector<8x512xf32>
    %11 = arith.cmpf olt, %9, %10 : vector<8x512xf32>
    %cst_8 = arith.constant -1.000000e+00 : f32
    %cst_9 = arith.constant 1.000000e+00 : f32
    %12 = vector.broadcast %cst_8 : f32 to vector<8x512xf32>
    %13 = vector.broadcast %cst_9 : f32 to vector<8x512xf32>
    %14 = arith.select %11, %12, %13 : vector<8x512xi1>, vector<8x512xf32>
    %15 = math.absf %9 : vector<8x512xf32>
    %cst_10 = arith.constant 0.327591091 : f32
    %16 = vector.broadcast %cst_10 : f32 to vector<8x512xf32>
    %17 = arith.mulf %16, %15 : vector<8x512xf32>
    %cst_11 = arith.constant 1.000000e+00 : f32
    %18 = vector.broadcast %cst_11 : f32 to vector<8x512xf32>
    %19 = arith.addf %18, %17 : vector<8x512xf32>
    %20 = tpu.reciprocal %19 {approx = true} : vector<8x512xf32> -> vector<8x512xf32>
    %cst_12 = arith.constant 1.06140542 : f32
    %21 = vector.broadcast %cst_12 : f32 to vector<8x512xf32>
    %22 = arith.mulf %21, %20 : vector<8x512xf32>
    %cst_13 = arith.constant -1.45315206 : f32
    %23 = vector.broadcast %cst_13 : f32 to vector<8x512xf32>
    %24 = arith.addf %22, %23 : vector<8x512xf32>
    %25 = arith.mulf %24, %20 : vector<8x512xf32>
    %cst_14 = arith.constant 1.42141378 : f32
    %26 = vector.broadcast %cst_14 : f32 to vector<8x512xf32>
    %27 = arith.addf %25, %26 : vector<8x512xf32>
    %28 = arith.mulf %27, %20 : vector<8x512xf32>
    %cst_15 = arith.constant -0.284496725 : f32
    %29 = vector.broadcast %cst_15 : f32 to vector<8x512xf32>
    %30 = arith.addf %28, %29 : vector<8x512xf32>
    %31 = arith.mulf %30, %20 : vector<8x512xf32>
    %cst_16 = arith.constant 0.254829586 : f32
    %32 = vector.broadcast %cst_16 : f32 to vector<8x512xf32>
    %33 = arith.addf %31, %32 : vector<8x512xf32>
    %34 = arith.mulf %33, %20 : vector<8x512xf32>
    %cst_17 = arith.constant 0.000000e+00 : f32
    %35 = vector.broadcast %cst_17 : f32 to vector<8x512xf32>
    %36 = arith.subf %35, %15 : vector<8x512xf32>
    %37 = arith.mulf %36, %15 : vector<8x512xf32>
    %38 = math.exp %37 : vector<8x512xf32>
    %39 = arith.mulf %34, %38 : vector<8x512xf32>
    %cst_18 = arith.constant 1.000000e+00 : f32
    %40 = vector.broadcast %cst_18 : f32 to vector<8x512xf32>
    %41 = arith.subf %40, %39 : vector<8x512xf32>
    %42 = arith.mulf %14, %41 : vector<8x512xf32>
    %cst_19 = arith.constant 1.000000e+00 : f32
    %43 = vector.broadcast %cst_19 : f32 to vector<8x512xf32>
    %44 = arith.addf %43, %42 : vector<8x512xf32>
    %45 = arith.mulf %7, %44 : vector<8x512xf32>
    %46 = arith.truncf %45 : vector<8x512xf32> to vector<8x512xbf16>
    %c0_20 = arith.constant 0 : index
    %c0_21 = arith.constant 0 : index
    %47 = vector.load %arg4[%c0_20, %c0_21] : memref<8x512xbf16, #tpu.memory_space<vmem>>, vector<8x512xbf16>
    tpu.vector_store %arg4[%c0_20, %c0_21], %46 {strides = array<i32>} : memref<8x512xbf16, #tpu.memory_space<vmem>>, vector<8x512xbf16>,
    return
  }
  func.func @transform_0(%arg0: i32) -> (i32, i32) {
    %c0_i32 = arith.constant 0 : i32
    %c0_i32_0 = arith.constant 0 : i32
    %c0_i32_1 = arith.constant 0 : i32
    return %c0_i32, %c0_i32_0 : i32, i32
  }
  func.func @transform_1(%arg0: i32) -> (i32, i32) {
    %c0_i32 = arith.constant 0 : i32
    %c0_i32_0 = arith.constant 0 : i32
    return %c0_i32, %arg0 : i32, i32
  }
  func.func @transform_2(%arg0: i32) -> (i32, i32) {
    %c0_i32 = arith.constant 0 : i32
    %c0_i32_0 = arith.constant 0 : i32
    return %c0_i32, %arg0 : i32, i32
  }
  func.func @transform_3(%arg0: i32) -> (i32, i32) {
    %c0_i32 = arith.constant 0 : i32
    %c0_i32_0 = arith.constant 0 : i32
    return %c0_i32, %arg0 : i32, i32
  }
}

module attributes {stable_mosaic.version = 11 : i64} {
  func.func @_linear_kernel(%arg0: i32, %arg1: memref<8x2048xbf16, #tpu.memory_space<vmem>>, %arg2: memref<2048x512xbf16, #tpu.memory_space<vmem>>, %arg3: memref<1x512xf32, #tpu.memory_space<vmem>>, %arg4: memref<8x512xbf16, #tpu.memory_space<vmem>>) attributes {dimension_semantics = [#tpu.dimension_semantics<parallel>], iteration_bounds = array<i64: 4>, scalar_prefetch = 0 : i64, scratch_operands = 0 : i64, tpu.core_type = #tpu.core_type<tc>, window_params = [{pipeline_mode = #tpu.pipeline_mode<synchronous>, transform_indices = @transform_0, window_bounds = array<i64: 8, 2048>}, {transform_indices = @transform_1, window_bounds = array<i64: 2048, 512>}, {transform_indices = @transform_2, window_bounds = array<i64: 1, 512>}, {transform_indices = @transform_3, window_bounds = array<i64: 8, 512>}]} {
    %c0 = arith.constant 0 : index
    %c0_0 = arith.constant 0 : index
    %0 = vector.load %arg1[%c0, %c0_0] : memref<8x2048xbf16, #tpu.memory_space<vmem>>, vector<8x2048xbf16>
    %c0_1 = arith.constant 0 : index
    %c0_2 = arith.constant 0 : index
    %1 = vector.load %arg2[%c0_1, %c0_2] : memref<2048x512xbf16, #tpu.memory_space<vmem>>, vector<2048x512xbf16>
    %cst = arith.constant dense<0.000000e+00> : vector<8x512xf32>
    %2 = tpu.matmul %0, %1, %cst {dimension_numbers = #tpu.dot_dimension_numbers<[1], [0], [0], [1], [0, 0, 1, 1], [], []>} : vector<8x2048xbf16>, vector<2048x512xbf16>, vector<8x512xf32> -> vector<8x512xf32>
    %c0_3 = arith.constant 0 : index
    %c0_4 = arith.constant 0 : index
    %3 = vector.load %arg3[%c0_3, %c0_4] : memref<1x512xf32, #tpu.memory_space<vmem>>, vector<1x512xf32>
    %4 = vector.broadcast %3 : vector<1x512xf32> to vector<8x512xf32>
    %5 = arith.addf %2, %4 : vector<8x512xf32>
    %cst_5 = arith.constant 5.000000e-01 : f32
    %6 = vector.broadcast %cst_5 : f32 to vector<8x512xf32>
    %7 = arith.mulf %6, %5 : vector<8x512xf32>
    %cst_6 = arith.constant 0.707106769 : f32
    %8 = vector.broadcast %cst_6 : f32 to vector<8x512xf32>
    %9 = arith.mulf %5, %8 : vector<8x512xf32>
    %cst_7 = arith.constant 0.000000e+00 : f32
    %10 = vector.broadcast %cst_7 : f32 to vector<8x512xf32>
    %11 = arith.cmpf olt, %9, %10 : vector<8x512xf32>
    %cst_8 = arith.constant -1.000000e+00 : f32
    %cst_9 = arith.constant 1.000000e+00 : f32
    %12 = vector.broadcast %cst_8 : f32 to vector<8x512xf32>
    %13 = vector.broadcast %cst_9 : f32 to vector<8x512xf32>
    %14 = arith.select %11, %12, %13 : vector<8x512xi1>, vector<8x512xf32>
    %15 = math.absf %9 : vector<8x512xf32>
    %cst_10 = arith.constant 0.327591091 : f32
    %16 = vector.broadcast %cst_10 : f32 to vector<8x512xf32>
    %17 = arith.mulf %16, %15 : vector<8x512xf32>
    %cst_11 = arith.constant 1.000000e+00 : f32
    %18 = vector.broadcast %cst_11 : f32 to vector<8x512xf32>
    %19 = arith.addf %18, %17 : vector<8x512xf32>
    %20 = tpu.reciprocal %19 {approx = true} : vector<8x512xf32> -> vector<8x512xf32>
    %cst_12 = arith.constant 1.06140542 : f32
    %21 = vector.broadcast %cst_12 : f32 to vector<8x512xf32>
    %22 = arith.mulf %21, %20 : vector<8x512xf32>
    %cst_13 = arith.constant -1.45315206 : f32
    %23 = vector.broadcast %cst_13 : f32 to vector<8x512xf32>
    %24 = arith.addf %22, %23 : vector<8x512xf32>
    %25 = arith.mulf %24, %20 : vector<8x512xf32>
    %cst_14 = arith.constant 1.42141378 : f32
    %26 = vector.broadcast %cst_14 : f32 to vector<8x512xf32>
    %27 = arith.addf %25, %26 : vector<8x512xf32>
    %28 = arith.mulf %27, %20 : vector<8x512xf32>
    %cst_15 = arith.constant -0.284496725 : f32
    %29 = vector.broadcast %cst_15 : f32 to vector<8x512xf32>
    %30 = arith.addf %28, %29 : vector<8x512xf32>
    %31 = arith.mulf %30, %20 : vector<8x512xf32>
    %cst_16 = arith.constant 0.254829586 : f32
    %32 = vector.broadcast %cst_16 : f32 to vector<8x512xf32>
    %33 = arith.addf %31, %32 : vector<8x512xf32>
    %34 = arith.mulf %33, %20 : vector<8x512xf32>
    %cst_17 = arith.constant 0.000000e+00 : f32
    %35 = vector.broadcast %cst_17 : f32 to vector<8x512xf32>
    %36 = arith.subf %35, %15 : vector<8x512xf32>
    %37 = arith.mulf %36, %15 : vector<8x512xf32>
    %38 = math.exp %37 : vector<8x512xf32>
    %39 = arith.mulf %34, %38 : vector<8x512xf32>
    %cst_18 = arith.constant 1.000000e+00 : f32
    %40 = vector.broadcast %cst_18 : f32 to vector<8x512xf32>
    %41 = arith.subf %40, %39 : vector<8x512xf32>
    %42 = arith.mulf %14, %41 : vector<8x512xf32>
    %cst_19 = arith.constant 1.000000e+00 : f32
    %43 = vector.broadcast %cst_19 : f32 to vector<8x512xf32>
    %44 = arith.addf %43, %42 : vector<8x512xf32>
    %45 = arith.mulf %7, %44 : vector<8x512xf32>
    %46 = arith.truncf %45 : vector<8x512xf32> to vector<8x512xbf16>
    %c0_20 = arith.constant 0 : index
    %c0_21 = arith.constant 0 : index
    %47 = vector.load %arg4[%c0_20, %c0_21] : memref<8x512xbf16, #tpu.memory_space<vmem>>, vector<8x512xbf16>
    tpu.vector_store %arg4[%c0_20, %c0_21], %46 {strides = array<i32>} : memref<8x512xbf16, #tpu.memory_space<vmem>>, vector<8x512xbf16>,
    return
  }
  func.func @transform_0(%arg0: i32) -> (i32, i32) {
    %c0_i32 = arith.constant 0 : i32
    %c0_i32_0 = arith.constant 0 : i32
    %c0_i32_1 = arith.constant 0 : i32
    return %c0_i32, %c0_i32_0 : i32, i32
  }
  func.func @transform_1(%arg0: i32) -> (i32, i32) {
    %c0_i32 = arith.constant 0 : i32
    %c0_i32_0 = arith.constant 0 : i32
    return %c0_i32, %arg0 : i32, i32
  }
  func.func @transform_2(%arg0: i32) -> (i32, i32) {
    %c0_i32 = arith.constant 0 : i32
    %c0_i32_0 = arith.constant 0 : i32
    return %c0_i32, %arg0 : i32, i32
  }
  func.func @transform_3(%arg0: i32) -> (i32, i32) {
    %c0_i32 = arith.constant 0 : i32
    %c0_i32_0 = arith.constant 0 : i32
    return %c0_i32, %arg0 : i32, i32
  }
}

module attributes {stable_mosaic.version = 11 : i64} {
  func.func @_linear_kernel(%arg0: i32, %arg1: memref<8x2048xbf16, #tpu.memory_space<vmem>>, %arg2: memref<2048x512xbf16, #tpu.memory_space<vmem>>, %arg3: memref<1x512xf32, #tpu.memory_space<vmem>>, %arg4: memref<8x512xbf16, #tpu.memory_space<vmem>>) attributes {dimension_semantics = [#tpu.dimension_semantics<parallel>], iteration_bounds = array<i64: 2>, scalar_prefetch = 0 : i64, scratch_operands = 0 : i64, tpu.core_type = #tpu.core_type<tc>, window_params = [{pipeline_mode = #tpu.pipeline_mode<synchronous>, transform_indices = @transform_0, window_bounds = array<i64: 8, 2048>}, {transform_indices = @transform_1, window_bounds = array<i64: 2048, 512>}, {transform_indices = @transform_2, window_bounds = array<i64: 1, 512>}, {transform_indices = @transform_3, window_bounds = array<i64: 8, 512>}]} {
    %c0 = arith.constant 0 : index
    %c0_0 = arith.constant 0 : index
    %0 = vector.load %arg1[%c0, %c0_0] : memref<8x2048xbf16, #tpu.memory_space<vmem>>, vector<8x2048xbf16>
    %c0_1 = arith.constant 0 : index
    %c0_2 = arith.constant 0 : index
    %1 = vector.load %arg2[%c0_1, %c0_2] : memref<2048x512xbf16, #tpu.memory_space<vmem>>, vector<2048x512xbf16>
    %cst = arith.constant dense<0.000000e+00> : vector<8x512xf32>
    %2 = tpu.matmul %0, %1, %cst {dimension_numbers = #tpu.dot_dimension_numbers<[1], [0], [0], [1], [0, 0, 1, 1], [], []>} : vector<8x2048xbf16>, vector<2048x512xbf16>, vector<8x512xf32> -> vector<8x512xf32>
    %c0_3 = arith.constant 0 : index
    %c0_4 = arith.constant 0 : index
    %3 = vector.load %arg3[%c0_3, %c0_4] : memref<1x512xf32, #tpu.memory_space<vmem>>, vector<1x512xf32>
    %4 = vector.broadcast %3 : vector<1x512xf32> to vector<8x512xf32>
    %5 = arith.addf %2, %4 : vector<8x512xf32>
    %cst_5 = arith.constant 5.000000e-01 : f32
    %6 = vector.broadcast %cst_5 : f32 to vector<8x512xf32>
    %7 = arith.mulf %6, %5 : vector<8x512xf32>
    %cst_6 = arith.constant 0.707106769 : f32
    %8 = vector.broadcast %cst_6 : f32 to vector<8x512xf32>
    %9 = arith.mulf %5, %8 : vector<8x512xf32>
    %cst_7 = arith.constant 0.000000e+00 : f32
    %10 = vector.broadcast %cst_7 : f32 to vector<8x512xf32>
    %11 = arith.cmpf olt, %9, %10 : vector<8x512xf32>
    %cst_8 = arith.constant -1.000000e+00 : f32
    %cst_9 = arith.constant 1.000000e+00 : f32
    %12 = vector.broadcast %cst_8 : f32 to vector<8x512xf32>
    %13 = vector.broadcast %cst_9 : f32 to vector<8x512xf32>
    %14 = arith.select %11, %12, %13 : vector<8x512xi1>, vector<8x512xf32>
    %15 = math.absf %9 : vector<8x512xf32>
    %cst_10 = arith.constant 0.327591091 : f32
    %16 = vector.broadcast %cst_10 : f32 to vector<8x512xf32>
    %17 = arith.mulf %16, %15 : vector<8x512xf32>
    %cst_11 = arith.constant 1.000000e+00 : f32
    %18 = vector.broadcast %cst_11 : f32 to vector<8x512xf32>
    %19 = arith.addf %18, %17 : vector<8x512xf32>
    %20 = tpu.reciprocal %19 {approx = true} : vector<8x512xf32> -> vector<8x512xf32>
    %cst_12 = arith.constant 1.06140542 : f32
    %21 = vector.broadcast %cst_12 : f32 to vector<8x512xf32>
    %22 = arith.mulf %21, %20 : vector<8x512xf32>
    %cst_13 = arith.constant -1.45315206 : f32
    %23 = vector.broadcast %cst_13 : f32 to vector<8x512xf32>
    %24 = arith.addf %22, %23 : vector<8x512xf32>
    %25 = arith.mulf %24, %20 : vector<8x512xf32>
    %cst_14 = arith.constant 1.42141378 : f32
    %26 = vector.broadcast %cst_14 : f32 to vector<8x512xf32>
    %27 = arith.addf %25, %26 : vector<8x512xf32>
    %28 = arith.mulf %27, %20 : vector<8x512xf32>
    %cst_15 = arith.constant -0.284496725 : f32
    %29 = vector.broadcast %cst_15 : f32 to vector<8x512xf32>
    %30 = arith.addf %28, %29 : vector<8x512xf32>
    %31 = arith.mulf %30, %20 : vector<8x512xf32>
    %cst_16 = arith.constant 0.254829586 : f32
    %32 = vector.broadcast %cst_16 : f32 to vector<8x512xf32>
    %33 = arith.addf %31, %32 : vector<8x512xf32>
    %34 = arith.mulf %33, %20 : vector<8x512xf32>
    %cst_17 = arith.constant 0.000000e+00 : f32
    %35 = vector.broadcast %cst_17 : f32 to vector<8x512xf32>
    %36 = arith.subf %35, %15 : vector<8x512xf32>
    %37 = arith.mulf %36, %15 : vector<8x512xf32>
    %38 = math.exp %37 : vector<8x512xf32>
    %39 = arith.mulf %34, %38 : vector<8x512xf32>
    %cst_18 = arith.constant 1.000000e+00 : f32
    %40 = vector.broadcast %cst_18 : f32 to vector<8x512xf32>
    %41 = arith.subf %40, %39 : vector<8x512xf32>
    %42 = arith.mulf %14, %41 : vector<8x512xf32>
    %cst_19 = arith.constant 1.000000e+00 : f32
    %43 = vector.broadcast %cst_19 : f32 to vector<8x512xf32>
    %44 = arith.addf %43, %42 : vector<8x512xf32>
    %45 = arith.mulf %7, %44 : vector<8x512xf32>
    %46 = arith.truncf %45 : vector<8x512xf32> to vector<8x512xbf16>
    %c0_20 = arith.constant 0 : index
    %c0_21 = arith.constant 0 : index
    %47 = vector.load %arg4[%c0_20, %c0_21] : memref<8x512xbf16, #tpu.memory_space<vmem>>, vector<8x512xbf16>
    tpu.vector_store %arg4[%c0_20, %c0_21], %46 {strides = array<i32>} : memref<8x512xbf16, #tpu.memory_space<vmem>>, vector<8x512xbf16>,
    return
  }
  func.func @transform_0(%arg0: i32) -> (i32, i32) {
    %c0_i32 = arith.constant 0 : i32
    %c0_i32_0 = arith.constant 0 : i32
    %c0_i32_1 = arith.constant 0 : i32
    return %c0_i32, %c0_i32_0 : i32, i32
  }
  func.func @transform_1(%arg0: i32) -> (i32, i32) {
    %c0_i32 = arith.constant 0 : i32
    %c0_i32_0 = arith.constant 0 : i32
    return %c0_i32, %arg0 : i32, i32
  }
  func.func @transform_2(%arg0: i32) -> (i32, i32) {
    %c0_i32 = arith.constant 0 : i32
    %c0_i32_0 = arith.constant 0 : i32
    return %c0_i32, %arg0 : i32, i32
  }
  func.func @transform_3(%arg0: i32) -> (i32, i32) {
    %c0_i32 = arith.constant 0 : i32
    %c0_i32_0 = arith.constant 0 : i32
    return %c0_i32, %arg0 : i32, i32
  }
}

module attributes {stable_mosaic.version = 11 : i64} {
  func.func @_linear_kernel(%arg0: i32, %arg1: memref<8x1024xbf16, #tpu.memory_space<vmem>>, %arg2: memref<1024x512xbf16, #tpu.memory_space<vmem>>, %arg3: memref<1x512xf32, #tpu.memory_space<vmem>>, %arg4: memref<8x512xf32, #tpu.memory_space<vmem>>) attributes {dimension_semantics = [#tpu.dimension_semantics<parallel>], iteration_bounds = array<i64: 2>, scalar_prefetch = 0 : i64, scratch_operands = 0 : i64, tpu.core_type = #tpu.core_type<tc>, window_params = [{pipeline_mode = #tpu.pipeline_mode<synchronous>, transform_indices = @transform_0, window_bounds = array<i64: 8, 1024>}, {transform_indices = @transform_1, window_bounds = array<i64: 1024, 512>}, {transform_indices = @transform_2, window_bounds = array<i64: 1, 512>}, {transform_indices = @transform_3, window_bounds = array<i64: 8, 512>}]} {
    %c0 = arith.constant 0 : index
    %c0_0 = arith.constant 0 : index
    %0 = vector.load %arg1[%c0, %c0_0] : memref<8x1024xbf16, #tpu.memory_space<vmem>>, vector<8x1024xbf16>
    %c0_1 = arith.constant 0 : index
    %c0_2 = arith.constant 0 : index
    %1 = vector.load %arg2[%c0_1, %c0_2] : memref<1024x512xbf16, #tpu.memory_space<vmem>>, vector<1024x512xbf16>
    %cst = arith.constant dense<0.000000e+00> : vector<8x512xf32>
    %2 = tpu.matmul %0, %1, %cst {dimension_numbers = #tpu.dot_dimension_numbers<[1], [0], [0], [1], [0, 0, 1, 1], [], []>} : vector<8x1024xbf16>, vector<1024x512xbf16>, vector<8x512xf32> -> vector<8x512xf32>
    %c0_3 = arith.constant 0 : index
    %c0_4 = arith.constant 0 : index
    %3 = vector.load %arg3[%c0_3, %c0_4] : memref<1x512xf32, #tpu.memory_space<vmem>>, vector<1x512xf32>
    %4 = vector.broadcast %3 : vector<1x512xf32> to vector<8x512xf32>
    %5 = arith.addf %2, %4 : vector<8x512xf32>
    %c0_5 = arith.constant 0 : index
    %c0_6 = arith.constant 0 : index
    %6 = vector.load %arg4[%c0_5, %c0_6] : memref<8x512xf32, #tpu.memory_space<vmem>>, vector<8x512xf32>
    tpu.vector_store %arg4[%c0_5, %c0_6], %5 {strides = array<i32>} : memref<8x512xf32, #tpu.memory_space<vmem>>, vector<8x512xf32>,
    return
  }
  func.func @transform_0(%arg0: i32) -> (i32, i32) {
    %c0_i32 = arith.constant 0 : i32
    %c0_i32_0 = arith.constant 0 : i32
    %c0_i32_1 = arith.constant 0 : i32
    return %c0_i32, %c0_i32_0 : i32, i32
  }
  func.func @transform_1(%arg0: i32) -> (i32, i32) {
    %c0_i32 = arith.constant 0 : i32
    %c0_i32_0 = arith.constant 0 : i32
    return %c0_i32, %arg0 : i32, i32
  }
  func.func @transform_2(%arg0: i32) -> (i32, i32) {
    %c0_i32 = arith.constant 0 : i32
    %c0_i32_0 = arith.constant 0 : i32
    return %c0_i32, %arg0 : i32, i32
  }
  func.func @transform_3(%arg0: i32) -> (i32, i32) {
    %c0_i32 = arith.constant 0 : i32
    %c0_i32_0 = arith.constant 0 : i32
    return %c0_i32, %arg0 : i32, i32
  }
}

</mosaic_0001>

<bundles_post_ra>
// kernel: fmri2image.4
= control target key start
LH: loop header
LB: loop body
LE: loop exit
PB: predicated region body
PF: predicated region fallthrough
CT: control target
= control target key end

     0   :  { %8 = vsyncpa [#allocation3], 0  ;;  %s2290_s0 = inlined_call_operand.vmem [shape: bf16[8,512], index: 0, kind: input, shape index: {}]   ;;  %s2291_s1 = inlined_call_operand.hbm [shape: bf16[512,2048], index: 1, kind: input, shape index: {}]   ;;  %s2292_s2 = inlined_call_operand.hbm [shape: f32[1,2048], index: 2, kind: input, shape index: {}]   ;;  %s2293_s3 = inlined_call_operand.vmem [shape: bf16[8,2048], index: 3, kind: output, shape index: {}]  }
   0x1   :  { %10 = vsyncpa [#allocation3 + $0x1], 0 }
   0x2   :  { %11 = vsyncpa [#allocation5], 0 }
   0x3   :  { %13 = vsyncpa [#allocation5 + $0x1], 0  ;;  %s1967_s12 = smov 0   ;;  %s1969_s13 = smov 0  }
   0x4   :  { %s1971_s14 = smov 0   ;;  %s1973_s15 = smov 0  }
   0x5 LB: > { %s1414_s16 = sadd.s32 4294967295, %s1939_s15   ;;  %s1987_s17 = sadd.s32 1, %s1939_s15   ;;  %s1939_s15 = sphi %s1973_s15, %s2303_s15   ;;  %s1935_s14 = sphi %s1971_s14, %s2302_s14   ;;  %s1931_s13 = sphi %s1969_s13, %s2301_s13   ;;  %s1927_s12 = sphi %s1967_s12, %s2300_s12  }
   0x6   : > { %s44_s18 = ssub.s32 %s1939_s15, %s1987_s17  ;;  %s47_s19 = sadd.s32 1, %s1935_s14 }
   0x7   : > { %p45_p0 = scmp.eq.s32.totalorder %s44_s18, 0  ;;  %p54_p1 = scmp.ne.s32.totalorder %s1935_s14, %s1931_s13 }
   0x8   : > { %p55_p2 = scmp.eq.s32.totalorder %s1939_s15, 0  ;;  %p60_p3 = scmp.ne.s32.totalorder %s1931_s13, %s1927_s12 }
   0x9   : > { %s1997_s20 = scalar_select %p45_p0, %s1935_s14, %s47_s19  }
   0xa   : > { %p56_p4 = por %p55_p2, %p54_p1  ;;  %p61_p5 = scmp.eq.s32.totalorder %s1414_s16, 0 }
   0xb   : > { %p1592_p6 = scmp.lt.s32.totalorder %s1939_s15, 4  ;;  %s2007_s22 = sand.u32 1, %s1935_s14  }
   0xc   : > { %p2002_p7 = por %p61_p5, %p60_p3  ;;  %s1418_s23 = sshll.u32 %s2007_s22, 10 }
   0xd   : > { %s1565_s24 = sshll.u32 %s1939_s15, 8  ;;  %s143_s28 = scalar_lea.vmem [#allocation2], %s1418_s23 }
   0xe   : > { %s2295_s21 = scalar_select %p2002_p7, 1, 0 }
   0xf   : > { %s2014_s27 = scalar_lea.hbm %s2291_s1, %s1565_s24  ;;  %s150_s29 = sshll.u32 %s143_s28, 4  ;;  %s2016_s29 = int_to_ptr.vmem [resolvable:$true] %s150_s29 }
  0x10   : > { %p2018_p8 = pnand %p1592_p6, %p56_p4  ;;  %s140_s4 = scalar_lea.sflag [#allocation3], %s2007_s22 }
  0x11   : > { %s1841_s5 = scalar_lea.hbm %s2014_s27, 16384  ;;  %s1846_s8 = scalar_lea.hbm %s2291_s1, 65536 }
  0x12   : > { %p1842_p9 = scmp.ne.s32.totalorder %s2014_s27, %s1841_s5  ;;  %p1843_p10 = pneg %p2018_p8 }
  0x13   : > { %p1847_p13 = scmp.lt.u32.totalorder %s2014_s27, %s2291_s1  ;;  %p1848_p0 = scmp.lt.u32.totalorder %s1846_s8, %s1841_s5 }
  0x14   : > { %p1844_p11 = pnand %p1843_p10, %p1842_p9  ;;  %p1850_p2 = scmp.lt.u32.totalorder %s1841_s5, %s2014_s27 }
  0x15   : > { %p1849_p1 = por %p1848_p0, %p1847_p13 }
  0x16   : > { %p1845_p12 = pneg %p1844_p11 }
  0x17   : > { %p1851_p3 = por %p1850_p2, %p1849_p1 }
  0x19   : > { %p1852_p4 = pnand %p1851_p3, %p1845_p12 }
  0x1b   : > { %1855 = shalt.err (!%p1852_p4)
}
  0x1c   : > { %s1856_s11 = scalar_lea.vmem %s2016_s29, 16384  ;;  %s1941_s12 = smov [#allocation2]  }
  0x1d   : > { %p1857_p5 = scmp.ne.s32.totalorder %s2016_s29, %s1856_s11  ;;  %s1861_s18 = sshll.u32 %s1941_s12, 4  ;;  %s1862_s18 = int_to_ptr.vmem [resolvable:$false] %s1861_s18 }
  0x1e   : > { %s1863_s19 = scalar_lea.vmem %s1862_s18, 32768  ;;  %p1864_p11 = scmp.lt.s32.totalorder %s2016_s29, %s1862_s18 }
  0x1f   : > { %p1859_p6 = pnand %p1857_p5, %p1843_p10  ;;  %p1865_p13 = scmp.lt.s32.totalorder %s1863_s19, %s1856_s11 }
  0x21   : > { %p1860_p9 = pneg %p1859_p6  ;;  %p1866_p0 = por %p1865_p13, %p1864_p11 }
  0x23   : > { %p1867_p1 = pnand %p1866_p0, %p1860_p9 }
  0x25   : > { %1870 = shalt.err (!%p1867_p1)
}
  0x26   : > { %s1942_s23 = smov 1024   ;;  %s1943_s24 = smov 256  }
  0x27   : > { %s1944_s25 = smov 16   ;;  %p1424_p12 = scmp.ge.s32.totalorder %s1939_s15, 1 }
  0x28   : > { %1588 = dma.hbm_to_vmem [thread:$0]  (!%p2018_p8), %s2014_s27, 16384, %s2016_s29, %s140_s4, %s1942_s23, %s1943_s24, %s1944_s25  }
  0x29   : > { %p177_p2 = scmp.lt.s32.totalorder %s1939_s15, 5  ;;  %s1421_s26 = sshll.u32 %s2007_s22, 2 }
  0x2a   : > { %s1566_s5 = sshll.u32 %s1939_s15, 6  ;;  %s164_s6 = scalar_lea.vmem [#allocation4], %s1421_s26 }
  0x2b   : > { %p2053_p3 = pnand %p1424_p12, %p177_p2  ;;  %s172_s7 = sshll.u32 %s164_s6, 4  ;;  %s173_s7 = int_to_ptr.vmem [resolvable:$true] %s172_s7 }
  0x2c   : > { %s2061_s10 = scalar_lea.hbm %s2292_s2, %s1566_s5  ;;  %s161_s27 = scalar_lea.sflag [#allocation5], %s2007_s22 }
  0x2d   : > { %s2297_s28 = scalar_select %p2053_p3, 1, 0 }
  0x2e   : > { %s1871_s29 = scalar_lea.hbm %s2061_s10, 64  ;;  %s1876_s12 = scalar_lea.hbm %s2292_s2, 256 }
  0x2f   : > { %p1872_p4 = scmp.ne.s32.totalorder %s2061_s10, %s1871_s29  ;;  %p1877_p9 = scmp.lt.u32.totalorder %s2061_s10, %s2292_s2 }
  0x30   : > { %p1878_p11 = scmp.lt.u32.totalorder %s1876_s12, %s1871_s29  ;;  %p1880_p0 = scmp.lt.u32.totalorder %s1871_s29, %s2061_s10 }
  0x31   : > { %p1874_p5 = pnand %p1872_p4, %p1843_p10 }
  0x32   : > { %p1879_p13 = por %p1878_p11, %p1877_p9 }
  0x33   : > { %p1875_p6 = pneg %p1874_p5 }
  0x34   : > { %p1881_p1 = por %p1880_p0, %p1879_p13 }
  0x36   : > { %p1882_p12 = pnand %p1881_p1, %p1875_p6 }
  0x38   : > { %1885 = shalt.err (!%p1882_p12)
}
  0x39   : > { %s1886_s22 = scalar_lea.vmem %s173_s7, 64  ;;  %s1945_s23 = smov [#allocation4]  }
  0x3a   : > { %p1887_p2 = scmp.ne.s32.totalorder %s173_s7, %s1886_s22  ;;  %s1891_s24 = sshll.u32 %s1945_s23, 4  ;;  %s1892_s24 = int_to_ptr.vmem [resolvable:$false] %s1891_s24 }
  0x3b   : > { %s1893_s25 = scalar_lea.vmem %s1892_s24, 128  ;;  %p1894_p7 = scmp.lt.s32.totalorder %s173_s7, %s1892_s24 }
  0x3c   : > { %p1889_p4 = pnand %p1887_p2, %p1843_p10  ;;  %p1895_p3 = scmp.lt.s32.totalorder %s1893_s25, %s1886_s22 }
  0x3e   : > { %p1890_p5 = pneg %p1889_p4  ;;  %p1896_p9 = por %p1895_p3, %p1894_p7 }
  0x40   : > { %p1897_p11 = pnand %p1896_p9, %p1890_p5 }
  0x42   : > { %1900 = shalt.err (!%p1897_p11)
}
  0x43   : > { %1591 = dma.hbm_to_vmem [thread:$0]  (!%p2018_p8), %s2061_s10, 64, %s173_s7, %s161_s27  }
  0x44   : > { %p2298_p6 = scmp.ne.s32.totalorder %s2297_s28, 0 }
  0x45   : > { %s183_s26 = sand.u32 (!%p2298_p6), 1, %s1931_s13   ;;  %p2299_p10 = scmp.ne.s32.totalorder (!%p2298_p6), %s2295_s21, 0 }
  0x46   : > { %181 = sbr.rel (%p2298_p6) target bundleno = 477 (0x1dd), region = 32  ;;  %s1425_s5 = sshll.u32 (!%p2298_p6), %s183_s26, 10 }
  0x47   : > { %s184_s6 = scalar_lea.sflag (!%p2298_p6), [#allocation3], %s183_s26  ;;  %s2086_s8 = scalar_lea.vmem (!%p2298_p6), [#allocation2], %s1425_s5 }
  0x4d   : > { %1918 = dma.done.wait (%p2299_p10), %s184_s6, 16384  }
  0x4e   : > { %1920 = vsyncadd (%p2299_p10), %s184_s6, 4294950912  ;;  %s1426_s9 = sshll.u32 %s183_s26, 2  ;;  %s193_s30 = scalar_lea.sflag [#allocation5], %s183_s26 }
  0x4f   : > { %s2092_s29 = scalar_lea.vmem [#allocation4], %s1426_s9 }
  0x50   : > { %1922 = dma.done.wait (%p2299_p10), %s193_s30, 64  }
  0x51   : > { %1924 = vsyncadd (%p2299_p10), %s193_s30, 4294967232  ;;  %v1629_v0 = vld [vmem:[%s2086_s8 + $0x4] ss:$16 sps:$4 sm:$0xff]   ;;  %v1631_v1 = vld [vmem:[%s2086_s8 + $0xc] ss:$16 sps:$4 sm:$0xff]   ;;  %s1427_s27 = sshll.u32 %s1414_s16, 2 }
  0x52   : > { %1038 = vmatprep.subr.bf16.mxu0 %v1629_v0  ;;  %v1633_v2 = vld [vmem:[%s2086_s8] ss:$16 sps:$4 sm:$0xff]   ;;  %v1634_v3 = vld [vmem:[%s2086_s8 + $0x8] ss:$16 sps:$4 sm:$0xff]   ;;  %1120 = vmatprep.subr.bf16.mxu1 %v1631_v1  ;;  %v1635_v4 = vld [vmem:[%s2086_s8 + $0x24] ss:$16 sps:$4 sm:$0xff]  }
  0x53   : > { %1039 = vmatpush1.bf16.msra.mxu0 %v1633_v2  ;;  %1121 = vmatpush1.bf16.msra.mxu1 %v1634_v3  ;;  %v1637_v5 = vld [vmem:[%s2086_s8 + $0x2c] ss:$16 sps:$4 sm:$0xff]   ;;  %v1639_v6 = vld [vmem:[%s2086_s8 + $0x20] ss:$16 sps:$4 sm:$0xff]   ;;  %v1640_v7 = vld [vmem:[%s2086_s8 + $0x28] ss:$16 sps:$4 sm:$0xff]  }
  0x54   : > { %1040 = vmatprep.subr.bf16.mxu0 %v1635_v4  ;;  %1122 = vmatprep.subr.bf16.mxu1 %v1637_v5  ;;  %v1641_v8 = vld [vmem:[%s2086_s8 + $0x44] ss:$16 sps:$4 sm:$0xff]   ;;  %v1643_v9 = vld [vmem:[%s2086_s8 + $0x4c] ss:$16 sps:$4 sm:$0xff]   ;;  %v1645_v10 = vld [vmem:[%s2086_s8 + $0x40] ss:$16 sps:$4 sm:$0xff]  }
  0x55   : > { %v1646_v11 = vld [vmem:[%s2086_s8 + $0x48] ss:$16 sps:$4 sm:$0xff]   ;;  %v1647_v12 = vld [vmem:[%s2086_s8 + $0x64] ss:$16 sps:$4 sm:$0xff]   ;;  %v1649_v13 = vld [vmem:[%s2086_s8 + $0x6c] ss:$16 sps:$4 sm:$0xff]  }
  0x56   : > { %v1651_v14 = vld [vmem:[%s2086_s8 + $0x60] ss:$16 sps:$4 sm:$0xff]   ;;  %v1652_v15 = vld [vmem:[%s2086_s8 + $0x68] ss:$16 sps:$4 sm:$0xff]   ;;  %v1653_v16 = vld [vmem:[%s2086_s8 + $0x84] ss:$16 sps:$4 sm:$0xff]  }
  0x57   : > { %1041 = vmatpush1.bf16.msra.mxu0 %v1639_v6  ;;  %1123 = vmatpush1.bf16.msra.mxu1 %v1640_v7  ;;  %v1655_v17 = vld [vmem:[%s2086_s8 + $0x8c] ss:$16 sps:$4 sm:$0xff]   ;;  %v1657_v18 = vld [vmem:[%s2086_s8 + $0x80] ss:$16 sps:$4 sm:$0xff]   ;;  %v1658_v19 = vld [vmem:[%s2086_s8 + $0x88] ss:$16 sps:$4 sm:$0xff]  }
  0x58   : > { %1042 = vmatprep.subr.bf16.mxu0 %v1641_v8  ;;  %1124 = vmatprep.subr.bf16.mxu1 %v1643_v9  ;;  %v1659_v20 = vld [vmem:[%s2086_s8 + $0xa4] ss:$16 sps:$4 sm:$0xff]   ;;  %v1661_v21 = vld [vmem:[%s2086_s8 + $0xac] ss:$16 sps:$4 sm:$0xff]   ;;  %v1663_v22 = vld [vmem:[%s2086_s8 + $0xa0] ss:$16 sps:$4 sm:$0xff]  }
  0x59   : > { %v1664_v23 = vld [vmem:[%s2086_s8 + $0xa8] ss:$16 sps:$4 sm:$0xff]   ;;  %v1665_v24 = vld [vmem:[%s2086_s8 + $0xc4] ss:$16 sps:$4 sm:$0xff]   ;;  %v1667_v25 = vld [vmem:[%s2086_s8 + $0xcc] ss:$16 sps:$4 sm:$0xff]  }
  0x5a   : > { %v1669_v26 = vld [vmem:[%s2086_s8 + $0xc0] ss:$16 sps:$4 sm:$0xff]   ;;  %v1670_v27 = vld [vmem:[%s2086_s8 + $0xc8] ss:$16 sps:$4 sm:$0xff]   ;;  %v1671_v28 = vld [vmem:[%s2086_s8 + $0xe4] ss:$16 sps:$4 sm:$0xff]  }
  0x5b   : > { %1043 = vmatpush1.bf16.msra.mxu0 %v1645_v10  ;;  %1125 = vmatpush1.bf16.msra.mxu1 %v1646_v11  ;;  %v1673_v29 = vld [vmem:[%s2086_s8 + $0xec] ss:$16 sps:$4 sm:$0xff]   ;;  %v1675_v30 = vld [vmem:[%s2086_s8 + $0xe0] ss:$16 sps:$4 sm:$0xff]   ;;  %v1676_v31 = vld [vmem:[%s2086_s8 + $0xe8] ss:$16 sps:$4 sm:$0xff]  }
  0x5c   : > { %1044 = vmatprep.subr.bf16.mxu0 %v1647_v12  ;;  %1126 = vmatprep.subr.bf16.mxu1 %v1649_v13  ;;  %v1677_v32 = vld [vmem:[%s2086_s8 + $0x104] ss:$16 sps:$4 sm:$0xff]   ;;  %v1679_v33 = vld [vmem:[%s2086_s8 + $0x10c] ss:$16 sps:$4 sm:$0xff]   ;;  %v1681_v34 = vld [vmem:[%s2086_s8 + $0x100] ss:$16 sps:$4 sm:$0xff]  }
  0x5d   : > { %v1682_v35 = vld [vmem:[%s2086_s8 + $0x108] ss:$16 sps:$4 sm:$0xff]   ;;  %v1683_v36 = vld [vmem:[%s2086_s8 + $0x124] ss:$16 sps:$4 sm:$0xff]   ;;  %v1685_v37 = vld [vmem:[%s2086_s8 + $0x12c] ss:$16 sps:$4 sm:$0xff]  }
  0x5e   : > { %v1687_v38 = vld [vmem:[%s2086_s8 + $0x120] ss:$16 sps:$4 sm:$0xff]   ;;  %v1688_v39 = vld [vmem:[%s2086_s8 + $0x128] ss:$16 sps:$4 sm:$0xff]   ;;  %v1689_v40 = vld [vmem:[%s2086_s8 + $0x144] ss:$16 sps:$4 sm:$0xff]  }
  0x5f   : > { %1045 = vmatpush1.bf16.msra.mxu0 %v1651_v14  ;;  %1127 = vmatpush1.bf16.msra.mxu1 %v1652_v15  ;;  %v1691_v41 = vld [vmem:[%s2086_s8 + $0x14c] ss:$16 sps:$4 sm:$0xff]   ;;  %v1693_v42 = vld [vmem:[%s2086_s8 + $0x140] ss:$16 sps:$4 sm:$0xff]   ;;  %v1694_v43 = vld [vmem:[%s2086_s8 + $0x148] ss:$16 sps:$4 sm:$0xff]  }
  0x60   : > { %1046 = vmatprep.subr.bf16.mxu0 %v1653_v16  ;;  %1128 = vmatprep.subr.bf16.mxu1 %v1655_v17  ;;  %v1695_v44 = vld [vmem:[%s2086_s8 + $0x164] ss:$16 sps:$4 sm:$0xff]   ;;  %v1697_v45 = vld [vmem:[%s2086_s8 + $0x16c] ss:$16 sps:$4 sm:$0xff]   ;;  %v1699_v47 = vld [vmem:[%s2086_s8 + $0x160] ss:$16 sps:$4 sm:$0xff]  }
  0x61   : > { %v232_v46 = vld [vmem:[%s2290_s0] sm:$0xff]  ;;  %v1700_v49 = vld [vmem:[%s2086_s8 + $0x168] ss:$16 sps:$4 sm:$0xff]   ;;  %v1703_v51 = vld [vmem:[%s2086_s8 + $0x18c] ss:$16 sps:$4 sm:$0xff]   ;;  %p227_p7 = scmp.lt.s32.totalorder %s1427_s27, 15 }
  0x62   : > { %v1430_v48 = vcombine.high %v232_v46, %v232_v46  ;;  %v1701_v50 = vld [vmem:[%s2086_s8 + $0x184] ss:$16 sps:$4 sm:$0xff]   ;;  %v1705_v52 = vld [vmem:[%s2086_s8 + $0x180] ss:$16 sps:$4 sm:$0xff]   ;;  %v1706_v53 = vld [vmem:[%s2086_s8 + $0x188] ss:$16 sps:$4 sm:$0xff]   ;;  %v1429_v4 = vcombine.low %v232_v46, %v232_v46 }
  0x63   : > { %1047 = vmatpush1.bf16.msra.mxu0 %v1657_v18  ;;  %1129 = vmatpush1.bf16.msra.mxu1 %v1658_v19  ;;  %v1707_v54 = vld [vmem:[%s2086_s8 + $0x1a4] ss:$16 sps:$4 sm:$0xff]   ;;  %v1709_v55 = vld [vmem:[%s2086_s8 + $0x1ac] ss:$16 sps:$4 sm:$0xff]   ;;  %v1711_v56 = vld [vmem:[%s2086_s8 + $0x1a0] ss:$16 sps:$4 sm:$0xff]  }
  0x64   : > { %1048 = vmatprep.subr.bf16.mxu0 %v1659_v20  ;;  %1130 = vmatprep.subr.bf16.mxu1 %v1661_v21  ;;  %v1712_v57 = vld [vmem:[%s2086_s8 + $0x1a8] ss:$16 sps:$4 sm:$0xff]   ;;  %v1713_v58 = vld [vmem:[%s2086_s8 + $0x1c4] ss:$16 sps:$4 sm:$0xff]   ;;  %v1715_v59 = vld [vmem:[%s2086_s8 + $0x1cc] ss:$16 sps:$4 sm:$0xff]  }
  0x65   : > { %1070 = vmatprep.mubr.bf16.mxu0 %v1430_v48  ;;  %1152 = vmatprep.mubr.bf16.mxu1 %v1430_v48  ;;  %v1717_v60 = vld [vmem:[%s2086_s8 + $0x1c0] ss:$16 sps:$4 sm:$0xff]   ;;  %v1718_v61 = vld [vmem:[%s2086_s8 + $0x1c8] ss:$16 sps:$4 sm:$0xff]   ;;  %v1719_v62 = vld [vmem:[%s2086_s8 + $0x1e4] ss:$16 sps:$4 sm:$0xff]  }
  0x66   : > { %v1721_v63 = vld [vmem:[%s2086_s8 + $0x1ec] ss:$16 sps:$4 sm:$0xff]   ;;  %v1723_v0 = vld [vmem:[%s2086_s8 + $0x1e0] ss:$16 sps:$4 sm:$0xff]   ;;  %v1724_v1 = vld [vmem:[%s2086_s8 + $0x1e8] ss:$16 sps:$4 sm:$0xff]  }
  0x67   : > { %1049 = vmatpush1.bf16.msra.mxu0 %v1663_v22  ;;  %1131 = vmatpush1.bf16.msra.mxu1 %v1664_v23  ;;  %v1729_v2 = vld [vmem:[%s2086_s8 + $0x204] ss:$16 sps:$4 sm:$0xff]   ;;  %v1732_v3 = vld [vmem:[%s2086_s8 + $0x20c] ss:$16 sps:$4 sm:$0xff]   ;;  %v1727_v5 = vld [vmem:[%s2086_s8 + $0x200] ss:$16 sps:$4 sm:$0xff]  }
  0x68   : > { %1050 = vmatprep.subr.bf16.mxu0 %v1665_v24  ;;  %1132 = vmatprep.subr.bf16.mxu1 %v1667_v25  ;;  %v1730_v6 = vld [vmem:[%s2086_s8 + $0x208] ss:$16 sps:$4 sm:$0xff]   ;;  %v1735_v7 = vld [vmem:[%s2086_s8 + $0x224] ss:$16 sps:$4 sm:$0xff]   ;;  %v1738_v8 = vld [vmem:[%s2086_s8 + $0x22c] ss:$16 sps:$4 sm:$0xff]  }
  0x69   : > { %v1733_v9 = vld [vmem:[%s2086_s8 + $0x220] ss:$16 sps:$4 sm:$0xff]   ;;  %v1736_v10 = vld [vmem:[%s2086_s8 + $0x228] ss:$16 sps:$4 sm:$0xff]   ;;  %v1741_v11 = vld [vmem:[%s2086_s8 + $0x244] ss:$16 sps:$4 sm:$0xff]  }
  0x6a   : > { %v1744_v12 = vld [vmem:[%s2086_s8 + $0x24c] ss:$16 sps:$4 sm:$0xff]   ;;  %v1739_v13 = vld [vmem:[%s2086_s8 + $0x240] ss:$16 sps:$4 sm:$0xff]   ;;  %v1742_v14 = vld [vmem:[%s2086_s8 + $0x248] ss:$16 sps:$4 sm:$0xff]  }
  0x6b   : > { %1051 = vmatpush1.bf16.msra.mxu0 %v1669_v26  ;;  %1133 = vmatpush1.bf16.msra.mxu1 %v1670_v27  ;;  %v1747_v15 = vld [vmem:[%s2086_s8 + $0x264] ss:$16 sps:$4 sm:$0xff]   ;;  %v1750_v16 = vld [vmem:[%s2086_s8 + $0x26c] ss:$16 sps:$4 sm:$0xff]   ;;  %v1745_v17 = vld [vmem:[%s2086_s8 + $0x260] ss:$16 sps:$4 sm:$0xff]  }
  0x6c   : > { %1052 = vmatprep.subr.bf16.mxu0 %v1671_v28  ;;  %1134 = vmatprep.subr.bf16.mxu1 %v1673_v29  ;;  %v1748_v18 = vld [vmem:[%s2086_s8 + $0x268] ss:$16 sps:$4 sm:$0xff]   ;;  %v1753_v19 = vld [vmem:[%s2086_s8 + $0x284] ss:$16 sps:$4 sm:$0xff]   ;;  %v1756_v20 = vld [vmem:[%s2086_s8 + $0x28c] ss:$16 sps:$4 sm:$0xff]  }
  0x6d   : > { %v1751_v21 = vld [vmem:[%s2086_s8 + $0x280] ss:$16 sps:$4 sm:$0xff]   ;;  %v1754_v22 = vld [vmem:[%s2086_s8 + $0x288] ss:$16 sps:$4 sm:$0xff]   ;;  %v1759_v23 = vld [vmem:[%s2086_s8 + $0x2a4] ss:$16 sps:$4 sm:$0xff]  }
  0x6e   : > { %v1762_v24 = vld [vmem:[%s2086_s8 + $0x2ac] ss:$16 sps:$4 sm:$0xff]   ;;  %v1757_v25 = vld [vmem:[%s2086_s8 + $0x2a0] ss:$16 sps:$4 sm:$0xff]   ;;  %v1760_v26 = vld [vmem:[%s2086_s8 + $0x2a8] ss:$16 sps:$4 sm:$0xff]  }
  0x6f   : > { %1053 = vmatpush1.bf16.msra.mxu0 %v1675_v30  ;;  %1135 = vmatpush1.bf16.msra.mxu1 %v1676_v31  ;;  %v1765_v27 = vld [vmem:[%s2086_s8 + $0x2c4] ss:$16 sps:$4 sm:$0xff]   ;;  %v1768_v28 = vld [vmem:[%s2086_s8 + $0x2cc] ss:$16 sps:$4 sm:$0xff]   ;;  %v1763_v31 = vld [vmem:[%s2086_s8 + $0x2c0] ss:$16 sps:$4 sm:$0xff]  }
  0x70   : > { %1054 = vmatprep.subr.bf16.mxu0 %v1677_v32  ;;  %1136 = vmatprep.subr.bf16.mxu1 %v1679_v33  ;;  %v2194_v29 = vld [vmem:[%s2290_s0 + $0x8] sm:$0xff]  ;;  %v1771_v33 = vld [vmem:[%s2086_s8 + $0x2e4] ss:$16 sps:$4 sm:$0xff]   ;;  %s2305_s27 = smov (!%p227_p7, %s1427_s27), 15 }
  0x71   : > { %v1432_v30 = vcombine.high %v2194_v29, %v2194_v29  ;;  %v1766_v32 = vld [vmem:[%s2086_s8 + $0x2c8] ss:$16 sps:$4 sm:$0xff]   ;;  %v1792_v46 = vld [vmem:[%s2086_s8 + $0x34c] ss:$16 sps:$4 sm:$0xff]   ;;  %s1428_s15 = sshll.u32 %s2305_s27, 2 }
  0x72   : > { %v1790_v48 = vld [vmem:[%s2086_s8 + $0x348] ss:$16 sps:$4 sm:$0xff]   ;;  %s230_s11 = scalar_lea.vmem %s2293_s3, %s1428_s15 }
  0x73   : > { %1055 = vmatpush1.bf16.msra.mxu0 %v1681_v34  ;;  %1137 = vmatpush1.bf16.msra.mxu1 %v1682_v35  ;;  %v1774_v34 = vld [vmem:[%s2086_s8 + $0x2ec] ss:$16 sps:$4 sm:$0xff]   ;;  %v1769_v35 = vld [vmem:[%s2086_s8 + $0x2e0] ss:$16 sps:$4 sm:$0xff]  }
  0x74   : > { %1056 = vmatprep.subr.bf16.mxu0 %v1683_v36  ;;  %1138 = vmatprep.subr.bf16.mxu1 %v1685_v37  ;;  %v1772_v36 = vld [vmem:[%s2086_s8 + $0x2e8] ss:$16 sps:$4 sm:$0xff]   ;;  %v1777_v37 = vld [vmem:[%s2086_s8 + $0x304] ss:$16 sps:$4 sm:$0xff]  }
  0x77   : > { %1057 = vmatpush1.bf16.msra.mxu0 %v1687_v38  ;;  %1139 = vmatpush1.bf16.msra.mxu1 %v1688_v39  ;;  %v1780_v38 = vld [vmem:[%s2086_s8 + $0x30c] ss:$16 sps:$4 sm:$0xff]   ;;  %v1775_v39 = vld [vmem:[%s2086_s8 + $0x300] ss:$16 sps:$4 sm:$0xff]  }
  0x78   : > { %1058 = vmatprep.subr.bf16.mxu0 %v1689_v40  ;;  %1140 = vmatprep.subr.bf16.mxu1 %v1691_v41  ;;  %v1778_v40 = vld [vmem:[%s2086_s8 + $0x308] ss:$16 sps:$4 sm:$0xff]   ;;  %v1783_v41 = vld [vmem:[%s2086_s8 + $0x324] ss:$16 sps:$4 sm:$0xff]  }
  0x7b   : > { %1059 = vmatpush1.bf16.msra.mxu0 %v1693_v42  ;;  %1141 = vmatpush1.bf16.msra.mxu1 %v1694_v43  ;;  %v1786_v42 = vld [vmem:[%s2086_s8 + $0x32c] ss:$16 sps:$4 sm:$0xff]   ;;  %v1781_v43 = vld [vmem:[%s2086_s8 + $0x320] ss:$16 sps:$4 sm:$0xff]  }
  0x7c   : > { %1060 = vmatprep.subr.bf16.mxu0 %v1695_v44  ;;  %1142 = vmatprep.subr.bf16.mxu1 %v1697_v45  ;;  %v1784_v44 = vld [vmem:[%s2086_s8 + $0x328] ss:$16 sps:$4 sm:$0xff]   ;;  %v1789_v45 = vld [vmem:[%s2086_s8 + $0x344] ss:$16 sps:$4 sm:$0xff]  }
  0x7f   : > { %1061 = vmatpush1.bf16.msra.mxu0 %v1699_v47  ;;  %1143 = vmatpush1.bf16.msra.mxu1 %v1700_v49  ;;  %v1787_v47 = vld [vmem:[%s2086_s8 + $0x340] ss:$16 sps:$4 sm:$0xff]   ;;  %v1795_v49 = vld [vmem:[%s2086_s8 + $0x364] ss:$16 sps:$4 sm:$0xff]  }
  0x80   : > { %1062 = vmatprep.subr.bf16.mxu0 %v1701_v50  ;;  %1144 = vmatprep.subr.bf16.mxu1 %v1703_v51  ;;  %v1798_v50 = vld [vmem:[%s2086_s8 + $0x36c] ss:$16 sps:$4 sm:$0xff]   ;;  %v1793_v51 = vld [vmem:[%s2086_s8 + $0x360] ss:$16 sps:$4 sm:$0xff]  }
  0x83   : > { %1063 = vmatpush1.bf16.msra.mxu0 %v1705_v52  ;;  %1145 = vmatpush1.bf16.msra.mxu1 %v1706_v53  ;;  %v1796_v52 = vld [vmem:[%s2086_s8 + $0x368] ss:$16 sps:$4 sm:$0xff]   ;;  %v1801_v53 = vld [vmem:[%s2086_s8 + $0x384] ss:$16 sps:$4 sm:$0xff]  }
  0x84   : > { %1064 = vmatprep.subr.bf16.mxu0 %v1707_v54  ;;  %1146 = vmatprep.subr.bf16.mxu1 %v1709_v55  ;;  %v1804_v54 = vld [vmem:[%s2086_s8 + $0x38c] ss:$16 sps:$4 sm:$0xff]   ;;  %v1799_v55 = vld [vmem:[%s2086_s8 + $0x380] ss:$16 sps:$4 sm:$0xff]  }
  0x87   : > { %1065 = vmatpush1.bf16.msra.mxu0 %v1711_v56  ;;  %1147 = vmatpush1.bf16.msra.mxu1 %v1712_v57  ;;  %v1802_v56 = vld [vmem:[%s2086_s8 + $0x388] ss:$16 sps:$4 sm:$0xff]   ;;  %v1807_v57 = vld [vmem:[%s2086_s8 + $0x3a4] ss:$16 sps:$4 sm:$0xff]  }
  0x88   : > { %1066 = vmatprep.subr.bf16.mxu0 %v1713_v58  ;;  %1148 = vmatprep.subr.bf16.mxu1 %v1715_v59  ;;  %v1810_v58 = vld [vmem:[%s2086_s8 + $0x3ac] ss:$16 sps:$4 sm:$0xff]   ;;  %v1805_v59 = vld [vmem:[%s2086_s8 + $0x3a0] ss:$16 sps:$4 sm:$0xff]  }
  0x8b   : > { %1067 = vmatpush1.bf16.msra.mxu0 %v1717_v60  ;;  %1149 = vmatpush1.bf16.msra.mxu1 %v1718_v61  ;;  %v1808_v60 = vld [vmem:[%s2086_s8 + $0x3a8] ss:$16 sps:$4 sm:$0xff]   ;;  %v1813_v61 = vld [vmem:[%s2086_s8 + $0x3c4] ss:$16 sps:$4 sm:$0xff]  }
  0x8c   : > { %1068 = vmatprep.subr.bf16.mxu0 %v1719_v62  ;;  %1150 = vmatprep.subr.bf16.mxu1 %v1721_v63  ;;  %v1816_v62 = vld [vmem:[%s2086_s8 + $0x3cc] ss:$16 sps:$4 sm:$0xff]   ;;  %v1811_v63 = vld [vmem:[%s2086_s8 + $0x3c0] ss:$16 sps:$4 sm:$0xff]  }
  0x8f   : > { %1069 = vmatpush1.bf16.msra.mxu0 %v1723_v0  ;;  %1151 = vmatpush1.bf16.msra.mxu1 %v1724_v1  ;;  %v1814_v0 = vld [vmem:[%s2086_s8 + $0x3c8] ss:$16 sps:$4 sm:$0xff]   ;;  %v1819_v1 = vld [vmem:[%s2086_s8 + $0x3e4] ss:$16 sps:$4 sm:$0xff]  }
  0x90   : > { %1079 = vmatprep.subr.bf16.mxu0 %v1729_v2  ;;  %1161 = vmatprep.subr.bf16.mxu1 %v1732_v3  ;;  %v1822_v2 = vld [vmem:[%s2086_s8 + $0x3ec] ss:$16 sps:$4 sm:$0xff]   ;;  %v1817_v3 = vld [vmem:[%s2086_s8 + $0x3e0] ss:$16 sps:$4 sm:$0xff]  }
  0x92   : > { %1071 = vmatmul.mubr.bf16.vlgmr.msra.gmra.mrb[0].mxu0 %v1429_v4  ;;  %1153 = vmatmul.mubr.bf16.vlgmr.msra.gmra.mrb[0].mxu1 %v1429_v4  ;;  %v1820_v4 = vld [vmem:[%s2086_s8 + $0x3e8] ss:$16 sps:$4 sm:$0xff]  }
  0x93   : > { %1080 = vmatpush1.bf16.msra.mxu0 %v1727_v5  ;;  %1162 = vmatpush1.bf16.msra.mxu1 %v1730_v6  ;;  %v1431_v5 = vcombine.low %v2194_v29, %v2194_v29  ;;  %v364_v6 = vlaneseq }
  0x94   : > { %1081 = vmatprep.subr.bf16.mxu0 %v1735_v7  ;;  %1163 = vmatprep.subr.bf16.mxu1 %v1738_v8 }
  0x95   : > { %1111 = vmatprep.mubr.bf16.mxu0 %v1432_v30  ;;  %1193 = vmatprep.mubr.bf16.mxu1 %v1432_v30  ;;  %v365_v7 = vshrl.u32 %v364_v6, 7 }
  0x97   : > { %1082 = vmatpush1.bf16.msra.mxu0 %v1733_v9  ;;  %1164 = vmatpush1.bf16.msra.mxu1 %v1736_v10  ;;  %v366_v8 = vsub.s32 0, %v365_v7  ;;  %v374_v9 = vsub.s32 2, %v365_v7  ;;  %v362_v10 = vld [vmem:[%s2092_s29] sm:$0xf] }
  0x98   : > { %1083 = vmatprep.subr.bf16.mxu0 %v1741_v11  ;;  %1165 = vmatprep.subr.bf16.mxu1 %v1744_v12  ;;  %v370_v11 = vsub.s32 1, %v365_v7  ;;  %v378_v12 = vsub.s32 3, %v365_v7 }
  0x9b   : > { %1084 = vmatpush1.bf16.msra.mxu0 %v1739_v13  ;;  %1166 = vmatpush1.bf16.msra.mxu1 %v1742_v14  ;;  %v367_v13 = vrot.slane %v362_v10, %v366_v8  ;;  %v375_v14 = vrot.slane %v362_v10, %v374_v9 }
  0x9c   : > { %1085 = vmatprep.subr.bf16.mxu0 %v1747_v15  ;;  %1167 = vmatprep.subr.bf16.mxu1 %v1750_v16  ;;  %v371_v15 = vrot.slane %v362_v10, %v370_v11  ;;  %v379_v16 = vrot.slane %v362_v10, %v378_v12 }
  0x9f   : > { %1086 = vmatpush1.bf16.msra.mxu0 %v1745_v17  ;;  %1168 = vmatpush1.bf16.msra.mxu1 %v1748_v18 }
  0xa0   : > { %1087 = vmatprep.subr.bf16.mxu0 %v1753_v19  ;;  %1169 = vmatprep.subr.bf16.mxu1 %v1756_v20 }
  0xa3   : > { %1088 = vmatpush1.bf16.msra.mxu0 %v1751_v21  ;;  %1170 = vmatpush1.bf16.msra.mxu1 %v1754_v22 }
  0xa4   : > { %1089 = vmatprep.subr.bf16.mxu0 %v1759_v23  ;;  %1171 = vmatprep.subr.bf16.mxu1 %v1762_v24 }
  0xa7   : > { %1090 = vmatpush1.bf16.msra.mxu0 %v1757_v25  ;;  %1172 = vmatpush1.bf16.msra.mxu1 %v1760_v26 }
  0xa8   : > { %1091 = vmatprep.subr.bf16.mxu0 %v1765_v27  ;;  %1173 = vmatprep.subr.bf16.mxu1 %v1768_v28 }
  0xab   : > { %1092 = vmatpush1.bf16.msra.mxu0 %v1763_v31  ;;  %1174 = vmatpush1.bf16.msra.mxu1 %v1766_v32 }
  0xac   : > { %1093 = vmatprep.subr.bf16.mxu0 %v1771_v33  ;;  %1175 = vmatprep.subr.bf16.mxu1 %v1774_v34 }
  0xaf   : > { %1094 = vmatpush1.bf16.msra.mxu0 %v1769_v35  ;;  %1176 = vmatpush1.bf16.msra.mxu1 %v1772_v36 }
  0xb0   : > { %1095 = vmatprep.subr.bf16.mxu0 %v1777_v37  ;;  %1177 = vmatprep.subr.bf16.mxu1 %v1780_v38 }
  0xb3   : > { %1096 = vmatpush1.bf16.msra.mxu0 %v1775_v39  ;;  %1178 = vmatpush1.bf16.msra.mxu1 %v1778_v40 }
  0xb4   : > { %1097 = vmatprep.subr.bf16.mxu0 %v1783_v41  ;;  %1179 = vmatprep.subr.bf16.mxu1 %v1786_v42 }
  0xb7   : > { %1098 = vmatpush1.bf16.msra.mxu0 %v1781_v43  ;;  %1180 = vmatpush1.bf16.msra.mxu1 %v1784_v44 }
  0xb8   : > { %1099 = vmatprep.subr.bf16.mxu0 %v1789_v45  ;;  %1181 = vmatprep.subr.bf16.mxu1 %v1792_v46 }
  0xbb   : > { %1100 = vmatpush1.bf16.msra.mxu0 %v1787_v47  ;;  %1182 = vmatpush1.bf16.msra.mxu1 %v1790_v48 }
  0xbc   : > { %1101 = vmatprep.subr.bf16.mxu0 %v1795_v49  ;;  %1183 = vmatprep.subr.bf16.mxu1 %v1798_v50 }
  0xbf   : > { %1102 = vmatpush1.bf16.msra.mxu0 %v1793_v51  ;;  %1184 = vmatpush1.bf16.msra.mxu1 %v1796_v52 }
  0xc0   : > { %1103 = vmatprep.subr.bf16.mxu0 %v1801_v53  ;;  %1185 = vmatprep.subr.bf16.mxu1 %v1804_v54 }
  0xc3   : > { %1104 = vmatpush1.bf16.msra.mxu0 %v1799_v55  ;;  %1186 = vmatpush1.bf16.msra.mxu1 %v1802_v56 }
  0xc4   : > { %1105 = vmatprep.subr.bf16.mxu0 %v1807_v57  ;;  %1187 = vmatprep.subr.bf16.mxu1 %v1810_v58 }
  0xc7   : > { %1106 = vmatpush1.bf16.msra.mxu0 %v1805_v59  ;;  %1188 = vmatpush1.bf16.msra.mxu1 %v1808_v60 }
  0xc8   : > { %1107 = vmatprep.subr.bf16.mxu0 %v1813_v61  ;;  %1189 = vmatprep.subr.bf16.mxu1 %v1816_v62 }
  0xcb   : > { %1108 = vmatpush1.bf16.msra.mxu0 %v1811_v63  ;;  %1190 = vmatpush1.bf16.msra.mxu1 %v1814_v0 }
  0xcc   : > { %1109 = vmatprep.subr.bf16.mxu0 %v1819_v1  ;;  %1191 = vmatprep.subr.bf16.mxu1 %v1822_v2 }
  0xcf   : > { %1110 = vmatpush1.bf16.msra.mxu0 %v1817_v3  ;;  %1192 = vmatpush1.bf16.msra.mxu1 %v1820_v4 }
  0xd2   : > { %1112 = vmatmul.mubr.bf16.vlgmr.msra.gmra.mrb[0].mxu0 %v1431_v5  ;;  %1194 = vmatmul.mubr.bf16.vlgmr.msra.gmra.mrb[0].mxu1 %v1431_v5 }
 0x1a5   : > { %v1113_v17 = vpop.f32.mrb[0].mxu0  ;;  %v1195_v18 = vpop.f32.mrb[0].mxu1 }
 0x1a6   : > { %v2239_v19 = vadd.f32 %v1113_v17, %v367_v13  ;;  %v2241_v20 = vadd.f32 %v1195_v18, %v375_v14  ;;  %v1115_v21 = vpop.f32.mrb[1].mxu0  ;;  %v1197_v22 = vpop.f32.mrb[1].mxu1 }
 0x1a7   : > { %v2243_v23 = vadd.f32 %v1115_v21, %v371_v15  ;;  %v2245_v24 = vadd.f32 %v1197_v22, %v379_v16  ;;  %v1117_v25 = vpop.f32.mrb[2].mxu0  ;;  %v1199_v26 = vpop.f32.mrb[2].mxu1 }
 0x1a8   : > { %v2248_v27 = vmul.f32 0.70710677, %v2239_v19  ;;  %v2251_v28 = vmul.f32 0.70710677, %v2241_v20  ;;  %v1118_v34 = vpop.f32.mrb[3].mxu0  ;;  %v1200_v38 = vpop.f32.mrb[3].mxu1 }
 0x1a9   : > { %v2254_v29 = vmul.f32 0.70710677, %v2243_v23  ;;  %v2260_v33 = vmul.f32 0.70710677, %v2245_v24 }
 0x1aa   : > { %v1218_v30 = vand.u32 2147483647, %v2248_v27  ;;  %v1220_v31 = vand.u32 2147483647, %v2251_v28  ;;  %vm1210_vm0 = vcmp.lt.f32.partialorder %v2248_v27, 0.0  ;;  %vm1212_vm1 = vcmp.lt.f32.partialorder %v2251_v28, 0.0 }
 0x1ab   : > { %v1219_v32 = vand.u32 2147483647, %v2254_v29  ;;  %v1221_v41 = vand.u32 2147483647, %v2260_v33  ;;  %vm1211_vm2 = vcmp.lt.f32.partialorder %v2254_v29, 0.0  ;;  %vm1213_vm3 = vcmp.lt.f32.partialorder %v2260_v33, 0.0 }
 0x1ac   : > { %v1222_v35 = vmul.f32 0.3275911, %v1218_v30  ;;  %v1224_v36 = vmul.f32 0.3275911, %v1220_v31  ;;  %v1270_v45 = vsub.f32 0.0, %v1218_v30  ;;  %v1272_v46 = vsub.f32 0.0, %v1220_v31 }
 0x1ad   : > { %v1223_v37 = vmul.f32 0.3275911, %v1219_v32  ;;  %v1225_v43 = vmul.f32 0.3275911, %v1221_v41  ;;  %v1271_v49 = vsub.f32 0.0, %v1219_v32  ;;  %v1273_v54 = vsub.f32 0.0, %v1221_v41 }
 0x1ae   : > { %v1226_v39 = vadd.f32 1.0, %v1222_v35  ;;  %v1228_v40 = vadd.f32 1.0, %v1224_v36  ;;  %v1274_v48 = vmul.f32 %v1270_v45, %v1218_v30  ;;  %v1276_v52 = vmul.f32 %v1272_v46, %v1220_v31 }
 0x1af   : > { %v1227_v42 = vadd.f32 1.0, %v1223_v37  ;;  %v1229_v44 = vadd.f32 1.0, %v1225_v43  ;;  %v1275_v59 = vmul.f32 %v1271_v49, %v1219_v32  ;;  %v1277_v1 = vmul.f32 %v1273_v54, %v1221_v41 }
 0x1b0   : > { %1825 = vrcp.f32 %v1226_v39  ;;  %v1278_v57 = vmul.f32 1.442695, %v1274_v48  ;;  %v1282_v61 = vmul.f32 1.442695, %v1276_v52  ;;  %v1946_v46 = vmov 1.0  }
 0x1b1   : > { %1827 = vrcp.f32 %v1228_v40  ;;  %v1280_v6 = vmul.f32 1.442695, %v1275_v59  ;;  %v1284_v11 = vmul.f32 1.442695, %v1277_v1  ;;  %v1216_v48 = vsel %vm1212_vm1, -1.0, %v1946_v46 }
 0x1b2   : > { %1829 = vrcp.f32 %v1227_v42  ;;  %v1217_v29 = vsel %vm1213_vm3, -1.0, %v1946_v46  ;;  %v1205_v33 = vmul.f32 0.5, %v2245_v24 }
 0x1b3   : > { %1831 = vrcp.f32 %v1229_v44 }
 0x1b4   : > { %1833 = vpow2.f32 %v1278_v57  ;;  %v1202_v57 = vmul.f32 0.5, %v2239_v19 }
 0x1b5   : > { %1835 = vpow2.f32 %v1282_v61  ;;  %v1204_v61 = vmul.f32 0.5, %v2241_v20 }
 0x1b6   : > { %1837 = vpow2.f32 %v1280_v6 }
 0x1b7   : > { %1839 = vpow2.f32 %v1284_v11 }
 0x1ba   : > { %v1826_v47 = vpop.eup %1825 }
 0x1bb   : > { %v1828_v50 = vpop.eup %1827  ;;  %v1234_v51 = vmul.f32 1.0614054, %v1826_v47 }
 0x1bc   : > { %v1236_v53 = vmul.f32 1.0614054, %v1828_v50  ;;  %v1830_v56 = vpop.eup %1829 }
 0x1bd   : > { %v1238_v55 = vadd.f32 -1.4531521, %v1234_v51  ;;  %v1235_v62 = vmul.f32 1.0614054, %v1830_v56  ;;  %v1832_v63 = vpop.eup %1831 }
 0x1be   : > { %v1240_v58 = vadd.f32 -1.4531521, %v1236_v53  ;;  %v1237_v4 = vmul.f32 1.0614054, %v1832_v63  ;;  %v1834_v35 = vpop.eup %1833 }
 0x1bf   : > { %v1242_v60 = vmul.f32 %v1826_v47, %v1238_v55  ;;  %v1239_v3 = vadd.f32 -1.4531521, %v1235_v62  ;;  %v1836_v37 = vpop.eup %1835 }
 0x1c0   : > { %v1244_v0 = vmul.f32 %v1828_v50, %v1240_v58  ;;  %v1241_v9 = vadd.f32 -1.4531521, %v1237_v4  ;;  %v1838_v45 = vpop.eup %1837 }
 0x1c1   : > { %v1246_v2 = vadd.f32 1.4214138, %v1242_v60  ;;  %v1243_v8 = vmul.f32 %v1830_v56, %v1239_v3  ;;  %v1840_v52 = vpop.eup %1839 }
 0x1c2   : > { %v1248_v5 = vadd.f32 1.4214138, %v1244_v0  ;;  %v1245_v14 = vmul.f32 %v1832_v63, %v1241_v9 }
 0x1c3   : > { %v1250_v7 = vmul.f32 %v1826_v47, %v1246_v2  ;;  %v1247_v13 = vadd.f32 1.4214138, %v1243_v8 }
 0x1c4   : > { %v1252_v10 = vmul.f32 %v1828_v50, %v1248_v5  ;;  %v1249_v18 = vadd.f32 1.4214138, %v1245_v14 }
 0x1c5   : > { %v1254_v12 = vadd.f32 -0.28449672, %v1250_v7  ;;  %v1251_v17 = vmul.f32 %v1830_v56, %v1247_v13 }
 0x1c6   : > { %v1256_v15 = vadd.f32 -0.28449672, %v1252_v10  ;;  %v1253_v26 = vmul.f32 %v1832_v63, %v1249_v18 }
 0x1c7   : > { %v1258_v16 = vmul.f32 %v1826_v47, %v1254_v12  ;;  %v1255_v25 = vadd.f32 -0.28449672, %v1251_v17 }
 0x1c8   : > { %v1260_v21 = vmul.f32 %v1828_v50, %v1256_v15  ;;  %v1257_v34 = vadd.f32 -0.28449672, %v1253_v26 }
 0x1c9   : > { %v1262_v22 = vadd.f32 0.2548296, %v1258_v16  ;;  %v1259_v32 = vmul.f32 %v1830_v56, %v1255_v25 }
 0x1ca   : > { %v1264_v30 = vadd.f32 0.2548296, %v1260_v21  ;;  %v1261_v40 = vmul.f32 %v1832_v63, %v1257_v34 }
 0x1cb   : > { %v1266_v31 = vmul.f32 %v1826_v47, %v1262_v22  ;;  %v1263_v39 = vadd.f32 0.2548296, %v1259_v32  ;;  %v1214_v47 = vsel %vm1210_vm0, -1.0, %v1946_v46 }
 0x1cc   : > { %v1268_v36 = vmul.f32 %v1828_v50, %v1264_v30  ;;  %v1265_v44 = vadd.f32 0.2548296, %v1261_v40 }
 0x1cd   : > { %v1286_v38 = vmul.f32 %v1834_v35, %v1266_v31  ;;  %v1267_v43 = vmul.f32 %v1830_v56, %v1263_v39  ;;  %v1215_v56 = vsel %vm1211_vm2, -1.0, %v1946_v46 }
 0x1ce   : > { %v1288_v41 = vmul.f32 %v1836_v37, %v1268_v36  ;;  %v1269_v51 = vmul.f32 %v1832_v63, %v1265_v44  ;;  %v1203_v63 = vmul.f32 0.5, %v2243_v23 }
 0x1cf   : > { %v1290_v42 = vsub.f32 1.0, %v1286_v38  ;;  %v1287_v50 = vmul.f32 %v1838_v45, %v1267_v43 }
 0x1d0   : > { %v1292_v49 = vsub.f32 1.0, %v1288_v41  ;;  %v1289_v55 = vmul.f32 %v1840_v52, %v1269_v51 }
 0x1d1   : > { %v1294_v27 = vmul.f32 %v1290_v42, %v1214_v47  ;;  %v1291_v54 = vsub.f32 1.0, %v1287_v50 }
 0x1d2   : > { %v1296_v53 = vmul.f32 %v1292_v49, %v1216_v48  ;;  %v1293_v60 = vsub.f32 1.0, %v1289_v55 }
 0x1d3   : > { %v1298_v28 = vadd.f32 1.0, %v1294_v27  ;;  %v1295_v59 = vmul.f32 %v1291_v54, %v1215_v56 }
 0x1d4   : > { %v1300_v58 = vadd.f32 1.0, %v1296_v53  ;;  %v1297_v1 = vmul.f32 %v1293_v60, %v1217_v29 }
 0x1d5   : > { %v1302_v62 = vmul.f32 %v1298_v28, %v1202_v57  ;;  %v1299_v0 = vadd.f32 1.0, %v1295_v59 }
 0x1d6   : > { %v1304_v2 = vmul.f32 %v1300_v58, %v1204_v61  ;;  %v1301_v4 = vadd.f32 1.0, %v1297_v1 }
 0x1d7   : > { %v1303_v3 = vmul.f32 %v1299_v0, %v1203_v63 }
 0x1d8   : > { %v1305_v5 = vmul.f32 %v1301_v4, %v1205_v33 }
 0x1d9   : > { %v1567_v19 = vpack.c.bf16 %v1303_v3, %v1302_v62 }
 0x1da   : > { %v1568_v20 = vpack.c.bf16 %v1305_v5, %v1304_v2 }
 0x1db   : > { %1322 = vst [vmem:[%s230_s11] sm:$0xff] %v1567_v19 }
 0x1dc   : > { %1323 = vst [vmem:[%s230_s11 + $0x8] sm:$0xff] %v1568_v20 }
 0x1dd PF: > { %p16_p8 = scmp.ge.s32.totalorder %s1987_s17, 6   ;;  %s2300_s12 = smov %s1931_s13 }
 0x1de   : > { %s2301_s13 = smov %s1935_s14  ;;  %s2302_s14 = smov %s1997_s20 }
 0x1df   : > { %s2303_s15 = smov %s1987_s17  ;;  %18 = sbr.rel (!%p16_p8) target bundleno = 5 (0x5), region = 85 }
 0x1e6   :  { %1346 = vsyncpa [#allocation3], 1 }
 0x1e7   :  { %1348 = vsyncpa [#allocation3 + $0x1], 1 }
 0x1e8   :  { %1349 = vsyncpa [#allocation5], 1 }
 0x1e9   :  { %1351 = vsyncpa [#allocation5 + $0x1], 1 }

// kernel: fmri2image.7
= control target key start
LH: loop header
LB: loop body
LE: loop exit
PB: predicated region body
PF: predicated region fallthrough
CT: control target
= control target key end

     0   :  { %s3482_s12 = smov 0   ;;  %s3484_s13 = smov 0   ;;  %s4347_s0 = inlined_call_operand.vmem [shape: bf16[8,1024], index: 0, kind: input, shape index: {}]   ;;  %s4348_s1 = inlined_call_operand.vmem [shape: bf16[1024,1024], index: 1, kind: input, shape index: {}]   ;;  %s4349_s2 = inlined_call_operand.vmem [shape: f32[1,1024], index: 2, kind: input, shape index: {}]   ;;  %s4350_s3 = inlined_call_operand.vmem [shape: f32[8,1024], index: 3, kind: output, shape index: {}]  }
   0x1   :  { %s3486_s14 = smov 0  }
   0x2 LB: > { %s2715_s15 = sadd.s32 4294967295, %s3460_s14   ;;  %s3499_s16 = sadd.s32 1, %s3460_s14   ;;  %s3460_s14 = sphi %s3486_s14, %s4353_s14   ;;  %s3456_s13 = sphi %s3484_s13, %s4352_s13   ;;  %s3452_s12 = sphi %s3482_s12, %s4351_s12  }
   0x3   : > { %s38_s17 = ssub.s32 %s3460_s14, %s3499_s16  ;;  %s41_s18 = sadd.s32 1, %s3456_s13 }
   0x4   : > { %p39_p0 = scmp.eq.s32.totalorder %s38_s17, 0  ;;  %p48_p1 = scmp.ne.s32.totalorder %s3456_s13, %s3452_s12 }
   0x5   : > { %p49_p2 = scmp.eq.s32.totalorder %s3460_s14, 0  ;;  %p2718_p4 = scmp.ge.s32.totalorder %s3460_s14, 2 }
   0x6   : > { %s3508_s19 = scalar_select %p39_p0, %s3456_s13, %s41_s18  }
   0x7   : > { %p50_p3 = por %p49_p2, %p48_p1  ;;  %129 = sbr.rel (%p2718_p4) target bundleno = 146 (0x92), region = 20 }
   0xe   : > { %132 = sbr.rel (!%p50_p3) target bundleno = 146 (0x92), region = 24  ;;  %s134_s20 = sand.u32 (%p50_p3), 1, %s3456_s13  }
   0xf   : > { %s2993_s21 = sshll.u32 (%p50_p3), %s3460_s14, 4  ;;  %s2719_s22 = sshll.u32 (%p50_p3), %s134_s20, 11 }
  0x10   : > { %s3516_s25 = scalar_lea.vmem (%p50_p3), %s4348_s1, %s2993_s21  ;;  %s3521_s26 = scalar_lea.vmem (%p50_p3), [#allocation2], %s2719_s22 }
  0x11   : > { %v152_v0 = vld [vmem:[%s3516_s25] sm:$0xff] (%p50_p3)  ;;  %v154_v1 = vld [vmem:[%s3516_s25 + $0x8] sm:$0xff] (%p50_p3) }
  0x12   : > { %v156_v2 = vld [vmem:[%s3516_s25 + $0x20] sm:$0xff] (%p50_p3)  ;;  %153 = vst [vmem:[%s3521_s26] sm:$0xff] (%p50_p3), %v152_v0  ;;  %155 = vst [vmem:[%s3521_s26 + $0x8] sm:$0xff] (%p50_p3), %v154_v1  ;;  %v158_v3 = vld [vmem:[%s3516_s25 + $0x28] sm:$0xff] (%p50_p3) }
  0x13   : > { %157 = vst [vmem:[%s3521_s26 + $0x10] sm:$0xff] (%p50_p3), %v156_v2  ;;  %v160_v4 = vld [vmem:[%s3516_s25 + $0x40] sm:$0xff] (%p50_p3)  ;;  %v162_v5 = vld [vmem:[%s3516_s25 + $0x48] sm:$0xff] (%p50_p3)  ;;  %159 = vst [vmem:[%s3521_s26 + $0x18] sm:$0xff] (%p50_p3), %v158_v3 }
  0x14   : > { %161 = vst [vmem:[%s3521_s26 + $0x20] sm:$0xff] (%p50_p3), %v160_v4  ;;  %163 = vst [vmem:[%s3521_s26 + $0x28] sm:$0xff] (%p50_p3), %v162_v5  ;;  %v164_v6 = vld [vmem:[%s3516_s25 + $0x60] sm:$0xff] (%p50_p3)  ;;  %v166_v7 = vld [vmem:[%s3516_s25 + $0x68] sm:$0xff] (%p50_p3) }
  0x15   : > { %v168_v8 = vld [vmem:[%s3516_s25 + $0x80] sm:$0xff]  ;;  %165 = vst [vmem:[%s3521_s26 + $0x30] sm:$0xff] %v164_v6  ;;  %167 = vst [vmem:[%s3521_s26 + $0x38] sm:$0xff] %v166_v7  ;;  %v170_v9 = vld [vmem:[%s3516_s25 + $0x88] sm:$0xff] }
  0x16   : > { %169 = vst [vmem:[%s3521_s26 + $0x40] sm:$0xff] %v168_v8  ;;  %v172_v10 = vld [vmem:[%s3516_s25 + $0xa0] sm:$0xff]  ;;  %v174_v11 = vld [vmem:[%s3516_s25 + $0xa8] sm:$0xff]  ;;  %171 = vst [vmem:[%s3521_s26 + $0x48] sm:$0xff] %v170_v9 }
  0x17   : > { %173 = vst [vmem:[%s3521_s26 + $0x50] sm:$0xff] %v172_v10  ;;  %175 = vst [vmem:[%s3521_s26 + $0x58] sm:$0xff] %v174_v11  ;;  %v176_v12 = vld [vmem:[%s3516_s25 + $0xc0] sm:$0xff]  ;;  %v178_v13 = vld [vmem:[%s3516_s25 + $0xc8] sm:$0xff] }
  0x18   : > { %v180_v14 = vld [vmem:[%s3516_s25 + $0xe0] sm:$0xff]  ;;  %177 = vst [vmem:[%s3521_s26 + $0x60] sm:$0xff] %v176_v12  ;;  %179 = vst [vmem:[%s3521_s26 + $0x68] sm:$0xff] %v178_v13  ;;  %v182_v15 = vld [vmem:[%s3516_s25 + $0xe8] sm:$0xff] }
  0x19   : > { %181 = vst [vmem:[%s3521_s26 + $0x70] sm:$0xff] %v180_v14  ;;  %v184_v16 = vld [vmem:[%s3516_s25 + $0x100] sm:$0xff]  ;;  %v186_v17 = vld [vmem:[%s3516_s25 + $0x108] sm:$0xff]  ;;  %183 = vst [vmem:[%s3521_s26 + $0x78] sm:$0xff] %v182_v15 }
  0x1a   : > { %185 = vst [vmem:[%s3521_s26 + $0x80] sm:$0xff] %v184_v16  ;;  %187 = vst [vmem:[%s3521_s26 + $0x88] sm:$0xff] %v186_v17  ;;  %v188_v18 = vld [vmem:[%s3516_s25 + $0x120] sm:$0xff]  ;;  %v190_v19 = vld [vmem:[%s3516_s25 + $0x128] sm:$0xff] }
  0x1b   : > { %v192_v20 = vld [vmem:[%s3516_s25 + $0x140] sm:$0xff]  ;;  %189 = vst [vmem:[%s3521_s26 + $0x90] sm:$0xff] %v188_v18  ;;  %191 = vst [vmem:[%s3521_s26 + $0x98] sm:$0xff] %v190_v19  ;;  %v194_v21 = vld [vmem:[%s3516_s25 + $0x148] sm:$0xff] }
  0x1c   : > { %193 = vst [vmem:[%s3521_s26 + $0xa0] sm:$0xff] %v192_v20  ;;  %v196_v22 = vld [vmem:[%s3516_s25 + $0x160] sm:$0xff]  ;;  %v198_v23 = vld [vmem:[%s3516_s25 + $0x168] sm:$0xff]  ;;  %195 = vst [vmem:[%s3521_s26 + $0xa8] sm:$0xff] %v194_v21 }
  0x1d   : > { %197 = vst [vmem:[%s3521_s26 + $0xb0] sm:$0xff] %v196_v22  ;;  %199 = vst [vmem:[%s3521_s26 + $0xb8] sm:$0xff] %v198_v23  ;;  %v200_v24 = vld [vmem:[%s3516_s25 + $0x180] sm:$0xff]  ;;  %v202_v25 = vld [vmem:[%s3516_s25 + $0x188] sm:$0xff] }
  0x1e   : > { %v204_v26 = vld [vmem:[%s3516_s25 + $0x1a0] sm:$0xff]  ;;  %201 = vst [vmem:[%s3521_s26 + $0xc0] sm:$0xff] %v200_v24  ;;  %203 = vst [vmem:[%s3521_s26 + $0xc8] sm:$0xff] %v202_v25  ;;  %v206_v27 = vld [vmem:[%s3516_s25 + $0x1a8] sm:$0xff] }
  0x1f   : > { %205 = vst [vmem:[%s3521_s26 + $0xd0] sm:$0xff] %v204_v26  ;;  %v208_v28 = vld [vmem:[%s3516_s25 + $0x1c0] sm:$0xff]  ;;  %v210_v29 = vld [vmem:[%s3516_s25 + $0x1c8] sm:$0xff]  ;;  %207 = vst [vmem:[%s3521_s26 + $0xd8] sm:$0xff] %v206_v27 }
  0x20   : > { %209 = vst [vmem:[%s3521_s26 + $0xe0] sm:$0xff] %v208_v28  ;;  %211 = vst [vmem:[%s3521_s26 + $0xe8] sm:$0xff] %v210_v29  ;;  %v212_v30 = vld [vmem:[%s3516_s25 + $0x1e0] sm:$0xff]  ;;  %v214_v31 = vld [vmem:[%s3516_s25 + $0x1e8] sm:$0xff] }
  0x21   : > { %v216_v32 = vld [vmem:[%s3516_s25 + $0x200] sm:$0xff]  ;;  %213 = vst [vmem:[%s3521_s26 + $0xf0] sm:$0xff] %v212_v30  ;;  %215 = vst [vmem:[%s3521_s26 + $0xf8] sm:$0xff] %v214_v31  ;;  %v218_v33 = vld [vmem:[%s3516_s25 + $0x208] sm:$0xff] }
  0x22   : > { %217 = vst [vmem:[%s3521_s26 + $0x100] sm:$0xff] %v216_v32  ;;  %v220_v34 = vld [vmem:[%s3516_s25 + $0x220] sm:$0xff]  ;;  %v222_v35 = vld [vmem:[%s3516_s25 + $0x228] sm:$0xff]  ;;  %219 = vst [vmem:[%s3521_s26 + $0x108] sm:$0xff] %v218_v33 }
  0x23   : > { %221 = vst [vmem:[%s3521_s26 + $0x110] sm:$0xff] %v220_v34  ;;  %223 = vst [vmem:[%s3521_s26 + $0x118] sm:$0xff] %v222_v35  ;;  %v224_v36 = vld [vmem:[%s3516_s25 + $0x240] sm:$0xff]  ;;  %v226_v37 = vld [vmem:[%s3516_s25 + $0x248] sm:$0xff] }
  0x24   : > { %v228_v38 = vld [vmem:[%s3516_s25 + $0x260] sm:$0xff]  ;;  %225 = vst [vmem:[%s3521_s26 + $0x120] sm:$0xff] %v224_v36  ;;  %227 = vst [vmem:[%s3521_s26 + $0x128] sm:$0xff] %v226_v37  ;;  %v230_v39 = vld [vmem:[%s3516_s25 + $0x268] sm:$0xff] }
  0x25   : > { %229 = vst [vmem:[%s3521_s26 + $0x130] sm:$0xff] %v228_v38  ;;  %v232_v40 = vld [vmem:[%s3516_s25 + $0x280] sm:$0xff]  ;;  %v234_v41 = vld [vmem:[%s3516_s25 + $0x288] sm:$0xff]  ;;  %231 = vst [vmem:[%s3521_s26 + $0x138] sm:$0xff] %v230_v39 }
  0x26   : > { %233 = vst [vmem:[%s3521_s26 + $0x140] sm:$0xff] %v232_v40  ;;  %235 = vst [vmem:[%s3521_s26 + $0x148] sm:$0xff] %v234_v41  ;;  %v236_v42 = vld [vmem:[%s3516_s25 + $0x2a0] sm:$0xff]  ;;  %v238_v43 = vld [vmem:[%s3516_s25 + $0x2a8] sm:$0xff] }
  0x27   : > { %v240_v44 = vld [vmem:[%s3516_s25 + $0x2c0] sm:$0xff]  ;;  %237 = vst [vmem:[%s3521_s26 + $0x150] sm:$0xff] %v236_v42  ;;  %239 = vst [vmem:[%s3521_s26 + $0x158] sm:$0xff] %v238_v43  ;;  %v242_v45 = vld [vmem:[%s3516_s25 + $0x2c8] sm:$0xff] }
  0x28   : > { %241 = vst [vmem:[%s3521_s26 + $0x160] sm:$0xff] %v240_v44  ;;  %v244_v46 = vld [vmem:[%s3516_s25 + $0x2e0] sm:$0xff]  ;;  %v246_v47 = vld [vmem:[%s3516_s25 + $0x2e8] sm:$0xff]  ;;  %243 = vst [vmem:[%s3521_s26 + $0x168] sm:$0xff] %v242_v45 }
  0x29   : > { %245 = vst [vmem:[%s3521_s26 + $0x170] sm:$0xff] %v244_v46  ;;  %247 = vst [vmem:[%s3521_s26 + $0x178] sm:$0xff] %v246_v47  ;;  %v248_v48 = vld [vmem:[%s3516_s25 + $0x300] sm:$0xff]  ;;  %v250_v49 = vld [vmem:[%s3516_s25 + $0x308] sm:$0xff] }
  0x2a   : > { %v252_v50 = vld [vmem:[%s3516_s25 + $0x320] sm:$0xff]  ;;  %249 = vst [vmem:[%s3521_s26 + $0x180] sm:$0xff] %v248_v48  ;;  %251 = vst [vmem:[%s3521_s26 + $0x188] sm:$0xff] %v250_v49  ;;  %v254_v51 = vld [vmem:[%s3516_s25 + $0x328] sm:$0xff] }
  0x2b   : > { %253 = vst [vmem:[%s3521_s26 + $0x190] sm:$0xff] %v252_v50  ;;  %v256_v52 = vld [vmem:[%s3516_s25 + $0x340] sm:$0xff]  ;;  %v258_v53 = vld [vmem:[%s3516_s25 + $0x348] sm:$0xff]  ;;  %255 = vst [vmem:[%s3521_s26 + $0x198] sm:$0xff] %v254_v51 }
  0x2c   : > { %257 = vst [vmem:[%s3521_s26 + $0x1a0] sm:$0xff] %v256_v52  ;;  %259 = vst [vmem:[%s3521_s26 + $0x1a8] sm:$0xff] %v258_v53  ;;  %v260_v54 = vld [vmem:[%s3516_s25 + $0x360] sm:$0xff]  ;;  %v262_v55 = vld [vmem:[%s3516_s25 + $0x368] sm:$0xff] }
  0x2d   : > { %v264_v56 = vld [vmem:[%s3516_s25 + $0x380] sm:$0xff]  ;;  %261 = vst [vmem:[%s3521_s26 + $0x1b0] sm:$0xff] %v260_v54  ;;  %263 = vst [vmem:[%s3521_s26 + $0x1b8] sm:$0xff] %v262_v55  ;;  %v266_v57 = vld [vmem:[%s3516_s25 + $0x388] sm:$0xff] }
  0x2e   : > { %265 = vst [vmem:[%s3521_s26 + $0x1c0] sm:$0xff] %v264_v56  ;;  %v268_v58 = vld [vmem:[%s3516_s25 + $0x3a0] sm:$0xff]  ;;  %v270_v59 = vld [vmem:[%s3516_s25 + $0x3a8] sm:$0xff]  ;;  %267 = vst [vmem:[%s3521_s26 + $0x1c8] sm:$0xff] %v266_v57 }
  0x2f   : > { %269 = vst [vmem:[%s3521_s26 + $0x1d0] sm:$0xff] %v268_v58  ;;  %271 = vst [vmem:[%s3521_s26 + $0x1d8] sm:$0xff] %v270_v59  ;;  %v272_v60 = vld [vmem:[%s3516_s25 + $0x3c0] sm:$0xff]  ;;  %v274_v61 = vld [vmem:[%s3516_s25 + $0x3c8] sm:$0xff] }
  0x30   : > { %v276_v62 = vld [vmem:[%s3516_s25 + $0x3e0] sm:$0xff]  ;;  %273 = vst [vmem:[%s3521_s26 + $0x1e0] sm:$0xff] %v272_v60  ;;  %275 = vst [vmem:[%s3521_s26 + $0x1e8] sm:$0xff] %v274_v61  ;;  %v278_v63 = vld [vmem:[%s3516_s25 + $0x3e8] sm:$0xff] }
  0x31   : > { %277 = vst [vmem:[%s3521_s26 + $0x1f0] sm:$0xff] %v276_v62  ;;  %v280_v0 = vld [vmem:[%s3516_s25 + $0x400] sm:$0xff]  ;;  %v282_v1 = vld [vmem:[%s3516_s25 + $0x408] sm:$0xff]  ;;  %279 = vst [vmem:[%s3521_s26 + $0x1f8] sm:$0xff] %v278_v63 }
  0x32   : > { %281 = vst [vmem:[%s3521_s26 + $0x200] sm:$0xff] %v280_v0  ;;  %283 = vst [vmem:[%s3521_s26 + $0x208] sm:$0xff] %v282_v1  ;;  %v284_v2 = vld [vmem:[%s3516_s25 + $0x420] sm:$0xff]  ;;  %v286_v3 = vld [vmem:[%s3516_s25 + $0x428] sm:$0xff] }
  0x33   : > { %v288_v4 = vld [vmem:[%s3516_s25 + $0x440] sm:$0xff]  ;;  %285 = vst [vmem:[%s3521_s26 + $0x210] sm:$0xff] %v284_v2  ;;  %287 = vst [vmem:[%s3521_s26 + $0x218] sm:$0xff] %v286_v3  ;;  %v290_v5 = vld [vmem:[%s3516_s25 + $0x448] sm:$0xff] }
  0x34   : > { %289 = vst [vmem:[%s3521_s26 + $0x220] sm:$0xff] %v288_v4  ;;  %v292_v6 = vld [vmem:[%s3516_s25 + $0x460] sm:$0xff]  ;;  %v294_v7 = vld [vmem:[%s3516_s25 + $0x468] sm:$0xff]  ;;  %291 = vst [vmem:[%s3521_s26 + $0x228] sm:$0xff] %v290_v5 }
  0x35   : > { %293 = vst [vmem:[%s3521_s26 + $0x230] sm:$0xff] %v292_v6  ;;  %295 = vst [vmem:[%s3521_s26 + $0x238] sm:$0xff] %v294_v7  ;;  %v296_v8 = vld [vmem:[%s3516_s25 + $0x480] sm:$0xff]  ;;  %v298_v9 = vld [vmem:[%s3516_s25 + $0x488] sm:$0xff] }
  0x36   : > { %v300_v10 = vld [vmem:[%s3516_s25 + $0x4a0] sm:$0xff]  ;;  %297 = vst [vmem:[%s3521_s26 + $0x240] sm:$0xff] %v296_v8  ;;  %299 = vst [vmem:[%s3521_s26 + $0x248] sm:$0xff] %v298_v9  ;;  %v302_v11 = vld [vmem:[%s3516_s25 + $0x4a8] sm:$0xff] }
  0x37   : > { %301 = vst [vmem:[%s3521_s26 + $0x250] sm:$0xff] %v300_v10  ;;  %v304_v12 = vld [vmem:[%s3516_s25 + $0x4c0] sm:$0xff]  ;;  %v306_v13 = vld [vmem:[%s3516_s25 + $0x4c8] sm:$0xff]  ;;  %303 = vst [vmem:[%s3521_s26 + $0x258] sm:$0xff] %v302_v11 }
  0x38   : > { %305 = vst [vmem:[%s3521_s26 + $0x260] sm:$0xff] %v304_v12  ;;  %307 = vst [vmem:[%s3521_s26 + $0x268] sm:$0xff] %v306_v13  ;;  %v308_v14 = vld [vmem:[%s3516_s25 + $0x4e0] sm:$0xff]  ;;  %v310_v15 = vld [vmem:[%s3516_s25 + $0x4e8] sm:$0xff] }
  0x39   : > { %v312_v16 = vld [vmem:[%s3516_s25 + $0x500] sm:$0xff]  ;;  %309 = vst [vmem:[%s3521_s26 + $0x270] sm:$0xff] %v308_v14  ;;  %311 = vst [vmem:[%s3521_s26 + $0x278] sm:$0xff] %v310_v15  ;;  %v314_v17 = vld [vmem:[%s3516_s25 + $0x508] sm:$0xff] }
  0x3a   : > { %313 = vst [vmem:[%s3521_s26 + $0x280] sm:$0xff] %v312_v16  ;;  %v316_v18 = vld [vmem:[%s3516_s25 + $0x520] sm:$0xff]  ;;  %v318_v19 = vld [vmem:[%s3516_s25 + $0x528] sm:$0xff]  ;;  %315 = vst [vmem:[%s3521_s26 + $0x288] sm:$0xff] %v314_v17 }
  0x3b   : > { %317 = vst [vmem:[%s3521_s26 + $0x290] sm:$0xff] %v316_v18  ;;  %319 = vst [vmem:[%s3521_s26 + $0x298] sm:$0xff] %v318_v19  ;;  %v320_v20 = vld [vmem:[%s3516_s25 + $0x540] sm:$0xff]  ;;  %v322_v21 = vld [vmem:[%s3516_s25 + $0x548] sm:$0xff] }
  0x3c   : > { %v324_v22 = vld [vmem:[%s3516_s25 + $0x560] sm:$0xff]  ;;  %321 = vst [vmem:[%s3521_s26 + $0x2a0] sm:$0xff] %v320_v20  ;;  %323 = vst [vmem:[%s3521_s26 + $0x2a8] sm:$0xff] %v322_v21  ;;  %v326_v23 = vld [vmem:[%s3516_s25 + $0x568] sm:$0xff] }
  0x3d   : > { %325 = vst [vmem:[%s3521_s26 + $0x2b0] sm:$0xff] %v324_v22  ;;  %v328_v24 = vld [vmem:[%s3516_s25 + $0x580] sm:$0xff]  ;;  %v330_v25 = vld [vmem:[%s3516_s25 + $0x588] sm:$0xff]  ;;  %327 = vst [vmem:[%s3521_s26 + $0x2b8] sm:$0xff] %v326_v23 }
  0x3e   : > { %329 = vst [vmem:[%s3521_s26 + $0x2c0] sm:$0xff] %v328_v24  ;;  %331 = vst [vmem:[%s3521_s26 + $0x2c8] sm:$0xff] %v330_v25  ;;  %v332_v26 = vld [vmem:[%s3516_s25 + $0x5a0] sm:$0xff]  ;;  %v334_v27 = vld [vmem:[%s3516_s25 + $0x5a8] sm:$0xff] }
  0x3f   : > { %v336_v28 = vld [vmem:[%s3516_s25 + $0x5c0] sm:$0xff]  ;;  %333 = vst [vmem:[%s3521_s26 + $0x2d0] sm:$0xff] %v332_v26  ;;  %335 = vst [vmem:[%s3521_s26 + $0x2d8] sm:$0xff] %v334_v27  ;;  %v338_v29 = vld [vmem:[%s3516_s25 + $0x5c8] sm:$0xff] }
  0x40   : > { %337 = vst [vmem:[%s3521_s26 + $0x2e0] sm:$0xff] %v336_v28  ;;  %v340_v30 = vld [vmem:[%s3516_s25 + $0x5e0] sm:$0xff]  ;;  %v342_v31 = vld [vmem:[%s3516_s25 + $0x5e8] sm:$0xff]  ;;  %339 = vst [vmem:[%s3521_s26 + $0x2e8] sm:$0xff] %v338_v29 }
  0x41   : > { %341 = vst [vmem:[%s3521_s26 + $0x2f0] sm:$0xff] %v340_v30  ;;  %343 = vst [vmem:[%s3521_s26 + $0x2f8] sm:$0xff] %v342_v31  ;;  %v344_v32 = vld [vmem:[%s3516_s25 + $0x600] sm:$0xff]  ;;  %v346_v33 = vld [vmem:[%s3516_s25 + $0x608] sm:$0xff] }
  0x42   : > { %v348_v34 = vld [vmem:[%s3516_s25 + $0x620] sm:$0xff]  ;;  %345 = vst [vmem:[%s3521_s26 + $0x300] sm:$0xff] %v344_v32  ;;  %347 = vst [vmem:[%s3521_s26 + $0x308] sm:$0xff] %v346_v33  ;;  %v350_v35 = vld [vmem:[%s3516_s25 + $0x628] sm:$0xff] }
  0x43   : > { %349 = vst [vmem:[%s3521_s26 + $0x310] sm:$0xff] %v348_v34  ;;  %v352_v36 = vld [vmem:[%s3516_s25 + $0x640] sm:$0xff]  ;;  %v354_v37 = vld [vmem:[%s3516_s25 + $0x648] sm:$0xff]  ;;  %351 = vst [vmem:[%s3521_s26 + $0x318] sm:$0xff] %v350_v35 }
  0x44   : > { %353 = vst [vmem:[%s3521_s26 + $0x320] sm:$0xff] %v352_v36  ;;  %355 = vst [vmem:[%s3521_s26 + $0x328] sm:$0xff] %v354_v37  ;;  %v356_v38 = vld [vmem:[%s3516_s25 + $0x660] sm:$0xff]  ;;  %v358_v39 = vld [vmem:[%s3516_s25 + $0x668] sm:$0xff] }
  0x45   : > { %v360_v40 = vld [vmem:[%s3516_s25 + $0x680] sm:$0xff]  ;;  %357 = vst [vmem:[%s3521_s26 + $0x330] sm:$0xff] %v356_v38  ;;  %359 = vst [vmem:[%s3521_s26 + $0x338] sm:$0xff] %v358_v39  ;;  %v362_v41 = vld [vmem:[%s3516_s25 + $0x688] sm:$0xff] }
  0x46   : > { %361 = vst [vmem:[%s3521_s26 + $0x340] sm:$0xff] %v360_v40  ;;  %v364_v42 = vld [vmem:[%s3516_s25 + $0x6a0] sm:$0xff]  ;;  %v366_v43 = vld [vmem:[%s3516_s25 + $0x6a8] sm:$0xff]  ;;  %363 = vst [vmem:[%s3521_s26 + $0x348] sm:$0xff] %v362_v41 }
  0x47   : > { %365 = vst [vmem:[%s3521_s26 + $0x350] sm:$0xff] %v364_v42  ;;  %367 = vst [vmem:[%s3521_s26 + $0x358] sm:$0xff] %v366_v43  ;;  %v368_v44 = vld [vmem:[%s3516_s25 + $0x6c0] sm:$0xff]  ;;  %v370_v45 = vld [vmem:[%s3516_s25 + $0x6c8] sm:$0xff] }
  0x48   : > { %v372_v46 = vld [vmem:[%s3516_s25 + $0x6e0] sm:$0xff]  ;;  %369 = vst [vmem:[%s3521_s26 + $0x360] sm:$0xff] %v368_v44  ;;  %371 = vst [vmem:[%s3521_s26 + $0x368] sm:$0xff] %v370_v45  ;;  %v374_v47 = vld [vmem:[%s3516_s25 + $0x6e8] sm:$0xff] }
  0x49   : > { %373 = vst [vmem:[%s3521_s26 + $0x370] sm:$0xff] %v372_v46  ;;  %v376_v48 = vld [vmem:[%s3516_s25 + $0x700] sm:$0xff]  ;;  %v378_v49 = vld [vmem:[%s3516_s25 + $0x708] sm:$0xff]  ;;  %375 = vst [vmem:[%s3521_s26 + $0x378] sm:$0xff] %v374_v47 }
  0x4a   : > { %377 = vst [vmem:[%s3521_s26 + $0x380] sm:$0xff] %v376_v48  ;;  %379 = vst [vmem:[%s3521_s26 + $0x388] sm:$0xff] %v378_v49  ;;  %v380_v50 = vld [vmem:[%s3516_s25 + $0x720] sm:$0xff]  ;;  %v382_v51 = vld [vmem:[%s3516_s25 + $0x728] sm:$0xff] }
  0x4b   : > { %v384_v52 = vld [vmem:[%s3516_s25 + $0x740] sm:$0xff]  ;;  %381 = vst [vmem:[%s3521_s26 + $0x390] sm:$0xff] %v380_v50  ;;  %383 = vst [vmem:[%s3521_s26 + $0x398] sm:$0xff] %v382_v51  ;;  %v386_v53 = vld [vmem:[%s3516_s25 + $0x748] sm:$0xff] }
  0x4c   : > { %385 = vst [vmem:[%s3521_s26 + $0x3a0] sm:$0xff] %v384_v52  ;;  %v388_v54 = vld [vmem:[%s3516_s25 + $0x760] sm:$0xff]  ;;  %v390_v55 = vld [vmem:[%s3516_s25 + $0x768] sm:$0xff]  ;;  %387 = vst [vmem:[%s3521_s26 + $0x3a8] sm:$0xff] %v386_v53 }
  0x4d   : > { %389 = vst [vmem:[%s3521_s26 + $0x3b0] sm:$0xff] %v388_v54  ;;  %391 = vst [vmem:[%s3521_s26 + $0x3b8] sm:$0xff] %v390_v55  ;;  %v392_v56 = vld [vmem:[%s3516_s25 + $0x780] sm:$0xff]  ;;  %v394_v57 = vld [vmem:[%s3516_s25 + $0x788] sm:$0xff] }
  0x4e   : > { %v396_v58 = vld [vmem:[%s3516_s25 + $0x7a0] sm:$0xff]  ;;  %393 = vst [vmem:[%s3521_s26 + $0x3c0] sm:$0xff] %v392_v56  ;;  %395 = vst [vmem:[%s3521_s26 + $0x3c8] sm:$0xff] %v394_v57  ;;  %v398_v59 = vld [vmem:[%s3516_s25 + $0x7a8] sm:$0xff] }
  0x4f   : > { %397 = vst [vmem:[%s3521_s26 + $0x3d0] sm:$0xff] %v396_v58  ;;  %v400_v60 = vld [vmem:[%s3516_s25 + $0x7c0] sm:$0xff]  ;;  %v402_v61 = vld [vmem:[%s3516_s25 + $0x7c8] sm:$0xff]  ;;  %399 = vst [vmem:[%s3521_s26 + $0x3d8] sm:$0xff] %v398_v59 }
  0x50   : > { %401 = vst [vmem:[%s3521_s26 + $0x3e0] sm:$0xff] %v400_v60  ;;  %403 = vst [vmem:[%s3521_s26 + $0x3e8] sm:$0xff] %v402_v61  ;;  %v404_v62 = vld [vmem:[%s3516_s25 + $0x7e0] sm:$0xff]  ;;  %v406_v63 = vld [vmem:[%s3516_s25 + $0x7e8] sm:$0xff] }
  0x51   : > { %v408_v0 = vld [vmem:[%s3516_s25 + $0x800] sm:$0xff]  ;;  %405 = vst [vmem:[%s3521_s26 + $0x3f0] sm:$0xff] %v404_v62  ;;  %407 = vst [vmem:[%s3521_s26 + $0x3f8] sm:$0xff] %v406_v63  ;;  %v410_v1 = vld [vmem:[%s3516_s25 + $0x808] sm:$0xff] }
  0x52   : > { %409 = vst [vmem:[%s3521_s26 + $0x400] sm:$0xff] %v408_v0  ;;  %v412_v2 = vld [vmem:[%s3516_s25 + $0x820] sm:$0xff]  ;;  %v414_v3 = vld [vmem:[%s3516_s25 + $0x828] sm:$0xff]  ;;  %411 = vst [vmem:[%s3521_s26 + $0x408] sm:$0xff] %v410_v1 }
  0x53   : > { %413 = vst [vmem:[%s3521_s26 + $0x410] sm:$0xff] %v412_v2  ;;  %415 = vst [vmem:[%s3521_s26 + $0x418] sm:$0xff] %v414_v3  ;;  %v416_v4 = vld [vmem:[%s3516_s25 + $0x840] sm:$0xff]  ;;  %v418_v5 = vld [vmem:[%s3516_s25 + $0x848] sm:$0xff] }
  0x54   : > { %v420_v6 = vld [vmem:[%s3516_s25 + $0x860] sm:$0xff]  ;;  %417 = vst [vmem:[%s3521_s26 + $0x420] sm:$0xff] %v416_v4  ;;  %419 = vst [vmem:[%s3521_s26 + $0x428] sm:$0xff] %v418_v5  ;;  %v422_v7 = vld [vmem:[%s3516_s25 + $0x868] sm:$0xff] }
  0x55   : > { %421 = vst [vmem:[%s3521_s26 + $0x430] sm:$0xff] %v420_v6  ;;  %v424_v8 = vld [vmem:[%s3516_s25 + $0x880] sm:$0xff]  ;;  %v426_v9 = vld [vmem:[%s3516_s25 + $0x888] sm:$0xff]  ;;  %423 = vst [vmem:[%s3521_s26 + $0x438] sm:$0xff] %v422_v7 }
  0x56   : > { %425 = vst [vmem:[%s3521_s26 + $0x440] sm:$0xff] %v424_v8  ;;  %427 = vst [vmem:[%s3521_s26 + $0x448] sm:$0xff] %v426_v9  ;;  %v428_v10 = vld [vmem:[%s3516_s25 + $0x8a0] sm:$0xff]  ;;  %v430_v11 = vld [vmem:[%s3516_s25 + $0x8a8] sm:$0xff] }
  0x57   : > { %v432_v12 = vld [vmem:[%s3516_s25 + $0x8c0] sm:$0xff]  ;;  %429 = vst [vmem:[%s3521_s26 + $0x450] sm:$0xff] %v428_v10  ;;  %431 = vst [vmem:[%s3521_s26 + $0x458] sm:$0xff] %v430_v11  ;;  %v434_v13 = vld [vmem:[%s3516_s25 + $0x8c8] sm:$0xff] }
  0x58   : > { %433 = vst [vmem:[%s3521_s26 + $0x460] sm:$0xff] %v432_v12  ;;  %v436_v14 = vld [vmem:[%s3516_s25 + $0x8e0] sm:$0xff]  ;;  %v438_v15 = vld [vmem:[%s3516_s25 + $0x8e8] sm:$0xff]  ;;  %435 = vst [vmem:[%s3521_s26 + $0x468] sm:$0xff] %v434_v13 }
  0x59   : > { %437 = vst [vmem:[%s3521_s26 + $0x470] sm:$0xff] %v436_v14  ;;  %439 = vst [vmem:[%s3521_s26 + $0x478] sm:$0xff] %v438_v15  ;;  %v440_v16 = vld [vmem:[%s3516_s25 + $0x900] sm:$0xff]  ;;  %v442_v17 = vld [vmem:[%s3516_s25 + $0x908] sm:$0xff] }
  0x5a   : > { %v444_v18 = vld [vmem:[%s3516_s25 + $0x920] sm:$0xff]  ;;  %441 = vst [vmem:[%s3521_s26 + $0x480] sm:$0xff] %v440_v16  ;;  %443 = vst [vmem:[%s3521_s26 + $0x488] sm:$0xff] %v442_v17  ;;  %v446_v19 = vld [vmem:[%s3516_s25 + $0x928] sm:$0xff] }
  0x5b   : > { %445 = vst [vmem:[%s3521_s26 + $0x490] sm:$0xff] %v444_v18  ;;  %v448_v20 = vld [vmem:[%s3516_s25 + $0x940] sm:$0xff]  ;;  %v450_v21 = vld [vmem:[%s3516_s25 + $0x948] sm:$0xff]  ;;  %447 = vst [vmem:[%s3521_s26 + $0x498] sm:$0xff] %v446_v19 }
  0x5c   : > { %449 = vst [vmem:[%s3521_s26 + $0x4a0] sm:$0xff] %v448_v20  ;;  %451 = vst [vmem:[%s3521_s26 + $0x4a8] sm:$0xff] %v450_v21  ;;  %v452_v22 = vld [vmem:[%s3516_s25 + $0x960] sm:$0xff]  ;;  %v454_v23 = vld [vmem:[%s3516_s25 + $0x968] sm:$0xff] }
  0x5d   : > { %v456_v24 = vld [vmem:[%s3516_s25 + $0x980] sm:$0xff]  ;;  %453 = vst [vmem:[%s3521_s26 + $0x4b0] sm:$0xff] %v452_v22  ;;  %455 = vst [vmem:[%s3521_s26 + $0x4b8] sm:$0xff] %v454_v23  ;;  %v458_v25 = vld [vmem:[%s3516_s25 + $0x988] sm:$0xff] }
  0x5e   : > { %457 = vst [vmem:[%s3521_s26 + $0x4c0] sm:$0xff] %v456_v24  ;;  %v460_v26 = vld [vmem:[%s3516_s25 + $0x9a0] sm:$0xff]  ;;  %v462_v27 = vld [vmem:[%s3516_s25 + $0x9a8] sm:$0xff]  ;;  %459 = vst [vmem:[%s3521_s26 + $0x4c8] sm:$0xff] %v458_v25 }
  0x5f   : > { %461 = vst [vmem:[%s3521_s26 + $0x4d0] sm:$0xff] %v460_v26  ;;  %463 = vst [vmem:[%s3521_s26 + $0x4d8] sm:$0xff] %v462_v27  ;;  %v464_v28 = vld [vmem:[%s3516_s25 + $0x9c0] sm:$0xff]  ;;  %v466_v29 = vld [vmem:[%s3516_s25 + $0x9c8] sm:$0xff] }
  0x60   : > { %v468_v30 = vld [vmem:[%s3516_s25 + $0x9e0] sm:$0xff]  ;;  %465 = vst [vmem:[%s3521_s26 + $0x4e0] sm:$0xff] %v464_v28  ;;  %467 = vst [vmem:[%s3521_s26 + $0x4e8] sm:$0xff] %v466_v29  ;;  %v470_v31 = vld [vmem:[%s3516_s25 + $0x9e8] sm:$0xff] }
  0x61   : > { %469 = vst [vmem:[%s3521_s26 + $0x4f0] sm:$0xff] %v468_v30  ;;  %v472_v32 = vld [vmem:[%s3516_s25 + $0xa00] sm:$0xff]  ;;  %v474_v33 = vld [vmem:[%s3516_s25 + $0xa08] sm:$0xff]  ;;  %471 = vst [vmem:[%s3521_s26 + $0x4f8] sm:$0xff] %v470_v31 }
  0x62   : > { %473 = vst [vmem:[%s3521_s26 + $0x500] sm:$0xff] %v472_v32  ;;  %475 = vst [vmem:[%s3521_s26 + $0x508] sm:$0xff] %v474_v33  ;;  %v476_v34 = vld [vmem:[%s3516_s25 + $0xa20] sm:$0xff]  ;;  %v478_v35 = vld [vmem:[%s3516_s25 + $0xa28] sm:$0xff] }
  0x63   : > { %v480_v36 = vld [vmem:[%s3516_s25 + $0xa40] sm:$0xff]  ;;  %477 = vst [vmem:[%s3521_s26 + $0x510] sm:$0xff] %v476_v34  ;;  %479 = vst [vmem:[%s3521_s26 + $0x518] sm:$0xff] %v478_v35  ;;  %v482_v37 = vld [vmem:[%s3516_s25 + $0xa48] sm:$0xff] }
  0x64   : > { %481 = vst [vmem:[%s3521_s26 + $0x520] sm:$0xff] %v480_v36  ;;  %v484_v38 = vld [vmem:[%s3516_s25 + $0xa60] sm:$0xff]  ;;  %v486_v39 = vld [vmem:[%s3516_s25 + $0xa68] sm:$0xff]  ;;  %483 = vst [vmem:[%s3521_s26 + $0x528] sm:$0xff] %v482_v37 }
  0x65   : > { %485 = vst [vmem:[%s3521_s26 + $0x530] sm:$0xff] %v484_v38  ;;  %487 = vst [vmem:[%s3521_s26 + $0x538] sm:$0xff] %v486_v39  ;;  %v488_v40 = vld [vmem:[%s3516_s25 + $0xa80] sm:$0xff]  ;;  %v490_v41 = vld [vmem:[%s3516_s25 + $0xa88] sm:$0xff] }
  0x66   : > { %v492_v42 = vld [vmem:[%s3516_s25 + $0xaa0] sm:$0xff]  ;;  %489 = vst [vmem:[%s3521_s26 + $0x540] sm:$0xff] %v488_v40  ;;  %491 = vst [vmem:[%s3521_s26 + $0x548] sm:$0xff] %v490_v41  ;;  %v494_v43 = vld [vmem:[%s3516_s25 + $0xaa8] sm:$0xff] }
  0x67   : > { %493 = vst [vmem:[%s3521_s26 + $0x550] sm:$0xff] %v492_v42  ;;  %v496_v44 = vld [vmem:[%s3516_s25 + $0xac0] sm:$0xff]  ;;  %v498_v45 = vld [vmem:[%s3516_s25 + $0xac8] sm:$0xff]  ;;  %495 = vst [vmem:[%s3521_s26 + $0x558] sm:$0xff] %v494_v43 }
  0x68   : > { %497 = vst [vmem:[%s3521_s26 + $0x560] sm:$0xff] %v496_v44  ;;  %499 = vst [vmem:[%s3521_s26 + $0x568] sm:$0xff] %v498_v45  ;;  %v500_v46 = vld [vmem:[%s3516_s25 + $0xae0] sm:$0xff]  ;;  %v502_v47 = vld [vmem:[%s3516_s25 + $0xae8] sm:$0xff] }
  0x69   : > { %v504_v48 = vld [vmem:[%s3516_s25 + $0xb00] sm:$0xff]  ;;  %501 = vst [vmem:[%s3521_s26 + $0x570] sm:$0xff] %v500_v46  ;;  %503 = vst [vmem:[%s3521_s26 + $0x578] sm:$0xff] %v502_v47  ;;  %v506_v49 = vld [vmem:[%s3516_s25 + $0xb08] sm:$0xff] }
  0x6a   : > { %505 = vst [vmem:[%s3521_s26 + $0x580] sm:$0xff] %v504_v48  ;;  %v508_v50 = vld [vmem:[%s3516_s25 + $0xb20] sm:$0xff]  ;;  %v510_v51 = vld [vmem:[%s3516_s25 + $0xb28] sm:$0xff]  ;;  %507 = vst [vmem:[%s3521_s26 + $0x588] sm:$0xff] %v506_v49 }
  0x6b   : > { %509 = vst [vmem:[%s3521_s26 + $0x590] sm:$0xff] %v508_v50  ;;  %511 = vst [vmem:[%s3521_s26 + $0x598] sm:$0xff] %v510_v51  ;;  %v512_v52 = vld [vmem:[%s3516_s25 + $0xb40] sm:$0xff]  ;;  %v514_v53 = vld [vmem:[%s3516_s25 + $0xb48] sm:$0xff] }
  0x6c   : > { %v516_v54 = vld [vmem:[%s3516_s25 + $0xb60] sm:$0xff]  ;;  %513 = vst [vmem:[%s3521_s26 + $0x5a0] sm:$0xff] %v512_v52  ;;  %515 = vst [vmem:[%s3521_s26 + $0x5a8] sm:$0xff] %v514_v53  ;;  %v518_v55 = vld [vmem:[%s3516_s25 + $0xb68] sm:$0xff] }
  0x6d   : > { %517 = vst [vmem:[%s3521_s26 + $0x5b0] sm:$0xff] %v516_v54  ;;  %v520_v56 = vld [vmem:[%s3516_s25 + $0xb80] sm:$0xff]  ;;  %v522_v57 = vld [vmem:[%s3516_s25 + $0xb88] sm:$0xff]  ;;  %519 = vst [vmem:[%s3521_s26 + $0x5b8] sm:$0xff] %v518_v55 }
  0x6e   : > { %521 = vst [vmem:[%s3521_s26 + $0x5c0] sm:$0xff] %v520_v56  ;;  %523 = vst [vmem:[%s3521_s26 + $0x5c8] sm:$0xff] %v522_v57  ;;  %v524_v58 = vld [vmem:[%s3516_s25 + $0xba0] sm:$0xff]  ;;  %v526_v59 = vld [vmem:[%s3516_s25 + $0xba8] sm:$0xff] }
  0x6f   : > { %v528_v60 = vld [vmem:[%s3516_s25 + $0xbc0] sm:$0xff]  ;;  %525 = vst [vmem:[%s3521_s26 + $0x5d0] sm:$0xff] %v524_v58  ;;  %527 = vst [vmem:[%s3521_s26 + $0x5d8] sm:$0xff] %v526_v59  ;;  %v530_v61 = vld [vmem:[%s3516_s25 + $0xbc8] sm:$0xff] }
  0x70   : > { %529 = vst [vmem:[%s3521_s26 + $0x5e0] sm:$0xff] %v528_v60  ;;  %v532_v62 = vld [vmem:[%s3516_s25 + $0xbe0] sm:$0xff]  ;;  %v534_v63 = vld [vmem:[%s3516_s25 + $0xbe8] sm:$0xff]  ;;  %531 = vst [vmem:[%s3521_s26 + $0x5e8] sm:$0xff] %v530_v61 }
  0x71   : > { %533 = vst [vmem:[%s3521_s26 + $0x5f0] sm:$0xff] %v532_v62  ;;  %535 = vst [vmem:[%s3521_s26 + $0x5f8] sm:$0xff] %v534_v63  ;;  %v536_v0 = vld [vmem:[%s3516_s25 + $0xc00] sm:$0xff]  ;;  %v538_v1 = vld [vmem:[%s3516_s25 + $0xc08] sm:$0xff] }
  0x72   : > { %v540_v2 = vld [vmem:[%s3516_s25 + $0xc20] sm:$0xff]  ;;  %537 = vst [vmem:[%s3521_s26 + $0x600] sm:$0xff] %v536_v0  ;;  %539 = vst [vmem:[%s3521_s26 + $0x608] sm:$0xff] %v538_v1  ;;  %v542_v3 = vld [vmem:[%s3516_s25 + $0xc28] sm:$0xff] }
  0x73   : > { %541 = vst [vmem:[%s3521_s26 + $0x610] sm:$0xff] %v540_v2  ;;  %v544_v4 = vld [vmem:[%s3516_s25 + $0xc40] sm:$0xff]  ;;  %v546_v5 = vld [vmem:[%s3516_s25 + $0xc48] sm:$0xff]  ;;  %543 = vst [vmem:[%s3521_s26 + $0x618] sm:$0xff] %v542_v3 }
  0x74   : > { %545 = vst [vmem:[%s3521_s26 + $0x620] sm:$0xff] %v544_v4  ;;  %547 = vst [vmem:[%s3521_s26 + $0x628] sm:$0xff] %v546_v5  ;;  %v548_v6 = vld [vmem:[%s3516_s25 + $0xc60] sm:$0xff]  ;;  %v550_v7 = vld [vmem:[%s3516_s25 + $0xc68] sm:$0xff] }
  0x75   : > { %v552_v8 = vld [vmem:[%s3516_s25 + $0xc80] sm:$0xff]  ;;  %549 = vst [vmem:[%s3521_s26 + $0x630] sm:$0xff] %v548_v6  ;;  %551 = vst [vmem:[%s3521_s26 + $0x638] sm:$0xff] %v550_v7  ;;  %v554_v9 = vld [vmem:[%s3516_s25 + $0xc88] sm:$0xff] }
  0x76   : > { %553 = vst [vmem:[%s3521_s26 + $0x640] sm:$0xff] %v552_v8  ;;  %v556_v10 = vld [vmem:[%s3516_s25 + $0xca0] sm:$0xff]  ;;  %v558_v11 = vld [vmem:[%s3516_s25 + $0xca8] sm:$0xff]  ;;  %555 = vst [vmem:[%s3521_s26 + $0x648] sm:$0xff] %v554_v9 }
  0x77   : > { %557 = vst [vmem:[%s3521_s26 + $0x650] sm:$0xff] %v556_v10  ;;  %559 = vst [vmem:[%s3521_s26 + $0x658] sm:$0xff] %v558_v11  ;;  %v560_v12 = vld [vmem:[%s3516_s25 + $0xcc0] sm:$0xff]  ;;  %v562_v13 = vld [vmem:[%s3516_s25 + $0xcc8] sm:$0xff] }
  0x78   : > { %v564_v14 = vld [vmem:[%s3516_s25 + $0xce0] sm:$0xff]  ;;  %561 = vst [vmem:[%s3521_s26 + $0x660] sm:$0xff] %v560_v12  ;;  %563 = vst [vmem:[%s3521_s26 + $0x668] sm:$0xff] %v562_v13  ;;  %v566_v15 = vld [vmem:[%s3516_s25 + $0xce8] sm:$0xff] }
  0x79   : > { %565 = vst [vmem:[%s3521_s26 + $0x670] sm:$0xff] %v564_v14  ;;  %v568_v16 = vld [vmem:[%s3516_s25 + $0xd00] sm:$0xff]  ;;  %v570_v17 = vld [vmem:[%s3516_s25 + $0xd08] sm:$0xff]  ;;  %567 = vst [vmem:[%s3521_s26 + $0x678] sm:$0xff] %v566_v15 }
  0x7a   : > { %569 = vst [vmem:[%s3521_s26 + $0x680] sm:$0xff] %v568_v16  ;;  %571 = vst [vmem:[%s3521_s26 + $0x688] sm:$0xff] %v570_v17  ;;  %v572_v18 = vld [vmem:[%s3516_s25 + $0xd20] sm:$0xff]  ;;  %v574_v19 = vld [vmem:[%s3516_s25 + $0xd28] sm:$0xff] }
  0x7b   : > { %v576_v20 = vld [vmem:[%s3516_s25 + $0xd40] sm:$0xff]  ;;  %573 = vst [vmem:[%s3521_s26 + $0x690] sm:$0xff] %v572_v18  ;;  %575 = vst [vmem:[%s3521_s26 + $0x698] sm:$0xff] %v574_v19  ;;  %v578_v21 = vld [vmem:[%s3516_s25 + $0xd48] sm:$0xff] }
  0x7c   : > { %577 = vst [vmem:[%s3521_s26 + $0x6a0] sm:$0xff] %v576_v20  ;;  %v580_v22 = vld [vmem:[%s3516_s25 + $0xd60] sm:$0xff]  ;;  %v582_v23 = vld [vmem:[%s3516_s25 + $0xd68] sm:$0xff]  ;;  %579 = vst [vmem:[%s3521_s26 + $0x6a8] sm:$0xff] %v578_v21 }
  0x7d   : > { %581 = vst [vmem:[%s3521_s26 + $0x6b0] sm:$0xff] %v580_v22  ;;  %583 = vst [vmem:[%s3521_s26 + $0x6b8] sm:$0xff] %v582_v23  ;;  %v584_v24 = vld [vmem:[%s3516_s25 + $0xd80] sm:$0xff]  ;;  %v586_v25 = vld [vmem:[%s3516_s25 + $0xd88] sm:$0xff] }
  0x7e   : > { %v588_v26 = vld [vmem:[%s3516_s25 + $0xda0] sm:$0xff]  ;;  %585 = vst [vmem:[%s3521_s26 + $0x6c0] sm:$0xff] %v584_v24  ;;  %587 = vst [vmem:[%s3521_s26 + $0x6c8] sm:$0xff] %v586_v25  ;;  %v590_v27 = vld [vmem:[%s3516_s25 + $0xda8] sm:$0xff] }
  0x7f   : > { %589 = vst [vmem:[%s3521_s26 + $0x6d0] sm:$0xff] %v588_v26  ;;  %v592_v28 = vld [vmem:[%s3516_s25 + $0xdc0] sm:$0xff]  ;;  %v594_v29 = vld [vmem:[%s3516_s25 + $0xdc8] sm:$0xff]  ;;  %591 = vst [vmem:[%s3521_s26 + $0x6d8] sm:$0xff] %v590_v27 }
  0x80   : > { %593 = vst [vmem:[%s3521_s26 + $0x6e0] sm:$0xff] %v592_v28  ;;  %595 = vst [vmem:[%s3521_s26 + $0x6e8] sm:$0xff] %v594_v29  ;;  %v596_v30 = vld [vmem:[%s3516_s25 + $0xde0] sm:$0xff]  ;;  %v598_v31 = vld [vmem:[%s3516_s25 + $0xde8] sm:$0xff] }
  0x81   : > { %v600_v32 = vld [vmem:[%s3516_s25 + $0xe00] sm:$0xff]  ;;  %597 = vst [vmem:[%s3521_s26 + $0x6f0] sm:$0xff] %v596_v30  ;;  %599 = vst [vmem:[%s3521_s26 + $0x6f8] sm:$0xff] %v598_v31  ;;  %v602_v33 = vld [vmem:[%s3516_s25 + $0xe08] sm:$0xff] }
  0x82   : > { %601 = vst [vmem:[%s3521_s26 + $0x700] sm:$0xff] %v600_v32  ;;  %v604_v34 = vld [vmem:[%s3516_s25 + $0xe20] sm:$0xff]  ;;  %v606_v35 = vld [vmem:[%s3516_s25 + $0xe28] sm:$0xff]  ;;  %603 = vst [vmem:[%s3521_s26 + $0x708] sm:$0xff] %v602_v33 }
  0x83   : > { %605 = vst [vmem:[%s3521_s26 + $0x710] sm:$0xff] %v604_v34  ;;  %607 = vst [vmem:[%s3521_s26 + $0x718] sm:$0xff] %v606_v35  ;;  %v608_v36 = vld [vmem:[%s3516_s25 + $0xe40] sm:$0xff]  ;;  %v610_v37 = vld [vmem:[%s3516_s25 + $0xe48] sm:$0xff] }
  0x84   : > { %v612_v38 = vld [vmem:[%s3516_s25 + $0xe60] sm:$0xff]  ;;  %609 = vst [vmem:[%s3521_s26 + $0x720] sm:$0xff] %v608_v36  ;;  %611 = vst [vmem:[%s3521_s26 + $0x728] sm:$0xff] %v610_v37  ;;  %v614_v39 = vld [vmem:[%s3516_s25 + $0xe68] sm:$0xff] }
  0x85   : > { %613 = vst [vmem:[%s3521_s26 + $0x730] sm:$0xff] %v612_v38  ;;  %v616_v40 = vld [vmem:[%s3516_s25 + $0xe80] sm:$0xff]  ;;  %v618_v41 = vld [vmem:[%s3516_s25 + $0xe88] sm:$0xff]  ;;  %615 = vst [vmem:[%s3521_s26 + $0x738] sm:$0xff] %v614_v39 }
  0x86   : > { %617 = vst [vmem:[%s3521_s26 + $0x740] sm:$0xff] %v616_v40  ;;  %619 = vst [vmem:[%s3521_s26 + $0x748] sm:$0xff] %v618_v41  ;;  %v620_v42 = vld [vmem:[%s3516_s25 + $0xea0] sm:$0xff]  ;;  %v622_v43 = vld [vmem:[%s3516_s25 + $0xea8] sm:$0xff] }
  0x87   : > { %v624_v44 = vld [vmem:[%s3516_s25 + $0xec0] sm:$0xff]  ;;  %621 = vst [vmem:[%s3521_s26 + $0x750] sm:$0xff] %v620_v42  ;;  %623 = vst [vmem:[%s3521_s26 + $0x758] sm:$0xff] %v622_v43  ;;  %v626_v45 = vld [vmem:[%s3516_s25 + $0xec8] sm:$0xff] }
  0x88   : > { %625 = vst [vmem:[%s3521_s26 + $0x760] sm:$0xff] %v624_v44  ;;  %v628_v46 = vld [vmem:[%s3516_s25 + $0xee0] sm:$0xff]  ;;  %v630_v47 = vld [vmem:[%s3516_s25 + $0xee8] sm:$0xff]  ;;  %627 = vst [vmem:[%s3521_s26 + $0x768] sm:$0xff] %v626_v45 }
  0x89   : > { %629 = vst [vmem:[%s3521_s26 + $0x770] sm:$0xff] %v628_v46  ;;  %631 = vst [vmem:[%s3521_s26 + $0x778] sm:$0xff] %v630_v47  ;;  %v632_v48 = vld [vmem:[%s3516_s25 + $0xf00] sm:$0xff]  ;;  %v634_v49 = vld [vmem:[%s3516_s25 + $0xf08] sm:$0xff] }
  0x8a   : > { %v636_v50 = vld [vmem:[%s3516_s25 + $0xf20] sm:$0xff]  ;;  %633 = vst [vmem:[%s3521_s26 + $0x780] sm:$0xff] %v632_v48  ;;  %635 = vst [vmem:[%s3521_s26 + $0x788] sm:$0xff] %v634_v49  ;;  %v638_v51 = vld [vmem:[%s3516_s25 + $0xf28] sm:$0xff] }
  0x8b   : > { %637 = vst [vmem:[%s3521_s26 + $0x790] sm:$0xff] %v636_v50  ;;  %v640_v52 = vld [vmem:[%s3516_s25 + $0xf40] sm:$0xff]  ;;  %v642_v53 = vld [vmem:[%s3516_s25 + $0xf48] sm:$0xff]  ;;  %639 = vst [vmem:[%s3521_s26 + $0x798] sm:$0xff] %v638_v51 }
  0x8c   : > { %641 = vst [vmem:[%s3521_s26 + $0x7a0] sm:$0xff] %v640_v52  ;;  %643 = vst [vmem:[%s3521_s26 + $0x7a8] sm:$0xff] %v642_v53  ;;  %v644_v54 = vld [vmem:[%s3516_s25 + $0xf60] sm:$0xff]  ;;  %v646_v55 = vld [vmem:[%s3516_s25 + $0xf68] sm:$0xff] }
  0x8d   : > { %v648_v56 = vld [vmem:[%s3516_s25 + $0xf80] sm:$0xff]  ;;  %645 = vst [vmem:[%s3521_s26 + $0x7b0] sm:$0xff] %v644_v54  ;;  %647 = vst [vmem:[%s3521_s26 + $0x7b8] sm:$0xff] %v646_v55  ;;  %v650_v57 = vld [vmem:[%s3516_s25 + $0xf88] sm:$0xff] }
  0x8e   : > { %649 = vst [vmem:[%s3521_s26 + $0x7c0] sm:$0xff] %v648_v56  ;;  %v652_v58 = vld [vmem:[%s3516_s25 + $0xfa0] sm:$0xff]  ;;  %v654_v59 = vld [vmem:[%s3516_s25 + $0xfa8] sm:$0xff]  ;;  %651 = vst [vmem:[%s3521_s26 + $0x7c8] sm:$0xff] %v650_v57 }
  0x8f   : > { %653 = vst [vmem:[%s3521_s26 + $0x7d0] sm:$0xff] %v652_v58  ;;  %655 = vst [vmem:[%s3521_s26 + $0x7d8] sm:$0xff] %v654_v59  ;;  %v656_v60 = vld [vmem:[%s3516_s25 + $0xfc0] sm:$0xff]  ;;  %v658_v61 = vld [vmem:[%s3516_s25 + $0xfc8] sm:$0xff] }
  0x90   : > { %v660_v62 = vld [vmem:[%s3516_s25 + $0xfe0] sm:$0xff]  ;;  %657 = vst [vmem:[%s3521_s26 + $0x7e0] sm:$0xff] %v656_v60  ;;  %659 = vst [vmem:[%s3521_s26 + $0x7e8] sm:$0xff] %v658_v61  ;;  %v662_v63 = vld [vmem:[%s3516_s25 + $0xfe8] sm:$0xff] }
  0x91   : > { %661 = vst [vmem:[%s3521_s26 + $0x7f0] sm:$0xff] %v660_v62  ;;  %663 = vst [vmem:[%s3521_s26 + $0x7f8] sm:$0xff] %v662_v63 }
  0x92 PF: > { %p2722_p5 = scmp.ge.s32.totalorder %s3460_s14, 1  ;;  %p676_p6 = scmp.lt.s32.totalorder %s3460_s14, 3 }
  0x94   : > { %p677_p7 = pnand %p2722_p5, %p676_p6 }
  0x95   : > { %s683_s27 = sand.u32 (!%p677_p7), 1, %s3452_s12   ;;  %v4038_v0 = vld [vmem:[%s4347_s0] sm:$0xff] (!%p677_p7)  ;;  %s2724_s11 = sshll.u32 (!%p677_p7), %s2715_s15, 2 }
  0x96   : > { %680 = sbr.rel (%p677_p7) target bundleno = 625 (0x271), region = 51  ;;  %s2723_s30 = sshll.u32 (!%p677_p7), %s683_s27, 11  ;;  %v2728_v1 = vcombine.high (!%p677_p7), %v4038_v0, %v4038_v0 }
  0x97   : > { %s4042_s4 = scalar_lea.vmem (!%p677_p7), [#allocation2], %s2723_s30  ;;  %p712_p8 = scmp.lt.s32.totalorder (!%p677_p7), %s2724_s11, 7 }
  0x98   : > { %v3046_v2 = vld [vmem:[%s4042_s4 + $0x4] ss:$16 sps:$4 sm:$0xff] (!%p677_p7)   ;;  %2344 = vmatprep.mubr.bf16.mxu0 (!%p677_p7), %v2728_v1  ;;  %2508 = vmatprep.mubr.bf16.mxu1 (!%p677_p7), %v2728_v1  ;;  %v3048_v3 = vld [vmem:[%s4042_s4 + $0xc] ss:$16 sps:$4 sm:$0xff] (!%p677_p7)   ;;  %v3050_v4 = vld [vmem:[%s4042_s4] ss:$16 sps:$4 sm:$0xff] (!%p677_p7)  }
  0x99   : > { %2312 = vmatprep.subr.bf16.mxu0 (!%p677_p7), %v3046_v2  ;;  %v3051_v5 = vld [vmem:[%s4042_s4 + $0x8] ss:$16 sps:$4 sm:$0xff] (!%p677_p7)   ;;  %2476 = vmatprep.subr.bf16.mxu1 (!%p677_p7), %v3048_v3  ;;  %v3052_v6 = vld [vmem:[%s4042_s4 + $0x24] ss:$16 sps:$4 sm:$0xff] (!%p677_p7)   ;;  %v3054_v7 = vld [vmem:[%s4042_s4 + $0x2c] ss:$16 sps:$4 sm:$0xff] (!%p677_p7)  }
  0x9a   : > { %2313 = vmatpush1.bf16.msra.mxu0 (!%p677_p7), %v3050_v4  ;;  %2477 = vmatpush1.bf16.msra.mxu1 (!%p677_p7), %v3051_v5  ;;  %v3056_v8 = vld [vmem:[%s4042_s4 + $0x20] ss:$16 sps:$4 sm:$0xff] (!%p677_p7)   ;;  %v3057_v9 = vld [vmem:[%s4042_s4 + $0x28] ss:$16 sps:$4 sm:$0xff] (!%p677_p7)   ;;  %v3058_v10 = vld [vmem:[%s4042_s4 + $0x44] ss:$16 sps:$4 sm:$0xff] (!%p677_p7)   ;;  %v2727_v5 = vcombine.low (!%p677_p7), %v4038_v0, %v4038_v0 }
  0x9b   : > { %2314 = vmatprep.subr.bf16.mxu0 (!%p677_p7), %v3052_v6  ;;  %2478 = vmatprep.subr.bf16.mxu1 (!%p677_p7), %v3054_v7  ;;  %v3060_v11 = vld [vmem:[%s4042_s4 + $0x4c] ss:$16 sps:$4 sm:$0xff] (!%p677_p7)   ;;  %v3062_v12 = vld [vmem:[%s4042_s4 + $0x40] ss:$16 sps:$4 sm:$0xff] (!%p677_p7)   ;;  %v3063_v13 = vld [vmem:[%s4042_s4 + $0x48] ss:$16 sps:$4 sm:$0xff] (!%p677_p7)  }
  0x9c   : > { %v3064_v14 = vld [vmem:[%s4042_s4 + $0x64] ss:$16 sps:$4 sm:$0xff] (!%p677_p7)   ;;  %v3066_v15 = vld [vmem:[%s4042_s4 + $0x6c] ss:$16 sps:$4 sm:$0xff] (!%p677_p7)   ;;  %v3068_v16 = vld [vmem:[%s4042_s4 + $0x60] ss:$16 sps:$4 sm:$0xff] (!%p677_p7)  }
  0x9d   : > { %v3069_v17 = vld [vmem:[%s4042_s4 + $0x68] ss:$16 sps:$4 sm:$0xff]   ;;  %v3070_v18 = vld [vmem:[%s4042_s4 + $0x84] ss:$16 sps:$4 sm:$0xff]   ;;  %v3072_v19 = vld [vmem:[%s4042_s4 + $0x8c] ss:$16 sps:$4 sm:$0xff]  }
  0x9e   : > { %2315 = vmatpush1.bf16.msra.mxu0 %v3056_v8  ;;  %2479 = vmatpush1.bf16.msra.mxu1 %v3057_v9  ;;  %v3074_v20 = vld [vmem:[%s4042_s4 + $0x80] ss:$16 sps:$4 sm:$0xff]   ;;  %v3075_v21 = vld [vmem:[%s4042_s4 + $0x88] ss:$16 sps:$4 sm:$0xff]   ;;  %v3076_v22 = vld [vmem:[%s4042_s4 + $0xa4] ss:$16 sps:$4 sm:$0xff]  }
  0x9f   : > { %2316 = vmatprep.subr.bf16.mxu0 %v3058_v10  ;;  %2480 = vmatprep.subr.bf16.mxu1 %v3060_v11  ;;  %v3078_v23 = vld [vmem:[%s4042_s4 + $0xac] ss:$16 sps:$4 sm:$0xff]   ;;  %v3080_v24 = vld [vmem:[%s4042_s4 + $0xa0] ss:$16 sps:$4 sm:$0xff]   ;;  %v3081_v25 = vld [vmem:[%s4042_s4 + $0xa8] ss:$16 sps:$4 sm:$0xff]  }
  0xa0   : > { %v3082_v26 = vld [vmem:[%s4042_s4 + $0xc4] ss:$16 sps:$4 sm:$0xff]   ;;  %v3084_v27 = vld [vmem:[%s4042_s4 + $0xcc] ss:$16 sps:$4 sm:$0xff]   ;;  %v3086_v28 = vld [vmem:[%s4042_s4 + $0xc0] ss:$16 sps:$4 sm:$0xff]  }
  0xa1   : > { %v3087_v29 = vld [vmem:[%s4042_s4 + $0xc8] ss:$16 sps:$4 sm:$0xff]   ;;  %v3088_v30 = vld [vmem:[%s4042_s4 + $0xe4] ss:$16 sps:$4 sm:$0xff]   ;;  %v3090_v31 = vld [vmem:[%s4042_s4 + $0xec] ss:$16 sps:$4 sm:$0xff]  }
  0xa2   : > { %2317 = vmatpush1.bf16.msra.mxu0 %v3062_v12  ;;  %2481 = vmatpush1.bf16.msra.mxu1 %v3063_v13  ;;  %v3092_v32 = vld [vmem:[%s4042_s4 + $0xe0] ss:$16 sps:$4 sm:$0xff]   ;;  %v3093_v33 = vld [vmem:[%s4042_s4 + $0xe8] ss:$16 sps:$4 sm:$0xff]   ;;  %v3094_v34 = vld [vmem:[%s4042_s4 + $0x104] ss:$16 sps:$4 sm:$0xff]  }
  0xa3   : > { %2318 = vmatprep.subr.bf16.mxu0 %v3064_v14  ;;  %2482 = vmatprep.subr.bf16.mxu1 %v3066_v15  ;;  %v3096_v35 = vld [vmem:[%s4042_s4 + $0x10c] ss:$16 sps:$4 sm:$0xff]   ;;  %v3098_v36 = vld [vmem:[%s4042_s4 + $0x100] ss:$16 sps:$4 sm:$0xff]   ;;  %v3099_v37 = vld [vmem:[%s4042_s4 + $0x108] ss:$16 sps:$4 sm:$0xff]  }
  0xa4   : > { %v3100_v38 = vld [vmem:[%s4042_s4 + $0x124] ss:$16 sps:$4 sm:$0xff]   ;;  %v3102_v39 = vld [vmem:[%s4042_s4 + $0x12c] ss:$16 sps:$4 sm:$0xff]   ;;  %v3104_v40 = vld [vmem:[%s4042_s4 + $0x120] ss:$16 sps:$4 sm:$0xff]  }
  0xa5   : > { %v3105_v41 = vld [vmem:[%s4042_s4 + $0x128] ss:$16 sps:$4 sm:$0xff]   ;;  %v3106_v42 = vld [vmem:[%s4042_s4 + $0x144] ss:$16 sps:$4 sm:$0xff]   ;;  %v3108_v43 = vld [vmem:[%s4042_s4 + $0x14c] ss:$16 sps:$4 sm:$0xff]  }
  0xa6   : > { %2319 = vmatpush1.bf16.msra.mxu0 %v3068_v16  ;;  %2483 = vmatpush1.bf16.msra.mxu1 %v3069_v17  ;;  %v3110_v44 = vld [vmem:[%s4042_s4 + $0x140] ss:$16 sps:$4 sm:$0xff]   ;;  %v3111_v45 = vld [vmem:[%s4042_s4 + $0x148] ss:$16 sps:$4 sm:$0xff]   ;;  %v3112_v46 = vld [vmem:[%s4042_s4 + $0x164] ss:$16 sps:$4 sm:$0xff]  }
  0xa7   : > { %2320 = vmatprep.subr.bf16.mxu0 %v3070_v18  ;;  %2484 = vmatprep.subr.bf16.mxu1 %v3072_v19  ;;  %v3114_v47 = vld [vmem:[%s4042_s4 + $0x16c] ss:$16 sps:$4 sm:$0xff]   ;;  %v3116_v48 = vld [vmem:[%s4042_s4 + $0x160] ss:$16 sps:$4 sm:$0xff]   ;;  %v3117_v49 = vld [vmem:[%s4042_s4 + $0x168] ss:$16 sps:$4 sm:$0xff]  }
  0xa8   : > { %v3118_v50 = vld [vmem:[%s4042_s4 + $0x184] ss:$16 sps:$4 sm:$0xff]   ;;  %v3120_v51 = vld [vmem:[%s4042_s4 + $0x18c] ss:$16 sps:$4 sm:$0xff]   ;;  %v3122_v52 = vld [vmem:[%s4042_s4 + $0x180] ss:$16 sps:$4 sm:$0xff]  }
  0xa9   : > { %v3123_v53 = vld [vmem:[%s4042_s4 + $0x188] ss:$16 sps:$4 sm:$0xff]   ;;  %v3124_v54 = vld [vmem:[%s4042_s4 + $0x1a4] ss:$16 sps:$4 sm:$0xff]   ;;  %v3126_v55 = vld [vmem:[%s4042_s4 + $0x1ac] ss:$16 sps:$4 sm:$0xff]  }
  0xaa   : > { %2321 = vmatpush1.bf16.msra.mxu0 %v3074_v20  ;;  %2485 = vmatpush1.bf16.msra.mxu1 %v3075_v21  ;;  %v3128_v56 = vld [vmem:[%s4042_s4 + $0x1a0] ss:$16 sps:$4 sm:$0xff]   ;;  %v3129_v57 = vld [vmem:[%s4042_s4 + $0x1a8] ss:$16 sps:$4 sm:$0xff]   ;;  %v3130_v58 = vld [vmem:[%s4042_s4 + $0x1c4] ss:$16 sps:$4 sm:$0xff]  }
  0xab   : > { %2322 = vmatprep.subr.bf16.mxu0 %v3076_v22  ;;  %2486 = vmatprep.subr.bf16.mxu1 %v3078_v23  ;;  %v3132_v59 = vld [vmem:[%s4042_s4 + $0x1cc] ss:$16 sps:$4 sm:$0xff]   ;;  %v3134_v60 = vld [vmem:[%s4042_s4 + $0x1c0] ss:$16 sps:$4 sm:$0xff]   ;;  %v3135_v61 = vld [vmem:[%s4042_s4 + $0x1c8] ss:$16 sps:$4 sm:$0xff]  }
  0xac   : > { %v3136_v62 = vld [vmem:[%s4042_s4 + $0x1e4] ss:$16 sps:$4 sm:$0xff]   ;;  %v3138_v63 = vld [vmem:[%s4042_s4 + $0x1ec] ss:$16 sps:$4 sm:$0xff]   ;;  %v3140_v1 = vld [vmem:[%s4042_s4 + $0x1e0] ss:$16 sps:$4 sm:$0xff]  }
  0xad   : > { %v3141_v2 = vld [vmem:[%s4042_s4 + $0x1e8] ss:$16 sps:$4 sm:$0xff]   ;;  %v3146_v3 = vld [vmem:[%s4042_s4 + $0x204] ss:$16 sps:$4 sm:$0xff]   ;;  %v3149_v4 = vld [vmem:[%s4042_s4 + $0x20c] ss:$16 sps:$4 sm:$0xff]  }
  0xae   : > { %2323 = vmatpush1.bf16.msra.mxu0 %v3080_v24  ;;  %2487 = vmatpush1.bf16.msra.mxu1 %v3081_v25  ;;  %v3144_v6 = vld [vmem:[%s4042_s4 + $0x200] ss:$16 sps:$4 sm:$0xff]   ;;  %v3147_v7 = vld [vmem:[%s4042_s4 + $0x208] ss:$16 sps:$4 sm:$0xff]   ;;  %v3152_v8 = vld [vmem:[%s4042_s4 + $0x224] ss:$16 sps:$4 sm:$0xff]  }
  0xaf   : > { %2324 = vmatprep.subr.bf16.mxu0 %v3082_v26  ;;  %2488 = vmatprep.subr.bf16.mxu1 %v3084_v27  ;;  %v3155_v9 = vld [vmem:[%s4042_s4 + $0x22c] ss:$16 sps:$4 sm:$0xff]   ;;  %v3150_v10 = vld [vmem:[%s4042_s4 + $0x220] ss:$16 sps:$4 sm:$0xff]   ;;  %v3153_v11 = vld [vmem:[%s4042_s4 + $0x228] ss:$16 sps:$4 sm:$0xff]  }
  0xb0   : > { %v3158_v0 = vld [vmem:[%s4042_s4 + $0x244] ss:$16 sps:$4 sm:$0xff]   ;;  %v3161_v12 = vld [vmem:[%s4042_s4 + $0x24c] ss:$16 sps:$4 sm:$0xff]   ;;  %v3156_v13 = vld [vmem:[%s4042_s4 + $0x240] ss:$16 sps:$4 sm:$0xff]  }
  0xb1   : > { %v3159_v14 = vld [vmem:[%s4042_s4 + $0x248] ss:$16 sps:$4 sm:$0xff]   ;;  %v3164_v15 = vld [vmem:[%s4042_s4 + $0x264] ss:$16 sps:$4 sm:$0xff]   ;;  %v3167_v16 = vld [vmem:[%s4042_s4 + $0x26c] ss:$16 sps:$4 sm:$0xff]  }
  0xb2   : > { %2325 = vmatpush1.bf16.msra.mxu0 %v3086_v28  ;;  %2489 = vmatpush1.bf16.msra.mxu1 %v3087_v29  ;;  %v3162_v17 = vld [vmem:[%s4042_s4 + $0x260] ss:$16 sps:$4 sm:$0xff]   ;;  %v3165_v18 = vld [vmem:[%s4042_s4 + $0x268] ss:$16 sps:$4 sm:$0xff]   ;;  %v3170_v19 = vld [vmem:[%s4042_s4 + $0x284] ss:$16 sps:$4 sm:$0xff]  }
  0xb3   : > { %2326 = vmatprep.subr.bf16.mxu0 %v3088_v30  ;;  %2490 = vmatprep.subr.bf16.mxu1 %v3090_v31  ;;  %v3173_v20 = vld [vmem:[%s4042_s4 + $0x28c] ss:$16 sps:$4 sm:$0xff]   ;;  %v3168_v21 = vld [vmem:[%s4042_s4 + $0x280] ss:$16 sps:$4 sm:$0xff]   ;;  %v3171_v22 = vld [vmem:[%s4042_s4 + $0x288] ss:$16 sps:$4 sm:$0xff]  }
  0xb4   : > { %v3176_v23 = vld [vmem:[%s4042_s4 + $0x2a4] ss:$16 sps:$4 sm:$0xff]   ;;  %v3179_v24 = vld [vmem:[%s4042_s4 + $0x2ac] ss:$16 sps:$4 sm:$0xff]   ;;  %v3174_v25 = vld [vmem:[%s4042_s4 + $0x2a0] ss:$16 sps:$4 sm:$0xff]  }
  0xb5   : > { %v3177_v26 = vld [vmem:[%s4042_s4 + $0x2a8] ss:$16 sps:$4 sm:$0xff]   ;;  %v3182_v27 = vld [vmem:[%s4042_s4 + $0x2c4] ss:$16 sps:$4 sm:$0xff]   ;;  %v3185_v28 = vld [vmem:[%s4042_s4 + $0x2cc] ss:$16 sps:$4 sm:$0xff]  }
  0xb6   : > { %2327 = vmatpush1.bf16.msra.mxu0 %v3092_v32  ;;  %2491 = vmatpush1.bf16.msra.mxu1 %v3093_v33  ;;  %v4139_v29 = vld [vmem:[%s4347_s0 + $0x8] sm:$0xff]  ;;  %v3180_v31 = vld [vmem:[%s4042_s4 + $0x2c0] ss:$16 sps:$4 sm:$0xff]   ;;  %v3188_v33 = vld [vmem:[%s4042_s4 + $0x2e4] ss:$16 sps:$4 sm:$0xff]   ;;  %s4355_s11 = smov (!%p712_p8, %s2724_s11), 7 }
  0xb7   : > { %2328 = vmatprep.subr.bf16.mxu0 %v3094_v34  ;;  %2492 = vmatprep.subr.bf16.mxu1 %v3096_v35  ;;  %v2730_v30 = vcombine.high %v4139_v29, %v4139_v29  ;;  %v3183_v32 = vld [vmem:[%s4042_s4 + $0x2c8] ss:$16 sps:$4 sm:$0xff]   ;;  %v3191_v34 = vld [vmem:[%s4042_s4 + $0x2ec] ss:$16 sps:$4 sm:$0xff]   ;;  %v3186_v35 = vld [vmem:[%s4042_s4 + $0x2e0] ss:$16 sps:$4 sm:$0xff]   ;;  %s714_s18 = scalar_lea.vmem %s4349_s2, %s4355_s11 }
  0xb8   : > { %s2726_s20 = sshll.u32 %s4355_s11, 3 }
  0xb9   : > { %s720_s15 = scalar_lea.vmem %s4350_s3, %s2726_s20 }
  0xba   : > { %2329 = vmatpush1.bf16.msra.mxu0 %v3098_v36  ;;  %2493 = vmatpush1.bf16.msra.mxu1 %v3099_v37  ;;  %v3189_v36 = vld [vmem:[%s4042_s4 + $0x2e8] ss:$16 sps:$4 sm:$0xff]   ;;  %v3194_v37 = vld [vmem:[%s4042_s4 + $0x304] ss:$16 sps:$4 sm:$0xff]  }
  0xbb   : > { %2330 = vmatprep.subr.bf16.mxu0 %v3100_v38  ;;  %2494 = vmatprep.subr.bf16.mxu1 %v3102_v39  ;;  %v3197_v38 = vld [vmem:[%s4042_s4 + $0x30c] ss:$16 sps:$4 sm:$0xff]   ;;  %v3192_v39 = vld [vmem:[%s4042_s4 + $0x300] ss:$16 sps:$4 sm:$0xff]  }
  0xbe   : > { %2331 = vmatpush1.bf16.msra.mxu0 %v3104_v40  ;;  %2495 = vmatpush1.bf16.msra.mxu1 %v3105_v41  ;;  %v3195_v40 = vld [vmem:[%s4042_s4 + $0x308] ss:$16 sps:$4 sm:$0xff]   ;;  %v3200_v41 = vld [vmem:[%s4042_s4 + $0x324] ss:$16 sps:$4 sm:$0xff]  }
  0xbf   : > { %2332 = vmatprep.subr.bf16.mxu0 %v3106_v42  ;;  %2496 = vmatprep.subr.bf16.mxu1 %v3108_v43  ;;  %v3203_v42 = vld [vmem:[%s4042_s4 + $0x32c] ss:$16 sps:$4 sm:$0xff]   ;;  %v3198_v43 = vld [vmem:[%s4042_s4 + $0x320] ss:$16 sps:$4 sm:$0xff]  }
  0xc2   : > { %2333 = vmatpush1.bf16.msra.mxu0 %v3110_v44  ;;  %2497 = vmatpush1.bf16.msra.mxu1 %v3111_v45  ;;  %v3201_v44 = vld [vmem:[%s4042_s4 + $0x328] ss:$16 sps:$4 sm:$0xff]   ;;  %v3206_v45 = vld [vmem:[%s4042_s4 + $0x344] ss:$16 sps:$4 sm:$0xff]  }
  0xc3   : > { %2334 = vmatprep.subr.bf16.mxu0 %v3112_v46  ;;  %2498 = vmatprep.subr.bf16.mxu1 %v3114_v47  ;;  %v3209_v46 = vld [vmem:[%s4042_s4 + $0x34c] ss:$16 sps:$4 sm:$0xff]   ;;  %v3204_v47 = vld [vmem:[%s4042_s4 + $0x340] ss:$16 sps:$4 sm:$0xff]  }
  0xc6   : > { %2335 = vmatpush1.bf16.msra.mxu0 %v3116_v48  ;;  %2499 = vmatpush1.bf16.msra.mxu1 %v3117_v49  ;;  %v3207_v48 = vld [vmem:[%s4042_s4 + $0x348] ss:$16 sps:$4 sm:$0xff]   ;;  %v3212_v49 = vld [vmem:[%s4042_s4 + $0x364] ss:$16 sps:$4 sm:$0xff]  }
  0xc7   : > { %2336 = vmatprep.subr.bf16.mxu0 %v3118_v50  ;;  %2500 = vmatprep.subr.bf16.mxu1 %v3120_v51  ;;  %v3215_v50 = vld [vmem:[%s4042_s4 + $0x36c] ss:$16 sps:$4 sm:$0xff]   ;;  %v3210_v51 = vld [vmem:[%s4042_s4 + $0x360] ss:$16 sps:$4 sm:$0xff]  }
  0xca   : > { %2337 = vmatpush1.bf16.msra.mxu0 %v3122_v52  ;;  %2501 = vmatpush1.bf16.msra.mxu1 %v3123_v53  ;;  %v3213_v52 = vld [vmem:[%s4042_s4 + $0x368] ss:$16 sps:$4 sm:$0xff]   ;;  %v3218_v53 = vld [vmem:[%s4042_s4 + $0x384] ss:$16 sps:$4 sm:$0xff]  }
  0xcb   : > { %2338 = vmatprep.subr.bf16.mxu0 %v3124_v54  ;;  %2502 = vmatprep.subr.bf16.mxu1 %v3126_v55  ;;  %v3221_v54 = vld [vmem:[%s4042_s4 + $0x38c] ss:$16 sps:$4 sm:$0xff]   ;;  %v3216_v55 = vld [vmem:[%s4042_s4 + $0x380] ss:$16 sps:$4 sm:$0xff]  }
  0xce   : > { %2339 = vmatpush1.bf16.msra.mxu0 %v3128_v56  ;;  %2503 = vmatpush1.bf16.msra.mxu1 %v3129_v57  ;;  %v3219_v56 = vld [vmem:[%s4042_s4 + $0x388] ss:$16 sps:$4 sm:$0xff]   ;;  %v3224_v57 = vld [vmem:[%s4042_s4 + $0x3a4] ss:$16 sps:$4 sm:$0xff]  }
  0xcf   : > { %2340 = vmatprep.subr.bf16.mxu0 %v3130_v58  ;;  %2504 = vmatprep.subr.bf16.mxu1 %v3132_v59  ;;  %v3227_v58 = vld [vmem:[%s4042_s4 + $0x3ac] ss:$16 sps:$4 sm:$0xff]   ;;  %v3222_v59 = vld [vmem:[%s4042_s4 + $0x3a0] ss:$16 sps:$4 sm:$0xff]  }
  0xd2   : > { %2341 = vmatpush1.bf16.msra.mxu0 %v3134_v60  ;;  %2505 = vmatpush1.bf16.msra.mxu1 %v3135_v61  ;;  %v3225_v60 = vld [vmem:[%s4042_s4 + $0x3a8] ss:$16 sps:$4 sm:$0xff]   ;;  %v3230_v61 = vld [vmem:[%s4042_s4 + $0x3c4] ss:$16 sps:$4 sm:$0xff]  }
  0xd3   : > { %2342 = vmatprep.subr.bf16.mxu0 %v3136_v62  ;;  %2506 = vmatprep.subr.bf16.mxu1 %v3138_v63  ;;  %v3233_v62 = vld [vmem:[%s4042_s4 + $0x3cc] ss:$16 sps:$4 sm:$0xff]   ;;  %v3228_v63 = vld [vmem:[%s4042_s4 + $0x3c0] ss:$16 sps:$4 sm:$0xff]  }
  0xd6   : > { %2343 = vmatpush1.bf16.msra.mxu0 %v3140_v1  ;;  %2507 = vmatpush1.bf16.msra.mxu1 %v3141_v2  ;;  %v3231_v1 = vld [vmem:[%s4042_s4 + $0x3c8] ss:$16 sps:$4 sm:$0xff]   ;;  %v3236_v2 = vld [vmem:[%s4042_s4 + $0x3e4] ss:$16 sps:$4 sm:$0xff]  }
  0xd7   : > { %2353 = vmatprep.subr.bf16.mxu0 %v3146_v3  ;;  %2517 = vmatprep.subr.bf16.mxu1 %v3149_v4  ;;  %v3239_v3 = vld [vmem:[%s4042_s4 + $0x3ec] ss:$16 sps:$4 sm:$0xff]   ;;  %v3234_v4 = vld [vmem:[%s4042_s4 + $0x3e0] ss:$16 sps:$4 sm:$0xff]  }
  0xd9   : > { %2345 = vmatmul.mubr.bf16.vlgmr.msra.gmra.mrb[0].mxu0 %v2727_v5  ;;  %2509 = vmatmul.mubr.bf16.vlgmr.msra.gmra.mrb[0].mxu1 %v2727_v5  ;;  %v3237_v5 = vld [vmem:[%s4042_s4 + $0x3e8] ss:$16 sps:$4 sm:$0xff]  }
  0xda   : > { %2354 = vmatpush1.bf16.msra.mxu0 %v3144_v6  ;;  %2518 = vmatpush1.bf16.msra.mxu1 %v3147_v7  ;;  %v3244_v6 = vld [vmem:[%s4042_s4 + $0x404] ss:$16 sps:$4 sm:$0xff]   ;;  %v3247_v7 = vld [vmem:[%s4042_s4 + $0x40c] ss:$16 sps:$4 sm:$0xff]  }
  0xdb   : > { %2355 = vmatprep.subr.bf16.mxu0 %v3152_v8  ;;  %2519 = vmatprep.subr.bf16.mxu1 %v3155_v9  ;;  %v2729_v8 = vcombine.low %v4139_v29, %v4139_v29  ;;  %v3242_v9 = vld [vmem:[%s4042_s4 + $0x400] ss:$16 sps:$4 sm:$0xff]   ;;  %v3277_v29 = vld [vmem:[%s4042_s4 + $0x4ac] ss:$16 sps:$4 sm:$0xff]  }
  0xdc   : > { %2385 = vmatprep.mubr.bf16.mxu0 %v2730_v30  ;;  %2549 = vmatprep.mubr.bf16.mxu1 %v2730_v30  ;;  %v3272_v30 = vld [vmem:[%s4042_s4 + $0x4a0] ss:$16 sps:$4 sm:$0xff]  }
  0xde   : > { %2356 = vmatpush1.bf16.msra.mxu0 %v3150_v10  ;;  %2520 = vmatpush1.bf16.msra.mxu1 %v3153_v11  ;;  %v3245_v10 = vld [vmem:[%s4042_s4 + $0x408] ss:$16 sps:$4 sm:$0xff]   ;;  %v4190_v11 = vld [vmem:[%s4347_s0 + $0x10] sm:$0xff] }
  0xdf   : > { %2357 = vmatprep.subr.bf16.mxu0 %v3158_v0  ;;  %2521 = vmatprep.subr.bf16.mxu1 %v3161_v12  ;;  %v3250_v0 = vld [vmem:[%s4042_s4 + $0x424] ss:$16 sps:$4 sm:$0xff]   ;;  %v3253_v12 = vld [vmem:[%s4042_s4 + $0x42c] ss:$16 sps:$4 sm:$0xff]  }
  0xe2   : > { %2358 = vmatpush1.bf16.msra.mxu0 %v3156_v13  ;;  %2522 = vmatpush1.bf16.msra.mxu1 %v3159_v14  ;;  %v2732_v13 = vcombine.high %v4190_v11, %v4190_v11  ;;  %v3248_v14 = vld [vmem:[%s4042_s4 + $0x420] ss:$16 sps:$4 sm:$0xff]  }
  0xe3   : > { %2359 = vmatprep.subr.bf16.mxu0 %v3164_v15  ;;  %2523 = vmatprep.subr.bf16.mxu1 %v3167_v16  ;;  %v3251_v15 = vld [vmem:[%s4042_s4 + $0x428] ss:$16 sps:$4 sm:$0xff]   ;;  %v3256_v16 = vld [vmem:[%s4042_s4 + $0x444] ss:$16 sps:$4 sm:$0xff]  }
  0xe6   : > { %2360 = vmatpush1.bf16.msra.mxu0 %v3162_v17  ;;  %2524 = vmatpush1.bf16.msra.mxu1 %v3165_v18  ;;  %v3259_v17 = vld [vmem:[%s4042_s4 + $0x44c] ss:$16 sps:$4 sm:$0xff]   ;;  %v3254_v18 = vld [vmem:[%s4042_s4 + $0x440] ss:$16 sps:$4 sm:$0xff]  }
  0xe7   : > { %2361 = vmatprep.subr.bf16.mxu0 %v3170_v19  ;;  %2525 = vmatprep.subr.bf16.mxu1 %v3173_v20  ;;  %v3257_v19 = vld [vmem:[%s4042_s4 + $0x448] ss:$16 sps:$4 sm:$0xff]   ;;  %v3262_v20 = vld [vmem:[%s4042_s4 + $0x464] ss:$16 sps:$4 sm:$0xff]  }
  0xea   : > { %2362 = vmatpush1.bf16.msra.mxu0 %v3168_v21  ;;  %2526 = vmatpush1.bf16.msra.mxu1 %v3171_v22  ;;  %v3265_v21 = vld [vmem:[%s4042_s4 + $0x46c] ss:$16 sps:$4 sm:$0xff]   ;;  %v3260_v22 = vld [vmem:[%s4042_s4 + $0x460] ss:$16 sps:$4 sm:$0xff]  }
  0xeb   : > { %2363 = vmatprep.subr.bf16.mxu0 %v3176_v23  ;;  %2527 = vmatprep.subr.bf16.mxu1 %v3179_v24  ;;  %v3263_v23 = vld [vmem:[%s4042_s4 + $0x468] ss:$16 sps:$4 sm:$0xff]   ;;  %v3268_v24 = vld [vmem:[%s4042_s4 + $0x484] ss:$16 sps:$4 sm:$0xff]  }
  0xee   : > { %2364 = vmatpush1.bf16.msra.mxu0 %v3174_v25  ;;  %2528 = vmatpush1.bf16.msra.mxu1 %v3177_v26  ;;  %v3271_v25 = vld [vmem:[%s4042_s4 + $0x48c] ss:$16 sps:$4 sm:$0xff]   ;;  %v3266_v26 = vld [vmem:[%s4042_s4 + $0x480] ss:$16 sps:$4 sm:$0xff]  }
  0xef   : > { %2365 = vmatprep.subr.bf16.mxu0 %v3182_v27  ;;  %2529 = vmatprep.subr.bf16.mxu1 %v3185_v28  ;;  %v3269_v27 = vld [vmem:[%s4042_s4 + $0x488] ss:$16 sps:$4 sm:$0xff]   ;;  %v3274_v28 = vld [vmem:[%s4042_s4 + $0x4a4] ss:$16 sps:$4 sm:$0xff]  }
  0xf2   : > { %2366 = vmatpush1.bf16.msra.mxu0 %v3180_v31  ;;  %2530 = vmatpush1.bf16.msra.mxu1 %v3183_v32  ;;  %v3275_v31 = vld [vmem:[%s4042_s4 + $0x4a8] ss:$16 sps:$4 sm:$0xff]   ;;  %v3280_v32 = vld [vmem:[%s4042_s4 + $0x4c4] ss:$16 sps:$4 sm:$0xff]  }
  0xf3   : > { %2367 = vmatprep.subr.bf16.mxu0 %v3188_v33  ;;  %2531 = vmatprep.subr.bf16.mxu1 %v3191_v34  ;;  %v3283_v33 = vld [vmem:[%s4042_s4 + $0x4cc] ss:$16 sps:$4 sm:$0xff]   ;;  %v3278_v34 = vld [vmem:[%s4042_s4 + $0x4c0] ss:$16 sps:$4 sm:$0xff]  }
  0xf6   : > { %2368 = vmatpush1.bf16.msra.mxu0 %v3186_v35  ;;  %2532 = vmatpush1.bf16.msra.mxu1 %v3189_v36  ;;  %v3281_v35 = vld [vmem:[%s4042_s4 + $0x4c8] ss:$16 sps:$4 sm:$0xff]   ;;  %v3286_v36 = vld [vmem:[%s4042_s4 + $0x4e4] ss:$16 sps:$4 sm:$0xff]  }
  0xf7   : > { %2369 = vmatprep.subr.bf16.mxu0 %v3194_v37  ;;  %2533 = vmatprep.subr.bf16.mxu1 %v3197_v38  ;;  %v3289_v37 = vld [vmem:[%s4042_s4 + $0x4ec] ss:$16 sps:$4 sm:$0xff]   ;;  %v3284_v38 = vld [vmem:[%s4042_s4 + $0x4e0] ss:$16 sps:$4 sm:$0xff]  }
  0xfa   : > { %2370 = vmatpush1.bf16.msra.mxu0 %v3192_v39  ;;  %2534 = vmatpush1.bf16.msra.mxu1 %v3195_v40  ;;  %v3287_v39 = vld [vmem:[%s4042_s4 + $0x4e8] ss:$16 sps:$4 sm:$0xff]   ;;  %v3292_v40 = vld [vmem:[%s4042_s4 + $0x504] ss:$16 sps:$4 sm:$0xff]  }
  0xfb   : > { %2371 = vmatprep.subr.bf16.mxu0 %v3200_v41  ;;  %2535 = vmatprep.subr.bf16.mxu1 %v3203_v42  ;;  %v3295_v41 = vld [vmem:[%s4042_s4 + $0x50c] ss:$16 sps:$4 sm:$0xff]   ;;  %v3290_v42 = vld [vmem:[%s4042_s4 + $0x500] ss:$16 sps:$4 sm:$0xff]  }
  0xfe   : > { %2372 = vmatpush1.bf16.msra.mxu0 %v3198_v43  ;;  %2536 = vmatpush1.bf16.msra.mxu1 %v3201_v44  ;;  %v3293_v43 = vld [vmem:[%s4042_s4 + $0x508] ss:$16 sps:$4 sm:$0xff]   ;;  %v3298_v44 = vld [vmem:[%s4042_s4 + $0x524] ss:$16 sps:$4 sm:$0xff]  }
  0xff   : > { %2373 = vmatprep.subr.bf16.mxu0 %v3206_v45  ;;  %2537 = vmatprep.subr.bf16.mxu1 %v3209_v46  ;;  %v3301_v45 = vld [vmem:[%s4042_s4 + $0x52c] ss:$16 sps:$4 sm:$0xff]   ;;  %v3296_v46 = vld [vmem:[%s4042_s4 + $0x520] ss:$16 sps:$4 sm:$0xff]  }
 0x102   : > { %2374 = vmatpush1.bf16.msra.mxu0 %v3204_v47  ;;  %2538 = vmatpush1.bf16.msra.mxu1 %v3207_v48  ;;  %v3299_v47 = vld [vmem:[%s4042_s4 + $0x528] ss:$16 sps:$4 sm:$0xff]   ;;  %v3304_v48 = vld [vmem:[%s4042_s4 + $0x544] ss:$16 sps:$4 sm:$0xff]  }
 0x103   : > { %2375 = vmatprep.subr.bf16.mxu0 %v3212_v49  ;;  %2539 = vmatprep.subr.bf16.mxu1 %v3215_v50  ;;  %v3307_v49 = vld [vmem:[%s4042_s4 + $0x54c] ss:$16 sps:$4 sm:$0xff]   ;;  %v3302_v50 = vld [vmem:[%s4042_s4 + $0x540] ss:$16 sps:$4 sm:$0xff]  }
 0x106   : > { %2376 = vmatpush1.bf16.msra.mxu0 %v3210_v51  ;;  %2540 = vmatpush1.bf16.msra.mxu1 %v3213_v52  ;;  %v3305_v51 = vld [vmem:[%s4042_s4 + $0x548] ss:$16 sps:$4 sm:$0xff]   ;;  %v3310_v52 = vld [vmem:[%s4042_s4 + $0x564] ss:$16 sps:$4 sm:$0xff]  }
 0x107   : > { %2377 = vmatprep.subr.bf16.mxu0 %v3218_v53  ;;  %2541 = vmatprep.subr.bf16.mxu1 %v3221_v54  ;;  %v3313_v53 = vld [vmem:[%s4042_s4 + $0x56c] ss:$16 sps:$4 sm:$0xff]   ;;  %v3308_v54 = vld [vmem:[%s4042_s4 + $0x560] ss:$16 sps:$4 sm:$0xff]  }
 0x10a   : > { %2378 = vmatpush1.bf16.msra.mxu0 %v3216_v55  ;;  %2542 = vmatpush1.bf16.msra.mxu1 %v3219_v56  ;;  %v3311_v55 = vld [vmem:[%s4042_s4 + $0x568] ss:$16 sps:$4 sm:$0xff]   ;;  %v3316_v56 = vld [vmem:[%s4042_s4 + $0x584] ss:$16 sps:$4 sm:$0xff]  }
 0x10b   : > { %2379 = vmatprep.subr.bf16.mxu0 %v3224_v57  ;;  %2543 = vmatprep.subr.bf16.mxu1 %v3227_v58  ;;  %v3319_v57 = vld [vmem:[%s4042_s4 + $0x58c] ss:$16 sps:$4 sm:$0xff]   ;;  %v3314_v58 = vld [vmem:[%s4042_s4 + $0x580] ss:$16 sps:$4 sm:$0xff]  }
 0x10e   : > { %2380 = vmatpush1.bf16.msra.mxu0 %v3222_v59  ;;  %2544 = vmatpush1.bf16.msra.mxu1 %v3225_v60  ;;  %v3317_v59 = vld [vmem:[%s4042_s4 + $0x588] ss:$16 sps:$4 sm:$0xff]   ;;  %v3322_v60 = vld [vmem:[%s4042_s4 + $0x5a4] ss:$16 sps:$4 sm:$0xff]  }
 0x10f   : > { %2381 = vmatprep.subr.bf16.mxu0 %v3230_v61  ;;  %2545 = vmatprep.subr.bf16.mxu1 %v3233_v62  ;;  %v3325_v61 = vld [vmem:[%s4042_s4 + $0x5ac] ss:$16 sps:$4 sm:$0xff]   ;;  %v3320_v62 = vld [vmem:[%s4042_s4 + $0x5a0] ss:$16 sps:$4 sm:$0xff]  }
 0x112   : > { %2382 = vmatpush1.bf16.msra.mxu0 %v3228_v63  ;;  %2546 = vmatpush1.bf16.msra.mxu1 %v3231_v1  ;;  %v3323_v63 = vld [vmem:[%s4042_s4 + $0x5a8] ss:$16 sps:$4 sm:$0xff]   ;;  %v3328_v1 = vld [vmem:[%s4042_s4 + $0x5c4] ss:$16 sps:$4 sm:$0xff]  }
 0x113   : > { %2383 = vmatprep.subr.bf16.mxu0 %v3236_v2  ;;  %2547 = vmatprep.subr.bf16.mxu1 %v3239_v3  ;;  %v3331_v2 = vld [vmem:[%s4042_s4 + $0x5cc] ss:$16 sps:$4 sm:$0xff]   ;;  %v3326_v3 = vld [vmem:[%s4042_s4 + $0x5c0] ss:$16 sps:$4 sm:$0xff]  }
 0x116   : > { %2384 = vmatpush1.bf16.msra.mxu0 %v3234_v4  ;;  %2548 = vmatpush1.bf16.msra.mxu1 %v3237_v5  ;;  %v3329_v4 = vld [vmem:[%s4042_s4 + $0x5c8] ss:$16 sps:$4 sm:$0xff]   ;;  %v3334_v5 = vld [vmem:[%s4042_s4 + $0x5e4] ss:$16 sps:$4 sm:$0xff]  }
 0x117   : > { %2394 = vmatprep.subr.bf16.mxu0 %v3244_v6  ;;  %2558 = vmatprep.subr.bf16.mxu1 %v3247_v7  ;;  %v3337_v6 = vld [vmem:[%s4042_s4 + $0x5ec] ss:$16 sps:$4 sm:$0xff]   ;;  %v3332_v7 = vld [vmem:[%s4042_s4 + $0x5e0] ss:$16 sps:$4 sm:$0xff]  }
 0x119   : > { %2386 = vmatmul.mubr.bf16.vlgmr.msra.gmra.mrb[0].mxu0 %v2729_v8  ;;  %2550 = vmatmul.mubr.bf16.vlgmr.msra.gmra.mrb[0].mxu1 %v2729_v8  ;;  %v3335_v8 = vld [vmem:[%s4042_s4 + $0x5e8] ss:$16 sps:$4 sm:$0xff]  }
 0x11a   : > { %2395 = vmatpush1.bf16.msra.mxu0 %v3242_v9  ;;  %2559 = vmatpush1.bf16.msra.mxu1 %v3245_v10  ;;  %v3342_v9 = vld [vmem:[%s4042_s4 + $0x604] ss:$16 sps:$4 sm:$0xff]   ;;  %v3345_v10 = vld [vmem:[%s4042_s4 + $0x60c] ss:$16 sps:$4 sm:$0xff]  }
 0x11b   : > { %2396 = vmatprep.subr.bf16.mxu0 %v3250_v0  ;;  %2560 = vmatprep.subr.bf16.mxu1 %v3253_v12  ;;  %v2731_v0 = vcombine.low %v4190_v11, %v4190_v11  ;;  %v4261_v12 = vld [vmem:[%s4347_s0 + $0x18] sm:$0xff] }
 0x11c   : > { %2426 = vmatprep.mubr.bf16.mxu0 %v2732_v13  ;;  %2590 = vmatprep.mubr.bf16.mxu1 %v2732_v13  ;;  %v3340_v13 = vld [vmem:[%s4042_s4 + $0x600] ss:$16 sps:$4 sm:$0xff]   ;;  %v2734_v11 = vcombine.high %v4261_v12, %v4261_v12 }
 0x11e   : > { %2397 = vmatpush1.bf16.msra.mxu0 %v3248_v14  ;;  %2561 = vmatpush1.bf16.msra.mxu1 %v3251_v15  ;;  %v3343_v14 = vld [vmem:[%s4042_s4 + $0x608] ss:$16 sps:$4 sm:$0xff]   ;;  %v3348_v15 = vld [vmem:[%s4042_s4 + $0x624] ss:$16 sps:$4 sm:$0xff]  }
 0x11f   : > { %2398 = vmatprep.subr.bf16.mxu0 %v3256_v16  ;;  %2562 = vmatprep.subr.bf16.mxu1 %v3259_v17  ;;  %v3351_v16 = vld [vmem:[%s4042_s4 + $0x62c] ss:$16 sps:$4 sm:$0xff]   ;;  %v3346_v17 = vld [vmem:[%s4042_s4 + $0x620] ss:$16 sps:$4 sm:$0xff]  }
 0x122   : > { %2399 = vmatpush1.bf16.msra.mxu0 %v3254_v18  ;;  %2563 = vmatpush1.bf16.msra.mxu1 %v3257_v19  ;;  %v3349_v18 = vld [vmem:[%s4042_s4 + $0x628] ss:$16 sps:$4 sm:$0xff]   ;;  %v3354_v19 = vld [vmem:[%s4042_s4 + $0x644] ss:$16 sps:$4 sm:$0xff]  }
 0x123   : > { %2400 = vmatprep.subr.bf16.mxu0 %v3262_v20  ;;  %2564 = vmatprep.subr.bf16.mxu1 %v3265_v21  ;;  %v3357_v20 = vld [vmem:[%s4042_s4 + $0x64c] ss:$16 sps:$4 sm:$0xff]   ;;  %v3352_v21 = vld [vmem:[%s4042_s4 + $0x640] ss:$16 sps:$4 sm:$0xff]  }
 0x126   : > { %2401 = vmatpush1.bf16.msra.mxu0 %v3260_v22  ;;  %2565 = vmatpush1.bf16.msra.mxu1 %v3263_v23  ;;  %v3355_v22 = vld [vmem:[%s4042_s4 + $0x648] ss:$16 sps:$4 sm:$0xff]   ;;  %v3360_v23 = vld [vmem:[%s4042_s4 + $0x664] ss:$16 sps:$4 sm:$0xff]  }
 0x127   : > { %2402 = vmatprep.subr.bf16.mxu0 %v3268_v24  ;;  %2566 = vmatprep.subr.bf16.mxu1 %v3271_v25  ;;  %v3363_v24 = vld [vmem:[%s4042_s4 + $0x66c] ss:$16 sps:$4 sm:$0xff]   ;;  %v3358_v25 = vld [vmem:[%s4042_s4 + $0x660] ss:$16 sps:$4 sm:$0xff]  }
 0x12a   : > { %2403 = vmatpush1.bf16.msra.mxu0 %v3266_v26  ;;  %2567 = vmatpush1.bf16.msra.mxu1 %v3269_v27  ;;  %v3361_v26 = vld [vmem:[%s4042_s4 + $0x668] ss:$16 sps:$4 sm:$0xff]   ;;  %v3366_v27 = vld [vmem:[%s4042_s4 + $0x684] ss:$16 sps:$4 sm:$0xff]  }
 0x12b   : > { %2404 = vmatprep.subr.bf16.mxu0 %v3274_v28  ;;  %2568 = vmatprep.subr.bf16.mxu1 %v3277_v29  ;;  %v3369_v28 = vld [vmem:[%s4042_s4 + $0x68c] ss:$16 sps:$4 sm:$0xff]   ;;  %v3364_v29 = vld [vmem:[%s4042_s4 + $0x680] ss:$16 sps:$4 sm:$0xff]  }
 0x12e   : > { %2405 = vmatpush1.bf16.msra.mxu0 %v3272_v30  ;;  %2569 = vmatpush1.bf16.msra.mxu1 %v3275_v31  ;;  %v3367_v30 = vld [vmem:[%s4042_s4 + $0x688] ss:$16 sps:$4 sm:$0xff]   ;;  %v3372_v31 = vld [vmem:[%s4042_s4 + $0x6a4] ss:$16 sps:$4 sm:$0xff]  }
 0x12f   : > { %2406 = vmatprep.subr.bf16.mxu0 %v3280_v32  ;;  %2570 = vmatprep.subr.bf16.mxu1 %v3283_v33  ;;  %v3375_v32 = vld [vmem:[%s4042_s4 + $0x6ac] ss:$16 sps:$4 sm:$0xff]   ;;  %v3370_v33 = vld [vmem:[%s4042_s4 + $0x6a0] ss:$16 sps:$4 sm:$0xff]  }
 0x132   : > { %2407 = vmatpush1.bf16.msra.mxu0 %v3278_v34  ;;  %2571 = vmatpush1.bf16.msra.mxu1 %v3281_v35  ;;  %v3373_v34 = vld [vmem:[%s4042_s4 + $0x6a8] ss:$16 sps:$4 sm:$0xff]   ;;  %v3378_v35 = vld [vmem:[%s4042_s4 + $0x6c4] ss:$16 sps:$4 sm:$0xff]  }
 0x133   : > { %2408 = vmatprep.subr.bf16.mxu0 %v3286_v36  ;;  %2572 = vmatprep.subr.bf16.mxu1 %v3289_v37  ;;  %v3381_v36 = vld [vmem:[%s4042_s4 + $0x6cc] ss:$16 sps:$4 sm:$0xff]   ;;  %v3376_v37 = vld [vmem:[%s4042_s4 + $0x6c0] ss:$16 sps:$4 sm:$0xff]  }
 0x136   : > { %2409 = vmatpush1.bf16.msra.mxu0 %v3284_v38  ;;  %2573 = vmatpush1.bf16.msra.mxu1 %v3287_v39  ;;  %v3379_v38 = vld [vmem:[%s4042_s4 + $0x6c8] ss:$16 sps:$4 sm:$0xff]   ;;  %v3384_v39 = vld [vmem:[%s4042_s4 + $0x6e4] ss:$16 sps:$4 sm:$0xff]  }
 0x137   : > { %2410 = vmatprep.subr.bf16.mxu0 %v3292_v40  ;;  %2574 = vmatprep.subr.bf16.mxu1 %v3295_v41  ;;  %v3387_v40 = vld [vmem:[%s4042_s4 + $0x6ec] ss:$16 sps:$4 sm:$0xff]   ;;  %v3382_v41 = vld [vmem:[%s4042_s4 + $0x6e0] ss:$16 sps:$4 sm:$0xff]  }
 0x13a   : > { %2411 = vmatpush1.bf16.msra.mxu0 %v3290_v42  ;;  %2575 = vmatpush1.bf16.msra.mxu1 %v3293_v43  ;;  %v3385_v42 = vld [vmem:[%s4042_s4 + $0x6e8] ss:$16 sps:$4 sm:$0xff]   ;;  %v3390_v43 = vld [vmem:[%s4042_s4 + $0x704] ss:$16 sps:$4 sm:$0xff]  }
 0x13b   : > { %2412 = vmatprep.subr.bf16.mxu0 %v3298_v44  ;;  %2576 = vmatprep.subr.bf16.mxu1 %v3301_v45  ;;  %v3393_v44 = vld [vmem:[%s4042_s4 + $0x70c] ss:$16 sps:$4 sm:$0xff]   ;;  %v3388_v45 = vld [vmem:[%s4042_s4 + $0x700] ss:$16 sps:$4 sm:$0xff]  }
 0x13e   : > { %2413 = vmatpush1.bf16.msra.mxu0 %v3296_v46  ;;  %2577 = vmatpush1.bf16.msra.mxu1 %v3299_v47  ;;  %v3391_v46 = vld [vmem:[%s4042_s4 + $0x708] ss:$16 sps:$4 sm:$0xff]   ;;  %v3396_v47 = vld [vmem:[%s4042_s4 + $0x724] ss:$16 sps:$4 sm:$0xff]  }
 0x13f   : > { %2414 = vmatprep.subr.bf16.mxu0 %v3304_v48  ;;  %2578 = vmatprep.subr.bf16.mxu1 %v3307_v49  ;;  %v3399_v48 = vld [vmem:[%s4042_s4 + $0x72c] ss:$16 sps:$4 sm:$0xff]   ;;  %v3394_v49 = vld [vmem:[%s4042_s4 + $0x720] ss:$16 sps:$4 sm:$0xff]  }
 0x142   : > { %2415 = vmatpush1.bf16.msra.mxu0 %v3302_v50  ;;  %2579 = vmatpush1.bf16.msra.mxu1 %v3305_v51  ;;  %v3397_v50 = vld [vmem:[%s4042_s4 + $0x728] ss:$16 sps:$4 sm:$0xff]   ;;  %v3402_v51 = vld [vmem:[%s4042_s4 + $0x744] ss:$16 sps:$4 sm:$0xff]  }
 0x143   : > { %2416 = vmatprep.subr.bf16.mxu0 %v3310_v52  ;;  %2580 = vmatprep.subr.bf16.mxu1 %v3313_v53  ;;  %v3405_v52 = vld [vmem:[%s4042_s4 + $0x74c] ss:$16 sps:$4 sm:$0xff]   ;;  %v3400_v53 = vld [vmem:[%s4042_s4 + $0x740] ss:$16 sps:$4 sm:$0xff]  }
 0x146   : > { %2417 = vmatpush1.bf16.msra.mxu0 %v3308_v54  ;;  %2581 = vmatpush1.bf16.msra.mxu1 %v3311_v55  ;;  %v3403_v54 = vld [vmem:[%s4042_s4 + $0x748] ss:$16 sps:$4 sm:$0xff]   ;;  %v3408_v55 = vld [vmem:[%s4042_s4 + $0x764] ss:$16 sps:$4 sm:$0xff]  }
 0x147   : > { %2418 = vmatprep.subr.bf16.mxu0 %v3316_v56  ;;  %2582 = vmatprep.subr.bf16.mxu1 %v3319_v57  ;;  %v3411_v56 = vld [vmem:[%s4042_s4 + $0x76c] ss:$16 sps:$4 sm:$0xff]   ;;  %v3406_v57 = vld [vmem:[%s4042_s4 + $0x760] ss:$16 sps:$4 sm:$0xff]  }
 0x14a   : > { %2419 = vmatpush1.bf16.msra.mxu0 %v3314_v58  ;;  %2583 = vmatpush1.bf16.msra.mxu1 %v3317_v59  ;;  %v3409_v58 = vld [vmem:[%s4042_s4 + $0x768] ss:$16 sps:$4 sm:$0xff]   ;;  %v3414_v59 = vld [vmem:[%s4042_s4 + $0x784] ss:$16 sps:$4 sm:$0xff]  }
 0x14b   : > { %2420 = vmatprep.subr.bf16.mxu0 %v3322_v60  ;;  %2584 = vmatprep.subr.bf16.mxu1 %v3325_v61  ;;  %v3417_v60 = vld [vmem:[%s4042_s4 + $0x78c] ss:$16 sps:$4 sm:$0xff]   ;;  %v3412_v61 = vld [vmem:[%s4042_s4 + $0x780] ss:$16 sps:$4 sm:$0xff]  }
 0x14e   : > { %2421 = vmatpush1.bf16.msra.mxu0 %v3320_v62  ;;  %2585 = vmatpush1.bf16.msra.mxu1 %v3323_v63  ;;  %v3415_v62 = vld [vmem:[%s4042_s4 + $0x788] ss:$16 sps:$4 sm:$0xff]   ;;  %v3420_v63 = vld [vmem:[%s4042_s4 + $0x7a4] ss:$16 sps:$4 sm:$0xff]  }
 0x14f   : > { %2422 = vmatprep.subr.bf16.mxu0 %v3328_v1  ;;  %2586 = vmatprep.subr.bf16.mxu1 %v3331_v2  ;;  %v3423_v1 = vld [vmem:[%s4042_s4 + $0x7ac] ss:$16 sps:$4 sm:$0xff]   ;;  %v3418_v2 = vld [vmem:[%s4042_s4 + $0x7a0] ss:$16 sps:$4 sm:$0xff]  }
 0x152   : > { %2423 = vmatpush1.bf16.msra.mxu0 %v3326_v3  ;;  %2587 = vmatpush1.bf16.msra.mxu1 %v3329_v4  ;;  %v3421_v3 = vld [vmem:[%s4042_s4 + $0x7a8] ss:$16 sps:$4 sm:$0xff]   ;;  %v3426_v4 = vld [vmem:[%s4042_s4 + $0x7c4] ss:$16 sps:$4 sm:$0xff]  }
 0x153   : > { %2424 = vmatprep.subr.bf16.mxu0 %v3334_v5  ;;  %2588 = vmatprep.subr.bf16.mxu1 %v3337_v6  ;;  %v3429_v5 = vld [vmem:[%s4042_s4 + $0x7cc] ss:$16 sps:$4 sm:$0xff]   ;;  %v3424_v6 = vld [vmem:[%s4042_s4 + $0x7c0] ss:$16 sps:$4 sm:$0xff]  }
 0x156   : > { %2425 = vmatpush1.bf16.msra.mxu0 %v3332_v7  ;;  %2589 = vmatpush1.bf16.msra.mxu1 %v3335_v8  ;;  %v3427_v7 = vld [vmem:[%s4042_s4 + $0x7c8] ss:$16 sps:$4 sm:$0xff]   ;;  %v3432_v8 = vld [vmem:[%s4042_s4 + $0x7e4] ss:$16 sps:$4 sm:$0xff]  }
 0x157   : > { %2435 = vmatprep.subr.bf16.mxu0 %v3342_v9  ;;  %2599 = vmatprep.subr.bf16.mxu1 %v3345_v10  ;;  %v3435_v9 = vld [vmem:[%s4042_s4 + $0x7ec] ss:$16 sps:$4 sm:$0xff]   ;;  %v3430_v10 = vld [vmem:[%s4042_s4 + $0x7e0] ss:$16 sps:$4 sm:$0xff]  }
 0x159   : > { %2427 = vmatmul.mubr.bf16.vlgmr.msra.gmra.mrb[0].mxu0 %v2731_v0  ;;  %2591 = vmatmul.mubr.bf16.vlgmr.msra.gmra.mrb[0].mxu1 %v2731_v0  ;;  %v3433_v0 = vld [vmem:[%s4042_s4 + $0x7e8] ss:$16 sps:$4 sm:$0xff]  }
 0x15a   : > { %2436 = vmatpush1.bf16.msra.mxu0 %v3340_v13  ;;  %2600 = vmatpush1.bf16.msra.mxu1 %v3343_v14  ;;  %v2733_v13 = vcombine.low %v4261_v12, %v4261_v12  ;;  %v984_v14 = vlaneseq }
 0x15b   : > { %2437 = vmatprep.subr.bf16.mxu0 %v3348_v15  ;;  %2601 = vmatprep.subr.bf16.mxu1 %v3351_v16 }
 0x15c   : > { %2467 = vmatprep.mubr.bf16.mxu0 %v2734_v11  ;;  %2631 = vmatprep.mubr.bf16.mxu1 %v2734_v11  ;;  %v985_v15 = vshrl.u32 %v984_v14, 7  ;;  %v982_v11 = vld [vmem:[%s714_s18] sm:$0xf] }
 0x15e   : > { %2438 = vmatpush1.bf16.msra.mxu0 %v3346_v17  ;;  %2602 = vmatpush1.bf16.msra.mxu1 %v3349_v18  ;;  %v986_v16 = vsub.s32 0, %v985_v15  ;;  %v990_v17 = vsub.s32 1, %v985_v15  ;;  %v994_v18 = vsub.s32 2, %v985_v15 }
 0x15f   : > { %2439 = vmatprep.subr.bf16.mxu0 %v3354_v19  ;;  %2603 = vmatprep.subr.bf16.mxu1 %v3357_v20  ;;  %v998_v19 = vsub.s32 3, %v985_v15 }
 0x160   : > { %v987_v12 = vrot.slane %v982_v11, %v986_v16  ;;  %v991_v20 = vrot.slane %v982_v11, %v990_v17 }
 0x162   : > { %2440 = vmatpush1.bf16.msra.mxu0 %v3352_v21  ;;  %2604 = vmatpush1.bf16.msra.mxu1 %v3355_v22  ;;  %v995_v21 = vrot.slane %v982_v11, %v994_v18 }
 0x163   : > { %2441 = vmatprep.subr.bf16.mxu0 %v3360_v23  ;;  %2605 = vmatprep.subr.bf16.mxu1 %v3363_v24  ;;  %v999_v24 = vrot.slane %v982_v11, %v998_v19 }
 0x166   : > { %2442 = vmatpush1.bf16.msra.mxu0 %v3358_v25  ;;  %2606 = vmatpush1.bf16.msra.mxu1 %v3361_v26 }
 0x167   : > { %2443 = vmatprep.subr.bf16.mxu0 %v3366_v27  ;;  %2607 = vmatprep.subr.bf16.mxu1 %v3369_v28 }
 0x16a   : > { %2444 = vmatpush1.bf16.msra.mxu0 %v3364_v29  ;;  %2608 = vmatpush1.bf16.msra.mxu1 %v3367_v30 }
 0x16b   : > { %2445 = vmatprep.subr.bf16.mxu0 %v3372_v31  ;;  %2609 = vmatprep.subr.bf16.mxu1 %v3375_v32 }
 0x16e   : > { %2446 = vmatpush1.bf16.msra.mxu0 %v3370_v33  ;;  %2610 = vmatpush1.bf16.msra.mxu1 %v3373_v34 }
 0x16f   : > { %2447 = vmatprep.subr.bf16.mxu0 %v3378_v35  ;;  %2611 = vmatprep.subr.bf16.mxu1 %v3381_v36 }
 0x172   : > { %2448 = vmatpush1.bf16.msra.mxu0 %v3376_v37  ;;  %2612 = vmatpush1.bf16.msra.mxu1 %v3379_v38 }
 0x173   : > { %2449 = vmatprep.subr.bf16.mxu0 %v3384_v39  ;;  %2613 = vmatprep.subr.bf16.mxu1 %v3387_v40 }
 0x176   : > { %2450 = vmatpush1.bf16.msra.mxu0 %v3382_v41  ;;  %2614 = vmatpush1.bf16.msra.mxu1 %v3385_v42 }
 0x177   : > { %2451 = vmatprep.subr.bf16.mxu0 %v3390_v43  ;;  %2615 = vmatprep.subr.bf16.mxu1 %v3393_v44 }
 0x17a   : > { %2452 = vmatpush1.bf16.msra.mxu0 %v3388_v45  ;;  %2616 = vmatpush1.bf16.msra.mxu1 %v3391_v46 }
 0x17b   : > { %2453 = vmatprep.subr.bf16.mxu0 %v3396_v47  ;;  %2617 = vmatprep.subr.bf16.mxu1 %v3399_v48 }
 0x17e   : > { %2454 = vmatpush1.bf16.msra.mxu0 %v3394_v49  ;;  %2618 = vmatpush1.bf16.msra.mxu1 %v3397_v50 }
 0x17f   : > { %2455 = vmatprep.subr.bf16.mxu0 %v3402_v51  ;;  %2619 = vmatprep.subr.bf16.mxu1 %v3405_v52 }
 0x182   : > { %2456 = vmatpush1.bf16.msra.mxu0 %v3400_v53  ;;  %2620 = vmatpush1.bf16.msra.mxu1 %v3403_v54 }
 0x183   : > { %2457 = vmatprep.subr.bf16.mxu0 %v3408_v55  ;;  %2621 = vmatprep.subr.bf16.mxu1 %v3411_v56 }
 0x186   : > { %2458 = vmatpush1.bf16.msra.mxu0 %v3406_v57  ;;  %2622 = vmatpush1.bf16.msra.mxu1 %v3409_v58 }
 0x187   : > { %2459 = vmatprep.subr.bf16.mxu0 %v3414_v59  ;;  %2623 = vmatprep.subr.bf16.mxu1 %v3417_v60 }
 0x18a   : > { %2460 = vmatpush1.bf16.msra.mxu0 %v3412_v61  ;;  %2624 = vmatpush1.bf16.msra.mxu1 %v3415_v62 }
 0x18b   : > { %2461 = vmatprep.subr.bf16.mxu0 %v3420_v63  ;;  %2625 = vmatprep.subr.bf16.mxu1 %v3423_v1 }
 0x18e   : > { %2462 = vmatpush1.bf16.msra.mxu0 %v3418_v2  ;;  %2626 = vmatpush1.bf16.msra.mxu1 %v3421_v3 }
 0x18f   : > { %2463 = vmatprep.subr.bf16.mxu0 %v3426_v4  ;;  %2627 = vmatprep.subr.bf16.mxu1 %v3429_v5 }
 0x192   : > { %2464 = vmatpush1.bf16.msra.mxu0 %v3424_v6  ;;  %2628 = vmatpush1.bf16.msra.mxu1 %v3427_v7 }
 0x193   : > { %2465 = vmatprep.subr.bf16.mxu0 %v3432_v8  ;;  %2629 = vmatprep.subr.bf16.mxu1 %v3435_v9 }
 0x196   : > { %2466 = vmatpush1.bf16.msra.mxu0 %v3430_v10  ;;  %2630 = vmatpush1.bf16.msra.mxu1 %v3433_v0 }
 0x199   : > { %2468 = vmatmul.mubr.bf16.vlgmr.msra.gmra.mrb[0].mxu0 %v2733_v13  ;;  %2632 = vmatmul.mubr.bf16.vlgmr.msra.gmra.mrb[0].mxu1 %v2733_v13 }
 0x26c   : > { %v2469_v22 = vpop.f32.mrb[0].mxu0  ;;  %v2633_v23 = vpop.f32.mrb[0].mxu1 }
 0x26d   : > { %v2994_v25 = vadd.f32 %v2469_v22, %v987_v12  ;;  %v2471_v26 = vpop.f32.mrb[1].mxu0  ;;  %v2635_v27 = vpop.f32.mrb[1].mxu1  ;;  %v2996_v31 = vadd.f32 %v2633_v23, %v995_v21 }
 0x26e   : > { %v2995_v28 = vadd.f32 %v2471_v26, %v991_v20  ;;  %v2473_v29 = vpop.f32.mrb[2].mxu0  ;;  %v2637_v30 = vpop.f32.mrb[2].mxu1  ;;  %v2997_v34 = vadd.f32 %v2635_v27, %v999_v24 }
 0x26f   : > { %2640 = vst [vmem:[%s720_s15] sm:$0xff] %v2994_v25  ;;  %v2474_v32 = vpop.f32.mrb[3].mxu0  ;;  %v2638_v33 = vpop.f32.mrb[3].mxu1  ;;  %2642 = vst [vmem:[%s720_s15 + $0x10] sm:$0xff] %v2996_v31 }
 0x270   : > { %2641 = vst [vmem:[%s720_s15 + $0x8] sm:$0xff] %v2995_v28  ;;  %2643 = vst [vmem:[%s720_s15 + $0x18] sm:$0xff] %v2997_v34 }
 0x271 PF: > { %p10_p9 = scmp.ge.s32.totalorder %s3499_s16, 4   ;;  %s4351_s12 = smov %s3456_s13 }
 0x272   : > { %s4352_s13 = smov %s3508_s19  ;;  %s4353_s14 = smov %s3499_s16 }
 0x273   :  { %12 = sbr.rel (!%p10_p9) target bundleno = 2 (0x2), region = 93 }

// kernel: fmri2image.5
= control target key start
LH: loop header
LB: loop body
LE: loop exit
PB: predicated region body
PF: predicated region fallthrough
CT: control target
= control target key end

     0   :  { %8 = vsyncpa [#allocation3], 0  ;;  %s6604_s0 = inlined_call_operand.vmem [shape: bf16[8,2048], index: 0, kind: input, shape index: {}]   ;;  %s6605_s1 = inlined_call_operand.hbm [shape: bf16[2048,2048], index: 1, kind: input, shape index: {}]   ;;  %s6606_s2 = inlined_call_operand.hbm [shape: f32[1,2048], index: 2, kind: input, shape index: {}]   ;;  %s6607_s3 = inlined_call_operand.vmem [shape: bf16[8,2048], index: 3, kind: output, shape index: {}]  }
   0x1   :  { %10 = vsyncpa [#allocation3 + $0x1], 0 }
   0x2   :  { %11 = vsyncpa [#allocation5], 0 }
   0x3   :  { %13 = vsyncpa [#allocation5 + $0x1], 0  ;;  %s5843_s12 = smov 0   ;;  %s5845_s13 = smov 0  }
   0x4   :  { %s5847_s14 = smov 0   ;;  %s5849_s15 = smov 0  }
   0x5 LB: > { %s4258_s16 = sadd.s32 4294967295, %s5815_s15   ;;  %s5863_s17 = sadd.s32 1, %s5815_s15   ;;  %s5815_s15 = sphi %s5849_s15, %s6617_s15   ;;  %s5811_s14 = sphi %s5847_s14, %s6616_s14   ;;  %s5807_s13 = sphi %s5845_s13, %s6615_s13   ;;  %s5803_s12 = sphi %s5843_s12, %s6614_s12  }
   0x6   : > { %s44_s18 = ssub.s32 %s5815_s15, %s5863_s17  ;;  %s47_s19 = sadd.s32 1, %s5811_s14 }
   0x7   : > { %p45_p0 = scmp.eq.s32.totalorder %s44_s18, 0  ;;  %p54_p1 = scmp.ne.s32.totalorder %s5811_s14, %s5807_s13 }
   0x8   : > { %p55_p2 = scmp.eq.s32.totalorder %s5815_s15, 0  ;;  %p60_p3 = scmp.ne.s32.totalorder %s5807_s13, %s5803_s12 }
   0x9   : > { %s5873_s20 = scalar_select %p45_p0, %s5811_s14, %s47_s19  }
   0xa   : > { %p56_p4 = por %p55_p2, %p54_p1  ;;  %p61_p5 = scmp.eq.s32.totalorder %s4258_s16, 0 }
   0xb   : > { %p4880_p6 = scmp.lt.s32.totalorder %s5815_s15, 4  ;;  %s5883_s22 = sand.u32 1, %s5811_s14  }
   0xc   : > { %p5878_p7 = por %p61_p5, %p60_p3  ;;  %s4262_s23 = sshll.u32 %s5883_s22, 12 }
   0xd   : > { %s4805_s24 = sshll.u32 %s5815_s15, 8  ;;  %s143_s28 = scalar_lea.vmem [#allocation2], %s4262_s23 }
   0xe   : > { %s6609_s21 = scalar_select %p5878_p7, 1, 0 }
   0xf   : > { %s5890_s27 = scalar_lea.hbm %s6605_s1, %s4805_s24  ;;  %s150_s29 = sshll.u32 %s143_s28, 4  ;;  %s5892_s29 = int_to_ptr.vmem [resolvable:$true] %s150_s29 }
  0x10   : > { %p5894_p8 = pnand %p4880_p6, %p56_p4  ;;  %s140_s4 = scalar_lea.sflag [#allocation3], %s5883_s22 }
  0x11   : > { %s5717_s5 = scalar_lea.hbm %s5890_s27, 65536  ;;  %s5722_s8 = scalar_lea.hbm %s6605_s1, 262144 }
  0x12   : > { %p5718_p9 = scmp.ne.s32.totalorder %s5890_s27, %s5717_s5  ;;  %p5719_p10 = pneg %p5894_p8 }
  0x13   : > { %p5723_p13 = scmp.lt.u32.totalorder %s5890_s27, %s6605_s1  ;;  %p5724_p0 = scmp.lt.u32.totalorder %s5722_s8, %s5717_s5 }
  0x14   : > { %p5720_p11 = pnand %p5719_p10, %p5718_p9  ;;  %p5726_p2 = scmp.lt.u32.totalorder %s5717_s5, %s5890_s27 }
  0x15   : > { %p5725_p1 = por %p5724_p0, %p5723_p13 }
  0x16   : > { %p5721_p12 = pneg %p5720_p11 }
  0x17   : > { %p5727_p3 = por %p5726_p2, %p5725_p1 }
  0x19   : > { %p5728_p4 = pnand %p5727_p3, %p5721_p12 }
  0x1b   : > { %5731 = shalt.err (!%p5728_p4)
}
  0x1c   : > { %s5732_s11 = scalar_lea.vmem %s5892_s29, 65536  ;;  %s5817_s12 = smov [#allocation2]  }
  0x1d   : > { %p5733_p5 = scmp.ne.s32.totalorder %s5892_s29, %s5732_s11  ;;  %s5737_s18 = sshll.u32 %s5817_s12, 4  ;;  %s5738_s18 = int_to_ptr.vmem [resolvable:$false] %s5737_s18 }
  0x1e   : > { %s5739_s19 = scalar_lea.vmem %s5738_s18, 131072  ;;  %p5740_p11 = scmp.lt.s32.totalorder %s5892_s29, %s5738_s18 }
  0x1f   : > { %p5735_p6 = pnand %p5733_p5, %p5719_p10  ;;  %p5741_p13 = scmp.lt.s32.totalorder %s5739_s19, %s5732_s11 }
  0x21   : > { %p5736_p9 = pneg %p5735_p6  ;;  %p5742_p0 = por %p5741_p13, %p5740_p11 }
  0x23   : > { %p5743_p1 = pnand %p5742_p0, %p5736_p9 }
  0x25   : > { %5746 = shalt.err (!%p5743_p1)
}
  0x26   : > { %s5818_s23 = smov 1024   ;;  %s5819_s24 = smov 256  }
  0x27   : > { %s5820_s25 = smov 16   ;;  %p4268_p12 = scmp.ge.s32.totalorder %s5815_s15, 1 }
  0x28   : > { %4876 = dma.hbm_to_vmem [thread:$0]  (!%p5894_p8), %s5890_s27, 65536, %s5892_s29, %s140_s4, %s5818_s23, %s5819_s24, %s5820_s25  }
  0x29   : > { %p177_p2 = scmp.lt.s32.totalorder %s5815_s15, 5  ;;  %s4265_s26 = sshll.u32 %s5883_s22, 2 }
  0x2a   : > { %s4806_s5 = sshll.u32 %s5815_s15, 6  ;;  %s164_s6 = scalar_lea.vmem [#allocation4], %s4265_s26 }
  0x2b   : > { %p5929_p3 = pnand %p4268_p12, %p177_p2  ;;  %s172_s7 = sshll.u32 %s164_s6, 4  ;;  %s173_s7 = int_to_ptr.vmem [resolvable:$true] %s172_s7 }
  0x2c   : > { %s5937_s10 = scalar_lea.hbm %s6606_s2, %s4806_s5  ;;  %s161_s27 = scalar_lea.sflag [#allocation5], %s5883_s22 }
  0x2d   : > { %s6611_s28 = scalar_select %p5929_p3, 1, 0 }
  0x2e   : > { %s5747_s29 = scalar_lea.hbm %s5937_s10, 64  ;;  %s5752_s12 = scalar_lea.hbm %s6606_s2, 256 }
  0x2f   : > { %p5748_p4 = scmp.ne.s32.totalorder %s5937_s10, %s5747_s29  ;;  %p5753_p9 = scmp.lt.u32.totalorder %s5937_s10, %s6606_s2 }
  0x30   : > { %p5754_p11 = scmp.lt.u32.totalorder %s5752_s12, %s5747_s29  ;;  %p5756_p0 = scmp.lt.u32.totalorder %s5747_s29, %s5937_s10 }
  0x31   : > { %p5750_p5 = pnand %p5748_p4, %p5719_p10 }
  0x32   : > { %p5755_p13 = por %p5754_p11, %p5753_p9 }
  0x33   : > { %p5751_p6 = pneg %p5750_p5 }
  0x34   : > { %p5757_p1 = por %p5756_p0, %p5755_p13 }
  0x36   : > { %p5758_p12 = pnand %p5757_p1, %p5751_p6 }
  0x38   : > { %5761 = shalt.err (!%p5758_p12)
}
  0x39   : > { %s5762_s22 = scalar_lea.vmem %s173_s7, 64  ;;  %s5821_s23 = smov [#allocation4]  }
  0x3a   : > { %p5763_p2 = scmp.ne.s32.totalorder %s173_s7, %s5762_s22  ;;  %s5767_s24 = sshll.u32 %s5821_s23, 4  ;;  %s5768_s24 = int_to_ptr.vmem [resolvable:$false] %s5767_s24 }
  0x3b   : > { %s5769_s25 = scalar_lea.vmem %s5768_s24, 128  ;;  %p5770_p7 = scmp.lt.s32.totalorder %s173_s7, %s5768_s24 }
  0x3c   : > { %p5765_p4 = pnand %p5763_p2, %p5719_p10  ;;  %p5771_p3 = scmp.lt.s32.totalorder %s5769_s25, %s5762_s22 }
  0x3e   : > { %p5766_p5 = pneg %p5765_p4  ;;  %p5772_p9 = por %p5771_p3, %p5770_p7 }
  0x40   : > { %p5773_p11 = pnand %p5772_p9, %p5766_p5 }
  0x42   : > { %5776 = shalt.err (!%p5773_p11)
}
  0x43   : > { %4879 = dma.hbm_to_vmem [thread:$0]  (!%p5894_p8), %s5937_s10, 64, %s173_s7, %s161_s27  }
  0x44   : > { %p6612_p6 = scmp.ne.s32.totalorder %s6611_s28, 0 }
  0x45   : > { %s183_s26 = sand.u32 (!%p6612_p6), 1, %s5807_s13   ;;  %p6613_p10 = scmp.ne.s32.totalorder (!%p6612_p6), %s6609_s21, 0 }
  0x46   : > { %181 = sbr.rel (%p6612_p6) target bundleno = 861 (0x35d), region = 32  ;;  %s4269_s5 = sshll.u32 (!%p6612_p6), %s183_s26, 12 }
  0x47   : > { %s184_s6 = scalar_lea.sflag (!%p6612_p6), [#allocation3], %s183_s26  ;;  %s5962_s8 = scalar_lea.vmem (!%p6612_p6), [#allocation2], %s4269_s5 }
  0x4d   : > { %5794 = dma.done.wait (%p6613_p10), %s184_s6, 65536  }
  0x4e   : > { %5796 = vsyncadd (%p6613_p10), %s184_s6, 4294901760  ;;  %s4270_s9 = sshll.u32 %s183_s26, 2  ;;  %s193_s30 = scalar_lea.sflag [#allocation5], %s183_s26 }
  0x4f   : > { %s5968_s29 = scalar_lea.vmem [#allocation4], %s4270_s9 }
  0x50   : > { %5798 = dma.done.wait (%p6613_p10), %s193_s30, 64  }
  0x51   : > { %5800 = vsyncadd (%p6613_p10), %s193_s30, 4294967232  ;;  %v4917_v0 = vld [vmem:[%s5962_s8 + $0x4] ss:$16 sps:$4 sm:$0xff]   ;;  %v4919_v1 = vld [vmem:[%s5962_s8 + $0xc] ss:$16 sps:$4 sm:$0xff]   ;;  %s4271_s6 = sshll.u32 %s4258_s16, 2 }
  0x52   : > { %3390 = vmatprep.subr.bf16.mxu0 %v4917_v0  ;;  %v4921_v2 = vld [vmem:[%s5962_s8] ss:$16 sps:$4 sm:$0xff]   ;;  %v4922_v3 = vld [vmem:[%s5962_s8 + $0x8] ss:$16 sps:$4 sm:$0xff]   ;;  %3718 = vmatprep.subr.bf16.mxu1 %v4919_v1  ;;  %v4923_v4 = vld [vmem:[%s5962_s8 + $0x24] ss:$16 sps:$4 sm:$0xff]  }
  0x53   : > { %3391 = vmatpush1.bf16.msra.mxu0 %v4921_v2  ;;  %3719 = vmatpush1.bf16.msra.mxu1 %v4922_v3  ;;  %v4925_v5 = vld [vmem:[%s5962_s8 + $0x2c] ss:$16 sps:$4 sm:$0xff]   ;;  %v4927_v6 = vld [vmem:[%s5962_s8 + $0x20] ss:$16 sps:$4 sm:$0xff]   ;;  %v4928_v7 = vld [vmem:[%s5962_s8 + $0x28] ss:$16 sps:$4 sm:$0xff]  }
  0x54   : > { %3392 = vmatprep.subr.bf16.mxu0 %v4923_v4  ;;  %3720 = vmatprep.subr.bf16.mxu1 %v4925_v5  ;;  %v4929_v8 = vld [vmem:[%s5962_s8 + $0x44] ss:$16 sps:$4 sm:$0xff]   ;;  %v4931_v9 = vld [vmem:[%s5962_s8 + $0x4c] ss:$16 sps:$4 sm:$0xff]   ;;  %v4933_v10 = vld [vmem:[%s5962_s8 + $0x40] ss:$16 sps:$4 sm:$0xff]  }
  0x55   : > { %v4934_v11 = vld [vmem:[%s5962_s8 + $0x48] ss:$16 sps:$4 sm:$0xff]   ;;  %v4935_v12 = vld [vmem:[%s5962_s8 + $0x64] ss:$16 sps:$4 sm:$0xff]   ;;  %v4937_v13 = vld [vmem:[%s5962_s8 + $0x6c] ss:$16 sps:$4 sm:$0xff]  }
  0x56   : > { %v4939_v14 = vld [vmem:[%s5962_s8 + $0x60] ss:$16 sps:$4 sm:$0xff]   ;;  %v4940_v15 = vld [vmem:[%s5962_s8 + $0x68] ss:$16 sps:$4 sm:$0xff]   ;;  %v4941_v16 = vld [vmem:[%s5962_s8 + $0x84] ss:$16 sps:$4 sm:$0xff]  }
  0x57   : > { %3393 = vmatpush1.bf16.msra.mxu0 %v4927_v6  ;;  %3721 = vmatpush1.bf16.msra.mxu1 %v4928_v7  ;;  %v4943_v17 = vld [vmem:[%s5962_s8 + $0x8c] ss:$16 sps:$4 sm:$0xff]   ;;  %v4945_v18 = vld [vmem:[%s5962_s8 + $0x80] ss:$16 sps:$4 sm:$0xff]   ;;  %v4946_v19 = vld [vmem:[%s5962_s8 + $0x88] ss:$16 sps:$4 sm:$0xff]  }
  0x58   : > { %3394 = vmatprep.subr.bf16.mxu0 %v4929_v8  ;;  %3722 = vmatprep.subr.bf16.mxu1 %v4931_v9  ;;  %v4947_v20 = vld [vmem:[%s5962_s8 + $0xa4] ss:$16 sps:$4 sm:$0xff]   ;;  %v4949_v21 = vld [vmem:[%s5962_s8 + $0xac] ss:$16 sps:$4 sm:$0xff]   ;;  %v4951_v22 = vld [vmem:[%s5962_s8 + $0xa0] ss:$16 sps:$4 sm:$0xff]  }
  0x59   : > { %v4952_v23 = vld [vmem:[%s5962_s8 + $0xa8] ss:$16 sps:$4 sm:$0xff]   ;;  %v4953_v24 = vld [vmem:[%s5962_s8 + $0xc4] ss:$16 sps:$4 sm:$0xff]   ;;  %v4955_v25 = vld [vmem:[%s5962_s8 + $0xcc] ss:$16 sps:$4 sm:$0xff]  }
  0x5a   : > { %v4957_v26 = vld [vmem:[%s5962_s8 + $0xc0] ss:$16 sps:$4 sm:$0xff]   ;;  %v4958_v27 = vld [vmem:[%s5962_s8 + $0xc8] ss:$16 sps:$4 sm:$0xff]   ;;  %v4959_v28 = vld [vmem:[%s5962_s8 + $0xe4] ss:$16 sps:$4 sm:$0xff]  }
  0x5b   : > { %3395 = vmatpush1.bf16.msra.mxu0 %v4933_v10  ;;  %3723 = vmatpush1.bf16.msra.mxu1 %v4934_v11  ;;  %v4961_v29 = vld [vmem:[%s5962_s8 + $0xec] ss:$16 sps:$4 sm:$0xff]   ;;  %v4963_v30 = vld [vmem:[%s5962_s8 + $0xe0] ss:$16 sps:$4 sm:$0xff]   ;;  %v4964_v31 = vld [vmem:[%s5962_s8 + $0xe8] ss:$16 sps:$4 sm:$0xff]  }
  0x5c   : > { %3396 = vmatprep.subr.bf16.mxu0 %v4935_v12  ;;  %3724 = vmatprep.subr.bf16.mxu1 %v4937_v13  ;;  %v4965_v32 = vld [vmem:[%s5962_s8 + $0x104] ss:$16 sps:$4 sm:$0xff]   ;;  %v4967_v33 = vld [vmem:[%s5962_s8 + $0x10c] ss:$16 sps:$4 sm:$0xff]   ;;  %v4969_v34 = vld [vmem:[%s5962_s8 + $0x100] ss:$16 sps:$4 sm:$0xff]  }
  0x5d   : > { %v4970_v35 = vld [vmem:[%s5962_s8 + $0x108] ss:$16 sps:$4 sm:$0xff]   ;;  %v4971_v36 = vld [vmem:[%s5962_s8 + $0x124] ss:$16 sps:$4 sm:$0xff]   ;;  %v4973_v37 = vld [vmem:[%s5962_s8 + $0x12c] ss:$16 sps:$4 sm:$0xff]  }
  0x5e   : > { %v4975_v38 = vld [vmem:[%s5962_s8 + $0x120] ss:$16 sps:$4 sm:$0xff]   ;;  %v4976_v39 = vld [vmem:[%s5962_s8 + $0x128] ss:$16 sps:$4 sm:$0xff]   ;;  %v4977_v40 = vld [vmem:[%s5962_s8 + $0x144] ss:$16 sps:$4 sm:$0xff]  }
  0x5f   : > { %3397 = vmatpush1.bf16.msra.mxu0 %v4939_v14  ;;  %3725 = vmatpush1.bf16.msra.mxu1 %v4940_v15  ;;  %v4979_v41 = vld [vmem:[%s5962_s8 + $0x14c] ss:$16 sps:$4 sm:$0xff]   ;;  %v4981_v42 = vld [vmem:[%s5962_s8 + $0x140] ss:$16 sps:$4 sm:$0xff]   ;;  %v4982_v43 = vld [vmem:[%s5962_s8 + $0x148] ss:$16 sps:$4 sm:$0xff]  }
  0x60   : > { %3398 = vmatprep.subr.bf16.mxu0 %v4941_v16  ;;  %3726 = vmatprep.subr.bf16.mxu1 %v4943_v17  ;;  %v4983_v44 = vld [vmem:[%s5962_s8 + $0x164] ss:$16 sps:$4 sm:$0xff]   ;;  %v4985_v45 = vld [vmem:[%s5962_s8 + $0x16c] ss:$16 sps:$4 sm:$0xff]   ;;  %v4987_v47 = vld [vmem:[%s5962_s8 + $0x160] ss:$16 sps:$4 sm:$0xff]  }
  0x61   : > { %v232_v46 = vld [vmem:[%s6604_s0] sm:$0xff]  ;;  %v4988_v49 = vld [vmem:[%s5962_s8 + $0x168] ss:$16 sps:$4 sm:$0xff]   ;;  %v4991_v51 = vld [vmem:[%s5962_s8 + $0x18c] ss:$16 sps:$4 sm:$0xff]   ;;  %p227_p7 = scmp.lt.s32.totalorder %s4271_s6, 15 }
  0x62   : > { %v4274_v48 = vcombine.high %v232_v46, %v232_v46  ;;  %v4989_v50 = vld [vmem:[%s5962_s8 + $0x184] ss:$16 sps:$4 sm:$0xff]   ;;  %v4993_v52 = vld [vmem:[%s5962_s8 + $0x180] ss:$16 sps:$4 sm:$0xff]   ;;  %v4994_v53 = vld [vmem:[%s5962_s8 + $0x188] ss:$16 sps:$4 sm:$0xff]   ;;  %v4273_v4 = vcombine.low %v232_v46, %v232_v46 }
  0x63   : > { %3399 = vmatpush1.bf16.msra.mxu0 %v4945_v18  ;;  %3727 = vmatpush1.bf16.msra.mxu1 %v4946_v19  ;;  %v4995_v54 = vld [vmem:[%s5962_s8 + $0x1a4] ss:$16 sps:$4 sm:$0xff]   ;;  %v4997_v55 = vld [vmem:[%s5962_s8 + $0x1ac] ss:$16 sps:$4 sm:$0xff]   ;;  %v4999_v56 = vld [vmem:[%s5962_s8 + $0x1a0] ss:$16 sps:$4 sm:$0xff]  }
  0x64   : > { %3400 = vmatprep.subr.bf16.mxu0 %v4947_v20  ;;  %3728 = vmatprep.subr.bf16.mxu1 %v4949_v21  ;;  %v5000_v57 = vld [vmem:[%s5962_s8 + $0x1a8] ss:$16 sps:$4 sm:$0xff]   ;;  %v5001_v58 = vld [vmem:[%s5962_s8 + $0x1c4] ss:$16 sps:$4 sm:$0xff]   ;;  %v5003_v59 = vld [vmem:[%s5962_s8 + $0x1cc] ss:$16 sps:$4 sm:$0xff]  }
  0x65   : > { %3422 = vmatprep.mubr.bf16.mxu0 %v4274_v48  ;;  %3750 = vmatprep.mubr.bf16.mxu1 %v4274_v48  ;;  %v5005_v60 = vld [vmem:[%s5962_s8 + $0x1c0] ss:$16 sps:$4 sm:$0xff]   ;;  %v5006_v61 = vld [vmem:[%s5962_s8 + $0x1c8] ss:$16 sps:$4 sm:$0xff]   ;;  %v5007_v62 = vld [vmem:[%s5962_s8 + $0x1e4] ss:$16 sps:$4 sm:$0xff]  }
  0x66   : > { %v5009_v63 = vld [vmem:[%s5962_s8 + $0x1ec] ss:$16 sps:$4 sm:$0xff]   ;;  %v5011_v0 = vld [vmem:[%s5962_s8 + $0x1e0] ss:$16 sps:$4 sm:$0xff]   ;;  %v5012_v1 = vld [vmem:[%s5962_s8 + $0x1e8] ss:$16 sps:$4 sm:$0xff]  }
  0x67   : > { %3401 = vmatpush1.bf16.msra.mxu0 %v4951_v22  ;;  %3729 = vmatpush1.bf16.msra.mxu1 %v4952_v23  ;;  %v5017_v2 = vld [vmem:[%s5962_s8 + $0x204] ss:$16 sps:$4 sm:$0xff]   ;;  %v5020_v3 = vld [vmem:[%s5962_s8 + $0x20c] ss:$16 sps:$4 sm:$0xff]   ;;  %v5015_v5 = vld [vmem:[%s5962_s8 + $0x200] ss:$16 sps:$4 sm:$0xff]  }
  0x68   : > { %3402 = vmatprep.subr.bf16.mxu0 %v4953_v24  ;;  %3730 = vmatprep.subr.bf16.mxu1 %v4955_v25  ;;  %v5018_v6 = vld [vmem:[%s5962_s8 + $0x208] ss:$16 sps:$4 sm:$0xff]   ;;  %v5023_v7 = vld [vmem:[%s5962_s8 + $0x224] ss:$16 sps:$4 sm:$0xff]   ;;  %v5026_v8 = vld [vmem:[%s5962_s8 + $0x22c] ss:$16 sps:$4 sm:$0xff]  }
  0x69   : > { %v5021_v9 = vld [vmem:[%s5962_s8 + $0x220] ss:$16 sps:$4 sm:$0xff]   ;;  %v5024_v10 = vld [vmem:[%s5962_s8 + $0x228] ss:$16 sps:$4 sm:$0xff]   ;;  %v5029_v11 = vld [vmem:[%s5962_s8 + $0x244] ss:$16 sps:$4 sm:$0xff]  }
  0x6a   : > { %v5032_v12 = vld [vmem:[%s5962_s8 + $0x24c] ss:$16 sps:$4 sm:$0xff]   ;;  %v5027_v13 = vld [vmem:[%s5962_s8 + $0x240] ss:$16 sps:$4 sm:$0xff]   ;;  %v5030_v14 = vld [vmem:[%s5962_s8 + $0x248] ss:$16 sps:$4 sm:$0xff]  }
  0x6b   : > { %3403 = vmatpush1.bf16.msra.mxu0 %v4957_v26  ;;  %3731 = vmatpush1.bf16.msra.mxu1 %v4958_v27  ;;  %v5035_v15 = vld [vmem:[%s5962_s8 + $0x264] ss:$16 sps:$4 sm:$0xff]   ;;  %v5038_v16 = vld [vmem:[%s5962_s8 + $0x26c] ss:$16 sps:$4 sm:$0xff]   ;;  %v5033_v17 = vld [vmem:[%s5962_s8 + $0x260] ss:$16 sps:$4 sm:$0xff]  }
  0x6c   : > { %3404 = vmatprep.subr.bf16.mxu0 %v4959_v28  ;;  %3732 = vmatprep.subr.bf16.mxu1 %v4961_v29  ;;  %v5036_v18 = vld [vmem:[%s5962_s8 + $0x268] ss:$16 sps:$4 sm:$0xff]   ;;  %v5041_v19 = vld [vmem:[%s5962_s8 + $0x284] ss:$16 sps:$4 sm:$0xff]   ;;  %v5044_v20 = vld [vmem:[%s5962_s8 + $0x28c] ss:$16 sps:$4 sm:$0xff]  }
  0x6d   : > { %v5039_v21 = vld [vmem:[%s5962_s8 + $0x280] ss:$16 sps:$4 sm:$0xff]   ;;  %v5042_v22 = vld [vmem:[%s5962_s8 + $0x288] ss:$16 sps:$4 sm:$0xff]   ;;  %v5047_v23 = vld [vmem:[%s5962_s8 + $0x2a4] ss:$16 sps:$4 sm:$0xff]  }
  0x6e   : > { %v5050_v24 = vld [vmem:[%s5962_s8 + $0x2ac] ss:$16 sps:$4 sm:$0xff]   ;;  %v5045_v25 = vld [vmem:[%s5962_s8 + $0x2a0] ss:$16 sps:$4 sm:$0xff]   ;;  %v5048_v26 = vld [vmem:[%s5962_s8 + $0x2a8] ss:$16 sps:$4 sm:$0xff]  }
  0x6f   : > { %3405 = vmatpush1.bf16.msra.mxu0 %v4963_v30  ;;  %3733 = vmatpush1.bf16.msra.mxu1 %v4964_v31  ;;  %v5053_v27 = vld [vmem:[%s5962_s8 + $0x2c4] ss:$16 sps:$4 sm:$0xff]   ;;  %v5056_v28 = vld [vmem:[%s5962_s8 + $0x2cc] ss:$16 sps:$4 sm:$0xff]   ;;  %v5051_v31 = vld [vmem:[%s5962_s8 + $0x2c0] ss:$16 sps:$4 sm:$0xff]  }
  0x70   : > { %3406 = vmatprep.subr.bf16.mxu0 %v4965_v32  ;;  %3734 = vmatprep.subr.bf16.mxu1 %v4967_v33  ;;  %v6070_v29 = vld [vmem:[%s6604_s0 + $0x8] sm:$0xff]  ;;  %v5059_v33 = vld [vmem:[%s5962_s8 + $0x2e4] ss:$16 sps:$4 sm:$0xff]   ;;  %s6619_s6 = smov (!%p227_p7, %s4271_s6), 15 }
  0x71   : > { %v4276_v30 = vcombine.high %v6070_v29, %v6070_v29  ;;  %v5054_v32 = vld [vmem:[%s5962_s8 + $0x2c8] ss:$16 sps:$4 sm:$0xff]   ;;  %v5080_v46 = vld [vmem:[%s5962_s8 + $0x34c] ss:$16 sps:$4 sm:$0xff]   ;;  %s4272_s15 = sshll.u32 %s6619_s6, 2 }
  0x72   : > { %v5078_v48 = vld [vmem:[%s5962_s8 + $0x348] ss:$16 sps:$4 sm:$0xff]   ;;  %s230_s9 = scalar_lea.vmem %s6607_s3, %s4272_s15 }
  0x73   : > { %3407 = vmatpush1.bf16.msra.mxu0 %v4969_v34  ;;  %3735 = vmatpush1.bf16.msra.mxu1 %v4970_v35  ;;  %v5062_v34 = vld [vmem:[%s5962_s8 + $0x2ec] ss:$16 sps:$4 sm:$0xff]   ;;  %v5057_v35 = vld [vmem:[%s5962_s8 + $0x2e0] ss:$16 sps:$4 sm:$0xff]  }
  0x74   : > { %3408 = vmatprep.subr.bf16.mxu0 %v4971_v36  ;;  %3736 = vmatprep.subr.bf16.mxu1 %v4973_v37  ;;  %v5060_v36 = vld [vmem:[%s5962_s8 + $0x2e8] ss:$16 sps:$4 sm:$0xff]   ;;  %v5065_v37 = vld [vmem:[%s5962_s8 + $0x304] ss:$16 sps:$4 sm:$0xff]  }
  0x77   : > { %3409 = vmatpush1.bf16.msra.mxu0 %v4975_v38  ;;  %3737 = vmatpush1.bf16.msra.mxu1 %v4976_v39  ;;  %v5068_v38 = vld [vmem:[%s5962_s8 + $0x30c] ss:$16 sps:$4 sm:$0xff]   ;;  %v5063_v39 = vld [vmem:[%s5962_s8 + $0x300] ss:$16 sps:$4 sm:$0xff]  }
  0x78   : > { %3410 = vmatprep.subr.bf16.mxu0 %v4977_v40  ;;  %3738 = vmatprep.subr.bf16.mxu1 %v4979_v41  ;;  %v5066_v40 = vld [vmem:[%s5962_s8 + $0x308] ss:$16 sps:$4 sm:$0xff]   ;;  %v5071_v41 = vld [vmem:[%s5962_s8 + $0x324] ss:$16 sps:$4 sm:$0xff]  }
  0x7b   : > { %3411 = vmatpush1.bf16.msra.mxu0 %v4981_v42  ;;  %3739 = vmatpush1.bf16.msra.mxu1 %v4982_v43  ;;  %v5074_v42 = vld [vmem:[%s5962_s8 + $0x32c] ss:$16 sps:$4 sm:$0xff]   ;;  %v5069_v43 = vld [vmem:[%s5962_s8 + $0x320] ss:$16 sps:$4 sm:$0xff]  }
  0x7c   : > { %3412 = vmatprep.subr.bf16.mxu0 %v4983_v44  ;;  %3740 = vmatprep.subr.bf16.mxu1 %v4985_v45  ;;  %v5072_v44 = vld [vmem:[%s5962_s8 + $0x328] ss:$16 sps:$4 sm:$0xff]   ;;  %v5077_v45 = vld [vmem:[%s5962_s8 + $0x344] ss:$16 sps:$4 sm:$0xff]  }
  0x7f   : > { %3413 = vmatpush1.bf16.msra.mxu0 %v4987_v47  ;;  %3741 = vmatpush1.bf16.msra.mxu1 %v4988_v49  ;;  %v5075_v47 = vld [vmem:[%s5962_s8 + $0x340] ss:$16 sps:$4 sm:$0xff]   ;;  %v5083_v49 = vld [vmem:[%s5962_s8 + $0x364] ss:$16 sps:$4 sm:$0xff]  }
  0x80   : > { %3414 = vmatprep.subr.bf16.mxu0 %v4989_v50  ;;  %3742 = vmatprep.subr.bf16.mxu1 %v4991_v51  ;;  %v5086_v50 = vld [vmem:[%s5962_s8 + $0x36c] ss:$16 sps:$4 sm:$0xff]   ;;  %v5081_v51 = vld [vmem:[%s5962_s8 + $0x360] ss:$16 sps:$4 sm:$0xff]  }
  0x83   : > { %3415 = vmatpush1.bf16.msra.mxu0 %v4993_v52  ;;  %3743 = vmatpush1.bf16.msra.mxu1 %v4994_v53  ;;  %v5084_v52 = vld [vmem:[%s5962_s8 + $0x368] ss:$16 sps:$4 sm:$0xff]   ;;  %v5089_v53 = vld [vmem:[%s5962_s8 + $0x384] ss:$16 sps:$4 sm:$0xff]  }
  0x84   : > { %3416 = vmatprep.subr.bf16.mxu0 %v4995_v54  ;;  %3744 = vmatprep.subr.bf16.mxu1 %v4997_v55  ;;  %v5092_v54 = vld [vmem:[%s5962_s8 + $0x38c] ss:$16 sps:$4 sm:$0xff]   ;;  %v5087_v55 = vld [vmem:[%s5962_s8 + $0x380] ss:$16 sps:$4 sm:$0xff]  }
  0x87   : > { %3417 = vmatpush1.bf16.msra.mxu0 %v4999_v56  ;;  %3745 = vmatpush1.bf16.msra.mxu1 %v5000_v57  ;;  %v5090_v56 = vld [vmem:[%s5962_s8 + $0x388] ss:$16 sps:$4 sm:$0xff]   ;;  %v5095_v57 = vld [vmem:[%s5962_s8 + $0x3a4] ss:$16 sps:$4 sm:$0xff]  }
  0x88   : > { %3418 = vmatprep.subr.bf16.mxu0 %v5001_v58  ;;  %3746 = vmatprep.subr.bf16.mxu1 %v5003_v59  ;;  %v5098_v58 = vld [vmem:[%s5962_s8 + $0x3ac] ss:$16 sps:$4 sm:$0xff]   ;;  %v5093_v59 = vld [vmem:[%s5962_s8 + $0x3a0] ss:$16 sps:$4 sm:$0xff]  }
  0x8b   : > { %3419 = vmatpush1.bf16.msra.mxu0 %v5005_v60  ;;  %3747 = vmatpush1.bf16.msra.mxu1 %v5006_v61  ;;  %v5096_v60 = vld [vmem:[%s5962_s8 + $0x3a8] ss:$16 sps:$4 sm:$0xff]   ;;  %v5101_v61 = vld [vmem:[%s5962_s8 + $0x3c4] ss:$16 sps:$4 sm:$0xff]  }
  0x8c   : > { %3420 = vmatprep.subr.bf16.mxu0 %v5007_v62  ;;  %3748 = vmatprep.subr.bf16.mxu1 %v5009_v63  ;;  %v5104_v62 = vld [vmem:[%s5962_s8 + $0x3cc] ss:$16 sps:$4 sm:$0xff]   ;;  %v5099_v63 = vld [vmem:[%s5962_s8 + $0x3c0] ss:$16 sps:$4 sm:$0xff]  }
  0x8f   : > { %3421 = vmatpush1.bf16.msra.mxu0 %v5011_v0  ;;  %3749 = vmatpush1.bf16.msra.mxu1 %v5012_v1  ;;  %v5102_v0 = vld [vmem:[%s5962_s8 + $0x3c8] ss:$16 sps:$4 sm:$0xff]   ;;  %v5107_v1 = vld [vmem:[%s5962_s8 + $0x3e4] ss:$16 sps:$4 sm:$0xff]  }
  0x90   : > { %3431 = vmatprep.subr.bf16.mxu0 %v5017_v2  ;;  %3759 = vmatprep.subr.bf16.mxu1 %v5020_v3  ;;  %v5110_v2 = vld [vmem:[%s5962_s8 + $0x3ec] ss:$16 sps:$4 sm:$0xff]   ;;  %v5105_v3 = vld [vmem:[%s5962_s8 + $0x3e0] ss:$16 sps:$4 sm:$0xff]  }
  0x92   : > { %3423 = vmatmul.mubr.bf16.vlgmr.msra.gmra.mrb[0].mxu0 %v4273_v4  ;;  %3751 = vmatmul.mubr.bf16.vlgmr.msra.gmra.mrb[0].mxu1 %v4273_v4  ;;  %v5108_v4 = vld [vmem:[%s5962_s8 + $0x3e8] ss:$16 sps:$4 sm:$0xff]  }
  0x93   : > { %3432 = vmatpush1.bf16.msra.mxu0 %v5015_v5  ;;  %3760 = vmatpush1.bf16.msra.mxu1 %v5018_v6  ;;  %v5115_v5 = vld [vmem:[%s5962_s8 + $0x404] ss:$16 sps:$4 sm:$0xff]   ;;  %v5118_v6 = vld [vmem:[%s5962_s8 + $0x40c] ss:$16 sps:$4 sm:$0xff]  }
  0x94   : > { %3433 = vmatprep.subr.bf16.mxu0 %v5023_v7  ;;  %3761 = vmatprep.subr.bf16.mxu1 %v5026_v8  ;;  %v4275_v7 = vcombine.low %v6070_v29, %v6070_v29  ;;  %v5113_v8 = vld [vmem:[%s5962_s8 + $0x400] ss:$16 sps:$4 sm:$0xff]   ;;  %v5148_v29 = vld [vmem:[%s5962_s8 + $0x4ac] ss:$16 sps:$4 sm:$0xff]  }
  0x95   : > { %3463 = vmatprep.mubr.bf16.mxu0 %v4276_v30  ;;  %3791 = vmatprep.mubr.bf16.mxu1 %v4276_v30  ;;  %v5143_v30 = vld [vmem:[%s5962_s8 + $0x4a0] ss:$16 sps:$4 sm:$0xff]  }
  0x97   : > { %3434 = vmatpush1.bf16.msra.mxu0 %v5021_v9  ;;  %3762 = vmatpush1.bf16.msra.mxu1 %v5024_v10  ;;  %v5116_v9 = vld [vmem:[%s5962_s8 + $0x408] ss:$16 sps:$4 sm:$0xff]   ;;  %v5121_v10 = vld [vmem:[%s5962_s8 + $0x424] ss:$16 sps:$4 sm:$0xff]  }
  0x98   : > { %3435 = vmatprep.subr.bf16.mxu0 %v5029_v11  ;;  %3763 = vmatprep.subr.bf16.mxu1 %v5032_v12  ;;  %v6122_v11 = vld [vmem:[%s6604_s0 + $0x10] sm:$0xff]  ;;  %v5124_v12 = vld [vmem:[%s5962_s8 + $0x42c] ss:$16 sps:$4 sm:$0xff]  }
  0x9b   : > { %3436 = vmatpush1.bf16.msra.mxu0 %v5027_v13  ;;  %3764 = vmatpush1.bf16.msra.mxu1 %v5030_v14  ;;  %v4278_v13 = vcombine.high %v6122_v11, %v6122_v11  ;;  %v5119_v14 = vld [vmem:[%s5962_s8 + $0x420] ss:$16 sps:$4 sm:$0xff]  }
  0x9c   : > { %3437 = vmatprep.subr.bf16.mxu0 %v5035_v15  ;;  %3765 = vmatprep.subr.bf16.mxu1 %v5038_v16  ;;  %v5122_v15 = vld [vmem:[%s5962_s8 + $0x428] ss:$16 sps:$4 sm:$0xff]   ;;  %v5127_v16 = vld [vmem:[%s5962_s8 + $0x444] ss:$16 sps:$4 sm:$0xff]  }
  0x9f   : > { %3438 = vmatpush1.bf16.msra.mxu0 %v5033_v17  ;;  %3766 = vmatpush1.bf16.msra.mxu1 %v5036_v18  ;;  %v5130_v17 = vld [vmem:[%s5962_s8 + $0x44c] ss:$16 sps:$4 sm:$0xff]   ;;  %v5125_v18 = vld [vmem:[%s5962_s8 + $0x440] ss:$16 sps:$4 sm:$0xff]  }
  0xa0   : > { %3439 = vmatprep.subr.bf16.mxu0 %v5041_v19  ;;  %3767 = vmatprep.subr.bf16.mxu1 %v5044_v20  ;;  %v5128_v19 = vld [vmem:[%s5962_s8 + $0x448] ss:$16 sps:$4 sm:$0xff]   ;;  %v5133_v20 = vld [vmem:[%s5962_s8 + $0x464] ss:$16 sps:$4 sm:$0xff]  }
  0xa3   : > { %3440 = vmatpush1.bf16.msra.mxu0 %v5039_v21  ;;  %3768 = vmatpush1.bf16.msra.mxu1 %v5042_v22  ;;  %v5136_v21 = vld [vmem:[%s5962_s8 + $0x46c] ss:$16 sps:$4 sm:$0xff]   ;;  %v5131_v22 = vld [vmem:[%s5962_s8 + $0x460] ss:$16 sps:$4 sm:$0xff]  }
  0xa4   : > { %3441 = vmatprep.subr.bf16.mxu0 %v5047_v23  ;;  %3769 = vmatprep.subr.bf16.mxu1 %v5050_v24  ;;  %v5134_v23 = vld [vmem:[%s5962_s8 + $0x468] ss:$16 sps:$4 sm:$0xff]   ;;  %v5139_v24 = vld [vmem:[%s5962_s8 + $0x484] ss:$16 sps:$4 sm:$0xff]  }
  0xa7   : > { %3442 = vmatpush1.bf16.msra.mxu0 %v5045_v25  ;;  %3770 = vmatpush1.bf16.msra.mxu1 %v5048_v26  ;;  %v5142_v25 = vld [vmem:[%s5962_s8 + $0x48c] ss:$16 sps:$4 sm:$0xff]   ;;  %v5137_v26 = vld [vmem:[%s5962_s8 + $0x480] ss:$16 sps:$4 sm:$0xff]  }
  0xa8   : > { %3443 = vmatprep.subr.bf16.mxu0 %v5053_v27  ;;  %3771 = vmatprep.subr.bf16.mxu1 %v5056_v28  ;;  %v5140_v27 = vld [vmem:[%s5962_s8 + $0x488] ss:$16 sps:$4 sm:$0xff]   ;;  %v5145_v28 = vld [vmem:[%s5962_s8 + $0x4a4] ss:$16 sps:$4 sm:$0xff]  }
  0xab   : > { %3444 = vmatpush1.bf16.msra.mxu0 %v5051_v31  ;;  %3772 = vmatpush1.bf16.msra.mxu1 %v5054_v32  ;;  %v5146_v31 = vld [vmem:[%s5962_s8 + $0x4a8] ss:$16 sps:$4 sm:$0xff]   ;;  %v5151_v32 = vld [vmem:[%s5962_s8 + $0x4c4] ss:$16 sps:$4 sm:$0xff]  }
  0xac   : > { %3445 = vmatprep.subr.bf16.mxu0 %v5059_v33  ;;  %3773 = vmatprep.subr.bf16.mxu1 %v5062_v34  ;;  %v5154_v33 = vld [vmem:[%s5962_s8 + $0x4cc] ss:$16 sps:$4 sm:$0xff]   ;;  %v5149_v34 = vld [vmem:[%s5962_s8 + $0x4c0] ss:$16 sps:$4 sm:$0xff]  }
  0xaf   : > { %3446 = vmatpush1.bf16.msra.mxu0 %v5057_v35  ;;  %3774 = vmatpush1.bf16.msra.mxu1 %v5060_v36  ;;  %v5152_v35 = vld [vmem:[%s5962_s8 + $0x4c8] ss:$16 sps:$4 sm:$0xff]   ;;  %v5157_v36 = vld [vmem:[%s5962_s8 + $0x4e4] ss:$16 sps:$4 sm:$0xff]  }
  0xb0   : > { %3447 = vmatprep.subr.bf16.mxu0 %v5065_v37  ;;  %3775 = vmatprep.subr.bf16.mxu1 %v5068_v38  ;;  %v5160_v37 = vld [vmem:[%s5962_s8 + $0x4ec] ss:$16 sps:$4 sm:$0xff]   ;;  %v5155_v38 = vld [vmem:[%s5962_s8 + $0x4e0] ss:$16 sps:$4 sm:$0xff]  }
  0xb3   : > { %3448 = vmatpush1.bf16.msra.mxu0 %v5063_v39  ;;  %3776 = vmatpush1.bf16.msra.mxu1 %v5066_v40  ;;  %v5158_v39 = vld [vmem:[%s5962_s8 + $0x4e8] ss:$16 sps:$4 sm:$0xff]   ;;  %v5163_v40 = vld [vmem:[%s5962_s8 + $0x504] ss:$16 sps:$4 sm:$0xff]  }
  0xb4   : > { %3449 = vmatprep.subr.bf16.mxu0 %v5071_v41  ;;  %3777 = vmatprep.subr.bf16.mxu1 %v5074_v42  ;;  %v5166_v41 = vld [vmem:[%s5962_s8 + $0x50c] ss:$16 sps:$4 sm:$0xff]   ;;  %v5161_v42 = vld [vmem:[%s5962_s8 + $0x500] ss:$16 sps:$4 sm:$0xff]  }
  0xb7   : > { %3450 = vmatpush1.bf16.msra.mxu0 %v5069_v43  ;;  %3778 = vmatpush1.bf16.msra.mxu1 %v5072_v44  ;;  %v5164_v43 = vld [vmem:[%s5962_s8 + $0x508] ss:$16 sps:$4 sm:$0xff]   ;;  %v5169_v44 = vld [vmem:[%s5962_s8 + $0x524] ss:$16 sps:$4 sm:$0xff]  }
  0xb8   : > { %3451 = vmatprep.subr.bf16.mxu0 %v5077_v45  ;;  %3779 = vmatprep.subr.bf16.mxu1 %v5080_v46  ;;  %v5172_v45 = vld [vmem:[%s5962_s8 + $0x52c] ss:$16 sps:$4 sm:$0xff]   ;;  %v5167_v46 = vld [vmem:[%s5962_s8 + $0x520] ss:$16 sps:$4 sm:$0xff]  }
  0xbb   : > { %3452 = vmatpush1.bf16.msra.mxu0 %v5075_v47  ;;  %3780 = vmatpush1.bf16.msra.mxu1 %v5078_v48  ;;  %v5170_v47 = vld [vmem:[%s5962_s8 + $0x528] ss:$16 sps:$4 sm:$0xff]   ;;  %v5175_v48 = vld [vmem:[%s5962_s8 + $0x544] ss:$16 sps:$4 sm:$0xff]  }
  0xbc   : > { %3453 = vmatprep.subr.bf16.mxu0 %v5083_v49  ;;  %3781 = vmatprep.subr.bf16.mxu1 %v5086_v50  ;;  %v5178_v49 = vld [vmem:[%s5962_s8 + $0x54c] ss:$16 sps:$4 sm:$0xff]   ;;  %v5173_v50 = vld [vmem:[%s5962_s8 + $0x540] ss:$16 sps:$4 sm:$0xff]  }
  0xbf   : > { %3454 = vmatpush1.bf16.msra.mxu0 %v5081_v51  ;;  %3782 = vmatpush1.bf16.msra.mxu1 %v5084_v52  ;;  %v5176_v51 = vld [vmem:[%s5962_s8 + $0x548] ss:$16 sps:$4 sm:$0xff]   ;;  %v5181_v52 = vld [vmem:[%s5962_s8 + $0x564] ss:$16 sps:$4 sm:$0xff]  }
  0xc0   : > { %3455 = vmatprep.subr.bf16.mxu0 %v5089_v53  ;;  %3783 = vmatprep.subr.bf16.mxu1 %v5092_v54  ;;  %v5184_v53 = vld [vmem:[%s5962_s8 + $0x56c] ss:$16 sps:$4 sm:$0xff]   ;;  %v5179_v54 = vld [vmem:[%s5962_s8 + $0x560] ss:$16 sps:$4 sm:$0xff]  }
  0xc3   : > { %3456 = vmatpush1.bf16.msra.mxu0 %v5087_v55  ;;  %3784 = vmatpush1.bf16.msra.mxu1 %v5090_v56  ;;  %v5182_v55 = vld [vmem:[%s5962_s8 + $0x568] ss:$16 sps:$4 sm:$0xff]   ;;  %v5187_v56 = vld [vmem:[%s5962_s8 + $0x584] ss:$16 sps:$4 sm:$0xff]  }
  0xc4   : > { %3457 = vmatprep.subr.bf16.mxu0 %v5095_v57  ;;  %3785 = vmatprep.subr.bf16.mxu1 %v5098_v58  ;;  %v5190_v57 = vld [vmem:[%s5962_s8 + $0x58c] ss:$16 sps:$4 sm:$0xff]   ;;  %v5185_v58 = vld [vmem:[%s5962_s8 + $0x580] ss:$16 sps:$4 sm:$0xff]  }
  0xc7   : > { %3458 = vmatpush1.bf16.msra.mxu0 %v5093_v59  ;;  %3786 = vmatpush1.bf16.msra.mxu1 %v5096_v60  ;;  %v5188_v59 = vld [vmem:[%s5962_s8 + $0x588] ss:$16 sps:$4 sm:$0xff]   ;;  %v5193_v60 = vld [vmem:[%s5962_s8 + $0x5a4] ss:$16 sps:$4 sm:$0xff]  }
  0xc8   : > { %3459 = vmatprep.subr.bf16.mxu0 %v5101_v61  ;;  %3787 = vmatprep.subr.bf16.mxu1 %v5104_v62  ;;  %v5196_v61 = vld [vmem:[%s5962_s8 + $0x5ac] ss:$16 sps:$4 sm:$0xff]   ;;  %v5191_v62 = vld [vmem:[%s5962_s8 + $0x5a0] ss:$16 sps:$4 sm:$0xff]  }
  0xcb   : > { %3460 = vmatpush1.bf16.msra.mxu0 %v5099_v63  ;;  %3788 = vmatpush1.bf16.msra.mxu1 %v5102_v0  ;;  %v5194_v63 = vld [vmem:[%s5962_s8 + $0x5a8] ss:$16 sps:$4 sm:$0xff]   ;;  %v5199_v0 = vld [vmem:[%s5962_s8 + $0x5c4] ss:$16 sps:$4 sm:$0xff]  }
  0xcc   : > { %3461 = vmatprep.subr.bf16.mxu0 %v5107_v1  ;;  %3789 = vmatprep.subr.bf16.mxu1 %v5110_v2  ;;  %v5202_v1 = vld [vmem:[%s5962_s8 + $0x5cc] ss:$16 sps:$4 sm:$0xff]   ;;  %v5197_v2 = vld [vmem:[%s5962_s8 + $0x5c0] ss:$16 sps:$4 sm:$0xff]  }
  0xcf   : > { %3462 = vmatpush1.bf16.msra.mxu0 %v5105_v3  ;;  %3790 = vmatpush1.bf16.msra.mxu1 %v5108_v4  ;;  %v5200_v3 = vld [vmem:[%s5962_s8 + $0x5c8] ss:$16 sps:$4 sm:$0xff]   ;;  %v5205_v4 = vld [vmem:[%s5962_s8 + $0x5e4] ss:$16 sps:$4 sm:$0xff]  }
  0xd0   : > { %3472 = vmatprep.subr.bf16.mxu0 %v5115_v5  ;;  %3800 = vmatprep.subr.bf16.mxu1 %v5118_v6  ;;  %v5208_v5 = vld [vmem:[%s5962_s8 + $0x5ec] ss:$16 sps:$4 sm:$0xff]   ;;  %v5203_v6 = vld [vmem:[%s5962_s8 + $0x5e0] ss:$16 sps:$4 sm:$0xff]  }
  0xd2   : > { %3464 = vmatmul.mubr.bf16.vlgmr.msra.gmra.mrb[0].mxu0 %v4275_v7  ;;  %3792 = vmatmul.mubr.bf16.vlgmr.msra.gmra.mrb[0].mxu1 %v4275_v7  ;;  %v5206_v7 = vld [vmem:[%s5962_s8 + $0x5e8] ss:$16 sps:$4 sm:$0xff]  }
  0xd3   : > { %3473 = vmatpush1.bf16.msra.mxu0 %v5113_v8  ;;  %3801 = vmatpush1.bf16.msra.mxu1 %v5116_v9  ;;  %v5213_v8 = vld [vmem:[%s5962_s8 + $0x604] ss:$16 sps:$4 sm:$0xff]   ;;  %v5216_v9 = vld [vmem:[%s5962_s8 + $0x60c] ss:$16 sps:$4 sm:$0xff]  }
  0xd4   : > { %3474 = vmatprep.subr.bf16.mxu0 %v5121_v10  ;;  %3802 = vmatprep.subr.bf16.mxu1 %v5124_v12  ;;  %v5211_v10 = vld [vmem:[%s5962_s8 + $0x600] ss:$16 sps:$4 sm:$0xff]   ;;  %v4277_v12 = vcombine.low %v6122_v11, %v6122_v11 }
  0xd5   : > { %3504 = vmatprep.mubr.bf16.mxu0 %v4278_v13  ;;  %3832 = vmatprep.mubr.bf16.mxu1 %v4278_v13  ;;  %v5214_v13 = vld [vmem:[%s5962_s8 + $0x608] ss:$16 sps:$4 sm:$0xff]   ;;  %v5217_v11 = vld [vmem:[%s5962_s8 + $0x620] ss:$16 sps:$4 sm:$0xff]  }
  0xd7   : > { %3475 = vmatpush1.bf16.msra.mxu0 %v5119_v14  ;;  %3803 = vmatpush1.bf16.msra.mxu1 %v5122_v15  ;;  %v6194_v14 = vld [vmem:[%s6604_s0 + $0x18] sm:$0xff]  ;;  %v5219_v15 = vld [vmem:[%s5962_s8 + $0x624] ss:$16 sps:$4 sm:$0xff]  }
  0xd8   : > { %3476 = vmatprep.subr.bf16.mxu0 %v5127_v16  ;;  %3804 = vmatprep.subr.bf16.mxu1 %v5130_v17  ;;  %v5222_v16 = vld [vmem:[%s5962_s8 + $0x62c] ss:$16 sps:$4 sm:$0xff]   ;;  %v4280_v17 = vcombine.high %v6194_v14, %v6194_v14 }
  0xdb   : > { %3477 = vmatpush1.bf16.msra.mxu0 %v5125_v18  ;;  %3805 = vmatpush1.bf16.msra.mxu1 %v5128_v19  ;;  %v5220_v18 = vld [vmem:[%s5962_s8 + $0x628] ss:$16 sps:$4 sm:$0xff]   ;;  %v5225_v19 = vld [vmem:[%s5962_s8 + $0x644] ss:$16 sps:$4 sm:$0xff]  }
  0xdc   : > { %3478 = vmatprep.subr.bf16.mxu0 %v5133_v20  ;;  %3806 = vmatprep.subr.bf16.mxu1 %v5136_v21  ;;  %v5228_v20 = vld [vmem:[%s5962_s8 + $0x64c] ss:$16 sps:$4 sm:$0xff]   ;;  %v5223_v21 = vld [vmem:[%s5962_s8 + $0x640] ss:$16 sps:$4 sm:$0xff]  }
  0xdf   : > { %3479 = vmatpush1.bf16.msra.mxu0 %v5131_v22  ;;  %3807 = vmatpush1.bf16.msra.mxu1 %v5134_v23  ;;  %v5226_v22 = vld [vmem:[%s5962_s8 + $0x648] ss:$16 sps:$4 sm:$0xff]   ;;  %v5231_v23 = vld [vmem:[%s5962_s8 + $0x664] ss:$16 sps:$4 sm:$0xff]  }
  0xe0   : > { %3480 = vmatprep.subr.bf16.mxu0 %v5139_v24  ;;  %3808 = vmatprep.subr.bf16.mxu1 %v5142_v25  ;;  %v5234_v24 = vld [vmem:[%s5962_s8 + $0x66c] ss:$16 sps:$4 sm:$0xff]   ;;  %v5229_v25 = vld [vmem:[%s5962_s8 + $0x660] ss:$16 sps:$4 sm:$0xff]  }
  0xe3   : > { %3481 = vmatpush1.bf16.msra.mxu0 %v5137_v26  ;;  %3809 = vmatpush1.bf16.msra.mxu1 %v5140_v27  ;;  %v5232_v26 = vld [vmem:[%s5962_s8 + $0x668] ss:$16 sps:$4 sm:$0xff]   ;;  %v5237_v27 = vld [vmem:[%s5962_s8 + $0x684] ss:$16 sps:$4 sm:$0xff]  }
  0xe4   : > { %3482 = vmatprep.subr.bf16.mxu0 %v5145_v28  ;;  %3810 = vmatprep.subr.bf16.mxu1 %v5148_v29  ;;  %v5240_v28 = vld [vmem:[%s5962_s8 + $0x68c] ss:$16 sps:$4 sm:$0xff]   ;;  %v5235_v29 = vld [vmem:[%s5962_s8 + $0x680] ss:$16 sps:$4 sm:$0xff]  }
  0xe7   : > { %3483 = vmatpush1.bf16.msra.mxu0 %v5143_v30  ;;  %3811 = vmatpush1.bf16.msra.mxu1 %v5146_v31  ;;  %v5238_v30 = vld [vmem:[%s5962_s8 + $0x688] ss:$16 sps:$4 sm:$0xff]   ;;  %v5243_v31 = vld [vmem:[%s5962_s8 + $0x6a4] ss:$16 sps:$4 sm:$0xff]  }
  0xe8   : > { %3484 = vmatprep.subr.bf16.mxu0 %v5151_v32  ;;  %3812 = vmatprep.subr.bf16.mxu1 %v5154_v33  ;;  %v5246_v32 = vld [vmem:[%s5962_s8 + $0x6ac] ss:$16 sps:$4 sm:$0xff]   ;;  %v5241_v33 = vld [vmem:[%s5962_s8 + $0x6a0] ss:$16 sps:$4 sm:$0xff]  }
  0xeb   : > { %3485 = vmatpush1.bf16.msra.mxu0 %v5149_v34  ;;  %3813 = vmatpush1.bf16.msra.mxu1 %v5152_v35  ;;  %v5244_v34 = vld [vmem:[%s5962_s8 + $0x6a8] ss:$16 sps:$4 sm:$0xff]   ;;  %v5249_v35 = vld [vmem:[%s5962_s8 + $0x6c4] ss:$16 sps:$4 sm:$0xff]  }
  0xec   : > { %3486 = vmatprep.subr.bf16.mxu0 %v5157_v36  ;;  %3814 = vmatprep.subr.bf16.mxu1 %v5160_v37  ;;  %v5252_v36 = vld [vmem:[%s5962_s8 + $0x6cc] ss:$16 sps:$4 sm:$0xff]   ;;  %v5247_v37 = vld [vmem:[%s5962_s8 + $0x6c0] ss:$16 sps:$4 sm:$0xff]  }
  0xef   : > { %3487 = vmatpush1.bf16.msra.mxu0 %v5155_v38  ;;  %3815 = vmatpush1.bf16.msra.mxu1 %v5158_v39  ;;  %v5250_v38 = vld [vmem:[%s5962_s8 + $0x6c8] ss:$16 sps:$4 sm:$0xff]   ;;  %v5255_v39 = vld [vmem:[%s5962_s8 + $0x6e4] ss:$16 sps:$4 sm:$0xff]  }
  0xf0   : > { %3488 = vmatprep.subr.bf16.mxu0 %v5163_v40  ;;  %3816 = vmatprep.subr.bf16.mxu1 %v5166_v41  ;;  %v5258_v40 = vld [vmem:[%s5962_s8 + $0x6ec] ss:$16 sps:$4 sm:$0xff]   ;;  %v5253_v41 = vld [vmem:[%s5962_s8 + $0x6e0] ss:$16 sps:$4 sm:$0xff]  }
  0xf3   : > { %3489 = vmatpush1.bf16.msra.mxu0 %v5161_v42  ;;  %3817 = vmatpush1.bf16.msra.mxu1 %v5164_v43  ;;  %v5256_v42 = vld [vmem:[%s5962_s8 + $0x6e8] ss:$16 sps:$4 sm:$0xff]   ;;  %v5261_v43 = vld [vmem:[%s5962_s8 + $0x704] ss:$16 sps:$4 sm:$0xff]  }
  0xf4   : > { %3490 = vmatprep.subr.bf16.mxu0 %v5169_v44  ;;  %3818 = vmatprep.subr.bf16.mxu1 %v5172_v45  ;;  %v5264_v44 = vld [vmem:[%s5962_s8 + $0x70c] ss:$16 sps:$4 sm:$0xff]   ;;  %v5259_v45 = vld [vmem:[%s5962_s8 + $0x700] ss:$16 sps:$4 sm:$0xff]  }
  0xf7   : > { %3491 = vmatpush1.bf16.msra.mxu0 %v5167_v46  ;;  %3819 = vmatpush1.bf16.msra.mxu1 %v5170_v47  ;;  %v5262_v46 = vld [vmem:[%s5962_s8 + $0x708] ss:$16 sps:$4 sm:$0xff]   ;;  %v5267_v47 = vld [vmem:[%s5962_s8 + $0x724] ss:$16 sps:$4 sm:$0xff]  }
  0xf8   : > { %3492 = vmatprep.subr.bf16.mxu0 %v5175_v48  ;;  %3820 = vmatprep.subr.bf16.mxu1 %v5178_v49  ;;  %v5270_v48 = vld [vmem:[%s5962_s8 + $0x72c] ss:$16 sps:$4 sm:$0xff]   ;;  %v5265_v49 = vld [vmem:[%s5962_s8 + $0x720] ss:$16 sps:$4 sm:$0xff]  }
  0xfb   : > { %3493 = vmatpush1.bf16.msra.mxu0 %v5173_v50  ;;  %3821 = vmatpush1.bf16.msra.mxu1 %v5176_v51  ;;  %v5268_v50 = vld [vmem:[%s5962_s8 + $0x728] ss:$16 sps:$4 sm:$0xff]   ;;  %v5273_v51 = vld [vmem:[%s5962_s8 + $0x744] ss:$16 sps:$4 sm:$0xff]  }
  0xfc   : > { %3494 = vmatprep.subr.bf16.mxu0 %v5181_v52  ;;  %3822 = vmatprep.subr.bf16.mxu1 %v5184_v53  ;;  %v5276_v52 = vld [vmem:[%s5962_s8 + $0x74c] ss:$16 sps:$4 sm:$0xff]   ;;  %v5271_v53 = vld [vmem:[%s5962_s8 + $0x740] ss:$16 sps:$4 sm:$0xff]  }
  0xff   : > { %3495 = vmatpush1.bf16.msra.mxu0 %v5179_v54  ;;  %3823 = vmatpush1.bf16.msra.mxu1 %v5182_v55  ;;  %v5274_v54 = vld [vmem:[%s5962_s8 + $0x748] ss:$16 sps:$4 sm:$0xff]   ;;  %v5279_v55 = vld [vmem:[%s5962_s8 + $0x764] ss:$16 sps:$4 sm:$0xff]  }
 0x100   : > { %3496 = vmatprep.subr.bf16.mxu0 %v5187_v56  ;;  %3824 = vmatprep.subr.bf16.mxu1 %v5190_v57  ;;  %v5282_v56 = vld [vmem:[%s5962_s8 + $0x76c] ss:$16 sps:$4 sm:$0xff]   ;;  %v5277_v57 = vld [vmem:[%s5962_s8 + $0x760] ss:$16 sps:$4 sm:$0xff]  }
 0x103   : > { %3497 = vmatpush1.bf16.msra.mxu0 %v5185_v58  ;;  %3825 = vmatpush1.bf16.msra.mxu1 %v5188_v59  ;;  %v5280_v58 = vld [vmem:[%s5962_s8 + $0x768] ss:$16 sps:$4 sm:$0xff]   ;;  %v5285_v59 = vld [vmem:[%s5962_s8 + $0x784] ss:$16 sps:$4 sm:$0xff]  }
 0x104   : > { %3498 = vmatprep.subr.bf16.mxu0 %v5193_v60  ;;  %3826 = vmatprep.subr.bf16.mxu1 %v5196_v61  ;;  %v5288_v60 = vld [vmem:[%s5962_s8 + $0x78c] ss:$16 sps:$4 sm:$0xff]   ;;  %v5283_v61 = vld [vmem:[%s5962_s8 + $0x780] ss:$16 sps:$4 sm:$0xff]  }
 0x107   : > { %3499 = vmatpush1.bf16.msra.mxu0 %v5191_v62  ;;  %3827 = vmatpush1.bf16.msra.mxu1 %v5194_v63  ;;  %v5286_v62 = vld [vmem:[%s5962_s8 + $0x788] ss:$16 sps:$4 sm:$0xff]   ;;  %v5291_v63 = vld [vmem:[%s5962_s8 + $0x7a4] ss:$16 sps:$4 sm:$0xff]  }
 0x108   : > { %3500 = vmatprep.subr.bf16.mxu0 %v5199_v0  ;;  %3828 = vmatprep.subr.bf16.mxu1 %v5202_v1  ;;  %v5294_v0 = vld [vmem:[%s5962_s8 + $0x7ac] ss:$16 sps:$4 sm:$0xff]   ;;  %v5289_v1 = vld [vmem:[%s5962_s8 + $0x7a0] ss:$16 sps:$4 sm:$0xff]  }
 0x10b   : > { %3501 = vmatpush1.bf16.msra.mxu0 %v5197_v2  ;;  %3829 = vmatpush1.bf16.msra.mxu1 %v5200_v3  ;;  %v5292_v2 = vld [vmem:[%s5962_s8 + $0x7a8] ss:$16 sps:$4 sm:$0xff]   ;;  %v5297_v3 = vld [vmem:[%s5962_s8 + $0x7c4] ss:$16 sps:$4 sm:$0xff]  }
 0x10c   : > { %3502 = vmatprep.subr.bf16.mxu0 %v5205_v4  ;;  %3830 = vmatprep.subr.bf16.mxu1 %v5208_v5  ;;  %v5300_v4 = vld [vmem:[%s5962_s8 + $0x7cc] ss:$16 sps:$4 sm:$0xff]   ;;  %v5295_v5 = vld [vmem:[%s5962_s8 + $0x7c0] ss:$16 sps:$4 sm:$0xff]  }
 0x10f   : > { %3503 = vmatpush1.bf16.msra.mxu0 %v5203_v6  ;;  %3831 = vmatpush1.bf16.msra.mxu1 %v5206_v7  ;;  %v5298_v6 = vld [vmem:[%s5962_s8 + $0x7c8] ss:$16 sps:$4 sm:$0xff]   ;;  %v5303_v7 = vld [vmem:[%s5962_s8 + $0x7e4] ss:$16 sps:$4 sm:$0xff]  }
 0x110   : > { %3513 = vmatprep.subr.bf16.mxu0 %v5213_v8  ;;  %3841 = vmatprep.subr.bf16.mxu1 %v5216_v9  ;;  %v5306_v8 = vld [vmem:[%s5962_s8 + $0x7ec] ss:$16 sps:$4 sm:$0xff]   ;;  %v5301_v9 = vld [vmem:[%s5962_s8 + $0x7e0] ss:$16 sps:$4 sm:$0xff]  }
 0x112   : > { %3505 = vmatmul.mubr.bf16.vlgmr.msra.gmra.mrb[0].mxu0 %v4277_v12  ;;  %3833 = vmatmul.mubr.bf16.vlgmr.msra.gmra.mrb[0].mxu1 %v4277_v12  ;;  %v5311_v12 = vld [vmem:[%s5962_s8 + $0x804] ss:$16 sps:$4 sm:$0xff]  }
 0x113   : > { %3514 = vmatpush1.bf16.msra.mxu0 %v5211_v10  ;;  %3842 = vmatpush1.bf16.msra.mxu1 %v5214_v13  ;;  %v5304_v10 = vld [vmem:[%s5962_s8 + $0x7e8] ss:$16 sps:$4 sm:$0xff]   ;;  %v5314_v13 = vld [vmem:[%s5962_s8 + $0x80c] ss:$16 sps:$4 sm:$0xff]  }
 0x114   : > { %3515 = vmatprep.subr.bf16.mxu0 %v5219_v15  ;;  %3843 = vmatprep.subr.bf16.mxu1 %v5222_v16  ;;  %v5309_v15 = vld [vmem:[%s5962_s8 + $0x800] ss:$16 sps:$4 sm:$0xff]   ;;  %v4279_v16 = vcombine.low %v6194_v14, %v6194_v14 }
 0x115   : > { %3545 = vmatprep.mubr.bf16.mxu0 %v4280_v17  ;;  %3873 = vmatprep.mubr.bf16.mxu1 %v4280_v17  ;;  %v6266_v17 = vld [vmem:[%s6604_s0 + $0x20] sm:$0xff] }
 0x116   : > { %v5315_v14 = vld [vmem:[%s5962_s8 + $0x820] ss:$16 sps:$4 sm:$0xff]  }
 0x117   : > { %3516 = vmatpush1.bf16.msra.mxu0 %v5217_v11  ;;  %3844 = vmatpush1.bf16.msra.mxu1 %v5220_v18  ;;  %v5312_v11 = vld [vmem:[%s5962_s8 + $0x808] ss:$16 sps:$4 sm:$0xff]   ;;  %v5317_v18 = vld [vmem:[%s5962_s8 + $0x824] ss:$16 sps:$4 sm:$0xff]  }
 0x118   : > { %3517 = vmatprep.subr.bf16.mxu0 %v5225_v19  ;;  %3845 = vmatprep.subr.bf16.mxu1 %v5228_v20  ;;  %v5320_v19 = vld [vmem:[%s5962_s8 + $0x82c] ss:$16 sps:$4 sm:$0xff]   ;;  %v4282_v20 = vcombine.high %v6266_v17, %v6266_v17 }
 0x11b   : > { %3518 = vmatpush1.bf16.msra.mxu0 %v5223_v21  ;;  %3846 = vmatpush1.bf16.msra.mxu1 %v5226_v22  ;;  %v5318_v21 = vld [vmem:[%s5962_s8 + $0x828] ss:$16 sps:$4 sm:$0xff]   ;;  %v5323_v22 = vld [vmem:[%s5962_s8 + $0x844] ss:$16 sps:$4 sm:$0xff]  }
 0x11c   : > { %3519 = vmatprep.subr.bf16.mxu0 %v5231_v23  ;;  %3847 = vmatprep.subr.bf16.mxu1 %v5234_v24  ;;  %v5326_v23 = vld [vmem:[%s5962_s8 + $0x84c] ss:$16 sps:$4 sm:$0xff]   ;;  %v5321_v24 = vld [vmem:[%s5962_s8 + $0x840] ss:$16 sps:$4 sm:$0xff]  }
 0x11f   : > { %3520 = vmatpush1.bf16.msra.mxu0 %v5229_v25  ;;  %3848 = vmatpush1.bf16.msra.mxu1 %v5232_v26  ;;  %v5324_v25 = vld [vmem:[%s5962_s8 + $0x848] ss:$16 sps:$4 sm:$0xff]   ;;  %v5329_v26 = vld [vmem:[%s5962_s8 + $0x864] ss:$16 sps:$4 sm:$0xff]  }
 0x120   : > { %3521 = vmatprep.subr.bf16.mxu0 %v5237_v27  ;;  %3849 = vmatprep.subr.bf16.mxu1 %v5240_v28  ;;  %v5332_v27 = vld [vmem:[%s5962_s8 + $0x86c] ss:$16 sps:$4 sm:$0xff]   ;;  %v5327_v28 = vld [vmem:[%s5962_s8 + $0x860] ss:$16 sps:$4 sm:$0xff]  }
 0x123   : > { %3522 = vmatpush1.bf16.msra.mxu0 %v5235_v29  ;;  %3850 = vmatpush1.bf16.msra.mxu1 %v5238_v30  ;;  %v5330_v29 = vld [vmem:[%s5962_s8 + $0x868] ss:$16 sps:$4 sm:$0xff]   ;;  %v5335_v30 = vld [vmem:[%s5962_s8 + $0x884] ss:$16 sps:$4 sm:$0xff]  }
 0x124   : > { %3523 = vmatprep.subr.bf16.mxu0 %v5243_v31  ;;  %3851 = vmatprep.subr.bf16.mxu1 %v5246_v32  ;;  %v5338_v31 = vld [vmem:[%s5962_s8 + $0x88c] ss:$16 sps:$4 sm:$0xff]   ;;  %v5333_v32 = vld [vmem:[%s5962_s8 + $0x880] ss:$16 sps:$4 sm:$0xff]  }
 0x127   : > { %3524 = vmatpush1.bf16.msra.mxu0 %v5241_v33  ;;  %3852 = vmatpush1.bf16.msra.mxu1 %v5244_v34  ;;  %v5336_v33 = vld [vmem:[%s5962_s8 + $0x888] ss:$16 sps:$4 sm:$0xff]   ;;  %v5341_v34 = vld [vmem:[%s5962_s8 + $0x8a4] ss:$16 sps:$4 sm:$0xff]  }
 0x128   : > { %3525 = vmatprep.subr.bf16.mxu0 %v5249_v35  ;;  %3853 = vmatprep.subr.bf16.mxu1 %v5252_v36  ;;  %v5344_v35 = vld [vmem:[%s5962_s8 + $0x8ac] ss:$16 sps:$4 sm:$0xff]   ;;  %v5339_v36 = vld [vmem:[%s5962_s8 + $0x8a0] ss:$16 sps:$4 sm:$0xff]  }
 0x12b   : > { %3526 = vmatpush1.bf16.msra.mxu0 %v5247_v37  ;;  %3854 = vmatpush1.bf16.msra.mxu1 %v5250_v38  ;;  %v5342_v37 = vld [vmem:[%s5962_s8 + $0x8a8] ss:$16 sps:$4 sm:$0xff]   ;;  %v5347_v38 = vld [vmem:[%s5962_s8 + $0x8c4] ss:$16 sps:$4 sm:$0xff]  }
 0x12c   : > { %3527 = vmatprep.subr.bf16.mxu0 %v5255_v39  ;;  %3855 = vmatprep.subr.bf16.mxu1 %v5258_v40  ;;  %v5350_v39 = vld [vmem:[%s5962_s8 + $0x8cc] ss:$16 sps:$4 sm:$0xff]   ;;  %v5345_v40 = vld [vmem:[%s5962_s8 + $0x8c0] ss:$16 sps:$4 sm:$0xff]  }
 0x12f   : > { %3528 = vmatpush1.bf16.msra.mxu0 %v5253_v41  ;;  %3856 = vmatpush1.bf16.msra.mxu1 %v5256_v42  ;;  %v5348_v41 = vld [vmem:[%s5962_s8 + $0x8c8] ss:$16 sps:$4 sm:$0xff]   ;;  %v5353_v42 = vld [vmem:[%s5962_s8 + $0x8e4] ss:$16 sps:$4 sm:$0xff]  }
 0x130   : > { %3529 = vmatprep.subr.bf16.mxu0 %v5261_v43  ;;  %3857 = vmatprep.subr.bf16.mxu1 %v5264_v44  ;;  %v5356_v43 = vld [vmem:[%s5962_s8 + $0x8ec] ss:$16 sps:$4 sm:$0xff]   ;;  %v5351_v44 = vld [vmem:[%s5962_s8 + $0x8e0] ss:$16 sps:$4 sm:$0xff]  }
 0x133   : > { %3530 = vmatpush1.bf16.msra.mxu0 %v5259_v45  ;;  %3858 = vmatpush1.bf16.msra.mxu1 %v5262_v46  ;;  %v5354_v45 = vld [vmem:[%s5962_s8 + $0x8e8] ss:$16 sps:$4 sm:$0xff]   ;;  %v5359_v46 = vld [vmem:[%s5962_s8 + $0x904] ss:$16 sps:$4 sm:$0xff]  }
 0x134   : > { %3531 = vmatprep.subr.bf16.mxu0 %v5267_v47  ;;  %3859 = vmatprep.subr.bf16.mxu1 %v5270_v48  ;;  %v5362_v47 = vld [vmem:[%s5962_s8 + $0x90c] ss:$16 sps:$4 sm:$0xff]   ;;  %v5357_v48 = vld [vmem:[%s5962_s8 + $0x900] ss:$16 sps:$4 sm:$0xff]  }
 0x137   : > { %3532 = vmatpush1.bf16.msra.mxu0 %v5265_v49  ;;  %3860 = vmatpush1.bf16.msra.mxu1 %v5268_v50  ;;  %v5360_v49 = vld [vmem:[%s5962_s8 + $0x908] ss:$16 sps:$4 sm:$0xff]   ;;  %v5365_v50 = vld [vmem:[%s5962_s8 + $0x924] ss:$16 sps:$4 sm:$0xff]  }
 0x138   : > { %3533 = vmatprep.subr.bf16.mxu0 %v5273_v51  ;;  %3861 = vmatprep.subr.bf16.mxu1 %v5276_v52  ;;  %v5368_v51 = vld [vmem:[%s5962_s8 + $0x92c] ss:$16 sps:$4 sm:$0xff]   ;;  %v5363_v52 = vld [vmem:[%s5962_s8 + $0x920] ss:$16 sps:$4 sm:$0xff]  }
 0x13b   : > { %3534 = vmatpush1.bf16.msra.mxu0 %v5271_v53  ;;  %3862 = vmatpush1.bf16.msra.mxu1 %v5274_v54  ;;  %v5366_v53 = vld [vmem:[%s5962_s8 + $0x928] ss:$16 sps:$4 sm:$0xff]   ;;  %v5371_v54 = vld [vmem:[%s5962_s8 + $0x944] ss:$16 sps:$4 sm:$0xff]  }
 0x13c   : > { %3535 = vmatprep.subr.bf16.mxu0 %v5279_v55  ;;  %3863 = vmatprep.subr.bf16.mxu1 %v5282_v56  ;;  %v5374_v55 = vld [vmem:[%s5962_s8 + $0x94c] ss:$16 sps:$4 sm:$0xff]   ;;  %v5369_v56 = vld [vmem:[%s5962_s8 + $0x940] ss:$16 sps:$4 sm:$0xff]  }
 0x13f   : > { %3536 = vmatpush1.bf16.msra.mxu0 %v5277_v57  ;;  %3864 = vmatpush1.bf16.msra.mxu1 %v5280_v58  ;;  %v5372_v57 = vld [vmem:[%s5962_s8 + $0x948] ss:$16 sps:$4 sm:$0xff]   ;;  %v5377_v58 = vld [vmem:[%s5962_s8 + $0x964] ss:$16 sps:$4 sm:$0xff]  }
 0x140   : > { %3537 = vmatprep.subr.bf16.mxu0 %v5285_v59  ;;  %3865 = vmatprep.subr.bf16.mxu1 %v5288_v60  ;;  %v5380_v59 = vld [vmem:[%s5962_s8 + $0x96c] ss:$16 sps:$4 sm:$0xff]   ;;  %v5375_v60 = vld [vmem:[%s5962_s8 + $0x960] ss:$16 sps:$4 sm:$0xff]  }
 0x143   : > { %3538 = vmatpush1.bf16.msra.mxu0 %v5283_v61  ;;  %3866 = vmatpush1.bf16.msra.mxu1 %v5286_v62  ;;  %v5378_v61 = vld [vmem:[%s5962_s8 + $0x968] ss:$16 sps:$4 sm:$0xff]   ;;  %v5383_v62 = vld [vmem:[%s5962_s8 + $0x984] ss:$16 sps:$4 sm:$0xff]  }
 0x144   : > { %3539 = vmatprep.subr.bf16.mxu0 %v5291_v63  ;;  %3867 = vmatprep.subr.bf16.mxu1 %v5294_v0  ;;  %v5386_v63 = vld [vmem:[%s5962_s8 + $0x98c] ss:$16 sps:$4 sm:$0xff]   ;;  %v5381_v0 = vld [vmem:[%s5962_s8 + $0x980] ss:$16 sps:$4 sm:$0xff]  }
 0x147   : > { %3540 = vmatpush1.bf16.msra.mxu0 %v5289_v1  ;;  %3868 = vmatpush1.bf16.msra.mxu1 %v5292_v2  ;;  %v5384_v1 = vld [vmem:[%s5962_s8 + $0x988] ss:$16 sps:$4 sm:$0xff]   ;;  %v5389_v2 = vld [vmem:[%s5962_s8 + $0x9a4] ss:$16 sps:$4 sm:$0xff]  }
 0x148   : > { %3541 = vmatprep.subr.bf16.mxu0 %v5297_v3  ;;  %3869 = vmatprep.subr.bf16.mxu1 %v5300_v4  ;;  %v5392_v3 = vld [vmem:[%s5962_s8 + $0x9ac] ss:$16 sps:$4 sm:$0xff]   ;;  %v5387_v4 = vld [vmem:[%s5962_s8 + $0x9a0] ss:$16 sps:$4 sm:$0xff]  }
 0x14b   : > { %3542 = vmatpush1.bf16.msra.mxu0 %v5295_v5  ;;  %3870 = vmatpush1.bf16.msra.mxu1 %v5298_v6  ;;  %v5390_v5 = vld [vmem:[%s5962_s8 + $0x9a8] ss:$16 sps:$4 sm:$0xff]   ;;  %v5395_v6 = vld [vmem:[%s5962_s8 + $0x9c4] ss:$16 sps:$4 sm:$0xff]  }
 0x14c   : > { %3543 = vmatprep.subr.bf16.mxu0 %v5303_v7  ;;  %3871 = vmatprep.subr.bf16.mxu1 %v5306_v8  ;;  %v5398_v7 = vld [vmem:[%s5962_s8 + $0x9cc] ss:$16 sps:$4 sm:$0xff]   ;;  %v5393_v8 = vld [vmem:[%s5962_s8 + $0x9c0] ss:$16 sps:$4 sm:$0xff]  }
 0x14f   : > { %3544 = vmatpush1.bf16.msra.mxu0 %v5301_v9  ;;  %3872 = vmatpush1.bf16.msra.mxu1 %v5304_v10  ;;  %v5396_v9 = vld [vmem:[%s5962_s8 + $0x9c8] ss:$16 sps:$4 sm:$0xff]   ;;  %v5401_v10 = vld [vmem:[%s5962_s8 + $0x9e4] ss:$16 sps:$4 sm:$0xff]  }
 0x150   : > { %3554 = vmatprep.subr.bf16.mxu0 %v5311_v12  ;;  %3882 = vmatprep.subr.bf16.mxu1 %v5314_v13  ;;  %v5404_v12 = vld [vmem:[%s5962_s8 + $0x9ec] ss:$16 sps:$4 sm:$0xff]   ;;  %v5399_v13 = vld [vmem:[%s5962_s8 + $0x9e0] ss:$16 sps:$4 sm:$0xff]  }
 0x152   : > { %3546 = vmatmul.mubr.bf16.vlgmr.msra.gmra.mrb[0].mxu0 %v4279_v16  ;;  %3874 = vmatmul.mubr.bf16.vlgmr.msra.gmra.mrb[0].mxu1 %v4279_v16  ;;  %v5409_v16 = vld [vmem:[%s5962_s8 + $0xa04] ss:$16 sps:$4 sm:$0xff]  }
 0x153   : > { %3555 = vmatpush1.bf16.msra.mxu0 %v5309_v15  ;;  %3883 = vmatpush1.bf16.msra.mxu1 %v5312_v11  ;;  %v5402_v15 = vld [vmem:[%s5962_s8 + $0x9e8] ss:$16 sps:$4 sm:$0xff]   ;;  %v5412_v11 = vld [vmem:[%s5962_s8 + $0xa0c] ss:$16 sps:$4 sm:$0xff]  }
 0x154   : > { %3556 = vmatprep.subr.bf16.mxu0 %v5317_v18  ;;  %3884 = vmatprep.subr.bf16.mxu1 %v5320_v19  ;;  %v6336_v18 = vld [vmem:[%s6604_s0 + $0x28] sm:$0xff]  ;;  %v4281_v19 = vcombine.low %v6266_v17, %v6266_v17  ;;  %v5413_v17 = vld [vmem:[%s5962_s8 + $0xa20] ss:$16 sps:$4 sm:$0xff]  }
 0x155   : > { %3586 = vmatprep.mubr.bf16.mxu0 %v4282_v20  ;;  %3914 = vmatprep.mubr.bf16.mxu1 %v4282_v20  ;;  %v5407_v20 = vld [vmem:[%s5962_s8 + $0xa00] ss:$16 sps:$4 sm:$0xff]  }
 0x157   : > { %3557 = vmatpush1.bf16.msra.mxu0 %v5315_v14  ;;  %3885 = vmatpush1.bf16.msra.mxu1 %v5318_v21  ;;  %v5410_v14 = vld [vmem:[%s5962_s8 + $0xa08] ss:$16 sps:$4 sm:$0xff]   ;;  %v5415_v21 = vld [vmem:[%s5962_s8 + $0xa24] ss:$16 sps:$4 sm:$0xff]  }
 0x158   : > { %3558 = vmatprep.subr.bf16.mxu0 %v5323_v22  ;;  %3886 = vmatprep.subr.bf16.mxu1 %v5326_v23  ;;  %v5418_v22 = vld [vmem:[%s5962_s8 + $0xa2c] ss:$16 sps:$4 sm:$0xff]   ;;  %v4284_v23 = vcombine.high %v6336_v18, %v6336_v18 }
 0x15b   : > { %3559 = vmatpush1.bf16.msra.mxu0 %v5321_v24  ;;  %3887 = vmatpush1.bf16.msra.mxu1 %v5324_v25  ;;  %v5416_v24 = vld [vmem:[%s5962_s8 + $0xa28] ss:$16 sps:$4 sm:$0xff]   ;;  %v5421_v25 = vld [vmem:[%s5962_s8 + $0xa44] ss:$16 sps:$4 sm:$0xff]  }
 0x15c   : > { %3560 = vmatprep.subr.bf16.mxu0 %v5329_v26  ;;  %3888 = vmatprep.subr.bf16.mxu1 %v5332_v27  ;;  %v5424_v26 = vld [vmem:[%s5962_s8 + $0xa4c] ss:$16 sps:$4 sm:$0xff]   ;;  %v5419_v27 = vld [vmem:[%s5962_s8 + $0xa40] ss:$16 sps:$4 sm:$0xff]  }
 0x15f   : > { %3561 = vmatpush1.bf16.msra.mxu0 %v5327_v28  ;;  %3889 = vmatpush1.bf16.msra.mxu1 %v5330_v29  ;;  %v5422_v28 = vld [vmem:[%s5962_s8 + $0xa48] ss:$16 sps:$4 sm:$0xff]   ;;  %v5427_v29 = vld [vmem:[%s5962_s8 + $0xa64] ss:$16 sps:$4 sm:$0xff]  }
 0x160   : > { %3562 = vmatprep.subr.bf16.mxu0 %v5335_v30  ;;  %3890 = vmatprep.subr.bf16.mxu1 %v5338_v31  ;;  %v5430_v30 = vld [vmem:[%s5962_s8 + $0xa6c] ss:$16 sps:$4 sm:$0xff]   ;;  %v5425_v31 = vld [vmem:[%s5962_s8 + $0xa60] ss:$16 sps:$4 sm:$0xff]  }
 0x163   : > { %3563 = vmatpush1.bf16.msra.mxu0 %v5333_v32  ;;  %3891 = vmatpush1.bf16.msra.mxu1 %v5336_v33  ;;  %v5428_v32 = vld [vmem:[%s5962_s8 + $0xa68] ss:$16 sps:$4 sm:$0xff]   ;;  %v5433_v33 = vld [vmem:[%s5962_s8 + $0xa84] ss:$16 sps:$4 sm:$0xff]  }
 0x164   : > { %3564 = vmatprep.subr.bf16.mxu0 %v5341_v34  ;;  %3892 = vmatprep.subr.bf16.mxu1 %v5344_v35  ;;  %v5436_v34 = vld [vmem:[%s5962_s8 + $0xa8c] ss:$16 sps:$4 sm:$0xff]   ;;  %v5431_v35 = vld [vmem:[%s5962_s8 + $0xa80] ss:$16 sps:$4 sm:$0xff]  }
 0x167   : > { %3565 = vmatpush1.bf16.msra.mxu0 %v5339_v36  ;;  %3893 = vmatpush1.bf16.msra.mxu1 %v5342_v37  ;;  %v5434_v36 = vld [vmem:[%s5962_s8 + $0xa88] ss:$16 sps:$4 sm:$0xff]   ;;  %v5439_v37 = vld [vmem:[%s5962_s8 + $0xaa4] ss:$16 sps:$4 sm:$0xff]  }
 0x168   : > { %3566 = vmatprep.subr.bf16.mxu0 %v5347_v38  ;;  %3894 = vmatprep.subr.bf16.mxu1 %v5350_v39  ;;  %v5442_v38 = vld [vmem:[%s5962_s8 + $0xaac] ss:$16 sps:$4 sm:$0xff]   ;;  %v5437_v39 = vld [vmem:[%s5962_s8 + $0xaa0] ss:$16 sps:$4 sm:$0xff]  }
 0x16b   : > { %3567 = vmatpush1.bf16.msra.mxu0 %v5345_v40  ;;  %3895 = vmatpush1.bf16.msra.mxu1 %v5348_v41  ;;  %v5440_v40 = vld [vmem:[%s5962_s8 + $0xaa8] ss:$16 sps:$4 sm:$0xff]   ;;  %v5445_v41 = vld [vmem:[%s5962_s8 + $0xac4] ss:$16 sps:$4 sm:$0xff]  }
 0x16c   : > { %3568 = vmatprep.subr.bf16.mxu0 %v5353_v42  ;;  %3896 = vmatprep.subr.bf16.mxu1 %v5356_v43  ;;  %v5448_v42 = vld [vmem:[%s5962_s8 + $0xacc] ss:$16 sps:$4 sm:$0xff]   ;;  %v5443_v43 = vld [vmem:[%s5962_s8 + $0xac0] ss:$16 sps:$4 sm:$0xff]  }
 0x16f   : > { %3569 = vmatpush1.bf16.msra.mxu0 %v5351_v44  ;;  %3897 = vmatpush1.bf16.msra.mxu1 %v5354_v45  ;;  %v5446_v44 = vld [vmem:[%s5962_s8 + $0xac8] ss:$16 sps:$4 sm:$0xff]   ;;  %v5451_v45 = vld [vmem:[%s5962_s8 + $0xae4] ss:$16 sps:$4 sm:$0xff]  }
 0x170   : > { %3570 = vmatprep.subr.bf16.mxu0 %v5359_v46  ;;  %3898 = vmatprep.subr.bf16.mxu1 %v5362_v47  ;;  %v5454_v46 = vld [vmem:[%s5962_s8 + $0xaec] ss:$16 sps:$4 sm:$0xff]   ;;  %v5449_v47 = vld [vmem:[%s5962_s8 + $0xae0] ss:$16 sps:$4 sm:$0xff]  }
 0x173   : > { %3571 = vmatpush1.bf16.msra.mxu0 %v5357_v48  ;;  %3899 = vmatpush1.bf16.msra.mxu1 %v5360_v49  ;;  %v5452_v48 = vld [vmem:[%s5962_s8 + $0xae8] ss:$16 sps:$4 sm:$0xff]   ;;  %v5457_v49 = vld [vmem:[%s5962_s8 + $0xb04] ss:$16 sps:$4 sm:$0xff]  }
 0x174   : > { %3572 = vmatprep.subr.bf16.mxu0 %v5365_v50  ;;  %3900 = vmatprep.subr.bf16.mxu1 %v5368_v51  ;;  %v5460_v50 = vld [vmem:[%s5962_s8 + $0xb0c] ss:$16 sps:$4 sm:$0xff]   ;;  %v5455_v51 = vld [vmem:[%s5962_s8 + $0xb00] ss:$16 sps:$4 sm:$0xff]  }
 0x177   : > { %3573 = vmatpush1.bf16.msra.mxu0 %v5363_v52  ;;  %3901 = vmatpush1.bf16.msra.mxu1 %v5366_v53  ;;  %v5458_v52 = vld [vmem:[%s5962_s8 + $0xb08] ss:$16 sps:$4 sm:$0xff]   ;;  %v5463_v53 = vld [vmem:[%s5962_s8 + $0xb24] ss:$16 sps:$4 sm:$0xff]  }
 0x178   : > { %3574 = vmatprep.subr.bf16.mxu0 %v5371_v54  ;;  %3902 = vmatprep.subr.bf16.mxu1 %v5374_v55  ;;  %v5466_v54 = vld [vmem:[%s5962_s8 + $0xb2c] ss:$16 sps:$4 sm:$0xff]   ;;  %v5461_v55 = vld [vmem:[%s5962_s8 + $0xb20] ss:$16 sps:$4 sm:$0xff]  }
 0x17b   : > { %3575 = vmatpush1.bf16.msra.mxu0 %v5369_v56  ;;  %3903 = vmatpush1.bf16.msra.mxu1 %v5372_v57  ;;  %v5464_v56 = vld [vmem:[%s5962_s8 + $0xb28] ss:$16 sps:$4 sm:$0xff]   ;;  %v5469_v57 = vld [vmem:[%s5962_s8 + $0xb44] ss:$16 sps:$4 sm:$0xff]  }
 0x17c   : > { %3576 = vmatprep.subr.bf16.mxu0 %v5377_v58  ;;  %3904 = vmatprep.subr.bf16.mxu1 %v5380_v59  ;;  %v5472_v58 = vld [vmem:[%s5962_s8 + $0xb4c] ss:$16 sps:$4 sm:$0xff]   ;;  %v5467_v59 = vld [vmem:[%s5962_s8 + $0xb40] ss:$16 sps:$4 sm:$0xff]  }
 0x17f   : > { %3577 = vmatpush1.bf16.msra.mxu0 %v5375_v60  ;;  %3905 = vmatpush1.bf16.msra.mxu1 %v5378_v61  ;;  %v5470_v60 = vld [vmem:[%s5962_s8 + $0xb48] ss:$16 sps:$4 sm:$0xff]   ;;  %v5475_v61 = vld [vmem:[%s5962_s8 + $0xb64] ss:$16 sps:$4 sm:$0xff]  }
 0x180   : > { %3578 = vmatprep.subr.bf16.mxu0 %v5383_v62  ;;  %3906 = vmatprep.subr.bf16.mxu1 %v5386_v63  ;;  %v5478_v62 = vld [vmem:[%s5962_s8 + $0xb6c] ss:$16 sps:$4 sm:$0xff]   ;;  %v5473_v63 = vld [vmem:[%s5962_s8 + $0xb60] ss:$16 sps:$4 sm:$0xff]  }
 0x183   : > { %3579 = vmatpush1.bf16.msra.mxu0 %v5381_v0  ;;  %3907 = vmatpush1.bf16.msra.mxu1 %v5384_v1  ;;  %v5476_v0 = vld [vmem:[%s5962_s8 + $0xb68] ss:$16 sps:$4 sm:$0xff]   ;;  %v5481_v1 = vld [vmem:[%s5962_s8 + $0xb84] ss:$16 sps:$4 sm:$0xff]  }
 0x184   : > { %3580 = vmatprep.subr.bf16.mxu0 %v5389_v2  ;;  %3908 = vmatprep.subr.bf16.mxu1 %v5392_v3  ;;  %v5484_v2 = vld [vmem:[%s5962_s8 + $0xb8c] ss:$16 sps:$4 sm:$0xff]   ;;  %v5479_v3 = vld [vmem:[%s5962_s8 + $0xb80] ss:$16 sps:$4 sm:$0xff]  }
 0x187   : > { %3581 = vmatpush1.bf16.msra.mxu0 %v5387_v4  ;;  %3909 = vmatpush1.bf16.msra.mxu1 %v5390_v5  ;;  %v5482_v4 = vld [vmem:[%s5962_s8 + $0xb88] ss:$16 sps:$4 sm:$0xff]   ;;  %v5487_v5 = vld [vmem:[%s5962_s8 + $0xba4] ss:$16 sps:$4 sm:$0xff]  }
 0x188   : > { %3582 = vmatprep.subr.bf16.mxu0 %v5395_v6  ;;  %3910 = vmatprep.subr.bf16.mxu1 %v5398_v7  ;;  %v5490_v6 = vld [vmem:[%s5962_s8 + $0xbac] ss:$16 sps:$4 sm:$0xff]   ;;  %v5485_v7 = vld [vmem:[%s5962_s8 + $0xba0] ss:$16 sps:$4 sm:$0xff]  }
 0x18b   : > { %3583 = vmatpush1.bf16.msra.mxu0 %v5393_v8  ;;  %3911 = vmatpush1.bf16.msra.mxu1 %v5396_v9  ;;  %v5488_v8 = vld [vmem:[%s5962_s8 + $0xba8] ss:$16 sps:$4 sm:$0xff]   ;;  %v5493_v9 = vld [vmem:[%s5962_s8 + $0xbc4] ss:$16 sps:$4 sm:$0xff]  }
 0x18c   : > { %3584 = vmatprep.subr.bf16.mxu0 %v5401_v10  ;;  %3912 = vmatprep.subr.bf16.mxu1 %v5404_v12  ;;  %v5496_v10 = vld [vmem:[%s5962_s8 + $0xbcc] ss:$16 sps:$4 sm:$0xff]   ;;  %v5491_v12 = vld [vmem:[%s5962_s8 + $0xbc0] ss:$16 sps:$4 sm:$0xff]  }
 0x18f   : > { %3585 = vmatpush1.bf16.msra.mxu0 %v5399_v13  ;;  %3913 = vmatpush1.bf16.msra.mxu1 %v5402_v15  ;;  %v5494_v13 = vld [vmem:[%s5962_s8 + $0xbc8] ss:$16 sps:$4 sm:$0xff]   ;;  %v5499_v15 = vld [vmem:[%s5962_s8 + $0xbe4] ss:$16 sps:$4 sm:$0xff]  }
 0x190   : > { %3595 = vmatprep.subr.bf16.mxu0 %v5409_v16  ;;  %3923 = vmatprep.subr.bf16.mxu1 %v5412_v11  ;;  %v5502_v16 = vld [vmem:[%s5962_s8 + $0xbec] ss:$16 sps:$4 sm:$0xff]   ;;  %v5497_v11 = vld [vmem:[%s5962_s8 + $0xbe0] ss:$16 sps:$4 sm:$0xff]  }
 0x192   : > { %3587 = vmatmul.mubr.bf16.vlgmr.msra.gmra.mrb[0].mxu0 %v4281_v19  ;;  %3915 = vmatmul.mubr.bf16.vlgmr.msra.gmra.mrb[0].mxu1 %v4281_v19  ;;  %v5500_v19 = vld [vmem:[%s5962_s8 + $0xbe8] ss:$16 sps:$4 sm:$0xff]  }
 0x193   : > { %3596 = vmatpush1.bf16.msra.mxu0 %v5407_v20  ;;  %3924 = vmatpush1.bf16.msra.mxu1 %v5410_v14  ;;  %v5507_v20 = vld [vmem:[%s5962_s8 + $0xc04] ss:$16 sps:$4 sm:$0xff]   ;;  %v5510_v14 = vld [vmem:[%s5962_s8 + $0xc0c] ss:$16 sps:$4 sm:$0xff]  }
 0x194   : > { %3597 = vmatprep.subr.bf16.mxu0 %v5415_v21  ;;  %3925 = vmatprep.subr.bf16.mxu1 %v5418_v22  ;;  %v4283_v21 = vcombine.low %v6336_v18, %v6336_v18  ;;  %v6411_v22 = vld [vmem:[%s6604_s0 + $0x30] sm:$0xff] }
 0x195   : > { %3627 = vmatprep.mubr.bf16.mxu0 %v4284_v23  ;;  %3955 = vmatprep.mubr.bf16.mxu1 %v4284_v23  ;;  %v5505_v23 = vld [vmem:[%s5962_s8 + $0xc00] ss:$16 sps:$4 sm:$0xff]   ;;  %v4286_v18 = vcombine.high %v6411_v22, %v6411_v22 }
 0x197   : > { %3598 = vmatpush1.bf16.msra.mxu0 %v5413_v17  ;;  %3926 = vmatpush1.bf16.msra.mxu1 %v5416_v24  ;;  %v5508_v17 = vld [vmem:[%s5962_s8 + $0xc08] ss:$16 sps:$4 sm:$0xff]   ;;  %v5513_v24 = vld [vmem:[%s5962_s8 + $0xc24] ss:$16 sps:$4 sm:$0xff]  }
 0x198   : > { %3599 = vmatprep.subr.bf16.mxu0 %v5421_v25  ;;  %3927 = vmatprep.subr.bf16.mxu1 %v5424_v26  ;;  %v5516_v25 = vld [vmem:[%s5962_s8 + $0xc2c] ss:$16 sps:$4 sm:$0xff]   ;;  %v5511_v26 = vld [vmem:[%s5962_s8 + $0xc20] ss:$16 sps:$4 sm:$0xff]  }
 0x19b   : > { %3600 = vmatpush1.bf16.msra.mxu0 %v5419_v27  ;;  %3928 = vmatpush1.bf16.msra.mxu1 %v5422_v28  ;;  %v5514_v27 = vld [vmem:[%s5962_s8 + $0xc28] ss:$16 sps:$4 sm:$0xff]   ;;  %v5519_v28 = vld [vmem:[%s5962_s8 + $0xc44] ss:$16 sps:$4 sm:$0xff]  }
 0x19c   : > { %3601 = vmatprep.subr.bf16.mxu0 %v5427_v29  ;;  %3929 = vmatprep.subr.bf16.mxu1 %v5430_v30  ;;  %v5522_v29 = vld [vmem:[%s5962_s8 + $0xc4c] ss:$16 sps:$4 sm:$0xff]   ;;  %v5517_v30 = vld [vmem:[%s5962_s8 + $0xc40] ss:$16 sps:$4 sm:$0xff]  }
 0x19f   : > { %3602 = vmatpush1.bf16.msra.mxu0 %v5425_v31  ;;  %3930 = vmatpush1.bf16.msra.mxu1 %v5428_v32  ;;  %v5520_v31 = vld [vmem:[%s5962_s8 + $0xc48] ss:$16 sps:$4 sm:$0xff]   ;;  %v5525_v32 = vld [vmem:[%s5962_s8 + $0xc64] ss:$16 sps:$4 sm:$0xff]  }
 0x1a0   : > { %3603 = vmatprep.subr.bf16.mxu0 %v5433_v33  ;;  %3931 = vmatprep.subr.bf16.mxu1 %v5436_v34  ;;  %v5528_v33 = vld [vmem:[%s5962_s8 + $0xc6c] ss:$16 sps:$4 sm:$0xff]   ;;  %v5523_v34 = vld [vmem:[%s5962_s8 + $0xc60] ss:$16 sps:$4 sm:$0xff]  }
 0x1a3   : > { %3604 = vmatpush1.bf16.msra.mxu0 %v5431_v35  ;;  %3932 = vmatpush1.bf16.msra.mxu1 %v5434_v36  ;;  %v5526_v35 = vld [vmem:[%s5962_s8 + $0xc68] ss:$16 sps:$4 sm:$0xff]   ;;  %v5531_v36 = vld [vmem:[%s5962_s8 + $0xc84] ss:$16 sps:$4 sm:$0xff]  }
 0x1a4   : > { %3605 = vmatprep.subr.bf16.mxu0 %v5439_v37  ;;  %3933 = vmatprep.subr.bf16.mxu1 %v5442_v38  ;;  %v5534_v37 = vld [vmem:[%s5962_s8 + $0xc8c] ss:$16 sps:$4 sm:$0xff]   ;;  %v5529_v38 = vld [vmem:[%s5962_s8 + $0xc80] ss:$16 sps:$4 sm:$0xff]  }
 0x1a7   : > { %3606 = vmatpush1.bf16.msra.mxu0 %v5437_v39  ;;  %3934 = vmatpush1.bf16.msra.mxu1 %v5440_v40  ;;  %v5532_v39 = vld [vmem:[%s5962_s8 + $0xc88] ss:$16 sps:$4 sm:$0xff]   ;;  %v5537_v40 = vld [vmem:[%s5962_s8 + $0xca4] ss:$16 sps:$4 sm:$0xff]  }
 0x1a8   : > { %3607 = vmatprep.subr.bf16.mxu0 %v5445_v41  ;;  %3935 = vmatprep.subr.bf16.mxu1 %v5448_v42  ;;  %v5540_v41 = vld [vmem:[%s5962_s8 + $0xcac] ss:$16 sps:$4 sm:$0xff]   ;;  %v5535_v42 = vld [vmem:[%s5962_s8 + $0xca0] ss:$16 sps:$4 sm:$0xff]  }
 0x1ab   : > { %3608 = vmatpush1.bf16.msra.mxu0 %v5443_v43  ;;  %3936 = vmatpush1.bf16.msra.mxu1 %v5446_v44  ;;  %v5538_v43 = vld [vmem:[%s5962_s8 + $0xca8] ss:$16 sps:$4 sm:$0xff]   ;;  %v5543_v44 = vld [vmem:[%s5962_s8 + $0xcc4] ss:$16 sps:$4 sm:$0xff]  }
 0x1ac   : > { %3609 = vmatprep.subr.bf16.mxu0 %v5451_v45  ;;  %3937 = vmatprep.subr.bf16.mxu1 %v5454_v46  ;;  %v5546_v45 = vld [vmem:[%s5962_s8 + $0xccc] ss:$16 sps:$4 sm:$0xff]   ;;  %v5541_v46 = vld [vmem:[%s5962_s8 + $0xcc0] ss:$16 sps:$4 sm:$0xff]  }
 0x1af   : > { %3610 = vmatpush1.bf16.msra.mxu0 %v5449_v47  ;;  %3938 = vmatpush1.bf16.msra.mxu1 %v5452_v48  ;;  %v5544_v47 = vld [vmem:[%s5962_s8 + $0xcc8] ss:$16 sps:$4 sm:$0xff]   ;;  %v5549_v48 = vld [vmem:[%s5962_s8 + $0xce4] ss:$16 sps:$4 sm:$0xff]  }
 0x1b0   : > { %3611 = vmatprep.subr.bf16.mxu0 %v5457_v49  ;;  %3939 = vmatprep.subr.bf16.mxu1 %v5460_v50  ;;  %v5552_v49 = vld [vmem:[%s5962_s8 + $0xcec] ss:$16 sps:$4 sm:$0xff]   ;;  %v5547_v50 = vld [vmem:[%s5962_s8 + $0xce0] ss:$16 sps:$4 sm:$0xff]  }
 0x1b3   : > { %3612 = vmatpush1.bf16.msra.mxu0 %v5455_v51  ;;  %3940 = vmatpush1.bf16.msra.mxu1 %v5458_v52  ;;  %v5550_v51 = vld [vmem:[%s5962_s8 + $0xce8] ss:$16 sps:$4 sm:$0xff]   ;;  %v5555_v52 = vld [vmem:[%s5962_s8 + $0xd04] ss:$16 sps:$4 sm:$0xff]  }
 0x1b4   : > { %3613 = vmatprep.subr.bf16.mxu0 %v5463_v53  ;;  %3941 = vmatprep.subr.bf16.mxu1 %v5466_v54  ;;  %v5558_v53 = vld [vmem:[%s5962_s8 + $0xd0c] ss:$16 sps:$4 sm:$0xff]   ;;  %v5553_v54 = vld [vmem:[%s5962_s8 + $0xd00] ss:$16 sps:$4 sm:$0xff]  }
 0x1b7   : > { %3614 = vmatpush1.bf16.msra.mxu0 %v5461_v55  ;;  %3942 = vmatpush1.bf16.msra.mxu1 %v5464_v56  ;;  %v5556_v55 = vld [vmem:[%s5962_s8 + $0xd08] ss:$16 sps:$4 sm:$0xff]   ;;  %v5561_v56 = vld [vmem:[%s5962_s8 + $0xd24] ss:$16 sps:$4 sm:$0xff]  }
 0x1b8   : > { %3615 = vmatprep.subr.bf16.mxu0 %v5469_v57  ;;  %3943 = vmatprep.subr.bf16.mxu1 %v5472_v58  ;;  %v5564_v57 = vld [vmem:[%s5962_s8 + $0xd2c] ss:$16 sps:$4 sm:$0xff]   ;;  %v5559_v58 = vld [vmem:[%s5962_s8 + $0xd20] ss:$16 sps:$4 sm:$0xff]  }
 0x1bb   : > { %3616 = vmatpush1.bf16.msra.mxu0 %v5467_v59  ;;  %3944 = vmatpush1.bf16.msra.mxu1 %v5470_v60  ;;  %v5562_v59 = vld [vmem:[%s5962_s8 + $0xd28] ss:$16 sps:$4 sm:$0xff]   ;;  %v5567_v60 = vld [vmem:[%s5962_s8 + $0xd44] ss:$16 sps:$4 sm:$0xff]  }
 0x1bc   : > { %3617 = vmatprep.subr.bf16.mxu0 %v5475_v61  ;;  %3945 = vmatprep.subr.bf16.mxu1 %v5478_v62  ;;  %v5570_v61 = vld [vmem:[%s5962_s8 + $0xd4c] ss:$16 sps:$4 sm:$0xff]   ;;  %v5565_v62 = vld [vmem:[%s5962_s8 + $0xd40] ss:$16 sps:$4 sm:$0xff]  }
 0x1bf   : > { %3618 = vmatpush1.bf16.msra.mxu0 %v5473_v63  ;;  %3946 = vmatpush1.bf16.msra.mxu1 %v5476_v0  ;;  %v5568_v63 = vld [vmem:[%s5962_s8 + $0xd48] ss:$16 sps:$4 sm:$0xff]   ;;  %v5573_v0 = vld [vmem:[%s5962_s8 + $0xd64] ss:$16 sps:$4 sm:$0xff]  }
 0x1c0   : > { %3619 = vmatprep.subr.bf16.mxu0 %v5481_v1  ;;  %3947 = vmatprep.subr.bf16.mxu1 %v5484_v2  ;;  %v5576_v1 = vld [vmem:[%s5962_s8 + $0xd6c] ss:$16 sps:$4 sm:$0xff]   ;;  %v5571_v2 = vld [vmem:[%s5962_s8 + $0xd60] ss:$16 sps:$4 sm:$0xff]  }
 0x1c3   : > { %3620 = vmatpush1.bf16.msra.mxu0 %v5479_v3  ;;  %3948 = vmatpush1.bf16.msra.mxu1 %v5482_v4  ;;  %v5574_v3 = vld [vmem:[%s5962_s8 + $0xd68] ss:$16 sps:$4 sm:$0xff]   ;;  %v5579_v4 = vld [vmem:[%s5962_s8 + $0xd84] ss:$16 sps:$4 sm:$0xff]  }
 0x1c4   : > { %3621 = vmatprep.subr.bf16.mxu0 %v5487_v5  ;;  %3949 = vmatprep.subr.bf16.mxu1 %v5490_v6  ;;  %v5582_v5 = vld [vmem:[%s5962_s8 + $0xd8c] ss:$16 sps:$4 sm:$0xff]   ;;  %v5577_v6 = vld [vmem:[%s5962_s8 + $0xd80] ss:$16 sps:$4 sm:$0xff]  }
 0x1c7   : > { %3622 = vmatpush1.bf16.msra.mxu0 %v5485_v7  ;;  %3950 = vmatpush1.bf16.msra.mxu1 %v5488_v8  ;;  %v5580_v7 = vld [vmem:[%s5962_s8 + $0xd88] ss:$16 sps:$4 sm:$0xff]   ;;  %v5585_v8 = vld [vmem:[%s5962_s8 + $0xda4] ss:$16 sps:$4 sm:$0xff]  }
 0x1c8   : > { %3623 = vmatprep.subr.bf16.mxu0 %v5493_v9  ;;  %3951 = vmatprep.subr.bf16.mxu1 %v5496_v10  ;;  %v5588_v9 = vld [vmem:[%s5962_s8 + $0xdac] ss:$16 sps:$4 sm:$0xff]   ;;  %v5583_v10 = vld [vmem:[%s5962_s8 + $0xda0] ss:$16 sps:$4 sm:$0xff]  }
 0x1cb   : > { %3624 = vmatpush1.bf16.msra.mxu0 %v5491_v12  ;;  %3952 = vmatpush1.bf16.msra.mxu1 %v5494_v13  ;;  %v5586_v12 = vld [vmem:[%s5962_s8 + $0xda8] ss:$16 sps:$4 sm:$0xff]   ;;  %v5591_v13 = vld [vmem:[%s5962_s8 + $0xdc4] ss:$16 sps:$4 sm:$0xff]  }
 0x1cc   : > { %3625 = vmatprep.subr.bf16.mxu0 %v5499_v15  ;;  %3953 = vmatprep.subr.bf16.mxu1 %v5502_v16  ;;  %v5594_v15 = vld [vmem:[%s5962_s8 + $0xdcc] ss:$16 sps:$4 sm:$0xff]   ;;  %v5589_v16 = vld [vmem:[%s5962_s8 + $0xdc0] ss:$16 sps:$4 sm:$0xff]  }
 0x1cf   : > { %3626 = vmatpush1.bf16.msra.mxu0 %v5497_v11  ;;  %3954 = vmatpush1.bf16.msra.mxu1 %v5500_v19  ;;  %v5592_v11 = vld [vmem:[%s5962_s8 + $0xdc8] ss:$16 sps:$4 sm:$0xff]   ;;  %v5597_v19 = vld [vmem:[%s5962_s8 + $0xde4] ss:$16 sps:$4 sm:$0xff]  }
 0x1d0   : > { %3636 = vmatprep.subr.bf16.mxu0 %v5507_v20  ;;  %3964 = vmatprep.subr.bf16.mxu1 %v5510_v14  ;;  %v5600_v20 = vld [vmem:[%s5962_s8 + $0xdec] ss:$16 sps:$4 sm:$0xff]   ;;  %v5595_v14 = vld [vmem:[%s5962_s8 + $0xde0] ss:$16 sps:$4 sm:$0xff]  }
 0x1d2   : > { %3628 = vmatmul.mubr.bf16.vlgmr.msra.gmra.mrb[0].mxu0 %v4283_v21  ;;  %3956 = vmatmul.mubr.bf16.vlgmr.msra.gmra.mrb[0].mxu1 %v4283_v21  ;;  %v5598_v21 = vld [vmem:[%s5962_s8 + $0xde8] ss:$16 sps:$4 sm:$0xff]  }
 0x1d3   : > { %3637 = vmatpush1.bf16.msra.mxu0 %v5505_v23  ;;  %3965 = vmatpush1.bf16.msra.mxu1 %v5508_v17  ;;  %v5605_v23 = vld [vmem:[%s5962_s8 + $0xe04] ss:$16 sps:$4 sm:$0xff]   ;;  %v5608_v17 = vld [vmem:[%s5962_s8 + $0xe0c] ss:$16 sps:$4 sm:$0xff]  }
 0x1d4   : > { %3638 = vmatprep.subr.bf16.mxu0 %v5513_v24  ;;  %3966 = vmatprep.subr.bf16.mxu1 %v5516_v25  ;;  %v4285_v24 = vcombine.low %v6411_v22, %v6411_v22  ;;  %v6484_v25 = vld [vmem:[%s6604_s0 + $0x38] sm:$0xff] }
 0x1d5   : > { %3668 = vmatprep.mubr.bf16.mxu0 %v4286_v18  ;;  %3996 = vmatprep.mubr.bf16.mxu1 %v4286_v18  ;;  %v5603_v18 = vld [vmem:[%s5962_s8 + $0xe00] ss:$16 sps:$4 sm:$0xff]   ;;  %v4288_v22 = vcombine.high %v6484_v25, %v6484_v25 }
 0x1d7   : > { %3639 = vmatpush1.bf16.msra.mxu0 %v5511_v26  ;;  %3967 = vmatpush1.bf16.msra.mxu1 %v5514_v27  ;;  %v5606_v26 = vld [vmem:[%s5962_s8 + $0xe08] ss:$16 sps:$4 sm:$0xff]   ;;  %v5611_v27 = vld [vmem:[%s5962_s8 + $0xe24] ss:$16 sps:$4 sm:$0xff]  }
 0x1d8   : > { %3640 = vmatprep.subr.bf16.mxu0 %v5519_v28  ;;  %3968 = vmatprep.subr.bf16.mxu1 %v5522_v29  ;;  %v5614_v28 = vld [vmem:[%s5962_s8 + $0xe2c] ss:$16 sps:$4 sm:$0xff]   ;;  %v5609_v29 = vld [vmem:[%s5962_s8 + $0xe20] ss:$16 sps:$4 sm:$0xff]  }
 0x1db   : > { %3641 = vmatpush1.bf16.msra.mxu0 %v5517_v30  ;;  %3969 = vmatpush1.bf16.msra.mxu1 %v5520_v31  ;;  %v5612_v30 = vld [vmem:[%s5962_s8 + $0xe28] ss:$16 sps:$4 sm:$0xff]   ;;  %v5617_v31 = vld [vmem:[%s5962_s8 + $0xe44] ss:$16 sps:$4 sm:$0xff]  }
 0x1dc   : > { %3642 = vmatprep.subr.bf16.mxu0 %v5525_v32  ;;  %3970 = vmatprep.subr.bf16.mxu1 %v5528_v33  ;;  %v5620_v32 = vld [vmem:[%s5962_s8 + $0xe4c] ss:$16 sps:$4 sm:$0xff]   ;;  %v5615_v33 = vld [vmem:[%s5962_s8 + $0xe40] ss:$16 sps:$4 sm:$0xff]  }
 0x1df   : > { %3643 = vmatpush1.bf16.msra.mxu0 %v5523_v34  ;;  %3971 = vmatpush1.bf16.msra.mxu1 %v5526_v35  ;;  %v5618_v34 = vld [vmem:[%s5962_s8 + $0xe48] ss:$16 sps:$4 sm:$0xff]   ;;  %v5623_v35 = vld [vmem:[%s5962_s8 + $0xe64] ss:$16 sps:$4 sm:$0xff]  }
 0x1e0   : > { %3644 = vmatprep.subr.bf16.mxu0 %v5531_v36  ;;  %3972 = vmatprep.subr.bf16.mxu1 %v5534_v37  ;;  %v5626_v36 = vld [vmem:[%s5962_s8 + $0xe6c] ss:$16 sps:$4 sm:$0xff]   ;;  %v5621_v37 = vld [vmem:[%s5962_s8 + $0xe60] ss:$16 sps:$4 sm:$0xff]  }
 0x1e3   : > { %3645 = vmatpush1.bf16.msra.mxu0 %v5529_v38  ;;  %3973 = vmatpush1.bf16.msra.mxu1 %v5532_v39  ;;  %v5624_v38 = vld [vmem:[%s5962_s8 + $0xe68] ss:$16 sps:$4 sm:$0xff]   ;;  %v5629_v39 = vld [vmem:[%s5962_s8 + $0xe84] ss:$16 sps:$4 sm:$0xff]  }
 0x1e4   : > { %3646 = vmatprep.subr.bf16.mxu0 %v5537_v40  ;;  %3974 = vmatprep.subr.bf16.mxu1 %v5540_v41  ;;  %v5632_v40 = vld [vmem:[%s5962_s8 + $0xe8c] ss:$16 sps:$4 sm:$0xff]   ;;  %v5627_v41 = vld [vmem:[%s5962_s8 + $0xe80] ss:$16 sps:$4 sm:$0xff]  }
 0x1e7   : > { %3647 = vmatpush1.bf16.msra.mxu0 %v5535_v42  ;;  %3975 = vmatpush1.bf16.msra.mxu1 %v5538_v43  ;;  %v5630_v42 = vld [vmem:[%s5962_s8 + $0xe88] ss:$16 sps:$4 sm:$0xff]   ;;  %v5635_v43 = vld [vmem:[%s5962_s8 + $0xea4] ss:$16 sps:$4 sm:$0xff]  }
 0x1e8   : > { %3648 = vmatprep.subr.bf16.mxu0 %v5543_v44  ;;  %3976 = vmatprep.subr.bf16.mxu1 %v5546_v45  ;;  %v5638_v44 = vld [vmem:[%s5962_s8 + $0xeac] ss:$16 sps:$4 sm:$0xff]   ;;  %v5633_v45 = vld [vmem:[%s5962_s8 + $0xea0] ss:$16 sps:$4 sm:$0xff]  }
 0x1eb   : > { %3649 = vmatpush1.bf16.msra.mxu0 %v5541_v46  ;;  %3977 = vmatpush1.bf16.msra.mxu1 %v5544_v47  ;;  %v5636_v46 = vld [vmem:[%s5962_s8 + $0xea8] ss:$16 sps:$4 sm:$0xff]   ;;  %v5641_v47 = vld [vmem:[%s5962_s8 + $0xec4] ss:$16 sps:$4 sm:$0xff]  }
 0x1ec   : > { %3650 = vmatprep.subr.bf16.mxu0 %v5549_v48  ;;  %3978 = vmatprep.subr.bf16.mxu1 %v5552_v49  ;;  %v5644_v48 = vld [vmem:[%s5962_s8 + $0xecc] ss:$16 sps:$4 sm:$0xff]   ;;  %v5639_v49 = vld [vmem:[%s5962_s8 + $0xec0] ss:$16 sps:$4 sm:$0xff]  }
 0x1ef   : > { %3651 = vmatpush1.bf16.msra.mxu0 %v5547_v50  ;;  %3979 = vmatpush1.bf16.msra.mxu1 %v5550_v51  ;;  %v5642_v50 = vld [vmem:[%s5962_s8 + $0xec8] ss:$16 sps:$4 sm:$0xff]   ;;  %v5647_v51 = vld [vmem:[%s5962_s8 + $0xee4] ss:$16 sps:$4 sm:$0xff]  }
 0x1f0   : > { %3652 = vmatprep.subr.bf16.mxu0 %v5555_v52  ;;  %3980 = vmatprep.subr.bf16.mxu1 %v5558_v53  ;;  %v5650_v52 = vld [vmem:[%s5962_s8 + $0xeec] ss:$16 sps:$4 sm:$0xff]   ;;  %v5645_v53 = vld [vmem:[%s5962_s8 + $0xee0] ss:$16 sps:$4 sm:$0xff]  }
 0x1f3   : > { %3653 = vmatpush1.bf16.msra.mxu0 %v5553_v54  ;;  %3981 = vmatpush1.bf16.msra.mxu1 %v5556_v55  ;;  %v5648_v54 = vld [vmem:[%s5962_s8 + $0xee8] ss:$16 sps:$4 sm:$0xff]   ;;  %v5653_v55 = vld [vmem:[%s5962_s8 + $0xf04] ss:$16 sps:$4 sm:$0xff]  }
 0x1f4   : > { %3654 = vmatprep.subr.bf16.mxu0 %v5561_v56  ;;  %3982 = vmatprep.subr.bf16.mxu1 %v5564_v57  ;;  %v5656_v56 = vld [vmem:[%s5962_s8 + $0xf0c] ss:$16 sps:$4 sm:$0xff]   ;;  %v5651_v57 = vld [vmem:[%s5962_s8 + $0xf00] ss:$16 sps:$4 sm:$0xff]  }
 0x1f7   : > { %3655 = vmatpush1.bf16.msra.mxu0 %v5559_v58  ;;  %3983 = vmatpush1.bf16.msra.mxu1 %v5562_v59  ;;  %v5654_v58 = vld [vmem:[%s5962_s8 + $0xf08] ss:$16 sps:$4 sm:$0xff]   ;;  %v5659_v59 = vld [vmem:[%s5962_s8 + $0xf24] ss:$16 sps:$4 sm:$0xff]  }
 0x1f8   : > { %3656 = vmatprep.subr.bf16.mxu0 %v5567_v60  ;;  %3984 = vmatprep.subr.bf16.mxu1 %v5570_v61  ;;  %v5662_v60 = vld [vmem:[%s5962_s8 + $0xf2c] ss:$16 sps:$4 sm:$0xff]   ;;  %v5657_v61 = vld [vmem:[%s5962_s8 + $0xf20] ss:$16 sps:$4 sm:$0xff]  }
 0x1fb   : > { %3657 = vmatpush1.bf16.msra.mxu0 %v5565_v62  ;;  %3985 = vmatpush1.bf16.msra.mxu1 %v5568_v63  ;;  %v5660_v62 = vld [vmem:[%s5962_s8 + $0xf28] ss:$16 sps:$4 sm:$0xff]   ;;  %v5665_v63 = vld [vmem:[%s5962_s8 + $0xf44] ss:$16 sps:$4 sm:$0xff]  }
 0x1fc   : > { %3658 = vmatprep.subr.bf16.mxu0 %v5573_v0  ;;  %3986 = vmatprep.subr.bf16.mxu1 %v5576_v1  ;;  %v5668_v0 = vld [vmem:[%s5962_s8 + $0xf4c] ss:$16 sps:$4 sm:$0xff]   ;;  %v5663_v1 = vld [vmem:[%s5962_s8 + $0xf40] ss:$16 sps:$4 sm:$0xff]  }
 0x1ff   : > { %3659 = vmatpush1.bf16.msra.mxu0 %v5571_v2  ;;  %3987 = vmatpush1.bf16.msra.mxu1 %v5574_v3  ;;  %v5666_v2 = vld [vmem:[%s5962_s8 + $0xf48] ss:$16 sps:$4 sm:$0xff]   ;;  %v5671_v3 = vld [vmem:[%s5962_s8 + $0xf64] ss:$16 sps:$4 sm:$0xff]  }
 0x200   : > { %3660 = vmatprep.subr.bf16.mxu0 %v5579_v4  ;;  %3988 = vmatprep.subr.bf16.mxu1 %v5582_v5  ;;  %v5674_v4 = vld [vmem:[%s5962_s8 + $0xf6c] ss:$16 sps:$4 sm:$0xff]   ;;  %v5669_v5 = vld [vmem:[%s5962_s8 + $0xf60] ss:$16 sps:$4 sm:$0xff]  }
 0x203   : > { %3661 = vmatpush1.bf16.msra.mxu0 %v5577_v6  ;;  %3989 = vmatpush1.bf16.msra.mxu1 %v5580_v7  ;;  %v5672_v6 = vld [vmem:[%s5962_s8 + $0xf68] ss:$16 sps:$4 sm:$0xff]   ;;  %v5677_v7 = vld [vmem:[%s5962_s8 + $0xf84] ss:$16 sps:$4 sm:$0xff]  }
 0x204   : > { %3662 = vmatprep.subr.bf16.mxu0 %v5585_v8  ;;  %3990 = vmatprep.subr.bf16.mxu1 %v5588_v9  ;;  %v5680_v8 = vld [vmem:[%s5962_s8 + $0xf8c] ss:$16 sps:$4 sm:$0xff]   ;;  %v5675_v9 = vld [vmem:[%s5962_s8 + $0xf80] ss:$16 sps:$4 sm:$0xff]  }
 0x207   : > { %3663 = vmatpush1.bf16.msra.mxu0 %v5583_v10  ;;  %3991 = vmatpush1.bf16.msra.mxu1 %v5586_v12  ;;  %v5678_v10 = vld [vmem:[%s5962_s8 + $0xf88] ss:$16 sps:$4 sm:$0xff]   ;;  %v5683_v12 = vld [vmem:[%s5962_s8 + $0xfa4] ss:$16 sps:$4 sm:$0xff]  }
 0x208   : > { %3664 = vmatprep.subr.bf16.mxu0 %v5591_v13  ;;  %3992 = vmatprep.subr.bf16.mxu1 %v5594_v15  ;;  %v5686_v13 = vld [vmem:[%s5962_s8 + $0xfac] ss:$16 sps:$4 sm:$0xff]   ;;  %v5681_v15 = vld [vmem:[%s5962_s8 + $0xfa0] ss:$16 sps:$4 sm:$0xff]  }
 0x20b   : > { %3665 = vmatpush1.bf16.msra.mxu0 %v5589_v16  ;;  %3993 = vmatpush1.bf16.msra.mxu1 %v5592_v11  ;;  %v5684_v16 = vld [vmem:[%s5962_s8 + $0xfa8] ss:$16 sps:$4 sm:$0xff]   ;;  %v5689_v11 = vld [vmem:[%s5962_s8 + $0xfc4] ss:$16 sps:$4 sm:$0xff]  }
 0x20c   : > { %3666 = vmatprep.subr.bf16.mxu0 %v5597_v19  ;;  %3994 = vmatprep.subr.bf16.mxu1 %v5600_v20  ;;  %v5692_v19 = vld [vmem:[%s5962_s8 + $0xfcc] ss:$16 sps:$4 sm:$0xff]   ;;  %v5687_v20 = vld [vmem:[%s5962_s8 + $0xfc0] ss:$16 sps:$4 sm:$0xff]  }
 0x20f   : > { %3667 = vmatpush1.bf16.msra.mxu0 %v5595_v14  ;;  %3995 = vmatpush1.bf16.msra.mxu1 %v5598_v21  ;;  %v5690_v14 = vld [vmem:[%s5962_s8 + $0xfc8] ss:$16 sps:$4 sm:$0xff]   ;;  %v5695_v21 = vld [vmem:[%s5962_s8 + $0xfe4] ss:$16 sps:$4 sm:$0xff]  }
 0x210   : > { %3677 = vmatprep.subr.bf16.mxu0 %v5605_v23  ;;  %4005 = vmatprep.subr.bf16.mxu1 %v5608_v17  ;;  %v5698_v23 = vld [vmem:[%s5962_s8 + $0xfec] ss:$16 sps:$4 sm:$0xff]   ;;  %v5693_v17 = vld [vmem:[%s5962_s8 + $0xfe0] ss:$16 sps:$4 sm:$0xff]  }
 0x212   : > { %3669 = vmatmul.mubr.bf16.vlgmr.msra.gmra.mrb[0].mxu0 %v4285_v24  ;;  %3997 = vmatmul.mubr.bf16.vlgmr.msra.gmra.mrb[0].mxu1 %v4285_v24  ;;  %v5696_v24 = vld [vmem:[%s5962_s8 + $0xfe8] ss:$16 sps:$4 sm:$0xff]  }
 0x213   : > { %3678 = vmatpush1.bf16.msra.mxu0 %v5603_v18  ;;  %4006 = vmatpush1.bf16.msra.mxu1 %v5606_v26  ;;  %v4287_v18 = vcombine.low %v6484_v25, %v6484_v25  ;;  %v754_v26 = vlaneseq }
 0x214   : > { %3679 = vmatprep.subr.bf16.mxu0 %v5611_v27  ;;  %4007 = vmatprep.subr.bf16.mxu1 %v5614_v28 }
 0x215   : > { %3709 = vmatprep.mubr.bf16.mxu0 %v4288_v22  ;;  %4037 = vmatprep.mubr.bf16.mxu1 %v4288_v22  ;;  %v755_v27 = vshrl.u32 %v754_v26, 7 }
 0x217   : > { %3680 = vmatpush1.bf16.msra.mxu0 %v5609_v29  ;;  %4008 = vmatpush1.bf16.msra.mxu1 %v5612_v30  ;;  %v756_v28 = vsub.s32 0, %v755_v27  ;;  %v764_v22 = vsub.s32 2, %v755_v27  ;;  %v752_v29 = vld [vmem:[%s5968_s29] sm:$0xf]  ;;  %v760_v30 = vsub.s32 1, %v755_v27 }
 0x218   : > { %3681 = vmatprep.subr.bf16.mxu0 %v5617_v31  ;;  %4009 = vmatprep.subr.bf16.mxu1 %v5620_v32  ;;  %v768_v31 = vsub.s32 3, %v755_v27 }
 0x219   : > { %v757_v32 = vrot.slane %v752_v29, %v756_v28 }
 0x21b   : > { %3682 = vmatpush1.bf16.msra.mxu0 %v5615_v33  ;;  %4010 = vmatpush1.bf16.msra.mxu1 %v5618_v34  ;;  %v765_v33 = vrot.slane %v752_v29, %v764_v22  ;;  %v761_v34 = vrot.slane %v752_v29, %v760_v30 }
 0x21c   : > { %3683 = vmatprep.subr.bf16.mxu0 %v5623_v35  ;;  %4011 = vmatprep.subr.bf16.mxu1 %v5626_v36  ;;  %v769_v35 = vrot.slane %v752_v29, %v768_v31 }
 0x21f   : > { %3684 = vmatpush1.bf16.msra.mxu0 %v5621_v37  ;;  %4012 = vmatpush1.bf16.msra.mxu1 %v5624_v38 }
 0x220   : > { %3685 = vmatprep.subr.bf16.mxu0 %v5629_v39  ;;  %4013 = vmatprep.subr.bf16.mxu1 %v5632_v40 }
 0x223   : > { %3686 = vmatpush1.bf16.msra.mxu0 %v5627_v41  ;;  %4014 = vmatpush1.bf16.msra.mxu1 %v5630_v42 }
 0x224   : > { %3687 = vmatprep.subr.bf16.mxu0 %v5635_v43  ;;  %4015 = vmatprep.subr.bf16.mxu1 %v5638_v44 }
 0x227   : > { %3688 = vmatpush1.bf16.msra.mxu0 %v5633_v45  ;;  %4016 = vmatpush1.bf16.msra.mxu1 %v5636_v46 }
 0x228   : > { %3689 = vmatprep.subr.bf16.mxu0 %v5641_v47  ;;  %4017 = vmatprep.subr.bf16.mxu1 %v5644_v48 }
 0x22b   : > { %3690 = vmatpush1.bf16.msra.mxu0 %v5639_v49  ;;  %4018 = vmatpush1.bf16.msra.mxu1 %v5642_v50 }
 0x22c   : > { %3691 = vmatprep.subr.bf16.mxu0 %v5647_v51  ;;  %4019 = vmatprep.subr.bf16.mxu1 %v5650_v52 }
 0x22f   : > { %3692 = vmatpush1.bf16.msra.mxu0 %v5645_v53  ;;  %4020 = vmatpush1.bf16.msra.mxu1 %v5648_v54 }
 0x230   : > { %3693 = vmatprep.subr.bf16.mxu0 %v5653_v55  ;;  %4021 = vmatprep.subr.bf16.mxu1 %v5656_v56 }
 0x233   : > { %3694 = vmatpush1.bf16.msra.mxu0 %v5651_v57  ;;  %4022 = vmatpush1.bf16.msra.mxu1 %v5654_v58 }
 0x234   : > { %3695 = vmatprep.subr.bf16.mxu0 %v5659_v59  ;;  %4023 = vmatprep.subr.bf16.mxu1 %v5662_v60 }
 0x237   : > { %3696 = vmatpush1.bf16.msra.mxu0 %v5657_v61  ;;  %4024 = vmatpush1.bf16.msra.mxu1 %v5660_v62 }
 0x238   : > { %3697 = vmatprep.subr.bf16.mxu0 %v5665_v63  ;;  %4025 = vmatprep.subr.bf16.mxu1 %v5668_v0 }
 0x23b   : > { %3698 = vmatpush1.bf16.msra.mxu0 %v5663_v1  ;;  %4026 = vmatpush1.bf16.msra.mxu1 %v5666_v2 }
 0x23c   : > { %3699 = vmatprep.subr.bf16.mxu0 %v5671_v3  ;;  %4027 = vmatprep.subr.bf16.mxu1 %v5674_v4 }
 0x23f   : > { %3700 = vmatpush1.bf16.msra.mxu0 %v5669_v5  ;;  %4028 = vmatpush1.bf16.msra.mxu1 %v5672_v6 }
 0x240   : > { %3701 = vmatprep.subr.bf16.mxu0 %v5677_v7  ;;  %4029 = vmatprep.subr.bf16.mxu1 %v5680_v8 }
 0x243   : > { %3702 = vmatpush1.bf16.msra.mxu0 %v5675_v9  ;;  %4030 = vmatpush1.bf16.msra.mxu1 %v5678_v10 }
 0x244   : > { %3703 = vmatprep.subr.bf16.mxu0 %v5683_v12  ;;  %4031 = vmatprep.subr.bf16.mxu1 %v5686_v13 }
 0x247   : > { %3704 = vmatpush1.bf16.msra.mxu0 %v5681_v15  ;;  %4032 = vmatpush1.bf16.msra.mxu1 %v5684_v16 }
 0x248   : > { %3705 = vmatprep.subr.bf16.mxu0 %v5689_v11  ;;  %4033 = vmatprep.subr.bf16.mxu1 %v5692_v19 }
 0x24b   : > { %3706 = vmatpush1.bf16.msra.mxu0 %v5687_v20  ;;  %4034 = vmatpush1.bf16.msra.mxu1 %v5690_v14 }
 0x24c   : > { %3707 = vmatprep.subr.bf16.mxu0 %v5695_v21  ;;  %4035 = vmatprep.subr.bf16.mxu1 %v5698_v23 }
 0x24f   : > { %3708 = vmatpush1.bf16.msra.mxu0 %v5693_v17  ;;  %4036 = vmatpush1.bf16.msra.mxu1 %v5696_v24 }
 0x252   : > { %3710 = vmatmul.mubr.bf16.vlgmr.msra.gmra.mrb[0].mxu0 %v4287_v18  ;;  %4038 = vmatmul.mubr.bf16.vlgmr.msra.gmra.mrb[0].mxu1 %v4287_v18 }
 0x325   : > { %v3711_v36 = vpop.f32.mrb[0].mxu0  ;;  %v4039_v37 = vpop.f32.mrb[0].mxu1 }
 0x326   : > { %v6553_v38 = vadd.f32 %v3711_v36, %v757_v32  ;;  %v6555_v25 = vadd.f32 %v4039_v37, %v765_v33  ;;  %v3713_v39 = vpop.f32.mrb[1].mxu0  ;;  %v4041_v40 = vpop.f32.mrb[1].mxu1 }
 0x327   : > { %v6557_v41 = vadd.f32 %v3713_v39, %v761_v34  ;;  %v6559_v42 = vadd.f32 %v4041_v40, %v769_v35  ;;  %v3715_v43 = vpop.f32.mrb[2].mxu0  ;;  %v4043_v44 = vpop.f32.mrb[2].mxu1 }
 0x328   : > { %v6562_v45 = vmul.f32 0.70710677, %v6553_v38  ;;  %v6565_v46 = vmul.f32 0.70710677, %v6555_v25  ;;  %v3716_v52 = vpop.f32.mrb[3].mxu0  ;;  %v4044_v56 = vpop.f32.mrb[3].mxu1 }
 0x329   : > { %v6568_v47 = vmul.f32 0.70710677, %v6557_v41  ;;  %v6574_v51 = vmul.f32 0.70710677, %v6559_v42 }
 0x32a   : > { %v4062_v48 = vand.u32 2147483647, %v6562_v45  ;;  %v4064_v49 = vand.u32 2147483647, %v6565_v46  ;;  %vm4054_vm0 = vcmp.lt.f32.partialorder %v6562_v45, 0.0  ;;  %vm4056_vm1 = vcmp.lt.f32.partialorder %v6565_v46, 0.0 }
 0x32b   : > { %v4063_v50 = vand.u32 2147483647, %v6568_v47  ;;  %v4065_v59 = vand.u32 2147483647, %v6574_v51  ;;  %vm4055_vm2 = vcmp.lt.f32.partialorder %v6568_v47, 0.0  ;;  %vm4057_vm3 = vcmp.lt.f32.partialorder %v6574_v51, 0.0 }
 0x32c   : > { %v4066_v53 = vmul.f32 0.3275911, %v4062_v48  ;;  %v4068_v54 = vmul.f32 0.3275911, %v4064_v49  ;;  %v4114_v63 = vsub.f32 0.0, %v4062_v48  ;;  %v4116_v0 = vsub.f32 0.0, %v4064_v49 }
 0x32d   : > { %v4067_v55 = vmul.f32 0.3275911, %v4063_v50  ;;  %v4069_v61 = vmul.f32 0.3275911, %v4065_v59  ;;  %v4115_v3 = vsub.f32 0.0, %v4063_v50  ;;  %v4117_v8 = vsub.f32 0.0, %v4065_v59 }
 0x32e   : > { %v4070_v57 = vadd.f32 1.0, %v4066_v53  ;;  %v4072_v58 = vadd.f32 1.0, %v4068_v54  ;;  %v4118_v2 = vmul.f32 %v4114_v63, %v4062_v48  ;;  %v4120_v6 = vmul.f32 %v4116_v0, %v4064_v49 }
 0x32f   : > { %v4071_v60 = vadd.f32 1.0, %v4067_v55  ;;  %v4073_v62 = vadd.f32 1.0, %v4069_v61  ;;  %v4119_v15 = vmul.f32 %v4115_v3, %v4063_v50  ;;  %v4121_v21 = vmul.f32 %v4117_v8, %v4065_v59 }
 0x330   : > { %5701 = vrcp.f32 %v4070_v57  ;;  %v4122_v12 = vmul.f32 1.442695, %v4118_v2  ;;  %v4126_v11 = vmul.f32 1.442695, %v4120_v6  ;;  %v5822_v0 = vmov 1.0  }
 0x331   : > { %5703 = vrcp.f32 %v4072_v58  ;;  %v4124_v26 = vmul.f32 1.442695, %v4119_v15  ;;  %v4128_v30 = vmul.f32 1.442695, %v4121_v21  ;;  %v4060_v2 = vsel %vm4056_vm1, -1.0, %v5822_v0 }
 0x332   : > { %5705 = vrcp.f32 %v4071_v60  ;;  %v4061_v47 = vsel %vm4057_vm3, -1.0, %v5822_v0  ;;  %v4049_v51 = vmul.f32 0.5, %v6559_v42 }
 0x333   : > { %5707 = vrcp.f32 %v4073_v62 }
 0x334   : > { %5709 = vpow2.f32 %v4122_v12  ;;  %v4046_v12 = vmul.f32 0.5, %v6553_v38 }
 0x335   : > { %5711 = vpow2.f32 %v4126_v11  ;;  %v4048_v11 = vmul.f32 0.5, %v6555_v25 }
 0x336   : > { %5713 = vpow2.f32 %v4124_v26 }
 0x337   : > { %5715 = vpow2.f32 %v4128_v30 }
 0x33a   : > { %v5702_v1 = vpop.eup %5701 }
 0x33b   : > { %v5704_v4 = vpop.eup %5703  ;;  %v4078_v5 = vmul.f32 1.0614054, %v5702_v1 }
 0x33c   : > { %v4080_v7 = vmul.f32 1.0614054, %v5704_v4  ;;  %v5706_v10 = vpop.eup %5705 }
 0x33d   : > { %v4082_v9 = vadd.f32 -1.4531521, %v4078_v5  ;;  %v4079_v19 = vmul.f32 1.0614054, %v5706_v10  ;;  %v5708_v20 = vpop.eup %5707 }
 0x33e   : > { %v4084_v13 = vadd.f32 -1.4531521, %v4080_v7  ;;  %v4081_v24 = vmul.f32 1.0614054, %v5708_v20  ;;  %v5710_v53 = vpop.eup %5709 }
 0x33f   : > { %v4086_v16 = vmul.f32 %v5702_v1, %v4082_v9  ;;  %v4083_v17 = vadd.f32 -1.4531521, %v4079_v19  ;;  %v5712_v55 = vpop.eup %5711 }
 0x340   : > { %v4088_v14 = vmul.f32 %v5704_v4, %v4084_v13  ;;  %v4085_v22 = vadd.f32 -1.4531521, %v4081_v24  ;;  %v5714_v63 = vpop.eup %5713 }
 0x341   : > { %v4090_v23 = vadd.f32 1.4214138, %v4086_v16  ;;  %v4087_v28 = vmul.f32 %v5706_v10, %v4083_v17  ;;  %v5716_v6 = vpop.eup %5715 }
 0x342   : > { %v4092_v18 = vadd.f32 1.4214138, %v4088_v14  ;;  %v4089_v33 = vmul.f32 %v5708_v20, %v4085_v22 }
 0x343   : > { %v4094_v27 = vmul.f32 %v5702_v1, %v4090_v23  ;;  %v4091_v32 = vadd.f32 1.4214138, %v4087_v28 }
 0x344   : > { %v4096_v29 = vmul.f32 %v5704_v4, %v4092_v18  ;;  %v4093_v37 = vadd.f32 1.4214138, %v4089_v33 }
 0x345   : > { %v4098_v31 = vadd.f32 -0.28449672, %v4094_v27  ;;  %v4095_v36 = vmul.f32 %v5706_v10, %v4091_v32 }
 0x346   : > { %v4100_v34 = vadd.f32 -0.28449672, %v4096_v29  ;;  %v4097_v44 = vmul.f32 %v5708_v20, %v4093_v37 }
 0x347   : > { %v4102_v35 = vmul.f32 %v5702_v1, %v4098_v31  ;;  %v4099_v43 = vadd.f32 -0.28449672, %v4095_v36 }
 0x348   : > { %v4104_v39 = vmul.f32 %v5704_v4, %v4100_v34  ;;  %v4101_v52 = vadd.f32 -0.28449672, %v4097_v44 }
 0x349   : > { %v4106_v40 = vadd.f32 0.2548296, %v4102_v35  ;;  %v4103_v50 = vmul.f32 %v5706_v10, %v4099_v43 }
 0x34a   : > { %v4108_v48 = vadd.f32 0.2548296, %v4104_v39  ;;  %v4105_v58 = vmul.f32 %v5708_v20, %v4101_v52 }
 0x34b   : > { %v4110_v49 = vmul.f32 %v5702_v1, %v4106_v40  ;;  %v4107_v57 = vadd.f32 0.2548296, %v4103_v50  ;;  %v4058_v1 = vsel %vm4054_vm0, -1.0, %v5822_v0 }
 0x34c   : > { %v4112_v54 = vmul.f32 %v5704_v4, %v4108_v48  ;;  %v4109_v62 = vadd.f32 0.2548296, %v4105_v58 }
 0x34d   : > { %v4130_v56 = vmul.f32 %v5710_v53, %v4110_v49  ;;  %v4111_v61 = vmul.f32 %v5706_v10, %v4107_v57  ;;  %v4059_v10 = vsel %vm4055_vm2, -1.0, %v5822_v0 }
 0x34e   : > { %v4132_v59 = vmul.f32 %v5712_v55, %v4112_v54  ;;  %v4113_v5 = vmul.f32 %v5708_v20, %v4109_v62  ;;  %v4047_v20 = vmul.f32 0.5, %v6557_v41 }
 0x34f   : > { %v4134_v60 = vsub.f32 1.0, %v4130_v56  ;;  %v4131_v4 = vmul.f32 %v5714_v63, %v4111_v61 }
 0x350   : > { %v4136_v3 = vsub.f32 1.0, %v4132_v59  ;;  %v4133_v9 = vmul.f32 %v5716_v6, %v4113_v5 }
 0x351   : > { %v4138_v45 = vmul.f32 %v4134_v60, %v4058_v1  ;;  %v4135_v8 = vsub.f32 1.0, %v4131_v4 }
 0x352   : > { %v4140_v7 = vmul.f32 %v4136_v3, %v4060_v2  ;;  %v4137_v16 = vsub.f32 1.0, %v4133_v9 }
 0x353   : > { %v4142_v46 = vadd.f32 1.0, %v4138_v45  ;;  %v4139_v15 = vmul.f32 %v4135_v8, %v4059_v10 }
 0x354   : > { %v4144_v13 = vadd.f32 1.0, %v4140_v7  ;;  %v4141_v21 = vmul.f32 %v4137_v16, %v4061_v47 }
 0x355   : > { %v4146_v19 = vmul.f32 %v4142_v46, %v4046_v12  ;;  %v4143_v14 = vadd.f32 1.0, %v4139_v15 }
 0x356   : > { %v4148_v23 = vmul.f32 %v4144_v13, %v4048_v11  ;;  %v4145_v24 = vadd.f32 1.0, %v4141_v21 }
 0x357   : > { %v4147_v17 = vmul.f32 %v4143_v14, %v4047_v20 }
 0x358   : > { %v4149_v18 = vmul.f32 %v4145_v24, %v4049_v51 }
 0x359   : > { %v4807_v38 = vpack.c.bf16 %v4147_v17, %v4146_v19 }
 0x35a   : > { %v4808_v25 = vpack.c.bf16 %v4149_v18, %v4148_v23 }
 0x35b   : > { %4166 = vst [vmem:[%s230_s9] sm:$0xff] %v4807_v38 }
 0x35c   : > { %4167 = vst [vmem:[%s230_s9 + $0x8] sm:$0xff] %v4808_v25 }
 0x35d PF: > { %p16_p8 = scmp.ge.s32.totalorder %s5863_s17, 6   ;;  %s6614_s12 = smov %s5807_s13 }
 0x35e   : > { %s6615_s13 = smov %s5811_s14  ;;  %s6616_s14 = smov %s5873_s20 }
 0x35f   : > { %s6617_s15 = smov %s5863_s17  ;;  %18 = sbr.rel (!%p16_p8) target bundleno = 5 (0x5), region = 85 }
 0x366   :  { %4190 = vsyncpa [#allocation3], 1 }
 0x367   :  { %4192 = vsyncpa [#allocation3 + $0x1], 1 }
 0x368   :  { %4193 = vsyncpa [#allocation5], 1 }
 0x369   :  { %4195 = vsyncpa [#allocation5 + $0x1], 1 }

// kernel: fmri2image.6
= control target key start
LH: loop header
LB: loop body
LE: loop exit
PB: predicated region body
PF: predicated region fallthrough
CT: control target
= control target key end

     0   :  { %s6718_s12 = smov 0   ;;  %s6720_s13 = smov 0   ;;  %s8423_s0 = inlined_call_operand.vmem [shape: bf16[8,2048], index: 0, kind: input, shape index: {}]   ;;  %s8424_s1 = inlined_call_operand.vmem [shape: bf16[2048,1024], index: 1, kind: input, shape index: {}]   ;;  %s8425_s2 = inlined_call_operand.vmem [shape: f32[1,1024], index: 2, kind: input, shape index: {}]   ;;  %s8426_s3 = inlined_call_operand.vmem [shape: bf16[8,1024], index: 3, kind: output, shape index: {}]  }
   0x1   :  { %s6722_s14 = smov 0  }
   0x2 LB: > { %s5241_s15 = sadd.s32 4294967295, %s6695_s14   ;;  %s6735_s16 = sadd.s32 1, %s6695_s14   ;;  %s6695_s14 = sphi %s6722_s14, %s8429_s14   ;;  %s6691_s13 = sphi %s6720_s13, %s8428_s13   ;;  %s6687_s12 = sphi %s6718_s12, %s8427_s12  }
   0x3   : > { %s38_s17 = ssub.s32 %s6695_s14, %s6735_s16  ;;  %s41_s18 = sadd.s32 1, %s6691_s13 }
   0x4   : > { %p39_p0 = scmp.eq.s32.totalorder %s38_s17, 0  ;;  %p48_p1 = scmp.ne.s32.totalorder %s6691_s13, %s6687_s12 }
   0x5   : > { %p49_p2 = scmp.eq.s32.totalorder %s6695_s14, 0  ;;  %p5244_p4 = scmp.ge.s32.totalorder %s6695_s14, 2 }
   0x6   : > { %s6744_s19 = scalar_select %p39_p0, %s6691_s13, %s41_s18  }
   0x7   : > { %p50_p3 = por %p49_p2, %p48_p1  ;;  %129 = sbr.rel (%p5244_p4) target bundleno = 274 (0x112), region = 20 }
   0xe   : > { %132 = sbr.rel (!%p50_p3) target bundleno = 274 (0x112), region = 24  ;;  %s134_s20 = sand.u32 (%p50_p3), 1, %s6691_s13  }
   0xf   : > { %s5785_s21 = sshll.u32 (%p50_p3), %s6695_s14, 4  ;;  %s5245_s22 = sshll.u32 (%p50_p3), %s134_s20, 12 }
  0x10   : > { %s6752_s25 = scalar_lea.vmem (%p50_p3), %s8424_s1, %s5785_s21  ;;  %s6757_s26 = scalar_lea.vmem (%p50_p3), [#allocation2], %s5245_s22 }
  0x11   : > { %v152_v0 = vld [vmem:[%s6752_s25] sm:$0xff] (%p50_p3)  ;;  %v154_v1 = vld [vmem:[%s6752_s25 + $0x8] sm:$0xff] (%p50_p3) }
  0x12   : > { %v156_v2 = vld [vmem:[%s6752_s25 + $0x20] sm:$0xff] (%p50_p3)  ;;  %153 = vst [vmem:[%s6757_s26] sm:$0xff] (%p50_p3), %v152_v0  ;;  %155 = vst [vmem:[%s6757_s26 + $0x8] sm:$0xff] (%p50_p3), %v154_v1  ;;  %v158_v3 = vld [vmem:[%s6752_s25 + $0x28] sm:$0xff] (%p50_p3) }
  0x13   : > { %157 = vst [vmem:[%s6757_s26 + $0x10] sm:$0xff] (%p50_p3), %v156_v2  ;;  %v160_v4 = vld [vmem:[%s6752_s25 + $0x40] sm:$0xff] (%p50_p3)  ;;  %v162_v5 = vld [vmem:[%s6752_s25 + $0x48] sm:$0xff] (%p50_p3)  ;;  %159 = vst [vmem:[%s6757_s26 + $0x18] sm:$0xff] (%p50_p3), %v158_v3 }
  0x14   : > { %161 = vst [vmem:[%s6757_s26 + $0x20] sm:$0xff] (%p50_p3), %v160_v4  ;;  %163 = vst [vmem:[%s6757_s26 + $0x28] sm:$0xff] (%p50_p3), %v162_v5  ;;  %v164_v6 = vld [vmem:[%s6752_s25 + $0x60] sm:$0xff] (%p50_p3)  ;;  %v166_v7 = vld [vmem:[%s6752_s25 + $0x68] sm:$0xff] (%p50_p3) }
  0x15   : > { %v168_v8 = vld [vmem:[%s6752_s25 + $0x80] sm:$0xff]  ;;  %165 = vst [vmem:[%s6757_s26 + $0x30] sm:$0xff] %v164_v6  ;;  %167 = vst [vmem:[%s6757_s26 + $0x38] sm:$0xff] %v166_v7  ;;  %v170_v9 = vld [vmem:[%s6752_s25 + $0x88] sm:$0xff] }
  0x16   : > { %169 = vst [vmem:[%s6757_s26 + $0x40] sm:$0xff] %v168_v8  ;;  %v172_v10 = vld [vmem:[%s6752_s25 + $0xa0] sm:$0xff]  ;;  %v174_v11 = vld [vmem:[%s6752_s25 + $0xa8] sm:$0xff]  ;;  %171 = vst [vmem:[%s6757_s26 + $0x48] sm:$0xff] %v170_v9 }
  0x17   : > { %173 = vst [vmem:[%s6757_s26 + $0x50] sm:$0xff] %v172_v10  ;;  %175 = vst [vmem:[%s6757_s26 + $0x58] sm:$0xff] %v174_v11  ;;  %v176_v12 = vld [vmem:[%s6752_s25 + $0xc0] sm:$0xff]  ;;  %v178_v13 = vld [vmem:[%s6752_s25 + $0xc8] sm:$0xff] }
  0x18   : > { %v180_v14 = vld [vmem:[%s6752_s25 + $0xe0] sm:$0xff]  ;;  %177 = vst [vmem:[%s6757_s26 + $0x60] sm:$0xff] %v176_v12  ;;  %179 = vst [vmem:[%s6757_s26 + $0x68] sm:$0xff] %v178_v13  ;;  %v182_v15 = vld [vmem:[%s6752_s25 + $0xe8] sm:$0xff] }
  0x19   : > { %181 = vst [vmem:[%s6757_s26 + $0x70] sm:$0xff] %v180_v14  ;;  %v184_v16 = vld [vmem:[%s6752_s25 + $0x100] sm:$0xff]  ;;  %v186_v17 = vld [vmem:[%s6752_s25 + $0x108] sm:$0xff]  ;;  %183 = vst [vmem:[%s6757_s26 + $0x78] sm:$0xff] %v182_v15 }
  0x1a   : > { %185 = vst [vmem:[%s6757_s26 + $0x80] sm:$0xff] %v184_v16  ;;  %187 = vst [vmem:[%s6757_s26 + $0x88] sm:$0xff] %v186_v17  ;;  %v188_v18 = vld [vmem:[%s6752_s25 + $0x120] sm:$0xff]  ;;  %v190_v19 = vld [vmem:[%s6752_s25 + $0x128] sm:$0xff] }
  0x1b   : > { %v192_v20 = vld [vmem:[%s6752_s25 + $0x140] sm:$0xff]  ;;  %189 = vst [vmem:[%s6757_s26 + $0x90] sm:$0xff] %v188_v18  ;;  %191 = vst [vmem:[%s6757_s26 + $0x98] sm:$0xff] %v190_v19  ;;  %v194_v21 = vld [vmem:[%s6752_s25 + $0x148] sm:$0xff] }
  0x1c   : > { %193 = vst [vmem:[%s6757_s26 + $0xa0] sm:$0xff] %v192_v20  ;;  %v196_v22 = vld [vmem:[%s6752_s25 + $0x160] sm:$0xff]  ;;  %v198_v23 = vld [vmem:[%s6752_s25 + $0x168] sm:$0xff]  ;;  %195 = vst [vmem:[%s6757_s26 + $0xa8] sm:$0xff] %v194_v21 }
  0x1d   : > { %197 = vst [vmem:[%s6757_s26 + $0xb0] sm:$0xff] %v196_v22  ;;  %199 = vst [vmem:[%s6757_s26 + $0xb8] sm:$0xff] %v198_v23  ;;  %v200_v24 = vld [vmem:[%s6752_s25 + $0x180] sm:$0xff]  ;;  %v202_v25 = vld [vmem:[%s6752_s25 + $0x188] sm:$0xff] }
  0x1e   : > { %v204_v26 = vld [vmem:[%s6752_s25 + $0x1a0] sm:$0xff]  ;;  %201 = vst [vmem:[%s6757_s26 + $0xc0] sm:$0xff] %v200_v24  ;;  %203 = vst [vmem:[%s6757_s26 + $0xc8] sm:$0xff] %v202_v25  ;;  %v206_v27 = vld [vmem:[%s6752_s25 + $0x1a8] sm:$0xff] }
  0x1f   : > { %205 = vst [vmem:[%s6757_s26 + $0xd0] sm:$0xff] %v204_v26  ;;  %v208_v28 = vld [vmem:[%s6752_s25 + $0x1c0] sm:$0xff]  ;;  %v210_v29 = vld [vmem:[%s6752_s25 + $0x1c8] sm:$0xff]  ;;  %207 = vst [vmem:[%s6757_s26 + $0xd8] sm:$0xff] %v206_v27 }
  0x20   : > { %209 = vst [vmem:[%s6757_s26 + $0xe0] sm:$0xff] %v208_v28  ;;  %211 = vst [vmem:[%s6757_s26 + $0xe8] sm:$0xff] %v210_v29  ;;  %v212_v30 = vld [vmem:[%s6752_s25 + $0x1e0] sm:$0xff]  ;;  %v214_v31 = vld [vmem:[%s6752_s25 + $0x1e8] sm:$0xff] }
  0x21   : > { %v216_v32 = vld [vmem:[%s6752_s25 + $0x200] sm:$0xff]  ;;  %213 = vst [vmem:[%s6757_s26 + $0xf0] sm:$0xff] %v212_v30  ;;  %215 = vst [vmem:[%s6757_s26 + $0xf8] sm:$0xff] %v214_v31  ;;  %v218_v33 = vld [vmem:[%s6752_s25 + $0x208] sm:$0xff] }
  0x22   : > { %217 = vst [vmem:[%s6757_s26 + $0x100] sm:$0xff] %v216_v32  ;;  %v220_v34 = vld [vmem:[%s6752_s25 + $0x220] sm:$0xff]  ;;  %v222_v35 = vld [vmem:[%s6752_s25 + $0x228] sm:$0xff]  ;;  %219 = vst [vmem:[%s6757_s26 + $0x108] sm:$0xff] %v218_v33 }
  0x23   : > { %221 = vst [vmem:[%s6757_s26 + $0x110] sm:$0xff] %v220_v34  ;;  %223 = vst [vmem:[%s6757_s26 + $0x118] sm:$0xff] %v222_v35  ;;  %v224_v36 = vld [vmem:[%s6752_s25 + $0x240] sm:$0xff]  ;;  %v226_v37 = vld [vmem:[%s6752_s25 + $0x248] sm:$0xff] }
  0x24   : > { %v228_v38 = vld [vmem:[%s6752_s25 + $0x260] sm:$0xff]  ;;  %225 = vst [vmem:[%s6757_s26 + $0x120] sm:$0xff] %v224_v36  ;;  %227 = vst [vmem:[%s6757_s26 + $0x128] sm:$0xff] %v226_v37  ;;  %v230_v39 = vld [vmem:[%s6752_s25 + $0x268] sm:$0xff] }
  0x25   : > { %229 = vst [vmem:[%s6757_s26 + $0x130] sm:$0xff] %v228_v38  ;;  %v232_v40 = vld [vmem:[%s6752_s25 + $0x280] sm:$0xff]  ;;  %v234_v41 = vld [vmem:[%s6752_s25 + $0x288] sm:$0xff]  ;;  %231 = vst [vmem:[%s6757_s26 + $0x138] sm:$0xff] %v230_v39 }
  0x26   : > { %233 = vst [vmem:[%s6757_s26 + $0x140] sm:$0xff] %v232_v40  ;;  %235 = vst [vmem:[%s6757_s26 + $0x148] sm:$0xff] %v234_v41  ;;  %v236_v42 = vld [vmem:[%s6752_s25 + $0x2a0] sm:$0xff]  ;;  %v238_v43 = vld [vmem:[%s6752_s25 + $0x2a8] sm:$0xff] }
  0x27   : > { %v240_v44 = vld [vmem:[%s6752_s25 + $0x2c0] sm:$0xff]  ;;  %237 = vst [vmem:[%s6757_s26 + $0x150] sm:$0xff] %v236_v42  ;;  %239 = vst [vmem:[%s6757_s26 + $0x158] sm:$0xff] %v238_v43  ;;  %v242_v45 = vld [vmem:[%s6752_s25 + $0x2c8] sm:$0xff] }
  0x28   : > { %241 = vst [vmem:[%s6757_s26 + $0x160] sm:$0xff] %v240_v44  ;;  %v244_v46 = vld [vmem:[%s6752_s25 + $0x2e0] sm:$0xff]  ;;  %v246_v47 = vld [vmem:[%s6752_s25 + $0x2e8] sm:$0xff]  ;;  %243 = vst [vmem:[%s6757_s26 + $0x168] sm:$0xff] %v242_v45 }
  0x29   : > { %245 = vst [vmem:[%s6757_s26 + $0x170] sm:$0xff] %v244_v46  ;;  %247 = vst [vmem:[%s6757_s26 + $0x178] sm:$0xff] %v246_v47  ;;  %v248_v48 = vld [vmem:[%s6752_s25 + $0x300] sm:$0xff]  ;;  %v250_v49 = vld [vmem:[%s6752_s25 + $0x308] sm:$0xff] }
  0x2a   : > { %v252_v50 = vld [vmem:[%s6752_s25 + $0x320] sm:$0xff]  ;;  %249 = vst [vmem:[%s6757_s26 + $0x180] sm:$0xff] %v248_v48  ;;  %251 = vst [vmem:[%s6757_s26 + $0x188] sm:$0xff] %v250_v49  ;;  %v254_v51 = vld [vmem:[%s6752_s25 + $0x328] sm:$0xff] }
  0x2b   : > { %253 = vst [vmem:[%s6757_s26 + $0x190] sm:$0xff] %v252_v50  ;;  %v256_v52 = vld [vmem:[%s6752_s25 + $0x340] sm:$0xff]  ;;  %v258_v53 = vld [vmem:[%s6752_s25 + $0x348] sm:$0xff]  ;;  %255 = vst [vmem:[%s6757_s26 + $0x198] sm:$0xff] %v254_v51 }
  0x2c   : > { %257 = vst [vmem:[%s6757_s26 + $0x1a0] sm:$0xff] %v256_v52  ;;  %259 = vst [vmem:[%s6757_s26 + $0x1a8] sm:$0xff] %v258_v53  ;;  %v260_v54 = vld [vmem:[%s6752_s25 + $0x360] sm:$0xff]  ;;  %v262_v55 = vld [vmem:[%s6752_s25 + $0x368] sm:$0xff] }
  0x2d   : > { %v264_v56 = vld [vmem:[%s6752_s25 + $0x380] sm:$0xff]  ;;  %261 = vst [vmem:[%s6757_s26 + $0x1b0] sm:$0xff] %v260_v54  ;;  %263 = vst [vmem:[%s6757_s26 + $0x1b8] sm:$0xff] %v262_v55  ;;  %v266_v57 = vld [vmem:[%s6752_s25 + $0x388] sm:$0xff] }
  0x2e   : > { %265 = vst [vmem:[%s6757_s26 + $0x1c0] sm:$0xff] %v264_v56  ;;  %v268_v58 = vld [vmem:[%s6752_s25 + $0x3a0] sm:$0xff]  ;;  %v270_v59 = vld [vmem:[%s6752_s25 + $0x3a8] sm:$0xff]  ;;  %267 = vst [vmem:[%s6757_s26 + $0x1c8] sm:$0xff] %v266_v57 }
  0x2f   : > { %269 = vst [vmem:[%s6757_s26 + $0x1d0] sm:$0xff] %v268_v58  ;;  %271 = vst [vmem:[%s6757_s26 + $0x1d8] sm:$0xff] %v270_v59  ;;  %v272_v60 = vld [vmem:[%s6752_s25 + $0x3c0] sm:$0xff]  ;;  %v274_v61 = vld [vmem:[%s6752_s25 + $0x3c8] sm:$0xff] }
  0x30   : > { %v276_v62 = vld [vmem:[%s6752_s25 + $0x3e0] sm:$0xff]  ;;  %273 = vst [vmem:[%s6757_s26 + $0x1e0] sm:$0xff] %v272_v60  ;;  %275 = vst [vmem:[%s6757_s26 + $0x1e8] sm:$0xff] %v274_v61  ;;  %v278_v63 = vld [vmem:[%s6752_s25 + $0x3e8] sm:$0xff] }
  0x31   : > { %277 = vst [vmem:[%s6757_s26 + $0x1f0] sm:$0xff] %v276_v62  ;;  %v280_v0 = vld [vmem:[%s6752_s25 + $0x400] sm:$0xff]  ;;  %v282_v1 = vld [vmem:[%s6752_s25 + $0x408] sm:$0xff]  ;;  %279 = vst [vmem:[%s6757_s26 + $0x1f8] sm:$0xff] %v278_v63 }
  0x32   : > { %281 = vst [vmem:[%s6757_s26 + $0x200] sm:$0xff] %v280_v0  ;;  %283 = vst [vmem:[%s6757_s26 + $0x208] sm:$0xff] %v282_v1  ;;  %v284_v2 = vld [vmem:[%s6752_s25 + $0x420] sm:$0xff]  ;;  %v286_v3 = vld [vmem:[%s6752_s25 + $0x428] sm:$0xff] }
  0x33   : > { %v288_v4 = vld [vmem:[%s6752_s25 + $0x440] sm:$0xff]  ;;  %285 = vst [vmem:[%s6757_s26 + $0x210] sm:$0xff] %v284_v2  ;;  %287 = vst [vmem:[%s6757_s26 + $0x218] sm:$0xff] %v286_v3  ;;  %v290_v5 = vld [vmem:[%s6752_s25 + $0x448] sm:$0xff] }
  0x34   : > { %289 = vst [vmem:[%s6757_s26 + $0x220] sm:$0xff] %v288_v4  ;;  %v292_v6 = vld [vmem:[%s6752_s25 + $0x460] sm:$0xff]  ;;  %v294_v7 = vld [vmem:[%s6752_s25 + $0x468] sm:$0xff]  ;;  %291 = vst [vmem:[%s6757_s26 + $0x228] sm:$0xff] %v290_v5 }
  0x35   : > { %293 = vst [vmem:[%s6757_s26 + $0x230] sm:$0xff] %v292_v6  ;;  %295 = vst [vmem:[%s6757_s26 + $0x238] sm:$0xff] %v294_v7  ;;  %v296_v8 = vld [vmem:[%s6752_s25 + $0x480] sm:$0xff]  ;;  %v298_v9 = vld [vmem:[%s6752_s25 + $0x488] sm:$0xff] }
  0x36   : > { %v300_v10 = vld [vmem:[%s6752_s25 + $0x4a0] sm:$0xff]  ;;  %297 = vst [vmem:[%s6757_s26 + $0x240] sm:$0xff] %v296_v8  ;;  %299 = vst [vmem:[%s6757_s26 + $0x248] sm:$0xff] %v298_v9  ;;  %v302_v11 = vld [vmem:[%s6752_s25 + $0x4a8] sm:$0xff] }
  0x37   : > { %301 = vst [vmem:[%s6757_s26 + $0x250] sm:$0xff] %v300_v10  ;;  %v304_v12 = vld [vmem:[%s6752_s25 + $0x4c0] sm:$0xff]  ;;  %v306_v13 = vld [vmem:[%s6752_s25 + $0x4c8] sm:$0xff]  ;;  %303 = vst [vmem:[%s6757_s26 + $0x258] sm:$0xff] %v302_v11 }
  0x38   : > { %305 = vst [vmem:[%s6757_s26 + $0x260] sm:$0xff] %v304_v12  ;;  %307 = vst [vmem:[%s6757_s26 + $0x268] sm:$0xff] %v306_v13  ;;  %v308_v14 = vld [vmem:[%s6752_s25 + $0x4e0] sm:$0xff]  ;;  %v310_v15 = vld [vmem:[%s6752_s25 + $0x4e8] sm:$0xff] }
  0x39   : > { %v312_v16 = vld [vmem:[%s6752_s25 + $0x500] sm:$0xff]  ;;  %309 = vst [vmem:[%s6757_s26 + $0x270] sm:$0xff] %v308_v14  ;;  %311 = vst [vmem:[%s6757_s26 + $0x278] sm:$0xff] %v310_v15  ;;  %v314_v17 = vld [vmem:[%s6752_s25 + $0x508] sm:$0xff] }
  0x3a   : > { %313 = vst [vmem:[%s6757_s26 + $0x280] sm:$0xff] %v312_v16  ;;  %v316_v18 = vld [vmem:[%s6752_s25 + $0x520] sm:$0xff]  ;;  %v318_v19 = vld [vmem:[%s6752_s25 + $0x528] sm:$0xff]  ;;  %315 = vst [vmem:[%s6757_s26 + $0x288] sm:$0xff] %v314_v17 }
  0x3b   : > { %317 = vst [vmem:[%s6757_s26 + $0x290] sm:$0xff] %v316_v18  ;;  %319 = vst [vmem:[%s6757_s26 + $0x298] sm:$0xff] %v318_v19  ;;  %v320_v20 = vld [vmem:[%s6752_s25 + $0x540] sm:$0xff]  ;;  %v322_v21 = vld [vmem:[%s6752_s25 + $0x548] sm:$0xff] }
  0x3c   : > { %v324_v22 = vld [vmem:[%s6752_s25 + $0x560] sm:$0xff]  ;;  %321 = vst [vmem:[%s6757_s26 + $0x2a0] sm:$0xff] %v320_v20  ;;  %323 = vst [vmem:[%s6757_s26 + $0x2a8] sm:$0xff] %v322_v21  ;;  %v326_v23 = vld [vmem:[%s6752_s25 + $0x568] sm:$0xff] }
  0x3d   : > { %325 = vst [vmem:[%s6757_s26 + $0x2b0] sm:$0xff] %v324_v22  ;;  %v328_v24 = vld [vmem:[%s6752_s25 + $0x580] sm:$0xff]  ;;  %v330_v25 = vld [vmem:[%s6752_s25 + $0x588] sm:$0xff]  ;;  %327 = vst [vmem:[%s6757_s26 + $0x2b8] sm:$0xff] %v326_v23 }
  0x3e   : > { %329 = vst [vmem:[%s6757_s26 + $0x2c0] sm:$0xff] %v328_v24  ;;  %331 = vst [vmem:[%s6757_s26 + $0x2c8] sm:$0xff] %v330_v25  ;;  %v332_v26 = vld [vmem:[%s6752_s25 + $0x5a0] sm:$0xff]  ;;  %v334_v27 = vld [vmem:[%s6752_s25 + $0x5a8] sm:$0xff] }
  0x3f   : > { %v336_v28 = vld [vmem:[%s6752_s25 + $0x5c0] sm:$0xff]  ;;  %333 = vst [vmem:[%s6757_s26 + $0x2d0] sm:$0xff] %v332_v26  ;;  %335 = vst [vmem:[%s6757_s26 + $0x2d8] sm:$0xff] %v334_v27  ;;  %v338_v29 = vld [vmem:[%s6752_s25 + $0x5c8] sm:$0xff] }
  0x40   : > { %337 = vst [vmem:[%s6757_s26 + $0x2e0] sm:$0xff] %v336_v28  ;;  %v340_v30 = vld [vmem:[%s6752_s25 + $0x5e0] sm:$0xff]  ;;  %v342_v31 = vld [vmem:[%s6752_s25 + $0x5e8] sm:$0xff]  ;;  %339 = vst [vmem:[%s6757_s26 + $0x2e8] sm:$0xff] %v338_v29 }
  0x41   : > { %341 = vst [vmem:[%s6757_s26 + $0x2f0] sm:$0xff] %v340_v30  ;;  %343 = vst [vmem:[%s6757_s26 + $0x2f8] sm:$0xff] %v342_v31  ;;  %v344_v32 = vld [vmem:[%s6752_s25 + $0x600] sm:$0xff]  ;;  %v346_v33 = vld [vmem:[%s6752_s25 + $0x608] sm:$0xff] }
  0x42   : > { %v348_v34 = vld [vmem:[%s6752_s25 + $0x620] sm:$0xff]  ;;  %345 = vst [vmem:[%s6757_s26 + $0x300] sm:$0xff] %v344_v32  ;;  %347 = vst [vmem:[%s6757_s26 + $0x308] sm:$0xff] %v346_v33  ;;  %v350_v35 = vld [vmem:[%s6752_s25 + $0x628] sm:$0xff] }
  0x43   : > { %349 = vst [vmem:[%s6757_s26 + $0x310] sm:$0xff] %v348_v34  ;;  %v352_v36 = vld [vmem:[%s6752_s25 + $0x640] sm:$0xff]  ;;  %v354_v37 = vld [vmem:[%s6752_s25 + $0x648] sm:$0xff]  ;;  %351 = vst [vmem:[%s6757_s26 + $0x318] sm:$0xff] %v350_v35 }
  0x44   : > { %353 = vst [vmem:[%s6757_s26 + $0x320] sm:$0xff] %v352_v36  ;;  %355 = vst [vmem:[%s6757_s26 + $0x328] sm:$0xff] %v354_v37  ;;  %v356_v38 = vld [vmem:[%s6752_s25 + $0x660] sm:$0xff]  ;;  %v358_v39 = vld [vmem:[%s6752_s25 + $0x668] sm:$0xff] }
  0x45   : > { %v360_v40 = vld [vmem:[%s6752_s25 + $0x680] sm:$0xff]  ;;  %357 = vst [vmem:[%s6757_s26 + $0x330] sm:$0xff] %v356_v38  ;;  %359 = vst [vmem:[%s6757_s26 + $0x338] sm:$0xff] %v358_v39  ;;  %v362_v41 = vld [vmem:[%s6752_s25 + $0x688] sm:$0xff] }
  0x46   : > { %361 = vst [vmem:[%s6757_s26 + $0x340] sm:$0xff] %v360_v40  ;;  %v364_v42 = vld [vmem:[%s6752_s25 + $0x6a0] sm:$0xff]  ;;  %v366_v43 = vld [vmem:[%s6752_s25 + $0x6a8] sm:$0xff]  ;;  %363 = vst [vmem:[%s6757_s26 + $0x348] sm:$0xff] %v362_v41 }
  0x47   : > { %365 = vst [vmem:[%s6757_s26 + $0x350] sm:$0xff] %v364_v42  ;;  %367 = vst [vmem:[%s6757_s26 + $0x358] sm:$0xff] %v366_v43  ;;  %v368_v44 = vld [vmem:[%s6752_s25 + $0x6c0] sm:$0xff]  ;;  %v370_v45 = vld [vmem:[%s6752_s25 + $0x6c8] sm:$0xff] }
  0x48   : > { %v372_v46 = vld [vmem:[%s6752_s25 + $0x6e0] sm:$0xff]  ;;  %369 = vst [vmem:[%s6757_s26 + $0x360] sm:$0xff] %v368_v44  ;;  %371 = vst [vmem:[%s6757_s26 + $0x368] sm:$0xff] %v370_v45  ;;  %v374_v47 = vld [vmem:[%s6752_s25 + $0x6e8] sm:$0xff] }
  0x49   : > { %373 = vst [vmem:[%s6757_s26 + $0x370] sm:$0xff] %v372_v46  ;;  %v376_v48 = vld [vmem:[%s6752_s25 + $0x700] sm:$0xff]  ;;  %v378_v49 = vld [vmem:[%s6752_s25 + $0x708] sm:$0xff]  ;;  %375 = vst [vmem:[%s6757_s26 + $0x378] sm:$0xff] %v374_v47 }
  0x4a   : > { %377 = vst [vmem:[%s6757_s26 + $0x380] sm:$0xff] %v376_v48  ;;  %379 = vst [vmem:[%s6757_s26 + $0x388] sm:$0xff] %v378_v49  ;;  %v380_v50 = vld [vmem:[%s6752_s25 + $0x720] sm:$0xff]  ;;  %v382_v51 = vld [vmem:[%s6752_s25 + $0x728] sm:$0xff] }
  0x4b   : > { %v384_v52 = vld [vmem:[%s6752_s25 + $0x740] sm:$0xff]  ;;  %381 = vst [vmem:[%s6757_s26 + $0x390] sm:$0xff] %v380_v50  ;;  %383 = vst [vmem:[%s6757_s26 + $0x398] sm:$0xff] %v382_v51  ;;  %v386_v53 = vld [vmem:[%s6752_s25 + $0x748] sm:$0xff] }
  0x4c   : > { %385 = vst [vmem:[%s6757_s26 + $0x3a0] sm:$0xff] %v384_v52  ;;  %v388_v54 = vld [vmem:[%s6752_s25 + $0x760] sm:$0xff]  ;;  %v390_v55 = vld [vmem:[%s6752_s25 + $0x768] sm:$0xff]  ;;  %387 = vst [vmem:[%s6757_s26 + $0x3a8] sm:$0xff] %v386_v53 }
  0x4d   : > { %389 = vst [vmem:[%s6757_s26 + $0x3b0] sm:$0xff] %v388_v54  ;;  %391 = vst [vmem:[%s6757_s26 + $0x3b8] sm:$0xff] %v390_v55  ;;  %v392_v56 = vld [vmem:[%s6752_s25 + $0x780] sm:$0xff]  ;;  %v394_v57 = vld [vmem:[%s6752_s25 + $0x788] sm:$0xff] }
  0x4e   : > { %v396_v58 = vld [vmem:[%s6752_s25 + $0x7a0] sm:$0xff]  ;;  %393 = vst [vmem:[%s6757_s26 + $0x3c0] sm:$0xff] %v392_v56  ;;  %395 = vst [vmem:[%s6757_s26 + $0x3c8] sm:$0xff] %v394_v57  ;;  %v398_v59 = vld [vmem:[%s6752_s25 + $0x7a8] sm:$0xff] }
  0x4f   : > { %397 = vst [vmem:[%s6757_s26 + $0x3d0] sm:$0xff] %v396_v58  ;;  %v400_v60 = vld [vmem:[%s6752_s25 + $0x7c0] sm:$0xff]  ;;  %v402_v61 = vld [vmem:[%s6752_s25 + $0x7c8] sm:$0xff]  ;;  %399 = vst [vmem:[%s6757_s26 + $0x3d8] sm:$0xff] %v398_v59 }
  0x50   : > { %401 = vst [vmem:[%s6757_s26 + $0x3e0] sm:$0xff] %v400_v60  ;;  %403 = vst [vmem:[%s6757_s26 + $0x3e8] sm:$0xff] %v402_v61  ;;  %v404_v62 = vld [vmem:[%s6752_s25 + $0x7e0] sm:$0xff]  ;;  %v406_v63 = vld [vmem:[%s6752_s25 + $0x7e8] sm:$0xff] }
  0x51   : > { %v408_v0 = vld [vmem:[%s6752_s25 + $0x800] sm:$0xff]  ;;  %405 = vst [vmem:[%s6757_s26 + $0x3f0] sm:$0xff] %v404_v62  ;;  %407 = vst [vmem:[%s6757_s26 + $0x3f8] sm:$0xff] %v406_v63  ;;  %v410_v1 = vld [vmem:[%s6752_s25 + $0x808] sm:$0xff] }
  0x52   : > { %409 = vst [vmem:[%s6757_s26 + $0x400] sm:$0xff] %v408_v0  ;;  %v412_v2 = vld [vmem:[%s6752_s25 + $0x820] sm:$0xff]  ;;  %v414_v3 = vld [vmem:[%s6752_s25 + $0x828] sm:$0xff]  ;;  %411 = vst [vmem:[%s6757_s26 + $0x408] sm:$0xff] %v410_v1 }
  0x53   : > { %413 = vst [vmem:[%s6757_s26 + $0x410] sm:$0xff] %v412_v2  ;;  %415 = vst [vmem:[%s6757_s26 + $0x418] sm:$0xff] %v414_v3  ;;  %v416_v4 = vld [vmem:[%s6752_s25 + $0x840] sm:$0xff]  ;;  %v418_v5 = vld [vmem:[%s6752_s25 + $0x848] sm:$0xff] }
  0x54   : > { %v420_v6 = vld [vmem:[%s6752_s25 + $0x860] sm:$0xff]  ;;  %417 = vst [vmem:[%s6757_s26 + $0x420] sm:$0xff] %v416_v4  ;;  %419 = vst [vmem:[%s6757_s26 + $0x428] sm:$0xff] %v418_v5  ;;  %v422_v7 = vld [vmem:[%s6752_s25 + $0x868] sm:$0xff] }
  0x55   : > { %421 = vst [vmem:[%s6757_s26 + $0x430] sm:$0xff] %v420_v6  ;;  %v424_v8 = vld [vmem:[%s6752_s25 + $0x880] sm:$0xff]  ;;  %v426_v9 = vld [vmem:[%s6752_s25 + $0x888] sm:$0xff]  ;;  %423 = vst [vmem:[%s6757_s26 + $0x438] sm:$0xff] %v422_v7 }
  0x56   : > { %425 = vst [vmem:[%s6757_s26 + $0x440] sm:$0xff] %v424_v8  ;;  %427 = vst [vmem:[%s6757_s26 + $0x448] sm:$0xff] %v426_v9  ;;  %v428_v10 = vld [vmem:[%s6752_s25 + $0x8a0] sm:$0xff]  ;;  %v430_v11 = vld [vmem:[%s6752_s25 + $0x8a8] sm:$0xff] }
  0x57   : > { %v432_v12 = vld [vmem:[%s6752_s25 + $0x8c0] sm:$0xff]  ;;  %429 = vst [vmem:[%s6757_s26 + $0x450] sm:$0xff] %v428_v10  ;;  %431 = vst [vmem:[%s6757_s26 + $0x458] sm:$0xff] %v430_v11  ;;  %v434_v13 = vld [vmem:[%s6752_s25 + $0x8c8] sm:$0xff] }
  0x58   : > { %433 = vst [vmem:[%s6757_s26 + $0x460] sm:$0xff] %v432_v12  ;;  %v436_v14 = vld [vmem:[%s6752_s25 + $0x8e0] sm:$0xff]  ;;  %v438_v15 = vld [vmem:[%s6752_s25 + $0x8e8] sm:$0xff]  ;;  %435 = vst [vmem:[%s6757_s26 + $0x468] sm:$0xff] %v434_v13 }
  0x59   : > { %437 = vst [vmem:[%s6757_s26 + $0x470] sm:$0xff] %v436_v14  ;;  %439 = vst [vmem:[%s6757_s26 + $0x478] sm:$0xff] %v438_v15  ;;  %v440_v16 = vld [vmem:[%s6752_s25 + $0x900] sm:$0xff]  ;;  %v442_v17 = vld [vmem:[%s6752_s25 + $0x908] sm:$0xff] }
  0x5a   : > { %v444_v18 = vld [vmem:[%s6752_s25 + $0x920] sm:$0xff]  ;;  %441 = vst [vmem:[%s6757_s26 + $0x480] sm:$0xff] %v440_v16  ;;  %443 = vst [vmem:[%s6757_s26 + $0x488] sm:$0xff] %v442_v17  ;;  %v446_v19 = vld [vmem:[%s6752_s25 + $0x928] sm:$0xff] }
  0x5b   : > { %445 = vst [vmem:[%s6757_s26 + $0x490] sm:$0xff] %v444_v18  ;;  %v448_v20 = vld [vmem:[%s6752_s25 + $0x940] sm:$0xff]  ;;  %v450_v21 = vld [vmem:[%s6752_s25 + $0x948] sm:$0xff]  ;;  %447 = vst [vmem:[%s6757_s26 + $0x498] sm:$0xff] %v446_v19 }
  0x5c   : > { %449 = vst [vmem:[%s6757_s26 + $0x4a0] sm:$0xff] %v448_v20  ;;  %451 = vst [vmem:[%s6757_s26 + $0x4a8] sm:$0xff] %v450_v21  ;;  %v452_v22 = vld [vmem:[%s6752_s25 + $0x960] sm:$0xff]  ;;  %v454_v23 = vld [vmem:[%s6752_s25 + $0x968] sm:$0xff] }
  0x5d   : > { %v456_v24 = vld [vmem:[%s6752_s25 + $0x980] sm:$0xff]  ;;  %453 = vst [vmem:[%s6757_s26 + $0x4b0] sm:$0xff] %v452_v22  ;;  %455 = vst [vmem:[%s6757_s26 + $0x4b8] sm:$0xff] %v454_v23  ;;  %v458_v25 = vld [vmem:[%s6752_s25 + $0x988] sm:$0xff] }
  0x5e   : > { %457 = vst [vmem:[%s6757_s26 + $0x4c0] sm:$0xff] %v456_v24  ;;  %v460_v26 = vld [vmem:[%s6752_s25 + $0x9a0] sm:$0xff]  ;;  %v462_v27 = vld [vmem:[%s6752_s25 + $0x9a8] sm:$0xff]  ;;  %459 = vst [vmem:[%s6757_s26 + $0x4c8] sm:$0xff] %v458_v25 }
  0x5f   : > { %461 = vst [vmem:[%s6757_s26 + $0x4d0] sm:$0xff] %v460_v26  ;;  %463 = vst [vmem:[%s6757_s26 + $0x4d8] sm:$0xff] %v462_v27  ;;  %v464_v28 = vld [vmem:[%s6752_s25 + $0x9c0] sm:$0xff]  ;;  %v466_v29 = vld [vmem:[%s6752_s25 + $0x9c8] sm:$0xff] }
  0x60   : > { %v468_v30 = vld [vmem:[%s6752_s25 + $0x9e0] sm:$0xff]  ;;  %465 = vst [vmem:[%s6757_s26 + $0x4e0] sm:$0xff] %v464_v28  ;;  %467 = vst [vmem:[%s6757_s26 + $0x4e8] sm:$0xff] %v466_v29  ;;  %v470_v31 = vld [vmem:[%s6752_s25 + $0x9e8] sm:$0xff] }
  0x61   : > { %469 = vst [vmem:[%s6757_s26 + $0x4f0] sm:$0xff] %v468_v30  ;;  %v472_v32 = vld [vmem:[%s6752_s25 + $0xa00] sm:$0xff]  ;;  %v474_v33 = vld [vmem:[%s6752_s25 + $0xa08] sm:$0xff]  ;;  %471 = vst [vmem:[%s6757_s26 + $0x4f8] sm:$0xff] %v470_v31 }
  0x62   : > { %473 = vst [vmem:[%s6757_s26 + $0x500] sm:$0xff] %v472_v32  ;;  %475 = vst [vmem:[%s6757_s26 + $0x508] sm:$0xff] %v474_v33  ;;  %v476_v34 = vld [vmem:[%s6752_s25 + $0xa20] sm:$0xff]  ;;  %v478_v35 = vld [vmem:[%s6752_s25 + $0xa28] sm:$0xff] }
  0x63   : > { %v480_v36 = vld [vmem:[%s6752_s25 + $0xa40] sm:$0xff]  ;;  %477 = vst [vmem:[%s6757_s26 + $0x510] sm:$0xff] %v476_v34  ;;  %479 = vst [vmem:[%s6757_s26 + $0x518] sm:$0xff] %v478_v35  ;;  %v482_v37 = vld [vmem:[%s6752_s25 + $0xa48] sm:$0xff] }
  0x64   : > { %481 = vst [vmem:[%s6757_s26 + $0x520] sm:$0xff] %v480_v36  ;;  %v484_v38 = vld [vmem:[%s6752_s25 + $0xa60] sm:$0xff]  ;;  %v486_v39 = vld [vmem:[%s6752_s25 + $0xa68] sm:$0xff]  ;;  %483 = vst [vmem:[%s6757_s26 + $0x528] sm:$0xff] %v482_v37 }
  0x65   : > { %485 = vst [vmem:[%s6757_s26 + $0x530] sm:$0xff] %v484_v38  ;;  %487 = vst [vmem:[%s6757_s26 + $0x538] sm:$0xff] %v486_v39  ;;  %v488_v40 = vld [vmem:[%s6752_s25 + $0xa80] sm:$0xff]  ;;  %v490_v41 = vld [vmem:[%s6752_s25 + $0xa88] sm:$0xff] }
  0x66   : > { %v492_v42 = vld [vmem:[%s6752_s25 + $0xaa0] sm:$0xff]  ;;  %489 = vst [vmem:[%s6757_s26 + $0x540] sm:$0xff] %v488_v40  ;;  %491 = vst [vmem:[%s6757_s26 + $0x548] sm:$0xff] %v490_v41  ;;  %v494_v43 = vld [vmem:[%s6752_s25 + $0xaa8] sm:$0xff] }
  0x67   : > { %493 = vst [vmem:[%s6757_s26 + $0x550] sm:$0xff] %v492_v42  ;;  %v496_v44 = vld [vmem:[%s6752_s25 + $0xac0] sm:$0xff]  ;;  %v498_v45 = vld [vmem:[%s6752_s25 + $0xac8] sm:$0xff]  ;;  %495 = vst [vmem:[%s6757_s26 + $0x558] sm:$0xff] %v494_v43 }
  0x68   : > { %497 = vst [vmem:[%s6757_s26 + $0x560] sm:$0xff] %v496_v44  ;;  %499 = vst [vmem:[%s6757_s26 + $0x568] sm:$0xff] %v498_v45  ;;  %v500_v46 = vld [vmem:[%s6752_s25 + $0xae0] sm:$0xff]  ;;  %v502_v47 = vld [vmem:[%s6752_s25 + $0xae8] sm:$0xff] }
  0x69   : > { %v504_v48 = vld [vmem:[%s6752_s25 + $0xb00] sm:$0xff]  ;;  %501 = vst [vmem:[%s6757_s26 + $0x570] sm:$0xff] %v500_v46  ;;  %503 = vst [vmem:[%s6757_s26 + $0x578] sm:$0xff] %v502_v47  ;;  %v506_v49 = vld [vmem:[%s6752_s25 + $0xb08] sm:$0xff] }
  0x6a   : > { %505 = vst [vmem:[%s6757_s26 + $0x580] sm:$0xff] %v504_v48  ;;  %v508_v50 = vld [vmem:[%s6752_s25 + $0xb20] sm:$0xff]  ;;  %v510_v51 = vld [vmem:[%s6752_s25 + $0xb28] sm:$0xff]  ;;  %507 = vst [vmem:[%s6757_s26 + $0x588] sm:$0xff] %v506_v49 }
  0x6b   : > { %509 = vst [vmem:[%s6757_s26 + $0x590] sm:$0xff] %v508_v50  ;;  %511 = vst [vmem:[%s6757_s26 + $0x598] sm:$0xff] %v510_v51  ;;  %v512_v52 = vld [vmem:[%s6752_s25 + $0xb40] sm:$0xff]  ;;  %v514_v53 = vld [vmem:[%s6752_s25 + $0xb48] sm:$0xff] }
  0x6c   : > { %v516_v54 = vld [vmem:[%s6752_s25 + $0xb60] sm:$0xff]  ;;  %513 = vst [vmem:[%s6757_s26 + $0x5a0] sm:$0xff] %v512_v52  ;;  %515 = vst [vmem:[%s6757_s26 + $0x5a8] sm:$0xff] %v514_v53  ;;  %v518_v55 = vld [vmem:[%s6752_s25 + $0xb68] sm:$0xff] }
  0x6d   : > { %517 = vst [vmem:[%s6757_s26 + $0x5b0] sm:$0xff] %v516_v54  ;;  %v520_v56 = vld [vmem:[%s6752_s25 + $0xb80] sm:$0xff]  ;;  %v522_v57 = vld [vmem:[%s6752_s25 + $0xb88] sm:$0xff]  ;;  %519 = vst [vmem:[%s6757_s26 + $0x5b8] sm:$0xff] %v518_v55 }
  0x6e   : > { %521 = vst [vmem:[%s6757_s26 + $0x5c0] sm:$0xff] %v520_v56  ;;  %523 = vst [vmem:[%s6757_s26 + $0x5c8] sm:$0xff] %v522_v57  ;;  %v524_v58 = vld [vmem:[%s6752_s25 + $0xba0] sm:$0xff]  ;;  %v526_v59 = vld [vmem:[%s6752_s25 + $0xba8] sm:$0xff] }
  0x6f   : > { %v528_v60 = vld [vmem:[%s6752_s25 + $0xbc0] sm:$0xff]  ;;  %525 = vst [vmem:[%s6757_s26 + $0x5d0] sm:$0xff] %v524_v58  ;;  %527 = vst [vmem:[%s6757_s26 + $0x5d8] sm:$0xff] %v526_v59  ;;  %v530_v61 = vld [vmem:[%s6752_s25 + $0xbc8] sm:$0xff] }
  0x70   : > { %529 = vst [vmem:[%s6757_s26 + $0x5e0] sm:$0xff] %v528_v60  ;;  %v532_v62 = vld [vmem:[%s6752_s25 + $0xbe0] sm:$0xff]  ;;  %v534_v63 = vld [vmem:[%s6752_s25 + $0xbe8] sm:$0xff]  ;;  %531 = vst [vmem:[%s6757_s26 + $0x5e8] sm:$0xff] %v530_v61 }
  0x71   : > { %533 = vst [vmem:[%s6757_s26 + $0x5f0] sm:$0xff] %v532_v62  ;;  %535 = vst [vmem:[%s6757_s26 + $0x5f8] sm:$0xff] %v534_v63  ;;  %v536_v0 = vld [vmem:[%s6752_s25 + $0xc00] sm:$0xff]  ;;  %v538_v1 = vld [vmem:[%s6752_s25 + $0xc08] sm:$0xff] }
  0x72   : > { %v540_v2 = vld [vmem:[%s6752_s25 + $0xc20] sm:$0xff]  ;;  %537 = vst [vmem:[%s6757_s26 + $0x600] sm:$0xff] %v536_v0  ;;  %539 = vst [vmem:[%s6757_s26 + $0x608] sm:$0xff] %v538_v1  ;;  %v542_v3 = vld [vmem:[%s6752_s25 + $0xc28] sm:$0xff] }
  0x73   : > { %541 = vst [vmem:[%s6757_s26 + $0x610] sm:$0xff] %v540_v2  ;;  %v544_v4 = vld [vmem:[%s6752_s25 + $0xc40] sm:$0xff]  ;;  %v546_v5 = vld [vmem:[%s6752_s25 + $0xc48] sm:$0xff]  ;;  %543 = vst [vmem:[%s6757_s26 + $0x618] sm:$0xff] %v542_v3 }
  0x74   : > { %545 = vst [vmem:[%s6757_s26 + $0x620] sm:$0xff] %v544_v4  ;;  %547 = vst [vmem:[%s6757_s26 + $0x628] sm:$0xff] %v546_v5  ;;  %v548_v6 = vld [vmem:[%s6752_s25 + $0xc60] sm:$0xff]  ;;  %v550_v7 = vld [vmem:[%s6752_s25 + $0xc68] sm:$0xff] }
  0x75   : > { %v552_v8 = vld [vmem:[%s6752_s25 + $0xc80] sm:$0xff]  ;;  %549 = vst [vmem:[%s6757_s26 + $0x630] sm:$0xff] %v548_v6  ;;  %551 = vst [vmem:[%s6757_s26 + $0x638] sm:$0xff] %v550_v7  ;;  %v554_v9 = vld [vmem:[%s6752_s25 + $0xc88] sm:$0xff] }
  0x76   : > { %553 = vst [vmem:[%s6757_s26 + $0x640] sm:$0xff] %v552_v8  ;;  %v556_v10 = vld [vmem:[%s6752_s25 + $0xca0] sm:$0xff]  ;;  %v558_v11 = vld [vmem:[%s6752_s25 + $0xca8] sm:$0xff]  ;;  %555 = vst [vmem:[%s6757_s26 + $0x648] sm:$0xff] %v554_v9 }
  0x77   : > { %557 = vst [vmem:[%s6757_s26 + $0x650] sm:$0xff] %v556_v10  ;;  %559 = vst [vmem:[%s6757_s26 + $0x658] sm:$0xff] %v558_v11  ;;  %v560_v12 = vld [vmem:[%s6752_s25 + $0xcc0] sm:$0xff]  ;;  %v562_v13 = vld [vmem:[%s6752_s25 + $0xcc8] sm:$0xff] }
  0x78   : > { %v564_v14 = vld [vmem:[%s6752_s25 + $0xce0] sm:$0xff]  ;;  %561 = vst [vmem:[%s6757_s26 + $0x660] sm:$0xff] %v560_v12  ;;  %563 = vst [vmem:[%s6757_s26 + $0x668] sm:$0xff] %v562_v13  ;;  %v566_v15 = vld [vmem:[%s6752_s25 + $0xce8] sm:$0xff] }
  0x79   : > { %565 = vst [vmem:[%s6757_s26 + $0x670] sm:$0xff] %v564_v14  ;;  %v568_v16 = vld [vmem:[%s6752_s25 + $0xd00] sm:$0xff]  ;;  %v570_v17 = vld [vmem:[%s6752_s25 + $0xd08] sm:$0xff]  ;;  %567 = vst [vmem:[%s6757_s26 + $0x678] sm:$0xff] %v566_v15 }
  0x7a   : > { %569 = vst [vmem:[%s6757_s26 + $0x680] sm:$0xff] %v568_v16  ;;  %571 = vst [vmem:[%s6757_s26 + $0x688] sm:$0xff] %v570_v17  ;;  %v572_v18 = vld [vmem:[%s6752_s25 + $0xd20] sm:$0xff]  ;;  %v574_v19 = vld [vmem:[%s6752_s25 + $0xd28] sm:$0xff] }
  0x7b   : > { %v576_v20 = vld [vmem:[%s6752_s25 + $0xd40] sm:$0xff]  ;;  %573 = vst [vmem:[%s6757_s26 + $0x690] sm:$0xff] %v572_v18  ;;  %575 = vst [vmem:[%s6757_s26 + $0x698] sm:$0xff] %v574_v19  ;;  %v578_v21 = vld [vmem:[%s6752_s25 + $0xd48] sm:$0xff] }
  0x7c   : > { %577 = vst [vmem:[%s6757_s26 + $0x6a0] sm:$0xff] %v576_v20  ;;  %v580_v22 = vld [vmem:[%s6752_s25 + $0xd60] sm:$0xff]  ;;  %v582_v23 = vld [vmem:[%s6752_s25 + $0xd68] sm:$0xff]  ;;  %579 = vst [vmem:[%s6757_s26 + $0x6a8] sm:$0xff] %v578_v21 }
  0x7d   : > { %581 = vst [vmem:[%s6757_s26 + $0x6b0] sm:$0xff] %v580_v22  ;;  %583 = vst [vmem:[%s6757_s26 + $0x6b8] sm:$0xff] %v582_v23  ;;  %v584_v24 = vld [vmem:[%s6752_s25 + $0xd80] sm:$0xff]  ;;  %v586_v25 = vld [vmem:[%s6752_s25 + $0xd88] sm:$0xff] }
  0x7e   : > { %v588_v26 = vld [vmem:[%s6752_s25 + $0xda0] sm:$0xff]  ;;  %585 = vst [vmem:[%s6757_s26 + $0x6c0] sm:$0xff] %v584_v24  ;;  %587 = vst [vmem:[%s6757_s26 + $0x6c8] sm:$0xff] %v586_v25  ;;  %v590_v27 = vld [vmem:[%s6752_s25 + $0xda8] sm:$0xff] }
  0x7f   : > { %589 = vst [vmem:[%s6757_s26 + $0x6d0] sm:$0xff] %v588_v26  ;;  %v592_v28 = vld [vmem:[%s6752_s25 + $0xdc0] sm:$0xff]  ;;  %v594_v29 = vld [vmem:[%s6752_s25 + $0xdc8] sm:$0xff]  ;;  %591 = vst [vmem:[%s6757_s26 + $0x6d8] sm:$0xff] %v590_v27 }
  0x80   : > { %593 = vst [vmem:[%s6757_s26 + $0x6e0] sm:$0xff] %v592_v28  ;;  %595 = vst [vmem:[%s6757_s26 + $0x6e8] sm:$0xff] %v594_v29  ;;  %v596_v30 = vld [vmem:[%s6752_s25 + $0xde0] sm:$0xff]  ;;  %v598_v31 = vld [vmem:[%s6752_s25 + $0xde8] sm:$0xff] }
  0x81   : > { %v600_v32 = vld [vmem:[%s6752_s25 + $0xe00] sm:$0xff]  ;;  %597 = vst [vmem:[%s6757_s26 + $0x6f0] sm:$0xff] %v596_v30  ;;  %599 = vst [vmem:[%s6757_s26 + $0x6f8] sm:$0xff] %v598_v31  ;;  %v602_v33 = vld [vmem:[%s6752_s25 + $0xe08] sm:$0xff] }
  0x82   : > { %601 = vst [vmem:[%s6757_s26 + $0x700] sm:$0xff] %v600_v32  ;;  %v604_v34 = vld [vmem:[%s6752_s25 + $0xe20] sm:$0xff]  ;;  %v606_v35 = vld [vmem:[%s6752_s25 + $0xe28] sm:$0xff]  ;;  %603 = vst [vmem:[%s6757_s26 + $0x708] sm:$0xff] %v602_v33 }
  0x83   : > { %605 = vst [vmem:[%s6757_s26 + $0x710] sm:$0xff] %v604_v34  ;;  %607 = vst [vmem:[%s6757_s26 + $0x718] sm:$0xff] %v606_v35  ;;  %v608_v36 = vld [vmem:[%s6752_s25 + $0xe40] sm:$0xff]  ;;  %v610_v37 = vld [vmem:[%s6752_s25 + $0xe48] sm:$0xff] }
  0x84   : > { %v612_v38 = vld [vmem:[%s6752_s25 + $0xe60] sm:$0xff]  ;;  %609 = vst [vmem:[%s6757_s26 + $0x720] sm:$0xff] %v608_v36  ;;  %611 = vst [vmem:[%s6757_s26 + $0x728] sm:$0xff] %v610_v37  ;;  %v614_v39 = vld [vmem:[%s6752_s25 + $0xe68] sm:$0xff] }
  0x85   : > { %613 = vst [vmem:[%s6757_s26 + $0x730] sm:$0xff] %v612_v38  ;;  %v616_v40 = vld [vmem:[%s6752_s25 + $0xe80] sm:$0xff]  ;;  %v618_v41 = vld [vmem:[%s6752_s25 + $0xe88] sm:$0xff]  ;;  %615 = vst [vmem:[%s6757_s26 + $0x738] sm:$0xff] %v614_v39 }
  0x86   : > { %617 = vst [vmem:[%s6757_s26 + $0x740] sm:$0xff] %v616_v40  ;;  %619 = vst [vmem:[%s6757_s26 + $0x748] sm:$0xff] %v618_v41  ;;  %v620_v42 = vld [vmem:[%s6752_s25 + $0xea0] sm:$0xff]  ;;  %v622_v43 = vld [vmem:[%s6752_s25 + $0xea8] sm:$0xff] }
  0x87   : > { %v624_v44 = vld [vmem:[%s6752_s25 + $0xec0] sm:$0xff]  ;;  %621 = vst [vmem:[%s6757_s26 + $0x750] sm:$0xff] %v620_v42  ;;  %623 = vst [vmem:[%s6757_s26 + $0x758] sm:$0xff] %v622_v43  ;;  %v626_v45 = vld [vmem:[%s6752_s25 + $0xec8] sm:$0xff] }
  0x88   : > { %625 = vst [vmem:[%s6757_s26 + $0x760] sm:$0xff] %v624_v44  ;;  %v628_v46 = vld [vmem:[%s6752_s25 + $0xee0] sm:$0xff]  ;;  %v630_v47 = vld [vmem:[%s6752_s25 + $0xee8] sm:$0xff]  ;;  %627 = vst [vmem:[%s6757_s26 + $0x768] sm:$0xff] %v626_v45 }
  0x89   : > { %629 = vst [vmem:[%s6757_s26 + $0x770] sm:$0xff] %v628_v46  ;;  %631 = vst [vmem:[%s6757_s26 + $0x778] sm:$0xff] %v630_v47  ;;  %v632_v48 = vld [vmem:[%s6752_s25 + $0xf00] sm:$0xff]  ;;  %v634_v49 = vld [vmem:[%s6752_s25 + $0xf08] sm:$0xff] }
  0x8a   : > { %v636_v50 = vld [vmem:[%s6752_s25 + $0xf20] sm:$0xff]  ;;  %633 = vst [vmem:[%s6757_s26 + $0x780] sm:$0xff] %v632_v48  ;;  %635 = vst [vmem:[%s6757_s26 + $0x788] sm:$0xff] %v634_v49  ;;  %v638_v51 = vld [vmem:[%s6752_s25 + $0xf28] sm:$0xff] }
  0x8b   : > { %637 = vst [vmem:[%s6757_s26 + $0x790] sm:$0xff] %v636_v50  ;;  %v640_v52 = vld [vmem:[%s6752_s25 + $0xf40] sm:$0xff]  ;;  %v642_v53 = vld [vmem:[%s6752_s25 + $0xf48] sm:$0xff]  ;;  %639 = vst [vmem:[%s6757_s26 + $0x798] sm:$0xff] %v638_v51 }
  0x8c   : > { %641 = vst [vmem:[%s6757_s26 + $0x7a0] sm:$0xff] %v640_v52  ;;  %643 = vst [vmem:[%s6757_s26 + $0x7a8] sm:$0xff] %v642_v53  ;;  %v644_v54 = vld [vmem:[%s6752_s25 + $0xf60] sm:$0xff]  ;;  %v646_v55 = vld [vmem:[%s6752_s25 + $0xf68] sm:$0xff] }
  0x8d   : > { %v648_v56 = vld [vmem:[%s6752_s25 + $0xf80] sm:$0xff]  ;;  %645 = vst [vmem:[%s6757_s26 + $0x7b0] sm:$0xff] %v644_v54  ;;  %647 = vst [vmem:[%s6757_s26 + $0x7b8] sm:$0xff] %v646_v55  ;;  %v650_v57 = vld [vmem:[%s6752_s25 + $0xf88] sm:$0xff] }
  0x8e   : > { %649 = vst [vmem:[%s6757_s26 + $0x7c0] sm:$0xff] %v648_v56  ;;  %v652_v58 = vld [vmem:[%s6752_s25 + $0xfa0] sm:$0xff]  ;;  %v654_v59 = vld [vmem:[%s6752_s25 + $0xfa8] sm:$0xff]  ;;  %651 = vst [vmem:[%s6757_s26 + $0x7c8] sm:$0xff] %v650_v57 }
  0x8f   : > { %653 = vst [vmem:[%s6757_s26 + $0x7d0] sm:$0xff] %v652_v58  ;;  %655 = vst [vmem:[%s6757_s26 + $0x7d8] sm:$0xff] %v654_v59  ;;  %v656_v60 = vld [vmem:[%s6752_s25 + $0xfc0] sm:$0xff]  ;;  %v658_v61 = vld [vmem:[%s6752_s25 + $0xfc8] sm:$0xff] }
  0x90   : > { %v660_v62 = vld [vmem:[%s6752_s25 + $0xfe0] sm:$0xff]  ;;  %657 = vst [vmem:[%s6757_s26 + $0x7e0] sm:$0xff] %v656_v60  ;;  %659 = vst [vmem:[%s6757_s26 + $0x7e8] sm:$0xff] %v658_v61  ;;  %v662_v63 = vld [vmem:[%s6752_s25 + $0xfe8] sm:$0xff] }
  0x91   : > { %661 = vst [vmem:[%s6757_s26 + $0x7f0] sm:$0xff] %v660_v62  ;;  %v664_v0 = vld [vmem:[%s6752_s25 + $0x1000] sm:$0xff]  ;;  %v666_v1 = vld [vmem:[%s6752_s25 + $0x1008] sm:$0xff]  ;;  %663 = vst [vmem:[%s6757_s26 + $0x7f8] sm:$0xff] %v662_v63 }
  0x92   : > { %665 = vst [vmem:[%s6757_s26 + $0x800] sm:$0xff] %v664_v0  ;;  %667 = vst [vmem:[%s6757_s26 + $0x808] sm:$0xff] %v666_v1  ;;  %v668_v2 = vld [vmem:[%s6752_s25 + $0x1020] sm:$0xff]  ;;  %v670_v3 = vld [vmem:[%s6752_s25 + $0x1028] sm:$0xff] }
  0x93   : > { %v672_v4 = vld [vmem:[%s6752_s25 + $0x1040] sm:$0xff]  ;;  %669 = vst [vmem:[%s6757_s26 + $0x810] sm:$0xff] %v668_v2  ;;  %671 = vst [vmem:[%s6757_s26 + $0x818] sm:$0xff] %v670_v3  ;;  %v674_v5 = vld [vmem:[%s6752_s25 + $0x1048] sm:$0xff] }
  0x94   : > { %673 = vst [vmem:[%s6757_s26 + $0x820] sm:$0xff] %v672_v4  ;;  %v676_v6 = vld [vmem:[%s6752_s25 + $0x1060] sm:$0xff]  ;;  %v678_v7 = vld [vmem:[%s6752_s25 + $0x1068] sm:$0xff]  ;;  %675 = vst [vmem:[%s6757_s26 + $0x828] sm:$0xff] %v674_v5 }
  0x95   : > { %677 = vst [vmem:[%s6757_s26 + $0x830] sm:$0xff] %v676_v6  ;;  %679 = vst [vmem:[%s6757_s26 + $0x838] sm:$0xff] %v678_v7  ;;  %v680_v8 = vld [vmem:[%s6752_s25 + $0x1080] sm:$0xff]  ;;  %v682_v9 = vld [vmem:[%s6752_s25 + $0x1088] sm:$0xff] }
  0x96   : > { %v684_v10 = vld [vmem:[%s6752_s25 + $0x10a0] sm:$0xff]  ;;  %681 = vst [vmem:[%s6757_s26 + $0x840] sm:$0xff] %v680_v8  ;;  %683 = vst [vmem:[%s6757_s26 + $0x848] sm:$0xff] %v682_v9  ;;  %v686_v11 = vld [vmem:[%s6752_s25 + $0x10a8] sm:$0xff] }
  0x97   : > { %685 = vst [vmem:[%s6757_s26 + $0x850] sm:$0xff] %v684_v10  ;;  %v688_v12 = vld [vmem:[%s6752_s25 + $0x10c0] sm:$0xff]  ;;  %v690_v13 = vld [vmem:[%s6752_s25 + $0x10c8] sm:$0xff]  ;;  %687 = vst [vmem:[%s6757_s26 + $0x858] sm:$0xff] %v686_v11 }
  0x98   : > { %689 = vst [vmem:[%s6757_s26 + $0x860] sm:$0xff] %v688_v12  ;;  %691 = vst [vmem:[%s6757_s26 + $0x868] sm:$0xff] %v690_v13  ;;  %v692_v14 = vld [vmem:[%s6752_s25 + $0x10e0] sm:$0xff]  ;;  %v694_v15 = vld [vmem:[%s6752_s25 + $0x10e8] sm:$0xff] }
  0x99   : > { %v696_v16 = vld [vmem:[%s6752_s25 + $0x1100] sm:$0xff]  ;;  %693 = vst [vmem:[%s6757_s26 + $0x870] sm:$0xff] %v692_v14  ;;  %695 = vst [vmem:[%s6757_s26 + $0x878] sm:$0xff] %v694_v15  ;;  %v698_v17 = vld [vmem:[%s6752_s25 + $0x1108] sm:$0xff] }
  0x9a   : > { %697 = vst [vmem:[%s6757_s26 + $0x880] sm:$0xff] %v696_v16  ;;  %v700_v18 = vld [vmem:[%s6752_s25 + $0x1120] sm:$0xff]  ;;  %v702_v19 = vld [vmem:[%s6752_s25 + $0x1128] sm:$0xff]  ;;  %699 = vst [vmem:[%s6757_s26 + $0x888] sm:$0xff] %v698_v17 }
  0x9b   : > { %701 = vst [vmem:[%s6757_s26 + $0x890] sm:$0xff] %v700_v18  ;;  %703 = vst [vmem:[%s6757_s26 + $0x898] sm:$0xff] %v702_v19  ;;  %v704_v20 = vld [vmem:[%s6752_s25 + $0x1140] sm:$0xff]  ;;  %v706_v21 = vld [vmem:[%s6752_s25 + $0x1148] sm:$0xff] }
  0x9c   : > { %v708_v22 = vld [vmem:[%s6752_s25 + $0x1160] sm:$0xff]  ;;  %705 = vst [vmem:[%s6757_s26 + $0x8a0] sm:$0xff] %v704_v20  ;;  %707 = vst [vmem:[%s6757_s26 + $0x8a8] sm:$0xff] %v706_v21  ;;  %v710_v23 = vld [vmem:[%s6752_s25 + $0x1168] sm:$0xff] }
  0x9d   : > { %709 = vst [vmem:[%s6757_s26 + $0x8b0] sm:$0xff] %v708_v22  ;;  %v712_v24 = vld [vmem:[%s6752_s25 + $0x1180] sm:$0xff]  ;;  %v714_v25 = vld [vmem:[%s6752_s25 + $0x1188] sm:$0xff]  ;;  %711 = vst [vmem:[%s6757_s26 + $0x8b8] sm:$0xff] %v710_v23 }
  0x9e   : > { %713 = vst [vmem:[%s6757_s26 + $0x8c0] sm:$0xff] %v712_v24  ;;  %715 = vst [vmem:[%s6757_s26 + $0x8c8] sm:$0xff] %v714_v25  ;;  %v716_v26 = vld [vmem:[%s6752_s25 + $0x11a0] sm:$0xff]  ;;  %v718_v27 = vld [vmem:[%s6752_s25 + $0x11a8] sm:$0xff] }
  0x9f   : > { %v720_v28 = vld [vmem:[%s6752_s25 + $0x11c0] sm:$0xff]  ;;  %717 = vst [vmem:[%s6757_s26 + $0x8d0] sm:$0xff] %v716_v26  ;;  %719 = vst [vmem:[%s6757_s26 + $0x8d8] sm:$0xff] %v718_v27  ;;  %v722_v29 = vld [vmem:[%s6752_s25 + $0x11c8] sm:$0xff] }
  0xa0   : > { %721 = vst [vmem:[%s6757_s26 + $0x8e0] sm:$0xff] %v720_v28  ;;  %v724_v30 = vld [vmem:[%s6752_s25 + $0x11e0] sm:$0xff]  ;;  %v726_v31 = vld [vmem:[%s6752_s25 + $0x11e8] sm:$0xff]  ;;  %723 = vst [vmem:[%s6757_s26 + $0x8e8] sm:$0xff] %v722_v29 }
  0xa1   : > { %725 = vst [vmem:[%s6757_s26 + $0x8f0] sm:$0xff] %v724_v30  ;;  %727 = vst [vmem:[%s6757_s26 + $0x8f8] sm:$0xff] %v726_v31  ;;  %v728_v32 = vld [vmem:[%s6752_s25 + $0x1200] sm:$0xff]  ;;  %v730_v33 = vld [vmem:[%s6752_s25 + $0x1208] sm:$0xff] }
  0xa2   : > { %v732_v34 = vld [vmem:[%s6752_s25 + $0x1220] sm:$0xff]  ;;  %729 = vst [vmem:[%s6757_s26 + $0x900] sm:$0xff] %v728_v32  ;;  %731 = vst [vmem:[%s6757_s26 + $0x908] sm:$0xff] %v730_v33  ;;  %v734_v35 = vld [vmem:[%s6752_s25 + $0x1228] sm:$0xff] }
  0xa3   : > { %733 = vst [vmem:[%s6757_s26 + $0x910] sm:$0xff] %v732_v34  ;;  %v736_v36 = vld [vmem:[%s6752_s25 + $0x1240] sm:$0xff]  ;;  %v738_v37 = vld [vmem:[%s6752_s25 + $0x1248] sm:$0xff]  ;;  %735 = vst [vmem:[%s6757_s26 + $0x918] sm:$0xff] %v734_v35 }
  0xa4   : > { %737 = vst [vmem:[%s6757_s26 + $0x920] sm:$0xff] %v736_v36  ;;  %739 = vst [vmem:[%s6757_s26 + $0x928] sm:$0xff] %v738_v37  ;;  %v740_v38 = vld [vmem:[%s6752_s25 + $0x1260] sm:$0xff]  ;;  %v742_v39 = vld [vmem:[%s6752_s25 + $0x1268] sm:$0xff] }
  0xa5   : > { %v744_v40 = vld [vmem:[%s6752_s25 + $0x1280] sm:$0xff]  ;;  %741 = vst [vmem:[%s6757_s26 + $0x930] sm:$0xff] %v740_v38  ;;  %743 = vst [vmem:[%s6757_s26 + $0x938] sm:$0xff] %v742_v39  ;;  %v746_v41 = vld [vmem:[%s6752_s25 + $0x1288] sm:$0xff] }
  0xa6   : > { %745 = vst [vmem:[%s6757_s26 + $0x940] sm:$0xff] %v744_v40  ;;  %v748_v42 = vld [vmem:[%s6752_s25 + $0x12a0] sm:$0xff]  ;;  %v750_v43 = vld [vmem:[%s6752_s25 + $0x12a8] sm:$0xff]  ;;  %747 = vst [vmem:[%s6757_s26 + $0x948] sm:$0xff] %v746_v41 }
  0xa7   : > { %749 = vst [vmem:[%s6757_s26 + $0x950] sm:$0xff] %v748_v42  ;;  %751 = vst [vmem:[%s6757_s26 + $0x958] sm:$0xff] %v750_v43  ;;  %v752_v44 = vld [vmem:[%s6752_s25 + $0x12c0] sm:$0xff]  ;;  %v754_v45 = vld [vmem:[%s6752_s25 + $0x12c8] sm:$0xff] }
  0xa8   : > { %v756_v46 = vld [vmem:[%s6752_s25 + $0x12e0] sm:$0xff]  ;;  %753 = vst [vmem:[%s6757_s26 + $0x960] sm:$0xff] %v752_v44  ;;  %755 = vst [vmem:[%s6757_s26 + $0x968] sm:$0xff] %v754_v45  ;;  %v758_v47 = vld [vmem:[%s6752_s25 + $0x12e8] sm:$0xff] }
  0xa9   : > { %757 = vst [vmem:[%s6757_s26 + $0x970] sm:$0xff] %v756_v46  ;;  %v760_v48 = vld [vmem:[%s6752_s25 + $0x1300] sm:$0xff]  ;;  %v762_v49 = vld [vmem:[%s6752_s25 + $0x1308] sm:$0xff]  ;;  %759 = vst [vmem:[%s6757_s26 + $0x978] sm:$0xff] %v758_v47 }
  0xaa   : > { %761 = vst [vmem:[%s6757_s26 + $0x980] sm:$0xff] %v760_v48  ;;  %763 = vst [vmem:[%s6757_s26 + $0x988] sm:$0xff] %v762_v49  ;;  %v764_v50 = vld [vmem:[%s6752_s25 + $0x1320] sm:$0xff]  ;;  %v766_v51 = vld [vmem:[%s6752_s25 + $0x1328] sm:$0xff] }
  0xab   : > { %v768_v52 = vld [vmem:[%s6752_s25 + $0x1340] sm:$0xff]  ;;  %765 = vst [vmem:[%s6757_s26 + $0x990] sm:$0xff] %v764_v50  ;;  %767 = vst [vmem:[%s6757_s26 + $0x998] sm:$0xff] %v766_v51  ;;  %v770_v53 = vld [vmem:[%s6752_s25 + $0x1348] sm:$0xff] }
  0xac   : > { %769 = vst [vmem:[%s6757_s26 + $0x9a0] sm:$0xff] %v768_v52  ;;  %v772_v54 = vld [vmem:[%s6752_s25 + $0x1360] sm:$0xff]  ;;  %v774_v55 = vld [vmem:[%s6752_s25 + $0x1368] sm:$0xff]  ;;  %771 = vst [vmem:[%s6757_s26 + $0x9a8] sm:$0xff] %v770_v53 }
  0xad   : > { %773 = vst [vmem:[%s6757_s26 + $0x9b0] sm:$0xff] %v772_v54  ;;  %775 = vst [vmem:[%s6757_s26 + $0x9b8] sm:$0xff] %v774_v55  ;;  %v776_v56 = vld [vmem:[%s6752_s25 + $0x1380] sm:$0xff]  ;;  %v778_v57 = vld [vmem:[%s6752_s25 + $0x1388] sm:$0xff] }
  0xae   : > { %v780_v58 = vld [vmem:[%s6752_s25 + $0x13a0] sm:$0xff]  ;;  %777 = vst [vmem:[%s6757_s26 + $0x9c0] sm:$0xff] %v776_v56  ;;  %779 = vst [vmem:[%s6757_s26 + $0x9c8] sm:$0xff] %v778_v57  ;;  %v782_v59 = vld [vmem:[%s6752_s25 + $0x13a8] sm:$0xff] }
  0xaf   : > { %781 = vst [vmem:[%s6757_s26 + $0x9d0] sm:$0xff] %v780_v58  ;;  %v784_v60 = vld [vmem:[%s6752_s25 + $0x13c0] sm:$0xff]  ;;  %v786_v61 = vld [vmem:[%s6752_s25 + $0x13c8] sm:$0xff]  ;;  %783 = vst [vmem:[%s6757_s26 + $0x9d8] sm:$0xff] %v782_v59 }
  0xb0   : > { %785 = vst [vmem:[%s6757_s26 + $0x9e0] sm:$0xff] %v784_v60  ;;  %787 = vst [vmem:[%s6757_s26 + $0x9e8] sm:$0xff] %v786_v61  ;;  %v788_v62 = vld [vmem:[%s6752_s25 + $0x13e0] sm:$0xff]  ;;  %v790_v63 = vld [vmem:[%s6752_s25 + $0x13e8] sm:$0xff] }
  0xb1   : > { %v792_v0 = vld [vmem:[%s6752_s25 + $0x1400] sm:$0xff]  ;;  %789 = vst [vmem:[%s6757_s26 + $0x9f0] sm:$0xff] %v788_v62  ;;  %791 = vst [vmem:[%s6757_s26 + $0x9f8] sm:$0xff] %v790_v63  ;;  %v794_v1 = vld [vmem:[%s6752_s25 + $0x1408] sm:$0xff] }
  0xb2   : > { %793 = vst [vmem:[%s6757_s26 + $0xa00] sm:$0xff] %v792_v0  ;;  %v796_v2 = vld [vmem:[%s6752_s25 + $0x1420] sm:$0xff]  ;;  %v798_v3 = vld [vmem:[%s6752_s25 + $0x1428] sm:$0xff]  ;;  %795 = vst [vmem:[%s6757_s26 + $0xa08] sm:$0xff] %v794_v1 }
  0xb3   : > { %797 = vst [vmem:[%s6757_s26 + $0xa10] sm:$0xff] %v796_v2  ;;  %799 = vst [vmem:[%s6757_s26 + $0xa18] sm:$0xff] %v798_v3  ;;  %v800_v4 = vld [vmem:[%s6752_s25 + $0x1440] sm:$0xff]  ;;  %v802_v5 = vld [vmem:[%s6752_s25 + $0x1448] sm:$0xff] }
  0xb4   : > { %v804_v6 = vld [vmem:[%s6752_s25 + $0x1460] sm:$0xff]  ;;  %801 = vst [vmem:[%s6757_s26 + $0xa20] sm:$0xff] %v800_v4  ;;  %803 = vst [vmem:[%s6757_s26 + $0xa28] sm:$0xff] %v802_v5  ;;  %v806_v7 = vld [vmem:[%s6752_s25 + $0x1468] sm:$0xff] }
  0xb5   : > { %805 = vst [vmem:[%s6757_s26 + $0xa30] sm:$0xff] %v804_v6  ;;  %v808_v8 = vld [vmem:[%s6752_s25 + $0x1480] sm:$0xff]  ;;  %v810_v9 = vld [vmem:[%s6752_s25 + $0x1488] sm:$0xff]  ;;  %807 = vst [vmem:[%s6757_s26 + $0xa38] sm:$0xff] %v806_v7 }
  0xb6   : > { %809 = vst [vmem:[%s6757_s26 + $0xa40] sm:$0xff] %v808_v8  ;;  %811 = vst [vmem:[%s6757_s26 + $0xa48] sm:$0xff] %v810_v9  ;;  %v812_v10 = vld [vmem:[%s6752_s25 + $0x14a0] sm:$0xff]  ;;  %v814_v11 = vld [vmem:[%s6752_s25 + $0x14a8] sm:$0xff] }
  0xb7   : > { %v816_v12 = vld [vmem:[%s6752_s25 + $0x14c0] sm:$0xff]  ;;  %813 = vst [vmem:[%s6757_s26 + $0xa50] sm:$0xff] %v812_v10  ;;  %815 = vst [vmem:[%s6757_s26 + $0xa58] sm:$0xff] %v814_v11  ;;  %v818_v13 = vld [vmem:[%s6752_s25 + $0x14c8] sm:$0xff] }
  0xb8   : > { %817 = vst [vmem:[%s6757_s26 + $0xa60] sm:$0xff] %v816_v12  ;;  %v820_v14 = vld [vmem:[%s6752_s25 + $0x14e0] sm:$0xff]  ;;  %v822_v15 = vld [vmem:[%s6752_s25 + $0x14e8] sm:$0xff]  ;;  %819 = vst [vmem:[%s6757_s26 + $0xa68] sm:$0xff] %v818_v13 }
  0xb9   : > { %821 = vst [vmem:[%s6757_s26 + $0xa70] sm:$0xff] %v820_v14  ;;  %823 = vst [vmem:[%s6757_s26 + $0xa78] sm:$0xff] %v822_v15  ;;  %v824_v16 = vld [vmem:[%s6752_s25 + $0x1500] sm:$0xff]  ;;  %v826_v17 = vld [vmem:[%s6752_s25 + $0x1508] sm:$0xff] }
  0xba   : > { %v828_v18 = vld [vmem:[%s6752_s25 + $0x1520] sm:$0xff]  ;;  %825 = vst [vmem:[%s6757_s26 + $0xa80] sm:$0xff] %v824_v16  ;;  %827 = vst [vmem:[%s6757_s26 + $0xa88] sm:$0xff] %v826_v17  ;;  %v830_v19 = vld [vmem:[%s6752_s25 + $0x1528] sm:$0xff] }
  0xbb   : > { %829 = vst [vmem:[%s6757_s26 + $0xa90] sm:$0xff] %v828_v18  ;;  %v832_v20 = vld [vmem:[%s6752_s25 + $0x1540] sm:$0xff]  ;;  %v834_v21 = vld [vmem:[%s6752_s25 + $0x1548] sm:$0xff]  ;;  %831 = vst [vmem:[%s6757_s26 + $0xa98] sm:$0xff] %v830_v19 }
  0xbc   : > { %833 = vst [vmem:[%s6757_s26 + $0xaa0] sm:$0xff] %v832_v20  ;;  %835 = vst [vmem:[%s6757_s26 + $0xaa8] sm:$0xff] %v834_v21  ;;  %v836_v22 = vld [vmem:[%s6752_s25 + $0x1560] sm:$0xff]  ;;  %v838_v23 = vld [vmem:[%s6752_s25 + $0x1568] sm:$0xff] }
  0xbd   : > { %v840_v24 = vld [vmem:[%s6752_s25 + $0x1580] sm:$0xff]  ;;  %837 = vst [vmem:[%s6757_s26 + $0xab0] sm:$0xff] %v836_v22  ;;  %839 = vst [vmem:[%s6757_s26 + $0xab8] sm:$0xff] %v838_v23  ;;  %v842_v25 = vld [vmem:[%s6752_s25 + $0x1588] sm:$0xff] }
  0xbe   : > { %841 = vst [vmem:[%s6757_s26 + $0xac0] sm:$0xff] %v840_v24  ;;  %v844_v26 = vld [vmem:[%s6752_s25 + $0x15a0] sm:$0xff]  ;;  %v846_v27 = vld [vmem:[%s6752_s25 + $0x15a8] sm:$0xff]  ;;  %843 = vst [vmem:[%s6757_s26 + $0xac8] sm:$0xff] %v842_v25 }
  0xbf   : > { %845 = vst [vmem:[%s6757_s26 + $0xad0] sm:$0xff] %v844_v26  ;;  %847 = vst [vmem:[%s6757_s26 + $0xad8] sm:$0xff] %v846_v27  ;;  %v848_v28 = vld [vmem:[%s6752_s25 + $0x15c0] sm:$0xff]  ;;  %v850_v29 = vld [vmem:[%s6752_s25 + $0x15c8] sm:$0xff] }
  0xc0   : > { %v852_v30 = vld [vmem:[%s6752_s25 + $0x15e0] sm:$0xff]  ;;  %849 = vst [vmem:[%s6757_s26 + $0xae0] sm:$0xff] %v848_v28  ;;  %851 = vst [vmem:[%s6757_s26 + $0xae8] sm:$0xff] %v850_v29  ;;  %v854_v31 = vld [vmem:[%s6752_s25 + $0x15e8] sm:$0xff] }
  0xc1   : > { %853 = vst [vmem:[%s6757_s26 + $0xaf0] sm:$0xff] %v852_v30  ;;  %v856_v32 = vld [vmem:[%s6752_s25 + $0x1600] sm:$0xff]  ;;  %v858_v33 = vld [vmem:[%s6752_s25 + $0x1608] sm:$0xff]  ;;  %855 = vst [vmem:[%s6757_s26 + $0xaf8] sm:$0xff] %v854_v31 }
  0xc2   : > { %857 = vst [vmem:[%s6757_s26 + $0xb00] sm:$0xff] %v856_v32  ;;  %859 = vst [vmem:[%s6757_s26 + $0xb08] sm:$0xff] %v858_v33  ;;  %v860_v34 = vld [vmem:[%s6752_s25 + $0x1620] sm:$0xff]  ;;  %v862_v35 = vld [vmem:[%s6752_s25 + $0x1628] sm:$0xff] }
  0xc3   : > { %v864_v36 = vld [vmem:[%s6752_s25 + $0x1640] sm:$0xff]  ;;  %861 = vst [vmem:[%s6757_s26 + $0xb10] sm:$0xff] %v860_v34  ;;  %863 = vst [vmem:[%s6757_s26 + $0xb18] sm:$0xff] %v862_v35  ;;  %v866_v37 = vld [vmem:[%s6752_s25 + $0x1648] sm:$0xff] }
  0xc4   : > { %865 = vst [vmem:[%s6757_s26 + $0xb20] sm:$0xff] %v864_v36  ;;  %v868_v38 = vld [vmem:[%s6752_s25 + $0x1660] sm:$0xff]  ;;  %v870_v39 = vld [vmem:[%s6752_s25 + $0x1668] sm:$0xff]  ;;  %867 = vst [vmem:[%s6757_s26 + $0xb28] sm:$0xff] %v866_v37 }
  0xc5   : > { %869 = vst [vmem:[%s6757_s26 + $0xb30] sm:$0xff] %v868_v38  ;;  %871 = vst [vmem:[%s6757_s26 + $0xb38] sm:$0xff] %v870_v39  ;;  %v872_v40 = vld [vmem:[%s6752_s25 + $0x1680] sm:$0xff]  ;;  %v874_v41 = vld [vmem:[%s6752_s25 + $0x1688] sm:$0xff] }
  0xc6   : > { %v876_v42 = vld [vmem:[%s6752_s25 + $0x16a0] sm:$0xff]  ;;  %873 = vst [vmem:[%s6757_s26 + $0xb40] sm:$0xff] %v872_v40  ;;  %875 = vst [vmem:[%s6757_s26 + $0xb48] sm:$0xff] %v874_v41  ;;  %v878_v43 = vld [vmem:[%s6752_s25 + $0x16a8] sm:$0xff] }
  0xc7   : > { %877 = vst [vmem:[%s6757_s26 + $0xb50] sm:$0xff] %v876_v42  ;;  %v880_v44 = vld [vmem:[%s6752_s25 + $0x16c0] sm:$0xff]  ;;  %v882_v45 = vld [vmem:[%s6752_s25 + $0x16c8] sm:$0xff]  ;;  %879 = vst [vmem:[%s6757_s26 + $0xb58] sm:$0xff] %v878_v43 }
  0xc8   : > { %881 = vst [vmem:[%s6757_s26 + $0xb60] sm:$0xff] %v880_v44  ;;  %883 = vst [vmem:[%s6757_s26 + $0xb68] sm:$0xff] %v882_v45  ;;  %v884_v46 = vld [vmem:[%s6752_s25 + $0x16e0] sm:$0xff]  ;;  %v886_v47 = vld [vmem:[%s6752_s25 + $0x16e8] sm:$0xff] }
  0xc9   : > { %v888_v48 = vld [vmem:[%s6752_s25 + $0x1700] sm:$0xff]  ;;  %885 = vst [vmem:[%s6757_s26 + $0xb70] sm:$0xff] %v884_v46  ;;  %887 = vst [vmem:[%s6757_s26 + $0xb78] sm:$0xff] %v886_v47  ;;  %v890_v49 = vld [vmem:[%s6752_s25 + $0x1708] sm:$0xff] }
  0xca   : > { %889 = vst [vmem:[%s6757_s26 + $0xb80] sm:$0xff] %v888_v48  ;;  %v892_v50 = vld [vmem:[%s6752_s25 + $0x1720] sm:$0xff]  ;;  %v894_v51 = vld [vmem:[%s6752_s25 + $0x1728] sm:$0xff]  ;;  %891 = vst [vmem:[%s6757_s26 + $0xb88] sm:$0xff] %v890_v49 }
  0xcb   : > { %893 = vst [vmem:[%s6757_s26 + $0xb90] sm:$0xff] %v892_v50  ;;  %895 = vst [vmem:[%s6757_s26 + $0xb98] sm:$0xff] %v894_v51  ;;  %v896_v52 = vld [vmem:[%s6752_s25 + $0x1740] sm:$0xff]  ;;  %v898_v53 = vld [vmem:[%s6752_s25 + $0x1748] sm:$0xff] }
  0xcc   : > { %v900_v54 = vld [vmem:[%s6752_s25 + $0x1760] sm:$0xff]  ;;  %897 = vst [vmem:[%s6757_s26 + $0xba0] sm:$0xff] %v896_v52  ;;  %899 = vst [vmem:[%s6757_s26 + $0xba8] sm:$0xff] %v898_v53  ;;  %v902_v55 = vld [vmem:[%s6752_s25 + $0x1768] sm:$0xff] }
  0xcd   : > { %901 = vst [vmem:[%s6757_s26 + $0xbb0] sm:$0xff] %v900_v54  ;;  %v904_v56 = vld [vmem:[%s6752_s25 + $0x1780] sm:$0xff]  ;;  %v906_v57 = vld [vmem:[%s6752_s25 + $0x1788] sm:$0xff]  ;;  %903 = vst [vmem:[%s6757_s26 + $0xbb8] sm:$0xff] %v902_v55 }
  0xce   : > { %905 = vst [vmem:[%s6757_s26 + $0xbc0] sm:$0xff] %v904_v56  ;;  %907 = vst [vmem:[%s6757_s26 + $0xbc8] sm:$0xff] %v906_v57  ;;  %v908_v58 = vld [vmem:[%s6752_s25 + $0x17a0] sm:$0xff]  ;;  %v910_v59 = vld [vmem:[%s6752_s25 + $0x17a8] sm:$0xff] }
  0xcf   : > { %v912_v60 = vld [vmem:[%s6752_s25 + $0x17c0] sm:$0xff]  ;;  %909 = vst [vmem:[%s6757_s26 + $0xbd0] sm:$0xff] %v908_v58  ;;  %911 = vst [vmem:[%s6757_s26 + $0xbd8] sm:$0xff] %v910_v59  ;;  %v914_v61 = vld [vmem:[%s6752_s25 + $0x17c8] sm:$0xff] }
  0xd0   : > { %913 = vst [vmem:[%s6757_s26 + $0xbe0] sm:$0xff] %v912_v60  ;;  %v916_v62 = vld [vmem:[%s6752_s25 + $0x17e0] sm:$0xff]  ;;  %v918_v63 = vld [vmem:[%s6752_s25 + $0x17e8] sm:$0xff]  ;;  %915 = vst [vmem:[%s6757_s26 + $0xbe8] sm:$0xff] %v914_v61 }
  0xd1   : > { %917 = vst [vmem:[%s6757_s26 + $0xbf0] sm:$0xff] %v916_v62  ;;  %919 = vst [vmem:[%s6757_s26 + $0xbf8] sm:$0xff] %v918_v63  ;;  %v920_v0 = vld [vmem:[%s6752_s25 + $0x1800] sm:$0xff]  ;;  %v922_v1 = vld [vmem:[%s6752_s25 + $0x1808] sm:$0xff] }
  0xd2   : > { %v924_v2 = vld [vmem:[%s6752_s25 + $0x1820] sm:$0xff]  ;;  %921 = vst [vmem:[%s6757_s26 + $0xc00] sm:$0xff] %v920_v0  ;;  %923 = vst [vmem:[%s6757_s26 + $0xc08] sm:$0xff] %v922_v1  ;;  %v926_v3 = vld [vmem:[%s6752_s25 + $0x1828] sm:$0xff] }
  0xd3   : > { %925 = vst [vmem:[%s6757_s26 + $0xc10] sm:$0xff] %v924_v2  ;;  %v928_v4 = vld [vmem:[%s6752_s25 + $0x1840] sm:$0xff]  ;;  %v930_v5 = vld [vmem:[%s6752_s25 + $0x1848] sm:$0xff]  ;;  %927 = vst [vmem:[%s6757_s26 + $0xc18] sm:$0xff] %v926_v3 }
  0xd4   : > { %929 = vst [vmem:[%s6757_s26 + $0xc20] sm:$0xff] %v928_v4  ;;  %931 = vst [vmem:[%s6757_s26 + $0xc28] sm:$0xff] %v930_v5  ;;  %v932_v6 = vld [vmem:[%s6752_s25 + $0x1860] sm:$0xff]  ;;  %v934_v7 = vld [vmem:[%s6752_s25 + $0x1868] sm:$0xff] }
  0xd5   : > { %v936_v8 = vld [vmem:[%s6752_s25 + $0x1880] sm:$0xff]  ;;  %933 = vst [vmem:[%s6757_s26 + $0xc30] sm:$0xff] %v932_v6  ;;  %935 = vst [vmem:[%s6757_s26 + $0xc38] sm:$0xff] %v934_v7  ;;  %v938_v9 = vld [vmem:[%s6752_s25 + $0x1888] sm:$0xff] }
  0xd6   : > { %937 = vst [vmem:[%s6757_s26 + $0xc40] sm:$0xff] %v936_v8  ;;  %v940_v10 = vld [vmem:[%s6752_s25 + $0x18a0] sm:$0xff]  ;;  %v942_v11 = vld [vmem:[%s6752_s25 + $0x18a8] sm:$0xff]  ;;  %939 = vst [vmem:[%s6757_s26 + $0xc48] sm:$0xff] %v938_v9 }
  0xd7   : > { %941 = vst [vmem:[%s6757_s26 + $0xc50] sm:$0xff] %v940_v10  ;;  %943 = vst [vmem:[%s6757_s26 + $0xc58] sm:$0xff] %v942_v11  ;;  %v944_v12 = vld [vmem:[%s6752_s25 + $0x18c0] sm:$0xff]  ;;  %v946_v13 = vld [vmem:[%s6752_s25 + $0x18c8] sm:$0xff] }
  0xd8   : > { %v948_v14 = vld [vmem:[%s6752_s25 + $0x18e0] sm:$0xff]  ;;  %945 = vst [vmem:[%s6757_s26 + $0xc60] sm:$0xff] %v944_v12  ;;  %947 = vst [vmem:[%s6757_s26 + $0xc68] sm:$0xff] %v946_v13  ;;  %v950_v15 = vld [vmem:[%s6752_s25 + $0x18e8] sm:$0xff] }
  0xd9   : > { %949 = vst [vmem:[%s6757_s26 + $0xc70] sm:$0xff] %v948_v14  ;;  %v952_v16 = vld [vmem:[%s6752_s25 + $0x1900] sm:$0xff]  ;;  %v954_v17 = vld [vmem:[%s6752_s25 + $0x1908] sm:$0xff]  ;;  %951 = vst [vmem:[%s6757_s26 + $0xc78] sm:$0xff] %v950_v15 }
  0xda   : > { %953 = vst [vmem:[%s6757_s26 + $0xc80] sm:$0xff] %v952_v16  ;;  %955 = vst [vmem:[%s6757_s26 + $0xc88] sm:$0xff] %v954_v17  ;;  %v956_v18 = vld [vmem:[%s6752_s25 + $0x1920] sm:$0xff]  ;;  %v958_v19 = vld [vmem:[%s6752_s25 + $0x1928] sm:$0xff] }
  0xdb   : > { %v960_v20 = vld [vmem:[%s6752_s25 + $0x1940] sm:$0xff]  ;;  %957 = vst [vmem:[%s6757_s26 + $0xc90] sm:$0xff] %v956_v18  ;;  %959 = vst [vmem:[%s6757_s26 + $0xc98] sm:$0xff] %v958_v19  ;;  %v962_v21 = vld [vmem:[%s6752_s25 + $0x1948] sm:$0xff] }
  0xdc   : > { %961 = vst [vmem:[%s6757_s26 + $0xca0] sm:$0xff] %v960_v20  ;;  %v964_v22 = vld [vmem:[%s6752_s25 + $0x1960] sm:$0xff]  ;;  %v966_v23 = vld [vmem:[%s6752_s25 + $0x1968] sm:$0xff]  ;;  %963 = vst [vmem:[%s6757_s26 + $0xca8] sm:$0xff] %v962_v21 }
  0xdd   : > { %965 = vst [vmem:[%s6757_s26 + $0xcb0] sm:$0xff] %v964_v22  ;;  %967 = vst [vmem:[%s6757_s26 + $0xcb8] sm:$0xff] %v966_v23  ;;  %v968_v24 = vld [vmem:[%s6752_s25 + $0x1980] sm:$0xff]  ;;  %v970_v25 = vld [vmem:[%s6752_s25 + $0x1988] sm:$0xff] }
  0xde   : > { %v972_v26 = vld [vmem:[%s6752_s25 + $0x19a0] sm:$0xff]  ;;  %969 = vst [vmem:[%s6757_s26 + $0xcc0] sm:$0xff] %v968_v24  ;;  %971 = vst [vmem:[%s6757_s26 + $0xcc8] sm:$0xff] %v970_v25  ;;  %v974_v27 = vld [vmem:[%s6752_s25 + $0x19a8] sm:$0xff] }
  0xdf   : > { %973 = vst [vmem:[%s6757_s26 + $0xcd0] sm:$0xff] %v972_v26  ;;  %v976_v28 = vld [vmem:[%s6752_s25 + $0x19c0] sm:$0xff]  ;;  %v978_v29 = vld [vmem:[%s6752_s25 + $0x19c8] sm:$0xff]  ;;  %975 = vst [vmem:[%s6757_s26 + $0xcd8] sm:$0xff] %v974_v27 }
  0xe0   : > { %977 = vst [vmem:[%s6757_s26 + $0xce0] sm:$0xff] %v976_v28  ;;  %979 = vst [vmem:[%s6757_s26 + $0xce8] sm:$0xff] %v978_v29  ;;  %v980_v30 = vld [vmem:[%s6752_s25 + $0x19e0] sm:$0xff]  ;;  %v982_v31 = vld [vmem:[%s6752_s25 + $0x19e8] sm:$0xff] }
  0xe1   : > { %v984_v32 = vld [vmem:[%s6752_s25 + $0x1a00] sm:$0xff]  ;;  %981 = vst [vmem:[%s6757_s26 + $0xcf0] sm:$0xff] %v980_v30  ;;  %983 = vst [vmem:[%s6757_s26 + $0xcf8] sm:$0xff] %v982_v31  ;;  %v986_v33 = vld [vmem:[%s6752_s25 + $0x1a08] sm:$0xff] }
  0xe2   : > { %985 = vst [vmem:[%s6757_s26 + $0xd00] sm:$0xff] %v984_v32  ;;  %v988_v34 = vld [vmem:[%s6752_s25 + $0x1a20] sm:$0xff]  ;;  %v990_v35 = vld [vmem:[%s6752_s25 + $0x1a28] sm:$0xff]  ;;  %987 = vst [vmem:[%s6757_s26 + $0xd08] sm:$0xff] %v986_v33 }
  0xe3   : > { %989 = vst [vmem:[%s6757_s26 + $0xd10] sm:$0xff] %v988_v34  ;;  %991 = vst [vmem:[%s6757_s26 + $0xd18] sm:$0xff] %v990_v35  ;;  %v992_v36 = vld [vmem:[%s6752_s25 + $0x1a40] sm:$0xff]  ;;  %v994_v37 = vld [vmem:[%s6752_s25 + $0x1a48] sm:$0xff] }
  0xe4   : > { %v996_v38 = vld [vmem:[%s6752_s25 + $0x1a60] sm:$0xff]  ;;  %993 = vst [vmem:[%s6757_s26 + $0xd20] sm:$0xff] %v992_v36  ;;  %995 = vst [vmem:[%s6757_s26 + $0xd28] sm:$0xff] %v994_v37  ;;  %v998_v39 = vld [vmem:[%s6752_s25 + $0x1a68] sm:$0xff] }
  0xe5   : > { %997 = vst [vmem:[%s6757_s26 + $0xd30] sm:$0xff] %v996_v38  ;;  %v1000_v40 = vld [vmem:[%s6752_s25 + $0x1a80] sm:$0xff]  ;;  %v1002_v41 = vld [vmem:[%s6752_s25 + $0x1a88] sm:$0xff]  ;;  %999 = vst [vmem:[%s6757_s26 + $0xd38] sm:$0xff] %v998_v39 }
  0xe6   : > { %1001 = vst [vmem:[%s6757_s26 + $0xd40] sm:$0xff] %v1000_v40  ;;  %1003 = vst [vmem:[%s6757_s26 + $0xd48] sm:$0xff] %v1002_v41  ;;  %v1004_v42 = vld [vmem:[%s6752_s25 + $0x1aa0] sm:$0xff]  ;;  %v1006_v43 = vld [vmem:[%s6752_s25 + $0x1aa8] sm:$0xff] }
  0xe7   : > { %v1008_v44 = vld [vmem:[%s6752_s25 + $0x1ac0] sm:$0xff]  ;;  %1005 = vst [vmem:[%s6757_s26 + $0xd50] sm:$0xff] %v1004_v42  ;;  %1007 = vst [vmem:[%s6757_s26 + $0xd58] sm:$0xff] %v1006_v43  ;;  %v1010_v45 = vld [vmem:[%s6752_s25 + $0x1ac8] sm:$0xff] }
  0xe8   : > { %1009 = vst [vmem:[%s6757_s26 + $0xd60] sm:$0xff] %v1008_v44  ;;  %v1012_v46 = vld [vmem:[%s6752_s25 + $0x1ae0] sm:$0xff]  ;;  %v1014_v47 = vld [vmem:[%s6752_s25 + $0x1ae8] sm:$0xff]  ;;  %1011 = vst [vmem:[%s6757_s26 + $0xd68] sm:$0xff] %v1010_v45 }
  0xe9   : > { %1013 = vst [vmem:[%s6757_s26 + $0xd70] sm:$0xff] %v1012_v46  ;;  %1015 = vst [vmem:[%s6757_s26 + $0xd78] sm:$0xff] %v1014_v47  ;;  %v1016_v48 = vld [vmem:[%s6752_s25 + $0x1b00] sm:$0xff]  ;;  %v1018_v49 = vld [vmem:[%s6752_s25 + $0x1b08] sm:$0xff] }
  0xea   : > { %v1020_v50 = vld [vmem:[%s6752_s25 + $0x1b20] sm:$0xff]  ;;  %1017 = vst [vmem:[%s6757_s26 + $0xd80] sm:$0xff] %v1016_v48  ;;  %1019 = vst [vmem:[%s6757_s26 + $0xd88] sm:$0xff] %v1018_v49  ;;  %v1022_v51 = vld [vmem:[%s6752_s25 + $0x1b28] sm:$0xff] }
  0xeb   : > { %1021 = vst [vmem:[%s6757_s26 + $0xd90] sm:$0xff] %v1020_v50  ;;  %v1024_v52 = vld [vmem:[%s6752_s25 + $0x1b40] sm:$0xff]  ;;  %v1026_v53 = vld [vmem:[%s6752_s25 + $0x1b48] sm:$0xff]  ;;  %1023 = vst [vmem:[%s6757_s26 + $0xd98] sm:$0xff] %v1022_v51 }
  0xec   : > { %1025 = vst [vmem:[%s6757_s26 + $0xda0] sm:$0xff] %v1024_v52  ;;  %1027 = vst [vmem:[%s6757_s26 + $0xda8] sm:$0xff] %v1026_v53  ;;  %v1028_v54 = vld [vmem:[%s6752_s25 + $0x1b60] sm:$0xff]  ;;  %v1030_v55 = vld [vmem:[%s6752_s25 + $0x1b68] sm:$0xff] }
  0xed   : > { %v1032_v56 = vld [vmem:[%s6752_s25 + $0x1b80] sm:$0xff]  ;;  %1029 = vst [vmem:[%s6757_s26 + $0xdb0] sm:$0xff] %v1028_v54  ;;  %1031 = vst [vmem:[%s6757_s26 + $0xdb8] sm:$0xff] %v1030_v55  ;;  %v1034_v57 = vld [vmem:[%s6752_s25 + $0x1b88] sm:$0xff] }
  0xee   : > { %1033 = vst [vmem:[%s6757_s26 + $0xdc0] sm:$0xff] %v1032_v56  ;;  %v1036_v58 = vld [vmem:[%s6752_s25 + $0x1ba0] sm:$0xff]  ;;  %v1038_v59 = vld [vmem:[%s6752_s25 + $0x1ba8] sm:$0xff]  ;;  %1035 = vst [vmem:[%s6757_s26 + $0xdc8] sm:$0xff] %v1034_v57 }
  0xef   : > { %1037 = vst [vmem:[%s6757_s26 + $0xdd0] sm:$0xff] %v1036_v58  ;;  %1039 = vst [vmem:[%s6757_s26 + $0xdd8] sm:$0xff] %v1038_v59  ;;  %v1040_v60 = vld [vmem:[%s6752_s25 + $0x1bc0] sm:$0xff]  ;;  %v1042_v61 = vld [vmem:[%s6752_s25 + $0x1bc8] sm:$0xff] }
  0xf0   : > { %v1044_v62 = vld [vmem:[%s6752_s25 + $0x1be0] sm:$0xff]  ;;  %1041 = vst [vmem:[%s6757_s26 + $0xde0] sm:$0xff] %v1040_v60  ;;  %1043 = vst [vmem:[%s6757_s26 + $0xde8] sm:$0xff] %v1042_v61  ;;  %v1046_v63 = vld [vmem:[%s6752_s25 + $0x1be8] sm:$0xff] }
  0xf1   : > { %1045 = vst [vmem:[%s6757_s26 + $0xdf0] sm:$0xff] %v1044_v62  ;;  %v1048_v0 = vld [vmem:[%s6752_s25 + $0x1c00] sm:$0xff]  ;;  %v1050_v1 = vld [vmem:[%s6752_s25 + $0x1c08] sm:$0xff]  ;;  %1047 = vst [vmem:[%s6757_s26 + $0xdf8] sm:$0xff] %v1046_v63 }
  0xf2   : > { %1049 = vst [vmem:[%s6757_s26 + $0xe00] sm:$0xff] %v1048_v0  ;;  %1051 = vst [vmem:[%s6757_s26 + $0xe08] sm:$0xff] %v1050_v1  ;;  %v1052_v2 = vld [vmem:[%s6752_s25 + $0x1c20] sm:$0xff]  ;;  %v1054_v3 = vld [vmem:[%s6752_s25 + $0x1c28] sm:$0xff] }
  0xf3   : > { %v1056_v4 = vld [vmem:[%s6752_s25 + $0x1c40] sm:$0xff]  ;;  %1053 = vst [vmem:[%s6757_s26 + $0xe10] sm:$0xff] %v1052_v2  ;;  %1055 = vst [vmem:[%s6757_s26 + $0xe18] sm:$0xff] %v1054_v3  ;;  %v1058_v5 = vld [vmem:[%s6752_s25 + $0x1c48] sm:$0xff] }
  0xf4   : > { %1057 = vst [vmem:[%s6757_s26 + $0xe20] sm:$0xff] %v1056_v4  ;;  %v1060_v6 = vld [vmem:[%s6752_s25 + $0x1c60] sm:$0xff]  ;;  %v1062_v7 = vld [vmem:[%s6752_s25 + $0x1c68] sm:$0xff]  ;;  %1059 = vst [vmem:[%s6757_s26 + $0xe28] sm:$0xff] %v1058_v5 }
  0xf5   : > { %1061 = vst [vmem:[%s6757_s26 + $0xe30] sm:$0xff] %v1060_v6  ;;  %1063 = vst [vmem:[%s6757_s26 + $0xe38] sm:$0xff] %v1062_v7  ;;  %v1064_v8 = vld [vmem:[%s6752_s25 + $0x1c80] sm:$0xff]  ;;  %v1066_v9 = vld [vmem:[%s6752_s25 + $0x1c88] sm:$0xff] }
  0xf6   : > { %v1068_v10 = vld [vmem:[%s6752_s25 + $0x1ca0] sm:$0xff]  ;;  %1065 = vst [vmem:[%s6757_s26 + $0xe40] sm:$0xff] %v1064_v8  ;;  %1067 = vst [vmem:[%s6757_s26 + $0xe48] sm:$0xff] %v1066_v9  ;;  %v1070_v11 = vld [vmem:[%s6752_s25 + $0x1ca8] sm:$0xff] }
  0xf7   : > { %1069 = vst [vmem:[%s6757_s26 + $0xe50] sm:$0xff] %v1068_v10  ;;  %v1072_v12 = vld [vmem:[%s6752_s25 + $0x1cc0] sm:$0xff]  ;;  %v1074_v13 = vld [vmem:[%s6752_s25 + $0x1cc8] sm:$0xff]  ;;  %1071 = vst [vmem:[%s6757_s26 + $0xe58] sm:$0xff] %v1070_v11 }
  0xf8   : > { %1073 = vst [vmem:[%s6757_s26 + $0xe60] sm:$0xff] %v1072_v12  ;;  %1075 = vst [vmem:[%s6757_s26 + $0xe68] sm:$0xff] %v1074_v13  ;;  %v1076_v14 = vld [vmem:[%s6752_s25 + $0x1ce0] sm:$0xff]  ;;  %v1078_v15 = vld [vmem:[%s6752_s25 + $0x1ce8] sm:$0xff] }
  0xf9   : > { %v1080_v16 = vld [vmem:[%s6752_s25 + $0x1d00] sm:$0xff]  ;;  %1077 = vst [vmem:[%s6757_s26 + $0xe70] sm:$0xff] %v1076_v14  ;;  %1079 = vst [vmem:[%s6757_s26 + $0xe78] sm:$0xff] %v1078_v15  ;;  %v1082_v17 = vld [vmem:[%s6752_s25 + $0x1d08] sm:$0xff] }
  0xfa   : > { %1081 = vst [vmem:[%s6757_s26 + $0xe80] sm:$0xff] %v1080_v16  ;;  %v1084_v18 = vld [vmem:[%s6752_s25 + $0x1d20] sm:$0xff]  ;;  %v1086_v19 = vld [vmem:[%s6752_s25 + $0x1d28] sm:$0xff]  ;;  %1083 = vst [vmem:[%s6757_s26 + $0xe88] sm:$0xff] %v1082_v17 }
  0xfb   : > { %1085 = vst [vmem:[%s6757_s26 + $0xe90] sm:$0xff] %v1084_v18  ;;  %1087 = vst [vmem:[%s6757_s26 + $0xe98] sm:$0xff] %v1086_v19  ;;  %v1088_v20 = vld [vmem:[%s6752_s25 + $0x1d40] sm:$0xff]  ;;  %v1090_v21 = vld [vmem:[%s6752_s25 + $0x1d48] sm:$0xff] }
  0xfc   : > { %v1092_v22 = vld [vmem:[%s6752_s25 + $0x1d60] sm:$0xff]  ;;  %1089 = vst [vmem:[%s6757_s26 + $0xea0] sm:$0xff] %v1088_v20  ;;  %1091 = vst [vmem:[%s6757_s26 + $0xea8] sm:$0xff] %v1090_v21  ;;  %v1094_v23 = vld [vmem:[%s6752_s25 + $0x1d68] sm:$0xff] }
  0xfd   : > { %1093 = vst [vmem:[%s6757_s26 + $0xeb0] sm:$0xff] %v1092_v22  ;;  %v1096_v24 = vld [vmem:[%s6752_s25 + $0x1d80] sm:$0xff]  ;;  %v1098_v25 = vld [vmem:[%s6752_s25 + $0x1d88] sm:$0xff]  ;;  %1095 = vst [vmem:[%s6757_s26 + $0xeb8] sm:$0xff] %v1094_v23 }
  0xfe   : > { %1097 = vst [vmem:[%s6757_s26 + $0xec0] sm:$0xff] %v1096_v24  ;;  %1099 = vst [vmem:[%s6757_s26 + $0xec8] sm:$0xff] %v1098_v25  ;;  %v1100_v26 = vld [vmem:[%s6752_s25 + $0x1da0] sm:$0xff]  ;;  %v1102_v27 = vld [vmem:[%s6752_s25 + $0x1da8] sm:$0xff] }
  0xff   : > { %v1104_v28 = vld [vmem:[%s6752_s25 + $0x1dc0] sm:$0xff]  ;;  %1101 = vst [vmem:[%s6757_s26 + $0xed0] sm:$0xff] %v1100_v26  ;;  %1103 = vst [vmem:[%s6757_s26 + $0xed8] sm:$0xff] %v1102_v27  ;;  %v1106_v29 = vld [vmem:[%s6752_s25 + $0x1dc8] sm:$0xff] }
 0x100   : > { %1105 = vst [vmem:[%s6757_s26 + $0xee0] sm:$0xff] %v1104_v28  ;;  %v1108_v30 = vld [vmem:[%s6752_s25 + $0x1de0] sm:$0xff]  ;;  %v1110_v31 = vld [vmem:[%s6752_s25 + $0x1de8] sm:$0xff]  ;;  %1107 = vst [vmem:[%s6757_s26 + $0xee8] sm:$0xff] %v1106_v29 }
 0x101   : > { %1109 = vst [vmem:[%s6757_s26 + $0xef0] sm:$0xff] %v1108_v30  ;;  %1111 = vst [vmem:[%s6757_s26 + $0xef8] sm:$0xff] %v1110_v31  ;;  %v1112_v32 = vld [vmem:[%s6752_s25 + $0x1e00] sm:$0xff]  ;;  %v1114_v33 = vld [vmem:[%s6752_s25 + $0x1e08] sm:$0xff] }
 0x102   : > { %v1116_v34 = vld [vmem:[%s6752_s25 + $0x1e20] sm:$0xff]  ;;  %1113 = vst [vmem:[%s6757_s26 + $0xf00] sm:$0xff] %v1112_v32  ;;  %1115 = vst [vmem:[%s6757_s26 + $0xf08] sm:$0xff] %v1114_v33  ;;  %v1118_v35 = vld [vmem:[%s6752_s25 + $0x1e28] sm:$0xff] }
 0x103   : > { %1117 = vst [vmem:[%s6757_s26 + $0xf10] sm:$0xff] %v1116_v34  ;;  %v1120_v36 = vld [vmem:[%s6752_s25 + $0x1e40] sm:$0xff]  ;;  %v1122_v37 = vld [vmem:[%s6752_s25 + $0x1e48] sm:$0xff]  ;;  %1119 = vst [vmem:[%s6757_s26 + $0xf18] sm:$0xff] %v1118_v35 }
 0x104   : > { %1121 = vst [vmem:[%s6757_s26 + $0xf20] sm:$0xff] %v1120_v36  ;;  %1123 = vst [vmem:[%s6757_s26 + $0xf28] sm:$0xff] %v1122_v37  ;;  %v1124_v38 = vld [vmem:[%s6752_s25 + $0x1e60] sm:$0xff]  ;;  %v1126_v39 = vld [vmem:[%s6752_s25 + $0x1e68] sm:$0xff] }
 0x105   : > { %v1128_v40 = vld [vmem:[%s6752_s25 + $0x1e80] sm:$0xff]  ;;  %1125 = vst [vmem:[%s6757_s26 + $0xf30] sm:$0xff] %v1124_v38  ;;  %1127 = vst [vmem:[%s6757_s26 + $0xf38] sm:$0xff] %v1126_v39  ;;  %v1130_v41 = vld [vmem:[%s6752_s25 + $0x1e88] sm:$0xff] }
 0x106   : > { %1129 = vst [vmem:[%s6757_s26 + $0xf40] sm:$0xff] %v1128_v40  ;;  %v1132_v42 = vld [vmem:[%s6752_s25 + $0x1ea0] sm:$0xff]  ;;  %v1134_v43 = vld [vmem:[%s6752_s25 + $0x1ea8] sm:$0xff]  ;;  %1131 = vst [vmem:[%s6757_s26 + $0xf48] sm:$0xff] %v1130_v41 }
 0x107   : > { %1133 = vst [vmem:[%s6757_s26 + $0xf50] sm:$0xff] %v1132_v42  ;;  %1135 = vst [vmem:[%s6757_s26 + $0xf58] sm:$0xff] %v1134_v43  ;;  %v1136_v44 = vld [vmem:[%s6752_s25 + $0x1ec0] sm:$0xff]  ;;  %v1138_v45 = vld [vmem:[%s6752_s25 + $0x1ec8] sm:$0xff] }
 0x108   : > { %v1140_v46 = vld [vmem:[%s6752_s25 + $0x1ee0] sm:$0xff]  ;;  %1137 = vst [vmem:[%s6757_s26 + $0xf60] sm:$0xff] %v1136_v44  ;;  %1139 = vst [vmem:[%s6757_s26 + $0xf68] sm:$0xff] %v1138_v45  ;;  %v1142_v47 = vld [vmem:[%s6752_s25 + $0x1ee8] sm:$0xff] }
 0x109   : > { %1141 = vst [vmem:[%s6757_s26 + $0xf70] sm:$0xff] %v1140_v46  ;;  %v1144_v48 = vld [vmem:[%s6752_s25 + $0x1f00] sm:$0xff]  ;;  %v1146_v49 = vld [vmem:[%s6752_s25 + $0x1f08] sm:$0xff]  ;;  %1143 = vst [vmem:[%s6757_s26 + $0xf78] sm:$0xff] %v1142_v47 }
 0x10a   : > { %1145 = vst [vmem:[%s6757_s26 + $0xf80] sm:$0xff] %v1144_v48  ;;  %1147 = vst [vmem:[%s6757_s26 + $0xf88] sm:$0xff] %v1146_v49  ;;  %v1148_v50 = vld [vmem:[%s6752_s25 + $0x1f20] sm:$0xff]  ;;  %v1150_v51 = vld [vmem:[%s6752_s25 + $0x1f28] sm:$0xff] }
 0x10b   : > { %v1152_v52 = vld [vmem:[%s6752_s25 + $0x1f40] sm:$0xff]  ;;  %1149 = vst [vmem:[%s6757_s26 + $0xf90] sm:$0xff] %v1148_v50  ;;  %1151 = vst [vmem:[%s6757_s26 + $0xf98] sm:$0xff] %v1150_v51  ;;  %v1154_v53 = vld [vmem:[%s6752_s25 + $0x1f48] sm:$0xff] }
 0x10c   : > { %1153 = vst [vmem:[%s6757_s26 + $0xfa0] sm:$0xff] %v1152_v52  ;;  %v1156_v54 = vld [vmem:[%s6752_s25 + $0x1f60] sm:$0xff]  ;;  %v1158_v55 = vld [vmem:[%s6752_s25 + $0x1f68] sm:$0xff]  ;;  %1155 = vst [vmem:[%s6757_s26 + $0xfa8] sm:$0xff] %v1154_v53 }
 0x10d   : > { %1157 = vst [vmem:[%s6757_s26 + $0xfb0] sm:$0xff] %v1156_v54  ;;  %1159 = vst [vmem:[%s6757_s26 + $0xfb8] sm:$0xff] %v1158_v55  ;;  %v1160_v56 = vld [vmem:[%s6752_s25 + $0x1f80] sm:$0xff]  ;;  %v1162_v57 = vld [vmem:[%s6752_s25 + $0x1f88] sm:$0xff] }
 0x10e   : > { %v1164_v58 = vld [vmem:[%s6752_s25 + $0x1fa0] sm:$0xff]  ;;  %1161 = vst [vmem:[%s6757_s26 + $0xfc0] sm:$0xff] %v1160_v56  ;;  %1163 = vst [vmem:[%s6757_s26 + $0xfc8] sm:$0xff] %v1162_v57  ;;  %v1166_v59 = vld [vmem:[%s6752_s25 + $0x1fa8] sm:$0xff] }
 0x10f   : > { %1165 = vst [vmem:[%s6757_s26 + $0xfd0] sm:$0xff] %v1164_v58  ;;  %v1168_v60 = vld [vmem:[%s6752_s25 + $0x1fc0] sm:$0xff]  ;;  %v1170_v61 = vld [vmem:[%s6752_s25 + $0x1fc8] sm:$0xff]  ;;  %1167 = vst [vmem:[%s6757_s26 + $0xfd8] sm:$0xff] %v1166_v59 }
 0x110   : > { %1169 = vst [vmem:[%s6757_s26 + $0xfe0] sm:$0xff] %v1168_v60  ;;  %1171 = vst [vmem:[%s6757_s26 + $0xfe8] sm:$0xff] %v1170_v61  ;;  %v1172_v62 = vld [vmem:[%s6752_s25 + $0x1fe0] sm:$0xff]  ;;  %v1174_v63 = vld [vmem:[%s6752_s25 + $0x1fe8] sm:$0xff] }
 0x111   : > { %1173 = vst [vmem:[%s6757_s26 + $0xff0] sm:$0xff] %v1172_v62  ;;  %1175 = vst [vmem:[%s6757_s26 + $0xff8] sm:$0xff] %v1174_v63 }
 0x112 PF: > { %p5248_p5 = scmp.ge.s32.totalorder %s6695_s14, 1  ;;  %p1188_p6 = scmp.lt.s32.totalorder %s6695_s14, 3 }
 0x114   : > { %p1189_p7 = pnand %p5248_p5, %p1188_p6 }
 0x115   : > { %s1195_s27 = sand.u32 (!%p1189_p7), 1, %s6687_s12   ;;  %v7786_v0 = vld [vmem:[%s8423_s0] sm:$0xff] (!%p1189_p7)  ;;  %s5250_s24 = sshll.u32 (!%p1189_p7), %s5241_s15, 2 }
 0x116   : > { %1192 = sbr.rel (%p1189_p7) target bundleno = 1060 (0x424), region = 51  ;;  %s5249_s30 = sshll.u32 (!%p1189_p7), %s1195_s27, 12  ;;  %v5254_v1 = vcombine.high (!%p1189_p7), %v7786_v0, %v7786_v0 }
 0x117   : > { %s7790_s4 = scalar_lea.vmem (!%p1189_p7), [#allocation2], %s5249_s30  ;;  %p1224_p8 = scmp.lt.s32.totalorder (!%p1189_p7), %s5250_s24, 7 }
 0x118   : > { %v5873_v2 = vld [vmem:[%s7790_s4 + $0x4] ss:$16 sps:$4 sm:$0xff] (!%p1189_p7)   ;;  %4424 = vmatprep.mubr.bf16.mxu0 (!%p1189_p7), %v5254_v1  ;;  %4752 = vmatprep.mubr.bf16.mxu1 (!%p1189_p7), %v5254_v1  ;;  %v5875_v3 = vld [vmem:[%s7790_s4 + $0xc] ss:$16 sps:$4 sm:$0xff] (!%p1189_p7)   ;;  %v5877_v4 = vld [vmem:[%s7790_s4] ss:$16 sps:$4 sm:$0xff] (!%p1189_p7)  }
 0x119   : > { %4392 = vmatprep.subr.bf16.mxu0 (!%p1189_p7), %v5873_v2  ;;  %v5878_v5 = vld [vmem:[%s7790_s4 + $0x8] ss:$16 sps:$4 sm:$0xff] (!%p1189_p7)   ;;  %4720 = vmatprep.subr.bf16.mxu1 (!%p1189_p7), %v5875_v3  ;;  %v5879_v6 = vld [vmem:[%s7790_s4 + $0x24] ss:$16 sps:$4 sm:$0xff] (!%p1189_p7)   ;;  %v5881_v7 = vld [vmem:[%s7790_s4 + $0x2c] ss:$16 sps:$4 sm:$0xff] (!%p1189_p7)  }
 0x11a   : > { %4393 = vmatpush1.bf16.msra.mxu0 (!%p1189_p7), %v5877_v4  ;;  %4721 = vmatpush1.bf16.msra.mxu1 (!%p1189_p7), %v5878_v5  ;;  %v5883_v8 = vld [vmem:[%s7790_s4 + $0x20] ss:$16 sps:$4 sm:$0xff] (!%p1189_p7)   ;;  %v5884_v9 = vld [vmem:[%s7790_s4 + $0x28] ss:$16 sps:$4 sm:$0xff] (!%p1189_p7)   ;;  %v5885_v10 = vld [vmem:[%s7790_s4 + $0x44] ss:$16 sps:$4 sm:$0xff] (!%p1189_p7)   ;;  %v5253_v5 = vcombine.low (!%p1189_p7), %v7786_v0, %v7786_v0 }
 0x11b   : > { %4394 = vmatprep.subr.bf16.mxu0 (!%p1189_p7), %v5879_v6  ;;  %4722 = vmatprep.subr.bf16.mxu1 (!%p1189_p7), %v5881_v7  ;;  %v5887_v11 = vld [vmem:[%s7790_s4 + $0x4c] ss:$16 sps:$4 sm:$0xff] (!%p1189_p7)   ;;  %v5889_v12 = vld [vmem:[%s7790_s4 + $0x40] ss:$16 sps:$4 sm:$0xff] (!%p1189_p7)   ;;  %v5890_v13 = vld [vmem:[%s7790_s4 + $0x48] ss:$16 sps:$4 sm:$0xff] (!%p1189_p7)  }
 0x11c   : > { %v5891_v14 = vld [vmem:[%s7790_s4 + $0x64] ss:$16 sps:$4 sm:$0xff] (!%p1189_p7)   ;;  %v5893_v15 = vld [vmem:[%s7790_s4 + $0x6c] ss:$16 sps:$4 sm:$0xff] (!%p1189_p7)   ;;  %v5895_v16 = vld [vmem:[%s7790_s4 + $0x60] ss:$16 sps:$4 sm:$0xff] (!%p1189_p7)  }
 0x11d   : > { %v5896_v17 = vld [vmem:[%s7790_s4 + $0x68] ss:$16 sps:$4 sm:$0xff]   ;;  %v5897_v18 = vld [vmem:[%s7790_s4 + $0x84] ss:$16 sps:$4 sm:$0xff]   ;;  %v5899_v19 = vld [vmem:[%s7790_s4 + $0x8c] ss:$16 sps:$4 sm:$0xff]  }
 0x11e   : > { %4395 = vmatpush1.bf16.msra.mxu0 %v5883_v8  ;;  %4723 = vmatpush1.bf16.msra.mxu1 %v5884_v9  ;;  %v5901_v20 = vld [vmem:[%s7790_s4 + $0x80] ss:$16 sps:$4 sm:$0xff]   ;;  %v5902_v21 = vld [vmem:[%s7790_s4 + $0x88] ss:$16 sps:$4 sm:$0xff]   ;;  %v5903_v22 = vld [vmem:[%s7790_s4 + $0xa4] ss:$16 sps:$4 sm:$0xff]  }
 0x11f   : > { %4396 = vmatprep.subr.bf16.mxu0 %v5885_v10  ;;  %4724 = vmatprep.subr.bf16.mxu1 %v5887_v11  ;;  %v5905_v23 = vld [vmem:[%s7790_s4 + $0xac] ss:$16 sps:$4 sm:$0xff]   ;;  %v5907_v24 = vld [vmem:[%s7790_s4 + $0xa0] ss:$16 sps:$4 sm:$0xff]   ;;  %v5908_v25 = vld [vmem:[%s7790_s4 + $0xa8] ss:$16 sps:$4 sm:$0xff]  }
 0x120   : > { %v5909_v26 = vld [vmem:[%s7790_s4 + $0xc4] ss:$16 sps:$4 sm:$0xff]   ;;  %v5911_v27 = vld [vmem:[%s7790_s4 + $0xcc] ss:$16 sps:$4 sm:$0xff]   ;;  %v5913_v28 = vld [vmem:[%s7790_s4 + $0xc0] ss:$16 sps:$4 sm:$0xff]  }
 0x121   : > { %v5914_v29 = vld [vmem:[%s7790_s4 + $0xc8] ss:$16 sps:$4 sm:$0xff]   ;;  %v5915_v30 = vld [vmem:[%s7790_s4 + $0xe4] ss:$16 sps:$4 sm:$0xff]   ;;  %v5917_v31 = vld [vmem:[%s7790_s4 + $0xec] ss:$16 sps:$4 sm:$0xff]  }
 0x122   : > { %4397 = vmatpush1.bf16.msra.mxu0 %v5889_v12  ;;  %4725 = vmatpush1.bf16.msra.mxu1 %v5890_v13  ;;  %v5919_v32 = vld [vmem:[%s7790_s4 + $0xe0] ss:$16 sps:$4 sm:$0xff]   ;;  %v5920_v33 = vld [vmem:[%s7790_s4 + $0xe8] ss:$16 sps:$4 sm:$0xff]   ;;  %v5921_v34 = vld [vmem:[%s7790_s4 + $0x104] ss:$16 sps:$4 sm:$0xff]  }
 0x123   : > { %4398 = vmatprep.subr.bf16.mxu0 %v5891_v14  ;;  %4726 = vmatprep.subr.bf16.mxu1 %v5893_v15  ;;  %v5923_v35 = vld [vmem:[%s7790_s4 + $0x10c] ss:$16 sps:$4 sm:$0xff]   ;;  %v5925_v36 = vld [vmem:[%s7790_s4 + $0x100] ss:$16 sps:$4 sm:$0xff]   ;;  %v5926_v37 = vld [vmem:[%s7790_s4 + $0x108] ss:$16 sps:$4 sm:$0xff]  }
 0x124   : > { %v5927_v38 = vld [vmem:[%s7790_s4 + $0x124] ss:$16 sps:$4 sm:$0xff]   ;;  %v5929_v39 = vld [vmem:[%s7790_s4 + $0x12c] ss:$16 sps:$4 sm:$0xff]   ;;  %v5931_v40 = vld [vmem:[%s7790_s4 + $0x120] ss:$16 sps:$4 sm:$0xff]  }
 0x125   : > { %v5932_v41 = vld [vmem:[%s7790_s4 + $0x128] ss:$16 sps:$4 sm:$0xff]   ;;  %v5933_v42 = vld [vmem:[%s7790_s4 + $0x144] ss:$16 sps:$4 sm:$0xff]   ;;  %v5935_v43 = vld [vmem:[%s7790_s4 + $0x14c] ss:$16 sps:$4 sm:$0xff]  }
 0x126   : > { %4399 = vmatpush1.bf16.msra.mxu0 %v5895_v16  ;;  %4727 = vmatpush1.bf16.msra.mxu1 %v5896_v17  ;;  %v5937_v44 = vld [vmem:[%s7790_s4 + $0x140] ss:$16 sps:$4 sm:$0xff]   ;;  %v5938_v45 = vld [vmem:[%s7790_s4 + $0x148] ss:$16 sps:$4 sm:$0xff]   ;;  %v5939_v46 = vld [vmem:[%s7790_s4 + $0x164] ss:$16 sps:$4 sm:$0xff]  }
 0x127   : > { %4400 = vmatprep.subr.bf16.mxu0 %v5897_v18  ;;  %4728 = vmatprep.subr.bf16.mxu1 %v5899_v19  ;;  %v5941_v47 = vld [vmem:[%s7790_s4 + $0x16c] ss:$16 sps:$4 sm:$0xff]   ;;  %v5943_v48 = vld [vmem:[%s7790_s4 + $0x160] ss:$16 sps:$4 sm:$0xff]   ;;  %v5944_v49 = vld [vmem:[%s7790_s4 + $0x168] ss:$16 sps:$4 sm:$0xff]  }
 0x128   : > { %v5945_v50 = vld [vmem:[%s7790_s4 + $0x184] ss:$16 sps:$4 sm:$0xff]   ;;  %v5947_v51 = vld [vmem:[%s7790_s4 + $0x18c] ss:$16 sps:$4 sm:$0xff]   ;;  %v5949_v52 = vld [vmem:[%s7790_s4 + $0x180] ss:$16 sps:$4 sm:$0xff]  }
 0x129   : > { %v5950_v53 = vld [vmem:[%s7790_s4 + $0x188] ss:$16 sps:$4 sm:$0xff]   ;;  %v5951_v54 = vld [vmem:[%s7790_s4 + $0x1a4] ss:$16 sps:$4 sm:$0xff]   ;;  %v5953_v55 = vld [vmem:[%s7790_s4 + $0x1ac] ss:$16 sps:$4 sm:$0xff]  }
 0x12a   : > { %4401 = vmatpush1.bf16.msra.mxu0 %v5901_v20  ;;  %4729 = vmatpush1.bf16.msra.mxu1 %v5902_v21  ;;  %v5955_v56 = vld [vmem:[%s7790_s4 + $0x1a0] ss:$16 sps:$4 sm:$0xff]   ;;  %v5956_v57 = vld [vmem:[%s7790_s4 + $0x1a8] ss:$16 sps:$4 sm:$0xff]   ;;  %v5957_v58 = vld [vmem:[%s7790_s4 + $0x1c4] ss:$16 sps:$4 sm:$0xff]  }
 0x12b   : > { %4402 = vmatprep.subr.bf16.mxu0 %v5903_v22  ;;  %4730 = vmatprep.subr.bf16.mxu1 %v5905_v23  ;;  %v5959_v59 = vld [vmem:[%s7790_s4 + $0x1cc] ss:$16 sps:$4 sm:$0xff]   ;;  %v5961_v60 = vld [vmem:[%s7790_s4 + $0x1c0] ss:$16 sps:$4 sm:$0xff]   ;;  %v5962_v61 = vld [vmem:[%s7790_s4 + $0x1c8] ss:$16 sps:$4 sm:$0xff]  }
 0x12c   : > { %v5963_v62 = vld [vmem:[%s7790_s4 + $0x1e4] ss:$16 sps:$4 sm:$0xff]   ;;  %v5965_v63 = vld [vmem:[%s7790_s4 + $0x1ec] ss:$16 sps:$4 sm:$0xff]   ;;  %v5967_v1 = vld [vmem:[%s7790_s4 + $0x1e0] ss:$16 sps:$4 sm:$0xff]  }
 0x12d   : > { %v5968_v2 = vld [vmem:[%s7790_s4 + $0x1e8] ss:$16 sps:$4 sm:$0xff]   ;;  %v5973_v3 = vld [vmem:[%s7790_s4 + $0x204] ss:$16 sps:$4 sm:$0xff]   ;;  %v5976_v4 = vld [vmem:[%s7790_s4 + $0x20c] ss:$16 sps:$4 sm:$0xff]  }
 0x12e   : > { %4403 = vmatpush1.bf16.msra.mxu0 %v5907_v24  ;;  %4731 = vmatpush1.bf16.msra.mxu1 %v5908_v25  ;;  %v5971_v6 = vld [vmem:[%s7790_s4 + $0x200] ss:$16 sps:$4 sm:$0xff]   ;;  %v5974_v7 = vld [vmem:[%s7790_s4 + $0x208] ss:$16 sps:$4 sm:$0xff]   ;;  %v5979_v8 = vld [vmem:[%s7790_s4 + $0x224] ss:$16 sps:$4 sm:$0xff]  }
 0x12f   : > { %4404 = vmatprep.subr.bf16.mxu0 %v5909_v26  ;;  %4732 = vmatprep.subr.bf16.mxu1 %v5911_v27  ;;  %v5982_v9 = vld [vmem:[%s7790_s4 + $0x22c] ss:$16 sps:$4 sm:$0xff]   ;;  %v5977_v10 = vld [vmem:[%s7790_s4 + $0x220] ss:$16 sps:$4 sm:$0xff]   ;;  %v5980_v11 = vld [vmem:[%s7790_s4 + $0x228] ss:$16 sps:$4 sm:$0xff]  }
 0x130   : > { %v5985_v0 = vld [vmem:[%s7790_s4 + $0x244] ss:$16 sps:$4 sm:$0xff]   ;;  %v5988_v12 = vld [vmem:[%s7790_s4 + $0x24c] ss:$16 sps:$4 sm:$0xff]   ;;  %v5983_v13 = vld [vmem:[%s7790_s4 + $0x240] ss:$16 sps:$4 sm:$0xff]  }
 0x131   : > { %v5986_v14 = vld [vmem:[%s7790_s4 + $0x248] ss:$16 sps:$4 sm:$0xff]   ;;  %v5991_v15 = vld [vmem:[%s7790_s4 + $0x264] ss:$16 sps:$4 sm:$0xff]   ;;  %v5994_v16 = vld [vmem:[%s7790_s4 + $0x26c] ss:$16 sps:$4 sm:$0xff]  }
 0x132   : > { %4405 = vmatpush1.bf16.msra.mxu0 %v5913_v28  ;;  %4733 = vmatpush1.bf16.msra.mxu1 %v5914_v29  ;;  %v5989_v17 = vld [vmem:[%s7790_s4 + $0x260] ss:$16 sps:$4 sm:$0xff]   ;;  %v5992_v18 = vld [vmem:[%s7790_s4 + $0x268] ss:$16 sps:$4 sm:$0xff]   ;;  %v5997_v19 = vld [vmem:[%s7790_s4 + $0x284] ss:$16 sps:$4 sm:$0xff]  }
 0x133   : > { %4406 = vmatprep.subr.bf16.mxu0 %v5915_v30  ;;  %4734 = vmatprep.subr.bf16.mxu1 %v5917_v31  ;;  %v6000_v20 = vld [vmem:[%s7790_s4 + $0x28c] ss:$16 sps:$4 sm:$0xff]   ;;  %v5995_v21 = vld [vmem:[%s7790_s4 + $0x280] ss:$16 sps:$4 sm:$0xff]   ;;  %v5998_v22 = vld [vmem:[%s7790_s4 + $0x288] ss:$16 sps:$4 sm:$0xff]  }
 0x134   : > { %v6003_v23 = vld [vmem:[%s7790_s4 + $0x2a4] ss:$16 sps:$4 sm:$0xff]   ;;  %v6006_v24 = vld [vmem:[%s7790_s4 + $0x2ac] ss:$16 sps:$4 sm:$0xff]   ;;  %v6001_v25 = vld [vmem:[%s7790_s4 + $0x2a0] ss:$16 sps:$4 sm:$0xff]  }
 0x135   : > { %v6004_v26 = vld [vmem:[%s7790_s4 + $0x2a8] ss:$16 sps:$4 sm:$0xff]   ;;  %v6009_v27 = vld [vmem:[%s7790_s4 + $0x2c4] ss:$16 sps:$4 sm:$0xff]   ;;  %v6012_v28 = vld [vmem:[%s7790_s4 + $0x2cc] ss:$16 sps:$4 sm:$0xff]  }
 0x136   : > { %4407 = vmatpush1.bf16.msra.mxu0 %v5919_v32  ;;  %4735 = vmatpush1.bf16.msra.mxu1 %v5920_v33  ;;  %v7887_v29 = vld [vmem:[%s8423_s0 + $0x8] sm:$0xff]  ;;  %v6007_v31 = vld [vmem:[%s7790_s4 + $0x2c0] ss:$16 sps:$4 sm:$0xff]   ;;  %v6015_v33 = vld [vmem:[%s7790_s4 + $0x2e4] ss:$16 sps:$4 sm:$0xff]   ;;  %s8431_s24 = smov (!%p1224_p8, %s5250_s24), 7 }
 0x137   : > { %4408 = vmatprep.subr.bf16.mxu0 %v5921_v34  ;;  %4736 = vmatprep.subr.bf16.mxu1 %v5923_v35  ;;  %v5256_v30 = vcombine.high %v7887_v29, %v7887_v29  ;;  %v6010_v32 = vld [vmem:[%s7790_s4 + $0x2c8] ss:$16 sps:$4 sm:$0xff]   ;;  %v6018_v34 = vld [vmem:[%s7790_s4 + $0x2ec] ss:$16 sps:$4 sm:$0xff]   ;;  %v6013_v35 = vld [vmem:[%s7790_s4 + $0x2e0] ss:$16 sps:$4 sm:$0xff]   ;;  %s1226_s27 = scalar_lea.vmem %s8425_s2, %s8431_s24 }
 0x138   : > { %s5252_s14 = sshll.u32 %s8431_s24, 2 }
 0x139   : > { %s1232_s29 = scalar_lea.vmem %s8426_s3, %s5252_s14 }
 0x13a   : > { %4409 = vmatpush1.bf16.msra.mxu0 %v5925_v36  ;;  %4737 = vmatpush1.bf16.msra.mxu1 %v5926_v37  ;;  %v6016_v36 = vld [vmem:[%s7790_s4 + $0x2e8] ss:$16 sps:$4 sm:$0xff]   ;;  %v6021_v37 = vld [vmem:[%s7790_s4 + $0x304] ss:$16 sps:$4 sm:$0xff]  }
 0x13b   : > { %4410 = vmatprep.subr.bf16.mxu0 %v5927_v38  ;;  %4738 = vmatprep.subr.bf16.mxu1 %v5929_v39  ;;  %v6024_v38 = vld [vmem:[%s7790_s4 + $0x30c] ss:$16 sps:$4 sm:$0xff]   ;;  %v6019_v39 = vld [vmem:[%s7790_s4 + $0x300] ss:$16 sps:$4 sm:$0xff]  }
 0x13e   : > { %4411 = vmatpush1.bf16.msra.mxu0 %v5931_v40  ;;  %4739 = vmatpush1.bf16.msra.mxu1 %v5932_v41  ;;  %v6022_v40 = vld [vmem:[%s7790_s4 + $0x308] ss:$16 sps:$4 sm:$0xff]   ;;  %v6027_v41 = vld [vmem:[%s7790_s4 + $0x324] ss:$16 sps:$4 sm:$0xff]  }
 0x13f   : > { %4412 = vmatprep.subr.bf16.mxu0 %v5933_v42  ;;  %4740 = vmatprep.subr.bf16.mxu1 %v5935_v43  ;;  %v6030_v42 = vld [vmem:[%s7790_s4 + $0x32c] ss:$16 sps:$4 sm:$0xff]   ;;  %v6025_v43 = vld [vmem:[%s7790_s4 + $0x320] ss:$16 sps:$4 sm:$0xff]  }
 0x142   : > { %4413 = vmatpush1.bf16.msra.mxu0 %v5937_v44  ;;  %4741 = vmatpush1.bf16.msra.mxu1 %v5938_v45  ;;  %v6028_v44 = vld [vmem:[%s7790_s4 + $0x328] ss:$16 sps:$4 sm:$0xff]   ;;  %v6033_v45 = vld [vmem:[%s7790_s4 + $0x344] ss:$16 sps:$4 sm:$0xff]  }
 0x143   : > { %4414 = vmatprep.subr.bf16.mxu0 %v5939_v46  ;;  %4742 = vmatprep.subr.bf16.mxu1 %v5941_v47  ;;  %v6036_v46 = vld [vmem:[%s7790_s4 + $0x34c] ss:$16 sps:$4 sm:$0xff]   ;;  %v6031_v47 = vld [vmem:[%s7790_s4 + $0x340] ss:$16 sps:$4 sm:$0xff]  }
 0x146   : > { %4415 = vmatpush1.bf16.msra.mxu0 %v5943_v48  ;;  %4743 = vmatpush1.bf16.msra.mxu1 %v5944_v49  ;;  %v6034_v48 = vld [vmem:[%s7790_s4 + $0x348] ss:$16 sps:$4 sm:$0xff]   ;;  %v6039_v49 = vld [vmem:[%s7790_s4 + $0x364] ss:$16 sps:$4 sm:$0xff]  }
 0x147   : > { %4416 = vmatprep.subr.bf16.mxu0 %v5945_v50  ;;  %4744 = vmatprep.subr.bf16.mxu1 %v5947_v51  ;;  %v6042_v50 = vld [vmem:[%s7790_s4 + $0x36c] ss:$16 sps:$4 sm:$0xff]   ;;  %v6037_v51 = vld [vmem:[%s7790_s4 + $0x360] ss:$16 sps:$4 sm:$0xff]  }
 0x14a   : > { %4417 = vmatpush1.bf16.msra.mxu0 %v5949_v52  ;;  %4745 = vmatpush1.bf16.msra.mxu1 %v5950_v53  ;;  %v6040_v52 = vld [vmem:[%s7790_s4 + $0x368] ss:$16 sps:$4 sm:$0xff]   ;;  %v6045_v53 = vld [vmem:[%s7790_s4 + $0x384] ss:$16 sps:$4 sm:$0xff]  }
 0x14b   : > { %4418 = vmatprep.subr.bf16.mxu0 %v5951_v54  ;;  %4746 = vmatprep.subr.bf16.mxu1 %v5953_v55  ;;  %v6048_v54 = vld [vmem:[%s7790_s4 + $0x38c] ss:$16 sps:$4 sm:$0xff]   ;;  %v6043_v55 = vld [vmem:[%s7790_s4 + $0x380] ss:$16 sps:$4 sm:$0xff]  }
 0x14e   : > { %4419 = vmatpush1.bf16.msra.mxu0 %v5955_v56  ;;  %4747 = vmatpush1.bf16.msra.mxu1 %v5956_v57  ;;  %v6046_v56 = vld [vmem:[%s7790_s4 + $0x388] ss:$16 sps:$4 sm:$0xff]   ;;  %v6051_v57 = vld [vmem:[%s7790_s4 + $0x3a4] ss:$16 sps:$4 sm:$0xff]  }
 0x14f   : > { %4420 = vmatprep.subr.bf16.mxu0 %v5957_v58  ;;  %4748 = vmatprep.subr.bf16.mxu1 %v5959_v59  ;;  %v6054_v58 = vld [vmem:[%s7790_s4 + $0x3ac] ss:$16 sps:$4 sm:$0xff]   ;;  %v6049_v59 = vld [vmem:[%s7790_s4 + $0x3a0] ss:$16 sps:$4 sm:$0xff]  }
 0x152   : > { %4421 = vmatpush1.bf16.msra.mxu0 %v5961_v60  ;;  %4749 = vmatpush1.bf16.msra.mxu1 %v5962_v61  ;;  %v6052_v60 = vld [vmem:[%s7790_s4 + $0x3a8] ss:$16 sps:$4 sm:$0xff]   ;;  %v6057_v61 = vld [vmem:[%s7790_s4 + $0x3c4] ss:$16 sps:$4 sm:$0xff]  }
 0x153   : > { %4422 = vmatprep.subr.bf16.mxu0 %v5963_v62  ;;  %4750 = vmatprep.subr.bf16.mxu1 %v5965_v63  ;;  %v6060_v62 = vld [vmem:[%s7790_s4 + $0x3cc] ss:$16 sps:$4 sm:$0xff]   ;;  %v6055_v63 = vld [vmem:[%s7790_s4 + $0x3c0] ss:$16 sps:$4 sm:$0xff]  }
 0x156   : > { %4423 = vmatpush1.bf16.msra.mxu0 %v5967_v1  ;;  %4751 = vmatpush1.bf16.msra.mxu1 %v5968_v2  ;;  %v6058_v1 = vld [vmem:[%s7790_s4 + $0x3c8] ss:$16 sps:$4 sm:$0xff]   ;;  %v6063_v2 = vld [vmem:[%s7790_s4 + $0x3e4] ss:$16 sps:$4 sm:$0xff]  }
 0x157   : > { %4433 = vmatprep.subr.bf16.mxu0 %v5973_v3  ;;  %4761 = vmatprep.subr.bf16.mxu1 %v5976_v4  ;;  %v6066_v3 = vld [vmem:[%s7790_s4 + $0x3ec] ss:$16 sps:$4 sm:$0xff]   ;;  %v6061_v4 = vld [vmem:[%s7790_s4 + $0x3e0] ss:$16 sps:$4 sm:$0xff]  }
 0x159   : > { %4425 = vmatmul.mubr.bf16.vlgmr.msra.gmra.mrb[0].mxu0 %v5253_v5  ;;  %4753 = vmatmul.mubr.bf16.vlgmr.msra.gmra.mrb[0].mxu1 %v5253_v5  ;;  %v6064_v5 = vld [vmem:[%s7790_s4 + $0x3e8] ss:$16 sps:$4 sm:$0xff]  }
 0x15a   : > { %4434 = vmatpush1.bf16.msra.mxu0 %v5971_v6  ;;  %4762 = vmatpush1.bf16.msra.mxu1 %v5974_v7  ;;  %v6071_v6 = vld [vmem:[%s7790_s4 + $0x404] ss:$16 sps:$4 sm:$0xff]   ;;  %v6074_v7 = vld [vmem:[%s7790_s4 + $0x40c] ss:$16 sps:$4 sm:$0xff]  }
 0x15b   : > { %4435 = vmatprep.subr.bf16.mxu0 %v5979_v8  ;;  %4763 = vmatprep.subr.bf16.mxu1 %v5982_v9  ;;  %v5255_v8 = vcombine.low %v7887_v29, %v7887_v29  ;;  %v6069_v9 = vld [vmem:[%s7790_s4 + $0x400] ss:$16 sps:$4 sm:$0xff]   ;;  %v6104_v29 = vld [vmem:[%s7790_s4 + $0x4ac] ss:$16 sps:$4 sm:$0xff]  }
 0x15c   : > { %4465 = vmatprep.mubr.bf16.mxu0 %v5256_v30  ;;  %4793 = vmatprep.mubr.bf16.mxu1 %v5256_v30  ;;  %v6099_v30 = vld [vmem:[%s7790_s4 + $0x4a0] ss:$16 sps:$4 sm:$0xff]  }
 0x15e   : > { %4436 = vmatpush1.bf16.msra.mxu0 %v5977_v10  ;;  %4764 = vmatpush1.bf16.msra.mxu1 %v5980_v11  ;;  %v6072_v10 = vld [vmem:[%s7790_s4 + $0x408] ss:$16 sps:$4 sm:$0xff]   ;;  %v7938_v11 = vld [vmem:[%s8423_s0 + $0x10] sm:$0xff] }
 0x15f   : > { %4437 = vmatprep.subr.bf16.mxu0 %v5985_v0  ;;  %4765 = vmatprep.subr.bf16.mxu1 %v5988_v12  ;;  %v6077_v0 = vld [vmem:[%s7790_s4 + $0x424] ss:$16 sps:$4 sm:$0xff]   ;;  %v6080_v12 = vld [vmem:[%s7790_s4 + $0x42c] ss:$16 sps:$4 sm:$0xff]  }
 0x162   : > { %4438 = vmatpush1.bf16.msra.mxu0 %v5983_v13  ;;  %4766 = vmatpush1.bf16.msra.mxu1 %v5986_v14  ;;  %v5258_v13 = vcombine.high %v7938_v11, %v7938_v11  ;;  %v6075_v14 = vld [vmem:[%s7790_s4 + $0x420] ss:$16 sps:$4 sm:$0xff]  }
 0x163   : > { %4439 = vmatprep.subr.bf16.mxu0 %v5991_v15  ;;  %4767 = vmatprep.subr.bf16.mxu1 %v5994_v16  ;;  %v6078_v15 = vld [vmem:[%s7790_s4 + $0x428] ss:$16 sps:$4 sm:$0xff]   ;;  %v6083_v16 = vld [vmem:[%s7790_s4 + $0x444] ss:$16 sps:$4 sm:$0xff]  }
 0x166   : > { %4440 = vmatpush1.bf16.msra.mxu0 %v5989_v17  ;;  %4768 = vmatpush1.bf16.msra.mxu1 %v5992_v18  ;;  %v6086_v17 = vld [vmem:[%s7790_s4 + $0x44c] ss:$16 sps:$4 sm:$0xff]   ;;  %v6081_v18 = vld [vmem:[%s7790_s4 + $0x440] ss:$16 sps:$4 sm:$0xff]  }
 0x167   : > { %4441 = vmatprep.subr.bf16.mxu0 %v5997_v19  ;;  %4769 = vmatprep.subr.bf16.mxu1 %v6000_v20  ;;  %v6084_v19 = vld [vmem:[%s7790_s4 + $0x448] ss:$16 sps:$4 sm:$0xff]   ;;  %v6089_v20 = vld [vmem:[%s7790_s4 + $0x464] ss:$16 sps:$4 sm:$0xff]  }
 0x16a   : > { %4442 = vmatpush1.bf16.msra.mxu0 %v5995_v21  ;;  %4770 = vmatpush1.bf16.msra.mxu1 %v5998_v22  ;;  %v6092_v21 = vld [vmem:[%s7790_s4 + $0x46c] ss:$16 sps:$4 sm:$0xff]   ;;  %v6087_v22 = vld [vmem:[%s7790_s4 + $0x460] ss:$16 sps:$4 sm:$0xff]  }
 0x16b   : > { %4443 = vmatprep.subr.bf16.mxu0 %v6003_v23  ;;  %4771 = vmatprep.subr.bf16.mxu1 %v6006_v24  ;;  %v6090_v23 = vld [vmem:[%s7790_s4 + $0x468] ss:$16 sps:$4 sm:$0xff]   ;;  %v6095_v24 = vld [vmem:[%s7790_s4 + $0x484] ss:$16 sps:$4 sm:$0xff]  }
 0x16e   : > { %4444 = vmatpush1.bf16.msra.mxu0 %v6001_v25  ;;  %4772 = vmatpush1.bf16.msra.mxu1 %v6004_v26  ;;  %v6098_v25 = vld [vmem:[%s7790_s4 + $0x48c] ss:$16 sps:$4 sm:$0xff]   ;;  %v6093_v26 = vld [vmem:[%s7790_s4 + $0x480] ss:$16 sps:$4 sm:$0xff]  }
 0x16f   : > { %4445 = vmatprep.subr.bf16.mxu0 %v6009_v27  ;;  %4773 = vmatprep.subr.bf16.mxu1 %v6012_v28  ;;  %v6096_v27 = vld [vmem:[%s7790_s4 + $0x488] ss:$16 sps:$4 sm:$0xff]   ;;  %v6101_v28 = vld [vmem:[%s7790_s4 + $0x4a4] ss:$16 sps:$4 sm:$0xff]  }
 0x172   : > { %4446 = vmatpush1.bf16.msra.mxu0 %v6007_v31  ;;  %4774 = vmatpush1.bf16.msra.mxu1 %v6010_v32  ;;  %v6102_v31 = vld [vmem:[%s7790_s4 + $0x4a8] ss:$16 sps:$4 sm:$0xff]   ;;  %v6107_v32 = vld [vmem:[%s7790_s4 + $0x4c4] ss:$16 sps:$4 sm:$0xff]  }
 0x173   : > { %4447 = vmatprep.subr.bf16.mxu0 %v6015_v33  ;;  %4775 = vmatprep.subr.bf16.mxu1 %v6018_v34  ;;  %v6110_v33 = vld [vmem:[%s7790_s4 + $0x4cc] ss:$16 sps:$4 sm:$0xff]   ;;  %v6105_v34 = vld [vmem:[%s7790_s4 + $0x4c0] ss:$16 sps:$4 sm:$0xff]  }
 0x176   : > { %4448 = vmatpush1.bf16.msra.mxu0 %v6013_v35  ;;  %4776 = vmatpush1.bf16.msra.mxu1 %v6016_v36  ;;  %v6108_v35 = vld [vmem:[%s7790_s4 + $0x4c8] ss:$16 sps:$4 sm:$0xff]   ;;  %v6113_v36 = vld [vmem:[%s7790_s4 + $0x4e4] ss:$16 sps:$4 sm:$0xff]  }
 0x177   : > { %4449 = vmatprep.subr.bf16.mxu0 %v6021_v37  ;;  %4777 = vmatprep.subr.bf16.mxu1 %v6024_v38  ;;  %v6116_v37 = vld [vmem:[%s7790_s4 + $0x4ec] ss:$16 sps:$4 sm:$0xff]   ;;  %v6111_v38 = vld [vmem:[%s7790_s4 + $0x4e0] ss:$16 sps:$4 sm:$0xff]  }
 0x17a   : > { %4450 = vmatpush1.bf16.msra.mxu0 %v6019_v39  ;;  %4778 = vmatpush1.bf16.msra.mxu1 %v6022_v40  ;;  %v6114_v39 = vld [vmem:[%s7790_s4 + $0x4e8] ss:$16 sps:$4 sm:$0xff]   ;;  %v6119_v40 = vld [vmem:[%s7790_s4 + $0x504] ss:$16 sps:$4 sm:$0xff]  }
 0x17b   : > { %4451 = vmatprep.subr.bf16.mxu0 %v6027_v41  ;;  %4779 = vmatprep.subr.bf16.mxu1 %v6030_v42  ;;  %v6122_v41 = vld [vmem:[%s7790_s4 + $0x50c] ss:$16 sps:$4 sm:$0xff]   ;;  %v6117_v42 = vld [vmem:[%s7790_s4 + $0x500] ss:$16 sps:$4 sm:$0xff]  }
 0x17e   : > { %4452 = vmatpush1.bf16.msra.mxu0 %v6025_v43  ;;  %4780 = vmatpush1.bf16.msra.mxu1 %v6028_v44  ;;  %v6120_v43 = vld [vmem:[%s7790_s4 + $0x508] ss:$16 sps:$4 sm:$0xff]   ;;  %v6125_v44 = vld [vmem:[%s7790_s4 + $0x524] ss:$16 sps:$4 sm:$0xff]  }
 0x17f   : > { %4453 = vmatprep.subr.bf16.mxu0 %v6033_v45  ;;  %4781 = vmatprep.subr.bf16.mxu1 %v6036_v46  ;;  %v6128_v45 = vld [vmem:[%s7790_s4 + $0x52c] ss:$16 sps:$4 sm:$0xff]   ;;  %v6123_v46 = vld [vmem:[%s7790_s4 + $0x520] ss:$16 sps:$4 sm:$0xff]  }
 0x182   : > { %4454 = vmatpush1.bf16.msra.mxu0 %v6031_v47  ;;  %4782 = vmatpush1.bf16.msra.mxu1 %v6034_v48  ;;  %v6126_v47 = vld [vmem:[%s7790_s4 + $0x528] ss:$16 sps:$4 sm:$0xff]   ;;  %v6131_v48 = vld [vmem:[%s7790_s4 + $0x544] ss:$16 sps:$4 sm:$0xff]  }
 0x183   : > { %4455 = vmatprep.subr.bf16.mxu0 %v6039_v49  ;;  %4783 = vmatprep.subr.bf16.mxu1 %v6042_v50  ;;  %v6134_v49 = vld [vmem:[%s7790_s4 + $0x54c] ss:$16 sps:$4 sm:$0xff]   ;;  %v6129_v50 = vld [vmem:[%s7790_s4 + $0x540] ss:$16 sps:$4 sm:$0xff]  }
 0x186   : > { %4456 = vmatpush1.bf16.msra.mxu0 %v6037_v51  ;;  %4784 = vmatpush1.bf16.msra.mxu1 %v6040_v52  ;;  %v6132_v51 = vld [vmem:[%s7790_s4 + $0x548] ss:$16 sps:$4 sm:$0xff]   ;;  %v6137_v52 = vld [vmem:[%s7790_s4 + $0x564] ss:$16 sps:$4 sm:$0xff]  }
 0x187   : > { %4457 = vmatprep.subr.bf16.mxu0 %v6045_v53  ;;  %4785 = vmatprep.subr.bf16.mxu1 %v6048_v54  ;;  %v6140_v53 = vld [vmem:[%s7790_s4 + $0x56c] ss:$16 sps:$4 sm:$0xff]   ;;  %v6135_v54 = vld [vmem:[%s7790_s4 + $0x560] ss:$16 sps:$4 sm:$0xff]  }
 0x18a   : > { %4458 = vmatpush1.bf16.msra.mxu0 %v6043_v55  ;;  %4786 = vmatpush1.bf16.msra.mxu1 %v6046_v56  ;;  %v6138_v55 = vld [vmem:[%s7790_s4 + $0x568] ss:$16 sps:$4 sm:$0xff]   ;;  %v6143_v56 = vld [vmem:[%s7790_s4 + $0x584] ss:$16 sps:$4 sm:$0xff]  }
 0x18b   : > { %4459 = vmatprep.subr.bf16.mxu0 %v6051_v57  ;;  %4787 = vmatprep.subr.bf16.mxu1 %v6054_v58  ;;  %v6146_v57 = vld [vmem:[%s7790_s4 + $0x58c] ss:$16 sps:$4 sm:$0xff]   ;;  %v6141_v58 = vld [vmem:[%s7790_s4 + $0x580] ss:$16 sps:$4 sm:$0xff]  }
 0x18e   : > { %4460 = vmatpush1.bf16.msra.mxu0 %v6049_v59  ;;  %4788 = vmatpush1.bf16.msra.mxu1 %v6052_v60  ;;  %v6144_v59 = vld [vmem:[%s7790_s4 + $0x588] ss:$16 sps:$4 sm:$0xff]   ;;  %v6149_v60 = vld [vmem:[%s7790_s4 + $0x5a4] ss:$16 sps:$4 sm:$0xff]  }
 0x18f   : > { %4461 = vmatprep.subr.bf16.mxu0 %v6057_v61  ;;  %4789 = vmatprep.subr.bf16.mxu1 %v6060_v62  ;;  %v6152_v61 = vld [vmem:[%s7790_s4 + $0x5ac] ss:$16 sps:$4 sm:$0xff]   ;;  %v6147_v62 = vld [vmem:[%s7790_s4 + $0x5a0] ss:$16 sps:$4 sm:$0xff]  }
 0x192   : > { %4462 = vmatpush1.bf16.msra.mxu0 %v6055_v63  ;;  %4790 = vmatpush1.bf16.msra.mxu1 %v6058_v1  ;;  %v6150_v63 = vld [vmem:[%s7790_s4 + $0x5a8] ss:$16 sps:$4 sm:$0xff]   ;;  %v6155_v1 = vld [vmem:[%s7790_s4 + $0x5c4] ss:$16 sps:$4 sm:$0xff]  }
 0x193   : > { %4463 = vmatprep.subr.bf16.mxu0 %v6063_v2  ;;  %4791 = vmatprep.subr.bf16.mxu1 %v6066_v3  ;;  %v6158_v2 = vld [vmem:[%s7790_s4 + $0x5cc] ss:$16 sps:$4 sm:$0xff]   ;;  %v6153_v3 = vld [vmem:[%s7790_s4 + $0x5c0] ss:$16 sps:$4 sm:$0xff]  }
 0x196   : > { %4464 = vmatpush1.bf16.msra.mxu0 %v6061_v4  ;;  %4792 = vmatpush1.bf16.msra.mxu1 %v6064_v5  ;;  %v6156_v4 = vld [vmem:[%s7790_s4 + $0x5c8] ss:$16 sps:$4 sm:$0xff]   ;;  %v6161_v5 = vld [vmem:[%s7790_s4 + $0x5e4] ss:$16 sps:$4 sm:$0xff]  }
 0x197   : > { %4474 = vmatprep.subr.bf16.mxu0 %v6071_v6  ;;  %4802 = vmatprep.subr.bf16.mxu1 %v6074_v7  ;;  %v6164_v6 = vld [vmem:[%s7790_s4 + $0x5ec] ss:$16 sps:$4 sm:$0xff]   ;;  %v6159_v7 = vld [vmem:[%s7790_s4 + $0x5e0] ss:$16 sps:$4 sm:$0xff]  }
 0x199   : > { %4466 = vmatmul.mubr.bf16.vlgmr.msra.gmra.mrb[0].mxu0 %v5255_v8  ;;  %4794 = vmatmul.mubr.bf16.vlgmr.msra.gmra.mrb[0].mxu1 %v5255_v8  ;;  %v6162_v8 = vld [vmem:[%s7790_s4 + $0x5e8] ss:$16 sps:$4 sm:$0xff]  }
 0x19a   : > { %4475 = vmatpush1.bf16.msra.mxu0 %v6069_v9  ;;  %4803 = vmatpush1.bf16.msra.mxu1 %v6072_v10  ;;  %v6169_v9 = vld [vmem:[%s7790_s4 + $0x604] ss:$16 sps:$4 sm:$0xff]   ;;  %v6172_v10 = vld [vmem:[%s7790_s4 + $0x60c] ss:$16 sps:$4 sm:$0xff]  }
 0x19b   : > { %4476 = vmatprep.subr.bf16.mxu0 %v6077_v0  ;;  %4804 = vmatprep.subr.bf16.mxu1 %v6080_v12  ;;  %v5257_v0 = vcombine.low %v7938_v11, %v7938_v11  ;;  %v6167_v12 = vld [vmem:[%s7790_s4 + $0x600] ss:$16 sps:$4 sm:$0xff]  }
 0x19c   : > { %4506 = vmatprep.mubr.bf16.mxu0 %v5258_v13  ;;  %4834 = vmatprep.mubr.bf16.mxu1 %v5258_v13  ;;  %v8010_v13 = vld [vmem:[%s8423_s0 + $0x18] sm:$0xff] }
 0x19d   : > { %v5260_v11 = vcombine.high %v8010_v13, %v8010_v13 }
 0x19e   : > { %4477 = vmatpush1.bf16.msra.mxu0 %v6075_v14  ;;  %4805 = vmatpush1.bf16.msra.mxu1 %v6078_v15  ;;  %v6170_v14 = vld [vmem:[%s7790_s4 + $0x608] ss:$16 sps:$4 sm:$0xff]   ;;  %v6175_v15 = vld [vmem:[%s7790_s4 + $0x624] ss:$16 sps:$4 sm:$0xff]  }
 0x19f   : > { %4478 = vmatprep.subr.bf16.mxu0 %v6083_v16  ;;  %4806 = vmatprep.subr.bf16.mxu1 %v6086_v17  ;;  %v6178_v16 = vld [vmem:[%s7790_s4 + $0x62c] ss:$16 sps:$4 sm:$0xff]   ;;  %v6173_v17 = vld [vmem:[%s7790_s4 + $0x620] ss:$16 sps:$4 sm:$0xff]  }
 0x1a2   : > { %4479 = vmatpush1.bf16.msra.mxu0 %v6081_v18  ;;  %4807 = vmatpush1.bf16.msra.mxu1 %v6084_v19  ;;  %v6176_v18 = vld [vmem:[%s7790_s4 + $0x628] ss:$16 sps:$4 sm:$0xff]   ;;  %v6181_v19 = vld [vmem:[%s7790_s4 + $0x644] ss:$16 sps:$4 sm:$0xff]  }
 0x1a3   : > { %4480 = vmatprep.subr.bf16.mxu0 %v6089_v20  ;;  %4808 = vmatprep.subr.bf16.mxu1 %v6092_v21  ;;  %v6184_v20 = vld [vmem:[%s7790_s4 + $0x64c] ss:$16 sps:$4 sm:$0xff]   ;;  %v6179_v21 = vld [vmem:[%s7790_s4 + $0x640] ss:$16 sps:$4 sm:$0xff]  }
 0x1a6   : > { %4481 = vmatpush1.bf16.msra.mxu0 %v6087_v22  ;;  %4809 = vmatpush1.bf16.msra.mxu1 %v6090_v23  ;;  %v6182_v22 = vld [vmem:[%s7790_s4 + $0x648] ss:$16 sps:$4 sm:$0xff]   ;;  %v6187_v23 = vld [vmem:[%s7790_s4 + $0x664] ss:$16 sps:$4 sm:$0xff]  }
 0x1a7   : > { %4482 = vmatprep.subr.bf16.mxu0 %v6095_v24  ;;  %4810 = vmatprep.subr.bf16.mxu1 %v6098_v25  ;;  %v6190_v24 = vld [vmem:[%s7790_s4 + $0x66c] ss:$16 sps:$4 sm:$0xff]   ;;  %v6185_v25 = vld [vmem:[%s7790_s4 + $0x660] ss:$16 sps:$4 sm:$0xff]  }
 0x1aa   : > { %4483 = vmatpush1.bf16.msra.mxu0 %v6093_v26  ;;  %4811 = vmatpush1.bf16.msra.mxu1 %v6096_v27  ;;  %v6188_v26 = vld [vmem:[%s7790_s4 + $0x668] ss:$16 sps:$4 sm:$0xff]   ;;  %v6193_v27 = vld [vmem:[%s7790_s4 + $0x684] ss:$16 sps:$4 sm:$0xff]  }
 0x1ab   : > { %4484 = vmatprep.subr.bf16.mxu0 %v6101_v28  ;;  %4812 = vmatprep.subr.bf16.mxu1 %v6104_v29  ;;  %v6196_v28 = vld [vmem:[%s7790_s4 + $0x68c] ss:$16 sps:$4 sm:$0xff]   ;;  %v6191_v29 = vld [vmem:[%s7790_s4 + $0x680] ss:$16 sps:$4 sm:$0xff]  }
 0x1ae   : > { %4485 = vmatpush1.bf16.msra.mxu0 %v6099_v30  ;;  %4813 = vmatpush1.bf16.msra.mxu1 %v6102_v31  ;;  %v6194_v30 = vld [vmem:[%s7790_s4 + $0x688] ss:$16 sps:$4 sm:$0xff]   ;;  %v6199_v31 = vld [vmem:[%s7790_s4 + $0x6a4] ss:$16 sps:$4 sm:$0xff]  }
 0x1af   : > { %4486 = vmatprep.subr.bf16.mxu0 %v6107_v32  ;;  %4814 = vmatprep.subr.bf16.mxu1 %v6110_v33  ;;  %v6202_v32 = vld [vmem:[%s7790_s4 + $0x6ac] ss:$16 sps:$4 sm:$0xff]   ;;  %v6197_v33 = vld [vmem:[%s7790_s4 + $0x6a0] ss:$16 sps:$4 sm:$0xff]  }
 0x1b2   : > { %4487 = vmatpush1.bf16.msra.mxu0 %v6105_v34  ;;  %4815 = vmatpush1.bf16.msra.mxu1 %v6108_v35  ;;  %v6200_v34 = vld [vmem:[%s7790_s4 + $0x6a8] ss:$16 sps:$4 sm:$0xff]   ;;  %v6205_v35 = vld [vmem:[%s7790_s4 + $0x6c4] ss:$16 sps:$4 sm:$0xff]  }
 0x1b3   : > { %4488 = vmatprep.subr.bf16.mxu0 %v6113_v36  ;;  %4816 = vmatprep.subr.bf16.mxu1 %v6116_v37  ;;  %v6208_v36 = vld [vmem:[%s7790_s4 + $0x6cc] ss:$16 sps:$4 sm:$0xff]   ;;  %v6203_v37 = vld [vmem:[%s7790_s4 + $0x6c0] ss:$16 sps:$4 sm:$0xff]  }
 0x1b6   : > { %4489 = vmatpush1.bf16.msra.mxu0 %v6111_v38  ;;  %4817 = vmatpush1.bf16.msra.mxu1 %v6114_v39  ;;  %v6206_v38 = vld [vmem:[%s7790_s4 + $0x6c8] ss:$16 sps:$4 sm:$0xff]   ;;  %v6211_v39 = vld [vmem:[%s7790_s4 + $0x6e4] ss:$16 sps:$4 sm:$0xff]  }
 0x1b7   : > { %4490 = vmatprep.subr.bf16.mxu0 %v6119_v40  ;;  %4818 = vmatprep.subr.bf16.mxu1 %v6122_v41  ;;  %v6214_v40 = vld [vmem:[%s7790_s4 + $0x6ec] ss:$16 sps:$4 sm:$0xff]   ;;  %v6209_v41 = vld [vmem:[%s7790_s4 + $0x6e0] ss:$16 sps:$4 sm:$0xff]  }
 0x1ba   : > { %4491 = vmatpush1.bf16.msra.mxu0 %v6117_v42  ;;  %4819 = vmatpush1.bf16.msra.mxu1 %v6120_v43  ;;  %v6212_v42 = vld [vmem:[%s7790_s4 + $0x6e8] ss:$16 sps:$4 sm:$0xff]   ;;  %v6217_v43 = vld [vmem:[%s7790_s4 + $0x704] ss:$16 sps:$4 sm:$0xff]  }
 0x1bb   : > { %4492 = vmatprep.subr.bf16.mxu0 %v6125_v44  ;;  %4820 = vmatprep.subr.bf16.mxu1 %v6128_v45  ;;  %v6220_v44 = vld [vmem:[%s7790_s4 + $0x70c] ss:$16 sps:$4 sm:$0xff]   ;;  %v6215_v45 = vld [vmem:[%s7790_s4 + $0x700] ss:$16 sps:$4 sm:$0xff]  }
 0x1be   : > { %4493 = vmatpush1.bf16.msra.mxu0 %v6123_v46  ;;  %4821 = vmatpush1.bf16.msra.mxu1 %v6126_v47  ;;  %v6218_v46 = vld [vmem:[%s7790_s4 + $0x708] ss:$16 sps:$4 sm:$0xff]   ;;  %v6223_v47 = vld [vmem:[%s7790_s4 + $0x724] ss:$16 sps:$4 sm:$0xff]  }
 0x1bf   : > { %4494 = vmatprep.subr.bf16.mxu0 %v6131_v48  ;;  %4822 = vmatprep.subr.bf16.mxu1 %v6134_v49  ;;  %v6226_v48 = vld [vmem:[%s7790_s4 + $0x72c] ss:$16 sps:$4 sm:$0xff]   ;;  %v6221_v49 = vld [vmem:[%s7790_s4 + $0x720] ss:$16 sps:$4 sm:$0xff]  }
 0x1c2   : > { %4495 = vmatpush1.bf16.msra.mxu0 %v6129_v50  ;;  %4823 = vmatpush1.bf16.msra.mxu1 %v6132_v51  ;;  %v6224_v50 = vld [vmem:[%s7790_s4 + $0x728] ss:$16 sps:$4 sm:$0xff]   ;;  %v6229_v51 = vld [vmem:[%s7790_s4 + $0x744] ss:$16 sps:$4 sm:$0xff]  }
 0x1c3   : > { %4496 = vmatprep.subr.bf16.mxu0 %v6137_v52  ;;  %4824 = vmatprep.subr.bf16.mxu1 %v6140_v53  ;;  %v6232_v52 = vld [vmem:[%s7790_s4 + $0x74c] ss:$16 sps:$4 sm:$0xff]   ;;  %v6227_v53 = vld [vmem:[%s7790_s4 + $0x740] ss:$16 sps:$4 sm:$0xff]  }
 0x1c6   : > { %4497 = vmatpush1.bf16.msra.mxu0 %v6135_v54  ;;  %4825 = vmatpush1.bf16.msra.mxu1 %v6138_v55  ;;  %v6230_v54 = vld [vmem:[%s7790_s4 + $0x748] ss:$16 sps:$4 sm:$0xff]   ;;  %v6235_v55 = vld [vmem:[%s7790_s4 + $0x764] ss:$16 sps:$4 sm:$0xff]  }
 0x1c7   : > { %4498 = vmatprep.subr.bf16.mxu0 %v6143_v56  ;;  %4826 = vmatprep.subr.bf16.mxu1 %v6146_v57  ;;  %v6238_v56 = vld [vmem:[%s7790_s4 + $0x76c] ss:$16 sps:$4 sm:$0xff]   ;;  %v6233_v57 = vld [vmem:[%s7790_s4 + $0x760] ss:$16 sps:$4 sm:$0xff]  }
 0x1ca   : > { %4499 = vmatpush1.bf16.msra.mxu0 %v6141_v58  ;;  %4827 = vmatpush1.bf16.msra.mxu1 %v6144_v59  ;;  %v6236_v58 = vld [vmem:[%s7790_s4 + $0x768] ss:$16 sps:$4 sm:$0xff]   ;;  %v6241_v59 = vld [vmem:[%s7790_s4 + $0x784] ss:$16 sps:$4 sm:$0xff]  }
 0x1cb   : > { %4500 = vmatprep.subr.bf16.mxu0 %v6149_v60  ;;  %4828 = vmatprep.subr.bf16.mxu1 %v6152_v61  ;;  %v6244_v60 = vld [vmem:[%s7790_s4 + $0x78c] ss:$16 sps:$4 sm:$0xff]   ;;  %v6239_v61 = vld [vmem:[%s7790_s4 + $0x780] ss:$16 sps:$4 sm:$0xff]  }
 0x1ce   : > { %4501 = vmatpush1.bf16.msra.mxu0 %v6147_v62  ;;  %4829 = vmatpush1.bf16.msra.mxu1 %v6150_v63  ;;  %v6242_v62 = vld [vmem:[%s7790_s4 + $0x788] ss:$16 sps:$4 sm:$0xff]   ;;  %v6247_v63 = vld [vmem:[%s7790_s4 + $0x7a4] ss:$16 sps:$4 sm:$0xff]  }
 0x1cf   : > { %4502 = vmatprep.subr.bf16.mxu0 %v6155_v1  ;;  %4830 = vmatprep.subr.bf16.mxu1 %v6158_v2  ;;  %v6250_v1 = vld [vmem:[%s7790_s4 + $0x7ac] ss:$16 sps:$4 sm:$0xff]   ;;  %v6245_v2 = vld [vmem:[%s7790_s4 + $0x7a0] ss:$16 sps:$4 sm:$0xff]  }
 0x1d2   : > { %4503 = vmatpush1.bf16.msra.mxu0 %v6153_v3  ;;  %4831 = vmatpush1.bf16.msra.mxu1 %v6156_v4  ;;  %v6248_v3 = vld [vmem:[%s7790_s4 + $0x7a8] ss:$16 sps:$4 sm:$0xff]   ;;  %v6253_v4 = vld [vmem:[%s7790_s4 + $0x7c4] ss:$16 sps:$4 sm:$0xff]  }
 0x1d3   : > { %4504 = vmatprep.subr.bf16.mxu0 %v6161_v5  ;;  %4832 = vmatprep.subr.bf16.mxu1 %v6164_v6  ;;  %v6256_v5 = vld [vmem:[%s7790_s4 + $0x7cc] ss:$16 sps:$4 sm:$0xff]   ;;  %v6251_v6 = vld [vmem:[%s7790_s4 + $0x7c0] ss:$16 sps:$4 sm:$0xff]  }
 0x1d6   : > { %4505 = vmatpush1.bf16.msra.mxu0 %v6159_v7  ;;  %4833 = vmatpush1.bf16.msra.mxu1 %v6162_v8  ;;  %v6254_v7 = vld [vmem:[%s7790_s4 + $0x7c8] ss:$16 sps:$4 sm:$0xff]   ;;  %v6259_v8 = vld [vmem:[%s7790_s4 + $0x7e4] ss:$16 sps:$4 sm:$0xff]  }
 0x1d7   : > { %4515 = vmatprep.subr.bf16.mxu0 %v6169_v9  ;;  %4843 = vmatprep.subr.bf16.mxu1 %v6172_v10  ;;  %v6262_v9 = vld [vmem:[%s7790_s4 + $0x7ec] ss:$16 sps:$4 sm:$0xff]   ;;  %v6257_v10 = vld [vmem:[%s7790_s4 + $0x7e0] ss:$16 sps:$4 sm:$0xff]  }
 0x1d9   : > { %4507 = vmatmul.mubr.bf16.vlgmr.msra.gmra.mrb[0].mxu0 %v5257_v0  ;;  %4835 = vmatmul.mubr.bf16.vlgmr.msra.gmra.mrb[0].mxu1 %v5257_v0  ;;  %v6260_v0 = vld [vmem:[%s7790_s4 + $0x7e8] ss:$16 sps:$4 sm:$0xff]  }
 0x1da   : > { %4516 = vmatpush1.bf16.msra.mxu0 %v6167_v12  ;;  %4844 = vmatpush1.bf16.msra.mxu1 %v6170_v14  ;;  %v6267_v12 = vld [vmem:[%s7790_s4 + $0x804] ss:$16 sps:$4 sm:$0xff]   ;;  %v6270_v14 = vld [vmem:[%s7790_s4 + $0x80c] ss:$16 sps:$4 sm:$0xff]  }
 0x1db   : > { %4517 = vmatprep.subr.bf16.mxu0 %v6175_v15  ;;  %4845 = vmatprep.subr.bf16.mxu1 %v6178_v16  ;;  %v5259_v15 = vcombine.low %v8010_v13, %v8010_v13  ;;  %v6265_v16 = vld [vmem:[%s7790_s4 + $0x800] ss:$16 sps:$4 sm:$0xff]  }
 0x1dc   : > { %4547 = vmatprep.mubr.bf16.mxu0 %v5260_v11  ;;  %4875 = vmatprep.mubr.bf16.mxu1 %v5260_v11  ;;  %v8083_v11 = vld [vmem:[%s8423_s0 + $0x20] sm:$0xff] }
 0x1dd   : > { %v5262_v13 = vcombine.high %v8083_v11, %v8083_v11 }
 0x1de   : > { %4518 = vmatpush1.bf16.msra.mxu0 %v6173_v17  ;;  %4846 = vmatpush1.bf16.msra.mxu1 %v6176_v18  ;;  %v6268_v17 = vld [vmem:[%s7790_s4 + $0x808] ss:$16 sps:$4 sm:$0xff]   ;;  %v6273_v18 = vld [vmem:[%s7790_s4 + $0x824] ss:$16 sps:$4 sm:$0xff]  }
 0x1df   : > { %4519 = vmatprep.subr.bf16.mxu0 %v6181_v19  ;;  %4847 = vmatprep.subr.bf16.mxu1 %v6184_v20  ;;  %v6276_v19 = vld [vmem:[%s7790_s4 + $0x82c] ss:$16 sps:$4 sm:$0xff]   ;;  %v6271_v20 = vld [vmem:[%s7790_s4 + $0x820] ss:$16 sps:$4 sm:$0xff]  }
 0x1e2   : > { %4520 = vmatpush1.bf16.msra.mxu0 %v6179_v21  ;;  %4848 = vmatpush1.bf16.msra.mxu1 %v6182_v22  ;;  %v6274_v21 = vld [vmem:[%s7790_s4 + $0x828] ss:$16 sps:$4 sm:$0xff]   ;;  %v6279_v22 = vld [vmem:[%s7790_s4 + $0x844] ss:$16 sps:$4 sm:$0xff]  }
 0x1e3   : > { %4521 = vmatprep.subr.bf16.mxu0 %v6187_v23  ;;  %4849 = vmatprep.subr.bf16.mxu1 %v6190_v24  ;;  %v6282_v23 = vld [vmem:[%s7790_s4 + $0x84c] ss:$16 sps:$4 sm:$0xff]   ;;  %v6277_v24 = vld [vmem:[%s7790_s4 + $0x840] ss:$16 sps:$4 sm:$0xff]  }
 0x1e6   : > { %4522 = vmatpush1.bf16.msra.mxu0 %v6185_v25  ;;  %4850 = vmatpush1.bf16.msra.mxu1 %v6188_v26  ;;  %v6280_v25 = vld [vmem:[%s7790_s4 + $0x848] ss:$16 sps:$4 sm:$0xff]   ;;  %v6285_v26 = vld [vmem:[%s7790_s4 + $0x864] ss:$16 sps:$4 sm:$0xff]  }
 0x1e7   : > { %4523 = vmatprep.subr.bf16.mxu0 %v6193_v27  ;;  %4851 = vmatprep.subr.bf16.mxu1 %v6196_v28  ;;  %v6288_v27 = vld [vmem:[%s7790_s4 + $0x86c] ss:$16 sps:$4 sm:$0xff]   ;;  %v6283_v28 = vld [vmem:[%s7790_s4 + $0x860] ss:$16 sps:$4 sm:$0xff]  }
 0x1ea   : > { %4524 = vmatpush1.bf16.msra.mxu0 %v6191_v29  ;;  %4852 = vmatpush1.bf16.msra.mxu1 %v6194_v30  ;;  %v6286_v29 = vld [vmem:[%s7790_s4 + $0x868] ss:$16 sps:$4 sm:$0xff]   ;;  %v6291_v30 = vld [vmem:[%s7790_s4 + $0x884] ss:$16 sps:$4 sm:$0xff]  }
 0x1eb   : > { %4525 = vmatprep.subr.bf16.mxu0 %v6199_v31  ;;  %4853 = vmatprep.subr.bf16.mxu1 %v6202_v32  ;;  %v6294_v31 = vld [vmem:[%s7790_s4 + $0x88c] ss:$16 sps:$4 sm:$0xff]   ;;  %v6289_v32 = vld [vmem:[%s7790_s4 + $0x880] ss:$16 sps:$4 sm:$0xff]  }
 0x1ee   : > { %4526 = vmatpush1.bf16.msra.mxu0 %v6197_v33  ;;  %4854 = vmatpush1.bf16.msra.mxu1 %v6200_v34  ;;  %v6292_v33 = vld [vmem:[%s7790_s4 + $0x888] ss:$16 sps:$4 sm:$0xff]   ;;  %v6297_v34 = vld [vmem:[%s7790_s4 + $0x8a4] ss:$16 sps:$4 sm:$0xff]  }
 0x1ef   : > { %4527 = vmatprep.subr.bf16.mxu0 %v6205_v35  ;;  %4855 = vmatprep.subr.bf16.mxu1 %v6208_v36  ;;  %v6300_v35 = vld [vmem:[%s7790_s4 + $0x8ac] ss:$16 sps:$4 sm:$0xff]   ;;  %v6295_v36 = vld [vmem:[%s7790_s4 + $0x8a0] ss:$16 sps:$4 sm:$0xff]  }
 0x1f2   : > { %4528 = vmatpush1.bf16.msra.mxu0 %v6203_v37  ;;  %4856 = vmatpush1.bf16.msra.mxu1 %v6206_v38  ;;  %v6298_v37 = vld [vmem:[%s7790_s4 + $0x8a8] ss:$16 sps:$4 sm:$0xff]   ;;  %v6303_v38 = vld [vmem:[%s7790_s4 + $0x8c4] ss:$16 sps:$4 sm:$0xff]  }
 0x1f3   : > { %4529 = vmatprep.subr.bf16.mxu0 %v6211_v39  ;;  %4857 = vmatprep.subr.bf16.mxu1 %v6214_v40  ;;  %v6306_v39 = vld [vmem:[%s7790_s4 + $0x8cc] ss:$16 sps:$4 sm:$0xff]   ;;  %v6301_v40 = vld [vmem:[%s7790_s4 + $0x8c0] ss:$16 sps:$4 sm:$0xff]  }
 0x1f6   : > { %4530 = vmatpush1.bf16.msra.mxu0 %v6209_v41  ;;  %4858 = vmatpush1.bf16.msra.mxu1 %v6212_v42  ;;  %v6304_v41 = vld [vmem:[%s7790_s4 + $0x8c8] ss:$16 sps:$4 sm:$0xff]   ;;  %v6309_v42 = vld [vmem:[%s7790_s4 + $0x8e4] ss:$16 sps:$4 sm:$0xff]  }
 0x1f7   : > { %4531 = vmatprep.subr.bf16.mxu0 %v6217_v43  ;;  %4859 = vmatprep.subr.bf16.mxu1 %v6220_v44  ;;  %v6312_v43 = vld [vmem:[%s7790_s4 + $0x8ec] ss:$16 sps:$4 sm:$0xff]   ;;  %v6307_v44 = vld [vmem:[%s7790_s4 + $0x8e0] ss:$16 sps:$4 sm:$0xff]  }
 0x1fa   : > { %4532 = vmatpush1.bf16.msra.mxu0 %v6215_v45  ;;  %4860 = vmatpush1.bf16.msra.mxu1 %v6218_v46  ;;  %v6310_v45 = vld [vmem:[%s7790_s4 + $0x8e8] ss:$16 sps:$4 sm:$0xff]   ;;  %v6315_v46 = vld [vmem:[%s7790_s4 + $0x904] ss:$16 sps:$4 sm:$0xff]  }
 0x1fb   : > { %4533 = vmatprep.subr.bf16.mxu0 %v6223_v47  ;;  %4861 = vmatprep.subr.bf16.mxu1 %v6226_v48  ;;  %v6318_v47 = vld [vmem:[%s7790_s4 + $0x90c] ss:$16 sps:$4 sm:$0xff]   ;;  %v6313_v48 = vld [vmem:[%s7790_s4 + $0x900] ss:$16 sps:$4 sm:$0xff]  }
 0x1fe   : > { %4534 = vmatpush1.bf16.msra.mxu0 %v6221_v49  ;;  %4862 = vmatpush1.bf16.msra.mxu1 %v6224_v50  ;;  %v6316_v49 = vld [vmem:[%s7790_s4 + $0x908] ss:$16 sps:$4 sm:$0xff]   ;;  %v6321_v50 = vld [vmem:[%s7790_s4 + $0x924] ss:$16 sps:$4 sm:$0xff]  }
 0x1ff   : > { %4535 = vmatprep.subr.bf16.mxu0 %v6229_v51  ;;  %4863 = vmatprep.subr.bf16.mxu1 %v6232_v52  ;;  %v6324_v51 = vld [vmem:[%s7790_s4 + $0x92c] ss:$16 sps:$4 sm:$0xff]   ;;  %v6319_v52 = vld [vmem:[%s7790_s4 + $0x920] ss:$16 sps:$4 sm:$0xff]  }
 0x202   : > { %4536 = vmatpush1.bf16.msra.mxu0 %v6227_v53  ;;  %4864 = vmatpush1.bf16.msra.mxu1 %v6230_v54  ;;  %v6322_v53 = vld [vmem:[%s7790_s4 + $0x928] ss:$16 sps:$4 sm:$0xff]   ;;  %v6327_v54 = vld [vmem:[%s7790_s4 + $0x944] ss:$16 sps:$4 sm:$0xff]  }
 0x203   : > { %4537 = vmatprep.subr.bf16.mxu0 %v6235_v55  ;;  %4865 = vmatprep.subr.bf16.mxu1 %v6238_v56  ;;  %v6330_v55 = vld [vmem:[%s7790_s4 + $0x94c] ss:$16 sps:$4 sm:$0xff]   ;;  %v6325_v56 = vld [vmem:[%s7790_s4 + $0x940] ss:$16 sps:$4 sm:$0xff]  }
 0x206   : > { %4538 = vmatpush1.bf16.msra.mxu0 %v6233_v57  ;;  %4866 = vmatpush1.bf16.msra.mxu1 %v6236_v58  ;;  %v6328_v57 = vld [vmem:[%s7790_s4 + $0x948] ss:$16 sps:$4 sm:$0xff]   ;;  %v6333_v58 = vld [vmem:[%s7790_s4 + $0x964] ss:$16 sps:$4 sm:$0xff]  }
 0x207   : > { %4539 = vmatprep.subr.bf16.mxu0 %v6241_v59  ;;  %4867 = vmatprep.subr.bf16.mxu1 %v6244_v60  ;;  %v6336_v59 = vld [vmem:[%s7790_s4 + $0x96c] ss:$16 sps:$4 sm:$0xff]   ;;  %v6331_v60 = vld [vmem:[%s7790_s4 + $0x960] ss:$16 sps:$4 sm:$0xff]  }
 0x20a   : > { %4540 = vmatpush1.bf16.msra.mxu0 %v6239_v61  ;;  %4868 = vmatpush1.bf16.msra.mxu1 %v6242_v62  ;;  %v6334_v61 = vld [vmem:[%s7790_s4 + $0x968] ss:$16 sps:$4 sm:$0xff]   ;;  %v6339_v62 = vld [vmem:[%s7790_s4 + $0x984] ss:$16 sps:$4 sm:$0xff]  }
 0x20b   : > { %4541 = vmatprep.subr.bf16.mxu0 %v6247_v63  ;;  %4869 = vmatprep.subr.bf16.mxu1 %v6250_v1  ;;  %v6342_v63 = vld [vmem:[%s7790_s4 + $0x98c] ss:$16 sps:$4 sm:$0xff]   ;;  %v6337_v1 = vld [vmem:[%s7790_s4 + $0x980] ss:$16 sps:$4 sm:$0xff]  }
 0x20e   : > { %4542 = vmatpush1.bf16.msra.mxu0 %v6245_v2  ;;  %4870 = vmatpush1.bf16.msra.mxu1 %v6248_v3  ;;  %v6340_v2 = vld [vmem:[%s7790_s4 + $0x988] ss:$16 sps:$4 sm:$0xff]   ;;  %v6345_v3 = vld [vmem:[%s7790_s4 + $0x9a4] ss:$16 sps:$4 sm:$0xff]  }
 0x20f   : > { %4543 = vmatprep.subr.bf16.mxu0 %v6253_v4  ;;  %4871 = vmatprep.subr.bf16.mxu1 %v6256_v5  ;;  %v6348_v4 = vld [vmem:[%s7790_s4 + $0x9ac] ss:$16 sps:$4 sm:$0xff]   ;;  %v6343_v5 = vld [vmem:[%s7790_s4 + $0x9a0] ss:$16 sps:$4 sm:$0xff]  }
 0x212   : > { %4544 = vmatpush1.bf16.msra.mxu0 %v6251_v6  ;;  %4872 = vmatpush1.bf16.msra.mxu1 %v6254_v7  ;;  %v6346_v6 = vld [vmem:[%s7790_s4 + $0x9a8] ss:$16 sps:$4 sm:$0xff]   ;;  %v6351_v7 = vld [vmem:[%s7790_s4 + $0x9c4] ss:$16 sps:$4 sm:$0xff]  }
 0x213   : > { %4545 = vmatprep.subr.bf16.mxu0 %v6259_v8  ;;  %4873 = vmatprep.subr.bf16.mxu1 %v6262_v9  ;;  %v6354_v8 = vld [vmem:[%s7790_s4 + $0x9cc] ss:$16 sps:$4 sm:$0xff]   ;;  %v6349_v9 = vld [vmem:[%s7790_s4 + $0x9c0] ss:$16 sps:$4 sm:$0xff]  }
 0x216   : > { %4546 = vmatpush1.bf16.msra.mxu0 %v6257_v10  ;;  %4874 = vmatpush1.bf16.msra.mxu1 %v6260_v0  ;;  %v6352_v10 = vld [vmem:[%s7790_s4 + $0x9c8] ss:$16 sps:$4 sm:$0xff]   ;;  %v6357_v0 = vld [vmem:[%s7790_s4 + $0x9e4] ss:$16 sps:$4 sm:$0xff]  }
 0x217   : > { %4556 = vmatprep.subr.bf16.mxu0 %v6267_v12  ;;  %4884 = vmatprep.subr.bf16.mxu1 %v6270_v14  ;;  %v6360_v12 = vld [vmem:[%s7790_s4 + $0x9ec] ss:$16 sps:$4 sm:$0xff]   ;;  %v6355_v14 = vld [vmem:[%s7790_s4 + $0x9e0] ss:$16 sps:$4 sm:$0xff]  }
 0x219   : > { %4548 = vmatmul.mubr.bf16.vlgmr.msra.gmra.mrb[0].mxu0 %v5259_v15  ;;  %4876 = vmatmul.mubr.bf16.vlgmr.msra.gmra.mrb[0].mxu1 %v5259_v15  ;;  %v6358_v15 = vld [vmem:[%s7790_s4 + $0x9e8] ss:$16 sps:$4 sm:$0xff]  }
 0x21a   : > { %4557 = vmatpush1.bf16.msra.mxu0 %v6265_v16  ;;  %4885 = vmatpush1.bf16.msra.mxu1 %v6268_v17  ;;  %v6365_v16 = vld [vmem:[%s7790_s4 + $0xa04] ss:$16 sps:$4 sm:$0xff]   ;;  %v6368_v17 = vld [vmem:[%s7790_s4 + $0xa0c] ss:$16 sps:$4 sm:$0xff]  }
 0x21b   : > { %4558 = vmatprep.subr.bf16.mxu0 %v6273_v18  ;;  %4886 = vmatprep.subr.bf16.mxu1 %v6276_v19  ;;  %v8153_v18 = vld [vmem:[%s8423_s0 + $0x28] sm:$0xff]  ;;  %v5261_v19 = vcombine.low %v8083_v11, %v8083_v11  ;;  %v6369_v11 = vld [vmem:[%s7790_s4 + $0xa20] ss:$16 sps:$4 sm:$0xff]  }
 0x21c   : > { %4588 = vmatprep.mubr.bf16.mxu0 %v5262_v13  ;;  %4916 = vmatprep.mubr.bf16.mxu1 %v5262_v13  ;;  %v6363_v13 = vld [vmem:[%s7790_s4 + $0xa00] ss:$16 sps:$4 sm:$0xff]  }
 0x21e   : > { %4559 = vmatpush1.bf16.msra.mxu0 %v6271_v20  ;;  %4887 = vmatpush1.bf16.msra.mxu1 %v6274_v21  ;;  %v6366_v20 = vld [vmem:[%s7790_s4 + $0xa08] ss:$16 sps:$4 sm:$0xff]   ;;  %v6371_v21 = vld [vmem:[%s7790_s4 + $0xa24] ss:$16 sps:$4 sm:$0xff]  }
 0x21f   : > { %4560 = vmatprep.subr.bf16.mxu0 %v6279_v22  ;;  %4888 = vmatprep.subr.bf16.mxu1 %v6282_v23  ;;  %v6374_v22 = vld [vmem:[%s7790_s4 + $0xa2c] ss:$16 sps:$4 sm:$0xff]   ;;  %v5264_v23 = vcombine.high %v8153_v18, %v8153_v18 }
 0x222   : > { %4561 = vmatpush1.bf16.msra.mxu0 %v6277_v24  ;;  %4889 = vmatpush1.bf16.msra.mxu1 %v6280_v25  ;;  %v6372_v24 = vld [vmem:[%s7790_s4 + $0xa28] ss:$16 sps:$4 sm:$0xff]   ;;  %v6377_v25 = vld [vmem:[%s7790_s4 + $0xa44] ss:$16 sps:$4 sm:$0xff]  }
 0x223   : > { %4562 = vmatprep.subr.bf16.mxu0 %v6285_v26  ;;  %4890 = vmatprep.subr.bf16.mxu1 %v6288_v27  ;;  %v6380_v26 = vld [vmem:[%s7790_s4 + $0xa4c] ss:$16 sps:$4 sm:$0xff]   ;;  %v6375_v27 = vld [vmem:[%s7790_s4 + $0xa40] ss:$16 sps:$4 sm:$0xff]  }
 0x226   : > { %4563 = vmatpush1.bf16.msra.mxu0 %v6283_v28  ;;  %4891 = vmatpush1.bf16.msra.mxu1 %v6286_v29  ;;  %v6378_v28 = vld [vmem:[%s7790_s4 + $0xa48] ss:$16 sps:$4 sm:$0xff]   ;;  %v6383_v29 = vld [vmem:[%s7790_s4 + $0xa64] ss:$16 sps:$4 sm:$0xff]  }
 0x227   : > { %4564 = vmatprep.subr.bf16.mxu0 %v6291_v30  ;;  %4892 = vmatprep.subr.bf16.mxu1 %v6294_v31  ;;  %v6386_v30 = vld [vmem:[%s7790_s4 + $0xa6c] ss:$16 sps:$4 sm:$0xff]   ;;  %v6381_v31 = vld [vmem:[%s7790_s4 + $0xa60] ss:$16 sps:$4 sm:$0xff]  }
 0x22a   : > { %4565 = vmatpush1.bf16.msra.mxu0 %v6289_v32  ;;  %4893 = vmatpush1.bf16.msra.mxu1 %v6292_v33  ;;  %v6384_v32 = vld [vmem:[%s7790_s4 + $0xa68] ss:$16 sps:$4 sm:$0xff]   ;;  %v6389_v33 = vld [vmem:[%s7790_s4 + $0xa84] ss:$16 sps:$4 sm:$0xff]  }
 0x22b   : > { %4566 = vmatprep.subr.bf16.mxu0 %v6297_v34  ;;  %4894 = vmatprep.subr.bf16.mxu1 %v6300_v35  ;;  %v6392_v34 = vld [vmem:[%s7790_s4 + $0xa8c] ss:$16 sps:$4 sm:$0xff]   ;;  %v6387_v35 = vld [vmem:[%s7790_s4 + $0xa80] ss:$16 sps:$4 sm:$0xff]  }
 0x22e   : > { %4567 = vmatpush1.bf16.msra.mxu0 %v6295_v36  ;;  %4895 = vmatpush1.bf16.msra.mxu1 %v6298_v37  ;;  %v6390_v36 = vld [vmem:[%s7790_s4 + $0xa88] ss:$16 sps:$4 sm:$0xff]   ;;  %v6395_v37 = vld [vmem:[%s7790_s4 + $0xaa4] ss:$16 sps:$4 sm:$0xff]  }
 0x22f   : > { %4568 = vmatprep.subr.bf16.mxu0 %v6303_v38  ;;  %4896 = vmatprep.subr.bf16.mxu1 %v6306_v39  ;;  %v6398_v38 = vld [vmem:[%s7790_s4 + $0xaac] ss:$16 sps:$4 sm:$0xff]   ;;  %v6393_v39 = vld [vmem:[%s7790_s4 + $0xaa0] ss:$16 sps:$4 sm:$0xff]  }
 0x232   : > { %4569 = vmatpush1.bf16.msra.mxu0 %v6301_v40  ;;  %4897 = vmatpush1.bf16.msra.mxu1 %v6304_v41  ;;  %v6396_v40 = vld [vmem:[%s7790_s4 + $0xaa8] ss:$16 sps:$4 sm:$0xff]   ;;  %v6401_v41 = vld [vmem:[%s7790_s4 + $0xac4] ss:$16 sps:$4 sm:$0xff]  }
 0x233   : > { %4570 = vmatprep.subr.bf16.mxu0 %v6309_v42  ;;  %4898 = vmatprep.subr.bf16.mxu1 %v6312_v43  ;;  %v6404_v42 = vld [vmem:[%s7790_s4 + $0xacc] ss:$16 sps:$4 sm:$0xff]   ;;  %v6399_v43 = vld [vmem:[%s7790_s4 + $0xac0] ss:$16 sps:$4 sm:$0xff]  }
 0x236   : > { %4571 = vmatpush1.bf16.msra.mxu0 %v6307_v44  ;;  %4899 = vmatpush1.bf16.msra.mxu1 %v6310_v45  ;;  %v6402_v44 = vld [vmem:[%s7790_s4 + $0xac8] ss:$16 sps:$4 sm:$0xff]   ;;  %v6407_v45 = vld [vmem:[%s7790_s4 + $0xae4] ss:$16 sps:$4 sm:$0xff]  }
 0x237   : > { %4572 = vmatprep.subr.bf16.mxu0 %v6315_v46  ;;  %4900 = vmatprep.subr.bf16.mxu1 %v6318_v47  ;;  %v6410_v46 = vld [vmem:[%s7790_s4 + $0xaec] ss:$16 sps:$4 sm:$0xff]   ;;  %v6405_v47 = vld [vmem:[%s7790_s4 + $0xae0] ss:$16 sps:$4 sm:$0xff]  }
 0x23a   : > { %4573 = vmatpush1.bf16.msra.mxu0 %v6313_v48  ;;  %4901 = vmatpush1.bf16.msra.mxu1 %v6316_v49  ;;  %v6408_v48 = vld [vmem:[%s7790_s4 + $0xae8] ss:$16 sps:$4 sm:$0xff]   ;;  %v6413_v49 = vld [vmem:[%s7790_s4 + $0xb04] ss:$16 sps:$4 sm:$0xff]  }
 0x23b   : > { %4574 = vmatprep.subr.bf16.mxu0 %v6321_v50  ;;  %4902 = vmatprep.subr.bf16.mxu1 %v6324_v51  ;;  %v6416_v50 = vld [vmem:[%s7790_s4 + $0xb0c] ss:$16 sps:$4 sm:$0xff]   ;;  %v6411_v51 = vld [vmem:[%s7790_s4 + $0xb00] ss:$16 sps:$4 sm:$0xff]  }
 0x23e   : > { %4575 = vmatpush1.bf16.msra.mxu0 %v6319_v52  ;;  %4903 = vmatpush1.bf16.msra.mxu1 %v6322_v53  ;;  %v6414_v52 = vld [vmem:[%s7790_s4 + $0xb08] ss:$16 sps:$4 sm:$0xff]   ;;  %v6419_v53 = vld [vmem:[%s7790_s4 + $0xb24] ss:$16 sps:$4 sm:$0xff]  }
 0x23f   : > { %4576 = vmatprep.subr.bf16.mxu0 %v6327_v54  ;;  %4904 = vmatprep.subr.bf16.mxu1 %v6330_v55  ;;  %v6422_v54 = vld [vmem:[%s7790_s4 + $0xb2c] ss:$16 sps:$4 sm:$0xff]   ;;  %v6417_v55 = vld [vmem:[%s7790_s4 + $0xb20] ss:$16 sps:$4 sm:$0xff]  }
 0x242   : > { %4577 = vmatpush1.bf16.msra.mxu0 %v6325_v56  ;;  %4905 = vmatpush1.bf16.msra.mxu1 %v6328_v57  ;;  %v6420_v56 = vld [vmem:[%s7790_s4 + $0xb28] ss:$16 sps:$4 sm:$0xff]   ;;  %v6425_v57 = vld [vmem:[%s7790_s4 + $0xb44] ss:$16 sps:$4 sm:$0xff]  }
 0x243   : > { %4578 = vmatprep.subr.bf16.mxu0 %v6333_v58  ;;  %4906 = vmatprep.subr.bf16.mxu1 %v6336_v59  ;;  %v6428_v58 = vld [vmem:[%s7790_s4 + $0xb4c] ss:$16 sps:$4 sm:$0xff]   ;;  %v6423_v59 = vld [vmem:[%s7790_s4 + $0xb40] ss:$16 sps:$4 sm:$0xff]  }
 0x246   : > { %4579 = vmatpush1.bf16.msra.mxu0 %v6331_v60  ;;  %4907 = vmatpush1.bf16.msra.mxu1 %v6334_v61  ;;  %v6426_v60 = vld [vmem:[%s7790_s4 + $0xb48] ss:$16 sps:$4 sm:$0xff]   ;;  %v6431_v61 = vld [vmem:[%s7790_s4 + $0xb64] ss:$16 sps:$4 sm:$0xff]  }
 0x247   : > { %4580 = vmatprep.subr.bf16.mxu0 %v6339_v62  ;;  %4908 = vmatprep.subr.bf16.mxu1 %v6342_v63  ;;  %v6434_v62 = vld [vmem:[%s7790_s4 + $0xb6c] ss:$16 sps:$4 sm:$0xff]   ;;  %v6429_v63 = vld [vmem:[%s7790_s4 + $0xb60] ss:$16 sps:$4 sm:$0xff]  }
 0x24a   : > { %4581 = vmatpush1.bf16.msra.mxu0 %v6337_v1  ;;  %4909 = vmatpush1.bf16.msra.mxu1 %v6340_v2  ;;  %v6432_v1 = vld [vmem:[%s7790_s4 + $0xb68] ss:$16 sps:$4 sm:$0xff]   ;;  %v6437_v2 = vld [vmem:[%s7790_s4 + $0xb84] ss:$16 sps:$4 sm:$0xff]  }
 0x24b   : > { %4582 = vmatprep.subr.bf16.mxu0 %v6345_v3  ;;  %4910 = vmatprep.subr.bf16.mxu1 %v6348_v4  ;;  %v6440_v3 = vld [vmem:[%s7790_s4 + $0xb8c] ss:$16 sps:$4 sm:$0xff]   ;;  %v6435_v4 = vld [vmem:[%s7790_s4 + $0xb80] ss:$16 sps:$4 sm:$0xff]  }
 0x24e   : > { %4583 = vmatpush1.bf16.msra.mxu0 %v6343_v5  ;;  %4911 = vmatpush1.bf16.msra.mxu1 %v6346_v6  ;;  %v6438_v5 = vld [vmem:[%s7790_s4 + $0xb88] ss:$16 sps:$4 sm:$0xff]   ;;  %v6443_v6 = vld [vmem:[%s7790_s4 + $0xba4] ss:$16 sps:$4 sm:$0xff]  }
 0x24f   : > { %4584 = vmatprep.subr.bf16.mxu0 %v6351_v7  ;;  %4912 = vmatprep.subr.bf16.mxu1 %v6354_v8  ;;  %v6446_v7 = vld [vmem:[%s7790_s4 + $0xbac] ss:$16 sps:$4 sm:$0xff]   ;;  %v6441_v8 = vld [vmem:[%s7790_s4 + $0xba0] ss:$16 sps:$4 sm:$0xff]  }
 0x252   : > { %4585 = vmatpush1.bf16.msra.mxu0 %v6349_v9  ;;  %4913 = vmatpush1.bf16.msra.mxu1 %v6352_v10  ;;  %v6444_v9 = vld [vmem:[%s7790_s4 + $0xba8] ss:$16 sps:$4 sm:$0xff]   ;;  %v6449_v10 = vld [vmem:[%s7790_s4 + $0xbc4] ss:$16 sps:$4 sm:$0xff]  }
 0x253   : > { %4586 = vmatprep.subr.bf16.mxu0 %v6357_v0  ;;  %4914 = vmatprep.subr.bf16.mxu1 %v6360_v12  ;;  %v6452_v0 = vld [vmem:[%s7790_s4 + $0xbcc] ss:$16 sps:$4 sm:$0xff]   ;;  %v6447_v12 = vld [vmem:[%s7790_s4 + $0xbc0] ss:$16 sps:$4 sm:$0xff]  }
 0x256   : > { %4587 = vmatpush1.bf16.msra.mxu0 %v6355_v14  ;;  %4915 = vmatpush1.bf16.msra.mxu1 %v6358_v15  ;;  %v6450_v14 = vld [vmem:[%s7790_s4 + $0xbc8] ss:$16 sps:$4 sm:$0xff]   ;;  %v6455_v15 = vld [vmem:[%s7790_s4 + $0xbe4] ss:$16 sps:$4 sm:$0xff]  }
 0x257   : > { %4597 = vmatprep.subr.bf16.mxu0 %v6365_v16  ;;  %4925 = vmatprep.subr.bf16.mxu1 %v6368_v17  ;;  %v6458_v16 = vld [vmem:[%s7790_s4 + $0xbec] ss:$16 sps:$4 sm:$0xff]   ;;  %v6453_v17 = vld [vmem:[%s7790_s4 + $0xbe0] ss:$16 sps:$4 sm:$0xff]  }
 0x259   : > { %4589 = vmatmul.mubr.bf16.vlgmr.msra.gmra.mrb[0].mxu0 %v5261_v19  ;;  %4917 = vmatmul.mubr.bf16.vlgmr.msra.gmra.mrb[0].mxu1 %v5261_v19  ;;  %v6456_v19 = vld [vmem:[%s7790_s4 + $0xbe8] ss:$16 sps:$4 sm:$0xff]  }
 0x25a   : > { %4598 = vmatpush1.bf16.msra.mxu0 %v6363_v13  ;;  %4926 = vmatpush1.bf16.msra.mxu1 %v6366_v20  ;;  %v6463_v13 = vld [vmem:[%s7790_s4 + $0xc04] ss:$16 sps:$4 sm:$0xff]   ;;  %v6466_v20 = vld [vmem:[%s7790_s4 + $0xc0c] ss:$16 sps:$4 sm:$0xff]  }
 0x25b   : > { %4599 = vmatprep.subr.bf16.mxu0 %v6371_v21  ;;  %4927 = vmatprep.subr.bf16.mxu1 %v6374_v22  ;;  %v5263_v21 = vcombine.low %v8153_v18, %v8153_v18  ;;  %v8228_v22 = vld [vmem:[%s8423_s0 + $0x30] sm:$0xff] }
 0x25c   : > { %4629 = vmatprep.mubr.bf16.mxu0 %v5264_v23  ;;  %4957 = vmatprep.mubr.bf16.mxu1 %v5264_v23  ;;  %v6461_v23 = vld [vmem:[%s7790_s4 + $0xc00] ss:$16 sps:$4 sm:$0xff]   ;;  %v5266_v18 = vcombine.high %v8228_v22, %v8228_v22 }
 0x25e   : > { %4600 = vmatpush1.bf16.msra.mxu0 %v6369_v11  ;;  %4928 = vmatpush1.bf16.msra.mxu1 %v6372_v24  ;;  %v6464_v11 = vld [vmem:[%s7790_s4 + $0xc08] ss:$16 sps:$4 sm:$0xff]   ;;  %v6469_v24 = vld [vmem:[%s7790_s4 + $0xc24] ss:$16 sps:$4 sm:$0xff]  }
 0x25f   : > { %4601 = vmatprep.subr.bf16.mxu0 %v6377_v25  ;;  %4929 = vmatprep.subr.bf16.mxu1 %v6380_v26  ;;  %v6472_v25 = vld [vmem:[%s7790_s4 + $0xc2c] ss:$16 sps:$4 sm:$0xff]   ;;  %v6467_v26 = vld [vmem:[%s7790_s4 + $0xc20] ss:$16 sps:$4 sm:$0xff]  }
 0x262   : > { %4602 = vmatpush1.bf16.msra.mxu0 %v6375_v27  ;;  %4930 = vmatpush1.bf16.msra.mxu1 %v6378_v28  ;;  %v6470_v27 = vld [vmem:[%s7790_s4 + $0xc28] ss:$16 sps:$4 sm:$0xff]   ;;  %v6475_v28 = vld [vmem:[%s7790_s4 + $0xc44] ss:$16 sps:$4 sm:$0xff]  }
 0x263   : > { %4603 = vmatprep.subr.bf16.mxu0 %v6383_v29  ;;  %4931 = vmatprep.subr.bf16.mxu1 %v6386_v30  ;;  %v6478_v29 = vld [vmem:[%s7790_s4 + $0xc4c] ss:$16 sps:$4 sm:$0xff]   ;;  %v6473_v30 = vld [vmem:[%s7790_s4 + $0xc40] ss:$16 sps:$4 sm:$0xff]  }
 0x266   : > { %4604 = vmatpush1.bf16.msra.mxu0 %v6381_v31  ;;  %4932 = vmatpush1.bf16.msra.mxu1 %v6384_v32  ;;  %v6476_v31 = vld [vmem:[%s7790_s4 + $0xc48] ss:$16 sps:$4 sm:$0xff]   ;;  %v6481_v32 = vld [vmem:[%s7790_s4 + $0xc64] ss:$16 sps:$4 sm:$0xff]  }
 0x267   : > { %4605 = vmatprep.subr.bf16.mxu0 %v6389_v33  ;;  %4933 = vmatprep.subr.bf16.mxu1 %v6392_v34  ;;  %v6484_v33 = vld [vmem:[%s7790_s4 + $0xc6c] ss:$16 sps:$4 sm:$0xff]   ;;  %v6479_v34 = vld [vmem:[%s7790_s4 + $0xc60] ss:$16 sps:$4 sm:$0xff]  }
 0x26a   : > { %4606 = vmatpush1.bf16.msra.mxu0 %v6387_v35  ;;  %4934 = vmatpush1.bf16.msra.mxu1 %v6390_v36  ;;  %v6482_v35 = vld [vmem:[%s7790_s4 + $0xc68] ss:$16 sps:$4 sm:$0xff]   ;;  %v6487_v36 = vld [vmem:[%s7790_s4 + $0xc84] ss:$16 sps:$4 sm:$0xff]  }
 0x26b   : > { %4607 = vmatprep.subr.bf16.mxu0 %v6395_v37  ;;  %4935 = vmatprep.subr.bf16.mxu1 %v6398_v38  ;;  %v6490_v37 = vld [vmem:[%s7790_s4 + $0xc8c] ss:$16 sps:$4 sm:$0xff]   ;;  %v6485_v38 = vld [vmem:[%s7790_s4 + $0xc80] ss:$16 sps:$4 sm:$0xff]  }
 0x26e   : > { %4608 = vmatpush1.bf16.msra.mxu0 %v6393_v39  ;;  %4936 = vmatpush1.bf16.msra.mxu1 %v6396_v40  ;;  %v6488_v39 = vld [vmem:[%s7790_s4 + $0xc88] ss:$16 sps:$4 sm:$0xff]   ;;  %v6493_v40 = vld [vmem:[%s7790_s4 + $0xca4] ss:$16 sps:$4 sm:$0xff]  }
 0x26f   : > { %4609 = vmatprep.subr.bf16.mxu0 %v6401_v41  ;;  %4937 = vmatprep.subr.bf16.mxu1 %v6404_v42  ;;  %v6496_v41 = vld [vmem:[%s7790_s4 + $0xcac] ss:$16 sps:$4 sm:$0xff]   ;;  %v6491_v42 = vld [vmem:[%s7790_s4 + $0xca0] ss:$16 sps:$4 sm:$0xff]  }
 0x272   : > { %4610 = vmatpush1.bf16.msra.mxu0 %v6399_v43  ;;  %4938 = vmatpush1.bf16.msra.mxu1 %v6402_v44  ;;  %v6494_v43 = vld [vmem:[%s7790_s4 + $0xca8] ss:$16 sps:$4 sm:$0xff]   ;;  %v6499_v44 = vld [vmem:[%s7790_s4 + $0xcc4] ss:$16 sps:$4 sm:$0xff]  }
 0x273   : > { %4611 = vmatprep.subr.bf16.mxu0 %v6407_v45  ;;  %4939 = vmatprep.subr.bf16.mxu1 %v6410_v46  ;;  %v6502_v45 = vld [vmem:[%s7790_s4 + $0xccc] ss:$16 sps:$4 sm:$0xff]   ;;  %v6497_v46 = vld [vmem:[%s7790_s4 + $0xcc0] ss:$16 sps:$4 sm:$0xff]  }
 0x276   : > { %4612 = vmatpush1.bf16.msra.mxu0 %v6405_v47  ;;  %4940 = vmatpush1.bf16.msra.mxu1 %v6408_v48  ;;  %v6500_v47 = vld [vmem:[%s7790_s4 + $0xcc8] ss:$16 sps:$4 sm:$0xff]   ;;  %v6505_v48 = vld [vmem:[%s7790_s4 + $0xce4] ss:$16 sps:$4 sm:$0xff]  }
 0x277   : > { %4613 = vmatprep.subr.bf16.mxu0 %v6413_v49  ;;  %4941 = vmatprep.subr.bf16.mxu1 %v6416_v50  ;;  %v6508_v49 = vld [vmem:[%s7790_s4 + $0xcec] ss:$16 sps:$4 sm:$0xff]   ;;  %v6503_v50 = vld [vmem:[%s7790_s4 + $0xce0] ss:$16 sps:$4 sm:$0xff]  }
 0x27a   : > { %4614 = vmatpush1.bf16.msra.mxu0 %v6411_v51  ;;  %4942 = vmatpush1.bf16.msra.mxu1 %v6414_v52  ;;  %v6506_v51 = vld [vmem:[%s7790_s4 + $0xce8] ss:$16 sps:$4 sm:$0xff]   ;;  %v6511_v52 = vld [vmem:[%s7790_s4 + $0xd04] ss:$16 sps:$4 sm:$0xff]  }
 0x27b   : > { %4615 = vmatprep.subr.bf16.mxu0 %v6419_v53  ;;  %4943 = vmatprep.subr.bf16.mxu1 %v6422_v54  ;;  %v6514_v53 = vld [vmem:[%s7790_s4 + $0xd0c] ss:$16 sps:$4 sm:$0xff]   ;;  %v6509_v54 = vld [vmem:[%s7790_s4 + $0xd00] ss:$16 sps:$4 sm:$0xff]  }
 0x27e   : > { %4616 = vmatpush1.bf16.msra.mxu0 %v6417_v55  ;;  %4944 = vmatpush1.bf16.msra.mxu1 %v6420_v56  ;;  %v6512_v55 = vld [vmem:[%s7790_s4 + $0xd08] ss:$16 sps:$4 sm:$0xff]   ;;  %v6517_v56 = vld [vmem:[%s7790_s4 + $0xd24] ss:$16 sps:$4 sm:$0xff]  }
 0x27f   : > { %4617 = vmatprep.subr.bf16.mxu0 %v6425_v57  ;;  %4945 = vmatprep.subr.bf16.mxu1 %v6428_v58  ;;  %v6520_v57 = vld [vmem:[%s7790_s4 + $0xd2c] ss:$16 sps:$4 sm:$0xff]   ;;  %v6515_v58 = vld [vmem:[%s7790_s4 + $0xd20] ss:$16 sps:$4 sm:$0xff]  }
 0x282   : > { %4618 = vmatpush1.bf16.msra.mxu0 %v6423_v59  ;;  %4946 = vmatpush1.bf16.msra.mxu1 %v6426_v60  ;;  %v6518_v59 = vld [vmem:[%s7790_s4 + $0xd28] ss:$16 sps:$4 sm:$0xff]   ;;  %v6523_v60 = vld [vmem:[%s7790_s4 + $0xd44] ss:$16 sps:$4 sm:$0xff]  }
 0x283   : > { %4619 = vmatprep.subr.bf16.mxu0 %v6431_v61  ;;  %4947 = vmatprep.subr.bf16.mxu1 %v6434_v62  ;;  %v6526_v61 = vld [vmem:[%s7790_s4 + $0xd4c] ss:$16 sps:$4 sm:$0xff]   ;;  %v6521_v62 = vld [vmem:[%s7790_s4 + $0xd40] ss:$16 sps:$4 sm:$0xff]  }
 0x286   : > { %4620 = vmatpush1.bf16.msra.mxu0 %v6429_v63  ;;  %4948 = vmatpush1.bf16.msra.mxu1 %v6432_v1  ;;  %v6524_v63 = vld [vmem:[%s7790_s4 + $0xd48] ss:$16 sps:$4 sm:$0xff]   ;;  %v6529_v1 = vld [vmem:[%s7790_s4 + $0xd64] ss:$16 sps:$4 sm:$0xff]  }
 0x287   : > { %4621 = vmatprep.subr.bf16.mxu0 %v6437_v2  ;;  %4949 = vmatprep.subr.bf16.mxu1 %v6440_v3  ;;  %v6532_v2 = vld [vmem:[%s7790_s4 + $0xd6c] ss:$16 sps:$4 sm:$0xff]   ;;  %v6527_v3 = vld [vmem:[%s7790_s4 + $0xd60] ss:$16 sps:$4 sm:$0xff]  }
 0x28a   : > { %4622 = vmatpush1.bf16.msra.mxu0 %v6435_v4  ;;  %4950 = vmatpush1.bf16.msra.mxu1 %v6438_v5  ;;  %v6530_v4 = vld [vmem:[%s7790_s4 + $0xd68] ss:$16 sps:$4 sm:$0xff]   ;;  %v6535_v5 = vld [vmem:[%s7790_s4 + $0xd84] ss:$16 sps:$4 sm:$0xff]  }
 0x28b   : > { %4623 = vmatprep.subr.bf16.mxu0 %v6443_v6  ;;  %4951 = vmatprep.subr.bf16.mxu1 %v6446_v7  ;;  %v6538_v6 = vld [vmem:[%s7790_s4 + $0xd8c] ss:$16 sps:$4 sm:$0xff]   ;;  %v6533_v7 = vld [vmem:[%s7790_s4 + $0xd80] ss:$16 sps:$4 sm:$0xff]  }
 0x28e   : > { %4624 = vmatpush1.bf16.msra.mxu0 %v6441_v8  ;;  %4952 = vmatpush1.bf16.msra.mxu1 %v6444_v9  ;;  %v6536_v8 = vld [vmem:[%s7790_s4 + $0xd88] ss:$16 sps:$4 sm:$0xff]   ;;  %v6541_v9 = vld [vmem:[%s7790_s4 + $0xda4] ss:$16 sps:$4 sm:$0xff]  }
 0x28f   : > { %4625 = vmatprep.subr.bf16.mxu0 %v6449_v10  ;;  %4953 = vmatprep.subr.bf16.mxu1 %v6452_v0  ;;  %v6544_v10 = vld [vmem:[%s7790_s4 + $0xdac] ss:$16 sps:$4 sm:$0xff]   ;;  %v6539_v0 = vld [vmem:[%s7790_s4 + $0xda0] ss:$16 sps:$4 sm:$0xff]  }
 0x292   : > { %4626 = vmatpush1.bf16.msra.mxu0 %v6447_v12  ;;  %4954 = vmatpush1.bf16.msra.mxu1 %v6450_v14  ;;  %v6542_v12 = vld [vmem:[%s7790_s4 + $0xda8] ss:$16 sps:$4 sm:$0xff]   ;;  %v6547_v14 = vld [vmem:[%s7790_s4 + $0xdc4] ss:$16 sps:$4 sm:$0xff]  }
 0x293   : > { %4627 = vmatprep.subr.bf16.mxu0 %v6455_v15  ;;  %4955 = vmatprep.subr.bf16.mxu1 %v6458_v16  ;;  %v6550_v15 = vld [vmem:[%s7790_s4 + $0xdcc] ss:$16 sps:$4 sm:$0xff]   ;;  %v6545_v16 = vld [vmem:[%s7790_s4 + $0xdc0] ss:$16 sps:$4 sm:$0xff]  }
 0x296   : > { %4628 = vmatpush1.bf16.msra.mxu0 %v6453_v17  ;;  %4956 = vmatpush1.bf16.msra.mxu1 %v6456_v19  ;;  %v6548_v17 = vld [vmem:[%s7790_s4 + $0xdc8] ss:$16 sps:$4 sm:$0xff]   ;;  %v6553_v19 = vld [vmem:[%s7790_s4 + $0xde4] ss:$16 sps:$4 sm:$0xff]  }
 0x297   : > { %4638 = vmatprep.subr.bf16.mxu0 %v6463_v13  ;;  %4966 = vmatprep.subr.bf16.mxu1 %v6466_v20  ;;  %v6556_v13 = vld [vmem:[%s7790_s4 + $0xdec] ss:$16 sps:$4 sm:$0xff]   ;;  %v6551_v20 = vld [vmem:[%s7790_s4 + $0xde0] ss:$16 sps:$4 sm:$0xff]  }
 0x299   : > { %4630 = vmatmul.mubr.bf16.vlgmr.msra.gmra.mrb[0].mxu0 %v5263_v21  ;;  %4958 = vmatmul.mubr.bf16.vlgmr.msra.gmra.mrb[0].mxu1 %v5263_v21  ;;  %v6554_v21 = vld [vmem:[%s7790_s4 + $0xde8] ss:$16 sps:$4 sm:$0xff]  }
 0x29a   : > { %4639 = vmatpush1.bf16.msra.mxu0 %v6461_v23  ;;  %4967 = vmatpush1.bf16.msra.mxu1 %v6464_v11  ;;  %v6561_v23 = vld [vmem:[%s7790_s4 + $0xe04] ss:$16 sps:$4 sm:$0xff]   ;;  %v6564_v11 = vld [vmem:[%s7790_s4 + $0xe0c] ss:$16 sps:$4 sm:$0xff]  }
 0x29b   : > { %4640 = vmatprep.subr.bf16.mxu0 %v6469_v24  ;;  %4968 = vmatprep.subr.bf16.mxu1 %v6472_v25  ;;  %v5265_v24 = vcombine.low %v8228_v22, %v8228_v22  ;;  %v8301_v25 = vld [vmem:[%s8423_s0 + $0x38] sm:$0xff] }
 0x29c   : > { %4670 = vmatprep.mubr.bf16.mxu0 %v5266_v18  ;;  %4998 = vmatprep.mubr.bf16.mxu1 %v5266_v18  ;;  %v6559_v18 = vld [vmem:[%s7790_s4 + $0xe00] ss:$16 sps:$4 sm:$0xff]   ;;  %v5268_v22 = vcombine.high %v8301_v25, %v8301_v25 }
 0x29e   : > { %4641 = vmatpush1.bf16.msra.mxu0 %v6467_v26  ;;  %4969 = vmatpush1.bf16.msra.mxu1 %v6470_v27  ;;  %v6562_v26 = vld [vmem:[%s7790_s4 + $0xe08] ss:$16 sps:$4 sm:$0xff]   ;;  %v6567_v27 = vld [vmem:[%s7790_s4 + $0xe24] ss:$16 sps:$4 sm:$0xff]  }
 0x29f   : > { %4642 = vmatprep.subr.bf16.mxu0 %v6475_v28  ;;  %4970 = vmatprep.subr.bf16.mxu1 %v6478_v29  ;;  %v6570_v28 = vld [vmem:[%s7790_s4 + $0xe2c] ss:$16 sps:$4 sm:$0xff]   ;;  %v6565_v29 = vld [vmem:[%s7790_s4 + $0xe20] ss:$16 sps:$4 sm:$0xff]  }
 0x2a2   : > { %4643 = vmatpush1.bf16.msra.mxu0 %v6473_v30  ;;  %4971 = vmatpush1.bf16.msra.mxu1 %v6476_v31  ;;  %v6568_v30 = vld [vmem:[%s7790_s4 + $0xe28] ss:$16 sps:$4 sm:$0xff]   ;;  %v6573_v31 = vld [vmem:[%s7790_s4 + $0xe44] ss:$16 sps:$4 sm:$0xff]  }
 0x2a3   : > { %4644 = vmatprep.subr.bf16.mxu0 %v6481_v32  ;;  %4972 = vmatprep.subr.bf16.mxu1 %v6484_v33  ;;  %v6576_v32 = vld [vmem:[%s7790_s4 + $0xe4c] ss:$16 sps:$4 sm:$0xff]   ;;  %v6571_v33 = vld [vmem:[%s7790_s4 + $0xe40] ss:$16 sps:$4 sm:$0xff]  }
 0x2a6   : > { %4645 = vmatpush1.bf16.msra.mxu0 %v6479_v34  ;;  %4973 = vmatpush1.bf16.msra.mxu1 %v6482_v35  ;;  %v6574_v34 = vld [vmem:[%s7790_s4 + $0xe48] ss:$16 sps:$4 sm:$0xff]   ;;  %v6579_v35 = vld [vmem:[%s7790_s4 + $0xe64] ss:$16 sps:$4 sm:$0xff]  }
 0x2a7   : > { %4646 = vmatprep.subr.bf16.mxu0 %v6487_v36  ;;  %4974 = vmatprep.subr.bf16.mxu1 %v6490_v37  ;;  %v6582_v36 = vld [vmem:[%s7790_s4 + $0xe6c] ss:$16 sps:$4 sm:$0xff]   ;;  %v6577_v37 = vld [vmem:[%s7790_s4 + $0xe60] ss:$16 sps:$4 sm:$0xff]  }
 0x2aa   : > { %4647 = vmatpush1.bf16.msra.mxu0 %v6485_v38  ;;  %4975 = vmatpush1.bf16.msra.mxu1 %v6488_v39  ;;  %v6580_v38 = vld [vmem:[%s7790_s4 + $0xe68] ss:$16 sps:$4 sm:$0xff]   ;;  %v6585_v39 = vld [vmem:[%s7790_s4 + $0xe84] ss:$16 sps:$4 sm:$0xff]  }
 0x2ab   : > { %4648 = vmatprep.subr.bf16.mxu0 %v6493_v40  ;;  %4976 = vmatprep.subr.bf16.mxu1 %v6496_v41  ;;  %v6588_v40 = vld [vmem:[%s7790_s4 + $0xe8c] ss:$16 sps:$4 sm:$0xff]   ;;  %v6583_v41 = vld [vmem:[%s7790_s4 + $0xe80] ss:$16 sps:$4 sm:$0xff]  }
 0x2ae   : > { %4649 = vmatpush1.bf16.msra.mxu0 %v6491_v42  ;;  %4977 = vmatpush1.bf16.msra.mxu1 %v6494_v43  ;;  %v6586_v42 = vld [vmem:[%s7790_s4 + $0xe88] ss:$16 sps:$4 sm:$0xff]   ;;  %v6591_v43 = vld [vmem:[%s7790_s4 + $0xea4] ss:$16 sps:$4 sm:$0xff]  }
 0x2af   : > { %4650 = vmatprep.subr.bf16.mxu0 %v6499_v44  ;;  %4978 = vmatprep.subr.bf16.mxu1 %v6502_v45  ;;  %v6594_v44 = vld [vmem:[%s7790_s4 + $0xeac] ss:$16 sps:$4 sm:$0xff]   ;;  %v6589_v45 = vld [vmem:[%s7790_s4 + $0xea0] ss:$16 sps:$4 sm:$0xff]  }
 0x2b2   : > { %4651 = vmatpush1.bf16.msra.mxu0 %v6497_v46  ;;  %4979 = vmatpush1.bf16.msra.mxu1 %v6500_v47  ;;  %v6592_v46 = vld [vmem:[%s7790_s4 + $0xea8] ss:$16 sps:$4 sm:$0xff]   ;;  %v6597_v47 = vld [vmem:[%s7790_s4 + $0xec4] ss:$16 sps:$4 sm:$0xff]  }
 0x2b3   : > { %4652 = vmatprep.subr.bf16.mxu0 %v6505_v48  ;;  %4980 = vmatprep.subr.bf16.mxu1 %v6508_v49  ;;  %v6600_v48 = vld [vmem:[%s7790_s4 + $0xecc] ss:$16 sps:$4 sm:$0xff]   ;;  %v6595_v49 = vld [vmem:[%s7790_s4 + $0xec0] ss:$16 sps:$4 sm:$0xff]  }
 0x2b6   : > { %4653 = vmatpush1.bf16.msra.mxu0 %v6503_v50  ;;  %4981 = vmatpush1.bf16.msra.mxu1 %v6506_v51  ;;  %v6598_v50 = vld [vmem:[%s7790_s4 + $0xec8] ss:$16 sps:$4 sm:$0xff]   ;;  %v6603_v51 = vld [vmem:[%s7790_s4 + $0xee4] ss:$16 sps:$4 sm:$0xff]  }
 0x2b7   : > { %4654 = vmatprep.subr.bf16.mxu0 %v6511_v52  ;;  %4982 = vmatprep.subr.bf16.mxu1 %v6514_v53  ;;  %v6606_v52 = vld [vmem:[%s7790_s4 + $0xeec] ss:$16 sps:$4 sm:$0xff]   ;;  %v6601_v53 = vld [vmem:[%s7790_s4 + $0xee0] ss:$16 sps:$4 sm:$0xff]  }
 0x2ba   : > { %4655 = vmatpush1.bf16.msra.mxu0 %v6509_v54  ;;  %4983 = vmatpush1.bf16.msra.mxu1 %v6512_v55  ;;  %v6604_v54 = vld [vmem:[%s7790_s4 + $0xee8] ss:$16 sps:$4 sm:$0xff]   ;;  %v6609_v55 = vld [vmem:[%s7790_s4 + $0xf04] ss:$16 sps:$4 sm:$0xff]  }
 0x2bb   : > { %4656 = vmatprep.subr.bf16.mxu0 %v6517_v56  ;;  %4984 = vmatprep.subr.bf16.mxu1 %v6520_v57  ;;  %v6612_v56 = vld [vmem:[%s7790_s4 + $0xf0c] ss:$16 sps:$4 sm:$0xff]   ;;  %v6607_v57 = vld [vmem:[%s7790_s4 + $0xf00] ss:$16 sps:$4 sm:$0xff]  }
 0x2be   : > { %4657 = vmatpush1.bf16.msra.mxu0 %v6515_v58  ;;  %4985 = vmatpush1.bf16.msra.mxu1 %v6518_v59  ;;  %v6610_v58 = vld [vmem:[%s7790_s4 + $0xf08] ss:$16 sps:$4 sm:$0xff]   ;;  %v6615_v59 = vld [vmem:[%s7790_s4 + $0xf24] ss:$16 sps:$4 sm:$0xff]  }
 0x2bf   : > { %4658 = vmatprep.subr.bf16.mxu0 %v6523_v60  ;;  %4986 = vmatprep.subr.bf16.mxu1 %v6526_v61  ;;  %v6618_v60 = vld [vmem:[%s7790_s4 + $0xf2c] ss:$16 sps:$4 sm:$0xff]   ;;  %v6613_v61 = vld [vmem:[%s7790_s4 + $0xf20] ss:$16 sps:$4 sm:$0xff]  }
 0x2c2   : > { %4659 = vmatpush1.bf16.msra.mxu0 %v6521_v62  ;;  %4987 = vmatpush1.bf16.msra.mxu1 %v6524_v63  ;;  %v6616_v62 = vld [vmem:[%s7790_s4 + $0xf28] ss:$16 sps:$4 sm:$0xff]   ;;  %v6621_v63 = vld [vmem:[%s7790_s4 + $0xf44] ss:$16 sps:$4 sm:$0xff]  }
 0x2c3   : > { %4660 = vmatprep.subr.bf16.mxu0 %v6529_v1  ;;  %4988 = vmatprep.subr.bf16.mxu1 %v6532_v2  ;;  %v6624_v1 = vld [vmem:[%s7790_s4 + $0xf4c] ss:$16 sps:$4 sm:$0xff]   ;;  %v6619_v2 = vld [vmem:[%s7790_s4 + $0xf40] ss:$16 sps:$4 sm:$0xff]  }
 0x2c6   : > { %4661 = vmatpush1.bf16.msra.mxu0 %v6527_v3  ;;  %4989 = vmatpush1.bf16.msra.mxu1 %v6530_v4  ;;  %v6622_v3 = vld [vmem:[%s7790_s4 + $0xf48] ss:$16 sps:$4 sm:$0xff]   ;;  %v6627_v4 = vld [vmem:[%s7790_s4 + $0xf64] ss:$16 sps:$4 sm:$0xff]  }
 0x2c7   : > { %4662 = vmatprep.subr.bf16.mxu0 %v6535_v5  ;;  %4990 = vmatprep.subr.bf16.mxu1 %v6538_v6  ;;  %v6630_v5 = vld [vmem:[%s7790_s4 + $0xf6c] ss:$16 sps:$4 sm:$0xff]   ;;  %v6625_v6 = vld [vmem:[%s7790_s4 + $0xf60] ss:$16 sps:$4 sm:$0xff]  }
 0x2ca   : > { %4663 = vmatpush1.bf16.msra.mxu0 %v6533_v7  ;;  %4991 = vmatpush1.bf16.msra.mxu1 %v6536_v8  ;;  %v6628_v7 = vld [vmem:[%s7790_s4 + $0xf68] ss:$16 sps:$4 sm:$0xff]   ;;  %v6633_v8 = vld [vmem:[%s7790_s4 + $0xf84] ss:$16 sps:$4 sm:$0xff]  }
 0x2cb   : > { %4664 = vmatprep.subr.bf16.mxu0 %v6541_v9  ;;  %4992 = vmatprep.subr.bf16.mxu1 %v6544_v10  ;;  %v6636_v9 = vld [vmem:[%s7790_s4 + $0xf8c] ss:$16 sps:$4 sm:$0xff]   ;;  %v6631_v10 = vld [vmem:[%s7790_s4 + $0xf80] ss:$16 sps:$4 sm:$0xff]  }
 0x2ce   : > { %4665 = vmatpush1.bf16.msra.mxu0 %v6539_v0  ;;  %4993 = vmatpush1.bf16.msra.mxu1 %v6542_v12  ;;  %v6634_v0 = vld [vmem:[%s7790_s4 + $0xf88] ss:$16 sps:$4 sm:$0xff]   ;;  %v6639_v12 = vld [vmem:[%s7790_s4 + $0xfa4] ss:$16 sps:$4 sm:$0xff]  }
 0x2cf   : > { %4666 = vmatprep.subr.bf16.mxu0 %v6547_v14  ;;  %4994 = vmatprep.subr.bf16.mxu1 %v6550_v15  ;;  %v6642_v14 = vld [vmem:[%s7790_s4 + $0xfac] ss:$16 sps:$4 sm:$0xff]   ;;  %v6637_v15 = vld [vmem:[%s7790_s4 + $0xfa0] ss:$16 sps:$4 sm:$0xff]  }
 0x2d2   : > { %4667 = vmatpush1.bf16.msra.mxu0 %v6545_v16  ;;  %4995 = vmatpush1.bf16.msra.mxu1 %v6548_v17  ;;  %v6640_v16 = vld [vmem:[%s7790_s4 + $0xfa8] ss:$16 sps:$4 sm:$0xff]   ;;  %v6645_v17 = vld [vmem:[%s7790_s4 + $0xfc4] ss:$16 sps:$4 sm:$0xff]  }
 0x2d3   : > { %4668 = vmatprep.subr.bf16.mxu0 %v6553_v19  ;;  %4996 = vmatprep.subr.bf16.mxu1 %v6556_v13  ;;  %v6648_v19 = vld [vmem:[%s7790_s4 + $0xfcc] ss:$16 sps:$4 sm:$0xff]   ;;  %v6643_v13 = vld [vmem:[%s7790_s4 + $0xfc0] ss:$16 sps:$4 sm:$0xff]  }
 0x2d6   : > { %4669 = vmatpush1.bf16.msra.mxu0 %v6551_v20  ;;  %4997 = vmatpush1.bf16.msra.mxu1 %v6554_v21  ;;  %v6646_v20 = vld [vmem:[%s7790_s4 + $0xfc8] ss:$16 sps:$4 sm:$0xff]   ;;  %v6651_v21 = vld [vmem:[%s7790_s4 + $0xfe4] ss:$16 sps:$4 sm:$0xff]  }
 0x2d7   : > { %4679 = vmatprep.subr.bf16.mxu0 %v6561_v23  ;;  %5007 = vmatprep.subr.bf16.mxu1 %v6564_v11  ;;  %v6654_v23 = vld [vmem:[%s7790_s4 + $0xfec] ss:$16 sps:$4 sm:$0xff]   ;;  %v6649_v11 = vld [vmem:[%s7790_s4 + $0xfe0] ss:$16 sps:$4 sm:$0xff]  }
 0x2d9   : > { %4671 = vmatmul.mubr.bf16.vlgmr.msra.gmra.mrb[0].mxu0 %v5265_v24  ;;  %4999 = vmatmul.mubr.bf16.vlgmr.msra.gmra.mrb[0].mxu1 %v5265_v24  ;;  %v6652_v24 = vld [vmem:[%s7790_s4 + $0xfe8] ss:$16 sps:$4 sm:$0xff]  }
 0x2da   : > { %4680 = vmatpush1.bf16.msra.mxu0 %v6559_v18  ;;  %5008 = vmatpush1.bf16.msra.mxu1 %v6562_v26  ;;  %v5267_v18 = vcombine.low %v8301_v25, %v8301_v25  ;;  %v1756_v26 = vlaneseq }
 0x2db   : > { %4681 = vmatprep.subr.bf16.mxu0 %v6567_v27  ;;  %5009 = vmatprep.subr.bf16.mxu1 %v6570_v28 }
 0x2dc   : > { %4711 = vmatprep.mubr.bf16.mxu0 %v5268_v22  ;;  %5039 = vmatprep.mubr.bf16.mxu1 %v5268_v22  ;;  %v1757_v27 = vshrl.u32 %v1756_v26, 7 }
 0x2de   : > { %4682 = vmatpush1.bf16.msra.mxu0 %v6565_v29  ;;  %5010 = vmatpush1.bf16.msra.mxu1 %v6568_v30  ;;  %v1758_v28 = vsub.s32 0, %v1757_v27  ;;  %v1766_v22 = vsub.s32 2, %v1757_v27  ;;  %v1754_v29 = vld [vmem:[%s1226_s27] sm:$0xf]  ;;  %v1762_v25 = vsub.s32 1, %v1757_v27  ;;  %v1770_v30 = vsub.s32 3, %v1757_v27 }
 0x2df   : > { %4683 = vmatprep.subr.bf16.mxu0 %v6573_v31  ;;  %5011 = vmatprep.subr.bf16.mxu1 %v6576_v32 }
 0x2e0   : > { %v1759_v31 = vrot.slane %v1754_v29, %v1758_v28  ;;  %v1767_v32 = vrot.slane %v1754_v29, %v1766_v22 }
 0x2e2   : > { %4684 = vmatpush1.bf16.msra.mxu0 %v6571_v33  ;;  %5012 = vmatpush1.bf16.msra.mxu1 %v6574_v34  ;;  %v1763_v33 = vrot.slane %v1754_v29, %v1762_v25  ;;  %v1771_v34 = vrot.slane %v1754_v29, %v1770_v30 }
 0x2e3   : > { %4685 = vmatprep.subr.bf16.mxu0 %v6579_v35  ;;  %5013 = vmatprep.subr.bf16.mxu1 %v6582_v36 }
 0x2e6   : > { %4686 = vmatpush1.bf16.msra.mxu0 %v6577_v37  ;;  %5014 = vmatpush1.bf16.msra.mxu1 %v6580_v38 }
 0x2e7   : > { %4687 = vmatprep.subr.bf16.mxu0 %v6585_v39  ;;  %5015 = vmatprep.subr.bf16.mxu1 %v6588_v40 }
 0x2ea   : > { %4688 = vmatpush1.bf16.msra.mxu0 %v6583_v41  ;;  %5016 = vmatpush1.bf16.msra.mxu1 %v6586_v42 }
 0x2eb   : > { %4689 = vmatprep.subr.bf16.mxu0 %v6591_v43  ;;  %5017 = vmatprep.subr.bf16.mxu1 %v6594_v44 }
 0x2ee   : > { %4690 = vmatpush1.bf16.msra.mxu0 %v6589_v45  ;;  %5018 = vmatpush1.bf16.msra.mxu1 %v6592_v46 }
 0x2ef   : > { %4691 = vmatprep.subr.bf16.mxu0 %v6597_v47  ;;  %5019 = vmatprep.subr.bf16.mxu1 %v6600_v48 }
 0x2f2   : > { %4692 = vmatpush1.bf16.msra.mxu0 %v6595_v49  ;;  %5020 = vmatpush1.bf16.msra.mxu1 %v6598_v50 }
 0x2f3   : > { %4693 = vmatprep.subr.bf16.mxu0 %v6603_v51  ;;  %5021 = vmatprep.subr.bf16.mxu1 %v6606_v52 }
 0x2f6   : > { %4694 = vmatpush1.bf16.msra.mxu0 %v6601_v53  ;;  %5022 = vmatpush1.bf16.msra.mxu1 %v6604_v54 }
 0x2f7   : > { %4695 = vmatprep.subr.bf16.mxu0 %v6609_v55  ;;  %5023 = vmatprep.subr.bf16.mxu1 %v6612_v56 }
 0x2fa   : > { %4696 = vmatpush1.bf16.msra.mxu0 %v6607_v57  ;;  %5024 = vmatpush1.bf16.msra.mxu1 %v6610_v58 }
 0x2fb   : > { %4697 = vmatprep.subr.bf16.mxu0 %v6615_v59  ;;  %5025 = vmatprep.subr.bf16.mxu1 %v6618_v60 }
 0x2fe   : > { %4698 = vmatpush1.bf16.msra.mxu0 %v6613_v61  ;;  %5026 = vmatpush1.bf16.msra.mxu1 %v6616_v62 }
 0x2ff   : > { %4699 = vmatprep.subr.bf16.mxu0 %v6621_v63  ;;  %5027 = vmatprep.subr.bf16.mxu1 %v6624_v1 }
 0x302   : > { %4700 = vmatpush1.bf16.msra.mxu0 %v6619_v2  ;;  %5028 = vmatpush1.bf16.msra.mxu1 %v6622_v3 }
 0x303   : > { %4701 = vmatprep.subr.bf16.mxu0 %v6627_v4  ;;  %5029 = vmatprep.subr.bf16.mxu1 %v6630_v5 }
 0x306   : > { %4702 = vmatpush1.bf16.msra.mxu0 %v6625_v6  ;;  %5030 = vmatpush1.bf16.msra.mxu1 %v6628_v7 }
 0x307   : > { %4703 = vmatprep.subr.bf16.mxu0 %v6633_v8  ;;  %5031 = vmatprep.subr.bf16.mxu1 %v6636_v9 }
 0x30a   : > { %4704 = vmatpush1.bf16.msra.mxu0 %v6631_v10  ;;  %5032 = vmatpush1.bf16.msra.mxu1 %v6634_v0 }
 0x30b   : > { %4705 = vmatprep.subr.bf16.mxu0 %v6639_v12  ;;  %5033 = vmatprep.subr.bf16.mxu1 %v6642_v14 }
 0x30e   : > { %4706 = vmatpush1.bf16.msra.mxu0 %v6637_v15  ;;  %5034 = vmatpush1.bf16.msra.mxu1 %v6640_v16 }
 0x30f   : > { %4707 = vmatprep.subr.bf16.mxu0 %v6645_v17  ;;  %5035 = vmatprep.subr.bf16.mxu1 %v6648_v19 }
 0x312   : > { %4708 = vmatpush1.bf16.msra.mxu0 %v6643_v13  ;;  %5036 = vmatpush1.bf16.msra.mxu1 %v6646_v20 }
 0x313   : > { %4709 = vmatprep.subr.bf16.mxu0 %v6651_v21  ;;  %5037 = vmatprep.subr.bf16.mxu1 %v6654_v23 }
 0x316   : > { %4710 = vmatpush1.bf16.msra.mxu0 %v6649_v11  ;;  %5038 = vmatpush1.bf16.msra.mxu1 %v6652_v24 }
 0x319   : > { %4712 = vmatmul.mubr.bf16.vlgmr.msra.gmra.mrb[0].mxu0 %v5267_v18  ;;  %5040 = vmatmul.mubr.bf16.vlgmr.msra.gmra.mrb[0].mxu1 %v5267_v18 }
 0x3ec   : > { %v4713_v35 = vpop.f32.mrb[0].mxu0  ;;  %v5041_v36 = vpop.f32.mrb[0].mxu1 }
 0x3ed   : > { %v8377_v37 = vadd.f32 %v4713_v35, %v1759_v31  ;;  %v8379_v38 = vadd.f32 %v5041_v36, %v1767_v32  ;;  %v4715_v39 = vpop.f32.mrb[1].mxu0  ;;  %v5043_v40 = vpop.f32.mrb[1].mxu1 }
 0x3ee   : > { %v8381_v41 = vadd.f32 %v4715_v39, %v1763_v33  ;;  %v8383_v42 = vadd.f32 %v5043_v40, %v1771_v34  ;;  %v4717_v43 = vpop.f32.mrb[2].mxu0  ;;  %v5045_v44 = vpop.f32.mrb[2].mxu1 }
 0x3ef   : > { %v8386_v45 = vmul.f32 0.70710677, %v8377_v37  ;;  %v8389_v46 = vmul.f32 0.70710677, %v8379_v38  ;;  %v4718_v52 = vpop.f32.mrb[3].mxu0  ;;  %v5046_v56 = vpop.f32.mrb[3].mxu1 }
 0x3f0   : > { %v8392_v47 = vmul.f32 0.70710677, %v8381_v41  ;;  %v8398_v51 = vmul.f32 0.70710677, %v8383_v42 }
 0x3f1   : > { %v5064_v48 = vand.u32 2147483647, %v8386_v45  ;;  %v5066_v49 = vand.u32 2147483647, %v8389_v46  ;;  %vm5056_vm0 = vcmp.lt.f32.partialorder %v8386_v45, 0.0  ;;  %vm5058_vm1 = vcmp.lt.f32.partialorder %v8389_v46, 0.0 }
 0x3f2   : > { %v5065_v50 = vand.u32 2147483647, %v8392_v47  ;;  %v5067_v59 = vand.u32 2147483647, %v8398_v51  ;;  %vm5057_vm2 = vcmp.lt.f32.partialorder %v8392_v47, 0.0  ;;  %vm5059_vm3 = vcmp.lt.f32.partialorder %v8398_v51, 0.0 }
 0x3f3   : > { %v5068_v53 = vmul.f32 0.3275911, %v5064_v48  ;;  %v5070_v54 = vmul.f32 0.3275911, %v5066_v49  ;;  %v5116_v63 = vsub.f32 0.0, %v5064_v48  ;;  %v5118_v1 = vsub.f32 0.0, %v5066_v49 }
 0x3f4   : > { %v5069_v55 = vmul.f32 0.3275911, %v5065_v50  ;;  %v5071_v61 = vmul.f32 0.3275911, %v5067_v59  ;;  %v5117_v4 = vsub.f32 0.0, %v5065_v50  ;;  %v5119_v9 = vsub.f32 0.0, %v5067_v59 }
 0x3f5   : > { %v5072_v57 = vadd.f32 1.0, %v5068_v53  ;;  %v5074_v58 = vadd.f32 1.0, %v5070_v54  ;;  %v5120_v3 = vmul.f32 %v5116_v63, %v5064_v48  ;;  %v5122_v7 = vmul.f32 %v5118_v1, %v5066_v49 }
 0x3f6   : > { %v5073_v60 = vadd.f32 1.0, %v5069_v55  ;;  %v5075_v62 = vadd.f32 1.0, %v5071_v61  ;;  %v5121_v15 = vmul.f32 %v5117_v4, %v5065_v50  ;;  %v5123_v21 = vmul.f32 %v5119_v9, %v5067_v59 }
 0x3f7   : > { %6657 = vrcp.f32 %v5072_v57  ;;  %v5124_v12 = vmul.f32 1.442695, %v5120_v3  ;;  %v5128_v17 = vmul.f32 1.442695, %v5122_v7  ;;  %v6697_v1 = vmov 1.0  }
 0x3f8   : > { %6659 = vrcp.f32 %v5074_v58  ;;  %v5126_v26 = vmul.f32 1.442695, %v5121_v15  ;;  %v5130_v25 = vmul.f32 1.442695, %v5123_v21  ;;  %v5060_v3 = vsel %vm5056_vm0, -1.0, %v6697_v1 }
 0x3f9   : > { %6661 = vrcp.f32 %v5073_v60  ;;  %v5051_v51 = vmul.f32 0.5, %v8383_v42 }
 0x3fa   : > { %6663 = vrcp.f32 %v5075_v62 }
 0x3fb   : > { %6665 = vpow2.f32 %v5124_v12  ;;  %v5048_v12 = vmul.f32 0.5, %v8377_v37 }
 0x3fc   : > { %6667 = vpow2.f32 %v5128_v17  ;;  %v5050_v17 = vmul.f32 0.5, %v8379_v38 }
 0x3fd   : > { %6669 = vpow2.f32 %v5126_v26 }
 0x3fe   : > { %6671 = vpow2.f32 %v5130_v25 }
 0x401   : > { %v6658_v2 = vpop.eup %6657 }
 0x402   : > { %v6660_v5 = vpop.eup %6659  ;;  %v5080_v6 = vmul.f32 1.0614054, %v6658_v2 }
 0x403   : > { %v5082_v8 = vmul.f32 1.0614054, %v6660_v5  ;;  %v6662_v0 = vpop.eup %6661 }
 0x404   : > { %v5084_v10 = vadd.f32 -1.4531521, %v5080_v6  ;;  %v5081_v19 = vmul.f32 1.0614054, %v6662_v0  ;;  %v6664_v13 = vpop.eup %6663 }
 0x405   : > { %v5086_v14 = vadd.f32 -1.4531521, %v5082_v8  ;;  %v5083_v24 = vmul.f32 1.0614054, %v6664_v13  ;;  %v6666_v53 = vpop.eup %6665 }
 0x406   : > { %v5088_v16 = vmul.f32 %v6658_v2, %v5084_v10  ;;  %v5085_v11 = vadd.f32 -1.4531521, %v5081_v19  ;;  %v6668_v55 = vpop.eup %6667  ;;  %v5063_v19 = vsel %vm5059_vm3, -1.0, %v6697_v1 }
 0x407   : > { %v5090_v20 = vmul.f32 %v6660_v5, %v5086_v14  ;;  %v5087_v22 = vadd.f32 -1.4531521, %v5083_v24  ;;  %v6670_v63 = vpop.eup %6669 }
 0x408   : > { %v5092_v23 = vadd.f32 1.4214138, %v5088_v16  ;;  %v5089_v28 = vmul.f32 %v6662_v0, %v5085_v11  ;;  %v6672_v7 = vpop.eup %6671 }
 0x409   : > { %v5094_v18 = vadd.f32 1.4214138, %v5090_v20  ;;  %v5091_v32 = vmul.f32 %v6664_v13, %v5087_v22 }
 0x40a   : > { %v5096_v27 = vmul.f32 %v6658_v2, %v5092_v23  ;;  %v5093_v31 = vadd.f32 1.4214138, %v5089_v28 }
 0x40b   : > { %v5098_v29 = vmul.f32 %v6660_v5, %v5094_v18  ;;  %v5095_v36 = vadd.f32 1.4214138, %v5091_v32 }
 0x40c   : > { %v5100_v30 = vadd.f32 -0.28449672, %v5096_v27  ;;  %v5097_v35 = vmul.f32 %v6662_v0, %v5093_v31 }
 0x40d   : > { %v5102_v33 = vadd.f32 -0.28449672, %v5098_v29  ;;  %v5099_v44 = vmul.f32 %v6664_v13, %v5095_v36 }
 0x40e   : > { %v5104_v34 = vmul.f32 %v6658_v2, %v5100_v30  ;;  %v5101_v43 = vadd.f32 -0.28449672, %v5097_v35 }
 0x40f   : > { %v5106_v39 = vmul.f32 %v6660_v5, %v5102_v33  ;;  %v5103_v52 = vadd.f32 -0.28449672, %v5099_v44 }
 0x410   : > { %v5108_v40 = vadd.f32 0.2548296, %v5104_v34  ;;  %v5105_v50 = vmul.f32 %v6662_v0, %v5101_v43 }
 0x411   : > { %v5110_v48 = vadd.f32 0.2548296, %v5106_v39  ;;  %v5107_v58 = vmul.f32 %v6664_v13, %v5103_v52 }
 0x412   : > { %v5112_v49 = vmul.f32 %v6658_v2, %v5108_v40  ;;  %v5109_v57 = vadd.f32 0.2548296, %v5105_v50  ;;  %v5062_v2 = vsel %vm5058_vm1, -1.0, %v6697_v1 }
 0x413   : > { %v5114_v54 = vmul.f32 %v6660_v5, %v5110_v48  ;;  %v5111_v62 = vadd.f32 0.2548296, %v5107_v58 }
 0x414   : > { %v5132_v56 = vmul.f32 %v6666_v53, %v5112_v49  ;;  %v5113_v61 = vmul.f32 %v6662_v0, %v5109_v57  ;;  %v5061_v0 = vsel %vm5057_vm2, -1.0, %v6697_v1 }
 0x415   : > { %v5134_v59 = vmul.f32 %v6668_v55, %v5114_v54  ;;  %v5115_v5 = vmul.f32 %v6664_v13, %v5111_v62  ;;  %v5049_v13 = vmul.f32 0.5, %v8381_v41 }
 0x416   : > { %v5136_v60 = vsub.f32 1.0, %v5132_v56  ;;  %v5133_v45 = vmul.f32 %v6670_v63, %v5113_v61 }
 0x417   : > { %v5138_v4 = vsub.f32 1.0, %v5134_v59  ;;  %v5135_v10 = vmul.f32 %v6672_v7, %v5115_v5 }
 0x418   : > { %v5140_v6 = vmul.f32 %v5136_v60, %v5060_v3  ;;  %v5137_v9 = vsub.f32 1.0, %v5133_v45 }
 0x419   : > { %v5142_v8 = vmul.f32 %v5138_v4, %v5062_v2  ;;  %v5139_v16 = vsub.f32 1.0, %v5135_v10 }
 0x41a   : > { %v5144_v46 = vadd.f32 1.0, %v5140_v6  ;;  %v5141_v15 = vmul.f32 %v5137_v9, %v5061_v0 }
 0x41b   : > { %v5146_v14 = vadd.f32 1.0, %v5142_v8  ;;  %v5143_v21 = vmul.f32 %v5139_v16, %v5063_v19 }
 0x41c   : > { %v5148_v47 = vmul.f32 %v5144_v46, %v5048_v12  ;;  %v5145_v20 = vadd.f32 1.0, %v5141_v15 }
 0x41d   : > { %v5150_v23 = vmul.f32 %v5146_v14, %v5050_v17  ;;  %v5147_v24 = vadd.f32 1.0, %v5143_v21 }
 0x41e   : > { %v5149_v11 = vmul.f32 %v5145_v20, %v5049_v13 }
 0x41f   : > { %v5151_v18 = vmul.f32 %v5147_v24, %v5051_v51 }
 0x420   : > { %v5786_v37 = vpack.c.bf16 %v5149_v11, %v5148_v47 }
 0x421   : > { %v5787_v38 = vpack.c.bf16 %v5151_v18, %v5150_v23 }
 0x422   : > { %5168 = vst [vmem:[%s1232_s29] sm:$0xff] %v5786_v37 }
 0x423   : > { %5169 = vst [vmem:[%s1232_s29 + $0x8] sm:$0xff] %v5787_v38 }
 0x424 PF: > { %p10_p9 = scmp.ge.s32.totalorder %s6735_s16, 4   ;;  %s8427_s12 = smov %s6691_s13 }
 0x425   : > { %s8428_s13 = smov %s6744_s19  ;;  %s8429_s14 = smov %s6735_s16 }
 0x426   :  { %12 = sbr.rel (!%p10_p9) target bundleno = 2 (0x2), region = 93 }

</bundles_post_ra>
